<compile_context>
chip_gen: v5e
topology: v5e:2x2
jax: 0.10.0
libtpu: 0.0.40
codegen_flags: <defaults>
</compile_context>

<pallas_src>
import functools

import jax
import jax.numpy as jnp
from jax.experimental import pallas as pl
from jax.experimental.pallas import tpu as pltpu


def _round_up(x, m):
    return (x + m - 1) // m * m


# ----------------------------------------------------------------------------
# Kernel 1: tiled matmul + bias + ReLU  (used for the 1x1 convolutions)
# ----------------------------------------------------------------------------
def _matmul_bias_relu_kernel(a_ref, w_ref, b_ref, o_ref):
    acc = jnp.dot(a_ref[...], w_ref[...], preferred_element_type=jnp.float32)
    o_ref[...] = jnp.maximum(acc + b_ref[...], 0.0).astype(o_ref.dtype)


def matmul_bias_relu(a, w, b, *, tm=256, tn=128):
    """relu(a @ w + b) with bf16 operands / f32 accumulation.

    a: (M, K) f32, w: (K, N) f32, b: (N,) f32.  M is padded up to a multiple of
    `tm` and N up to a multiple of `tn` (lane-dense output tiles, proper
    multi-step grid for pipelining + megacore); padding is sliced off after.
    """
    M, K = a.shape
    _, N = w.shape
    m_pad = _round_up(M, tm)
    n_pad = _round_up(N, tn)
    a_p = jnp.pad(a, ((0, m_pad - M), (0, 0))).astype(jnp.bfloat16)
    w_p = jnp.pad(w, ((0, 0), (0, n_pad - N))).astype(jnp.bfloat16)
    b_p = jnp.pad(b, (0, n_pad - N)).astype(jnp.float32).reshape(1, n_pad)

    grid = (m_pad // tm, n_pad // tn)
    out = pl.pallas_call(
        _matmul_bias_relu_kernel,
        out_shape=jax.ShapeDtypeStruct((m_pad, n_pad), jnp.float32),
        grid=grid,
        in_specs=[
            pl.BlockSpec((tm, K), lambda i, j: (i, 0)),
            pl.BlockSpec((K, tn), lambda i, j: (0, j)),
            pl.BlockSpec((1, tn), lambda i, j: (0, j)),
        ],
        out_specs=pl.BlockSpec((tm, tn), lambda i, j: (i, j)),
        compiler_params=pltpu.CompilerParams(
            dimension_semantics=("parallel", "parallel")),
    )(a_p, w_p, b_p)
    return out[:M, :N]


# ----------------------------------------------------------------------------
# Phase split: turn a strided kxk conv/pool into static stride-1 window taps.
# ----------------------------------------------------------------------------
def _phase_split(x, kh, kw, sh, sw, ph, pw, pad_value):
    """Split the spatially padded NHWC input into sh*sw stride-1 phases.

    Returns (phases, taps, Ho, Wo) where phases has shape (N*P, Hq, Wq, C)
    (P = sh*sw, total footprint == padded input -- NO kh*kw im2col blow-up)
    and taps[t] = (phase_index, oy, ox) such that conv tap t reads the static
    stride-1 window phases[n*P + phase][oy:oy+Ho, ox:ox+Wo, :].
    """
    n, h, w, c = x.shape
    ho = (h + 2 * ph - kh) // sh + 1
    wo = (w + 2 * pw - kw) // sw + 1
    hq = ho + (kh - 1) // sh
    wq = wo + (kw - 1) // sw
    xp = jnp.pad(x, ((0, 0), (ph, ph), (pw, pw), (0, 0)),
                 constant_values=pad_value)
    phases = []
    for a in range(sh):
        for b in range(sw):
            p = xp[:, a::sh, b::sw, :][:, :hq, :wq, :]
            dh, dw = hq - p.shape[1], wq - p.shape[2]
            if dh or dw:   # uniform shape across phases; padded rows are never read
                p = jnp.pad(p, ((0, 0), (0, dh), (0, dw), (0, 0)),
                            constant_values=pad_value)
            phases.append(p)
    x_ph = jnp.stack(phases, axis=1).reshape(n * sh * sw, hq, wq, c)
    taps = [((dy % sh) * sw + (dx % sw), dy // sh, dx // sw)
            for dy in range(kh) for dx in range(kw)]
    return x_ph, taps, ho, wo


# ----------------------------------------------------------------------------
# Kernel 2: fused multi-tap conv + bias + ReLU (1x7, 7x1, 3x3 stride-2)
# ----------------------------------------------------------------------------
def _fused_conv_kernel(x_ref, w_ref, b_ref, o_ref, *, taps, ho, wo):
    # x_ref: (P, Hq, Wq, Cin) bf16   w_ref: (KK, Cin, tco) bf16
    # b_ref: (1, tco) f32            o_ref: (1, Ho, Wo, tco) f32
    cin = x_ref.shape[-1]
    tco = o_ref.shape[-1]
    acc = jnp.zeros((ho * wo, tco), jnp.float32)
    for t, (p, oy, ox) in enumerate(taps):          # static unrolled tap loop
        tap = x_ref[p, oy:oy + ho, ox:ox + wo, :]   # (Ho, Wo, Cin) VMEM window
        acc = acc + jnp.dot(tap.reshape(ho * wo, cin), w_ref[t],
                            preferred_element_type=jnp.float32)
    out = jnp.maximum(acc + b_ref[...], 0.0)
    o_ref[...] = out.reshape(1, ho, wo, tco).astype(o_ref.dtype)


def conv_relu_nhwc(x, w, b, *, stride=(1, 1), padding=(0, 0)):
    """Conv2d (OIHW weights, NHWC activations) + bias + ReLU via Pallas."""
    cout, cin, kh, kw = w.shape
    n, h, wdt, _ = x.shape
    sh, sw = stride
    ph, pw = padding

    if kh == 1 and kw == 1 and stride == (1, 1) and padding == (0, 0):
        # 1x1 conv: plain (N*H*W, Cin) @ (Cin, Cout) -- no patch extraction.
        a = x.reshape(n * h * wdt, cin)
        w_mat = w.reshape(cout, cin).T
        out = matmul_bias_relu(a, w_mat, b)
        return out.reshape(n, h, wdt, cout)

    # General kxk conv: phase split (stride folded away) + fused tap matmuls.
    co_pad = _round_up(cout, 128)
    tco = co_pad if co_pad <= 256 else 128
    x_ph, taps, ho, wo = _phase_split(x, kh, kw, sh, sw, ph, pw, 0.0)
    x_ph = x_ph.astype(jnp.bfloat16)
    p_cnt, hq, wq = sh * sw, x_ph.shape[1], x_ph.shape[2]

    w_mat = jnp.transpose(w, (2, 3, 1, 0)).reshape(kh * kw, cin, cout)
    w_mat = jnp.pad(w_mat, ((0, 0), (0, 0), (0, co_pad - cout))).astype(jnp.bfloat16)
    b_p = jnp.pad(b, (0, co_pad - cout)).astype(jnp.float32).reshape(1, co_pad)

    grid = (n, co_pad // tco)
    out = pl.pallas_call(
        functools.partial(_fused_conv_kernel, taps=taps, ho=ho, wo=wo),
        out_shape=jax.ShapeDtypeStruct((n, ho, wo, co_pad), jnp.float32),
        grid=grid,
        in_specs=[
            pl.BlockSpec((p_cnt, hq, wq, cin), lambda i, j: (i, 0, 0, 0)),
            pl.BlockSpec((kh * kw, cin, tco), lambda i, j: (0, 0, j)),
            pl.BlockSpec((1, tco), lambda i, j: (0, j)),
        ],
        out_specs=pl.BlockSpec((1, ho, wo, tco), lambda i, j: (i, 0, 0, j)),
        compiler_params=pltpu.CompilerParams(
            dimension_semantics=("parallel", "parallel")),
    )(x_ph, w_mat, b_p)
    return out[:, :, :, :cout]


# ----------------------------------------------------------------------------
# Kernel 3: fused 3x3 stride-2 max pool (9 shifted maxima on the VPU)
# ----------------------------------------------------------------------------
def _maxpool_kernel(x_ref, o_ref, *, taps, ho, wo):
    p0, oy0, ox0 = taps[0]
    acc = x_ref[p0, oy0:oy0 + ho, ox0:ox0 + wo, :]
    for p, oy, ox in taps[1:]:
        acc = jnp.maximum(acc, x_ref[p, oy:oy + ho, ox:ox + wo, :])
    o_ref[...] = acc[None]


def maxpool_3x3_s2_p1_nhwc(x):
    n, h, w, c = x.shape
    x_ph, taps, ho, wo = _phase_split(x, 3, 3, 2, 2, 1, 1, -jnp.inf)
    p_cnt, hq, wq = 4, x_ph.shape[1], x_ph.shape[2]
    return pl.pallas_call(
        functools.partial(_maxpool_kernel, taps=taps, ho=ho, wo=wo),
        out_shape=jax.ShapeDtypeStruct((n, ho, wo, c), x.dtype),
        grid=(n,),
        in_specs=[pl.BlockSpec((p_cnt, hq, wq, c), lambda i: (i, 0, 0, 0))],
        out_specs=pl.BlockSpec((1, ho, wo, c), lambda i: (i, 0, 0, 0)),
        compiler_params=pltpu.CompilerParams(dimension_semantics=("parallel",)),
    )(x_ph)


# ----------------------------------------------------------------------------
# ModuleD
# ----------------------------------------------------------------------------
def init_conv(key, cout, cin, kh, kw, scale=0.1):
    kw_, kb_ = jax.random.split(key)
    w = scale * jax.random.normal(kw_, (cout, cin, kh, kw), jnp.float32)
    b = scale * jax.random.normal(kb_, (cout,), jnp.float32)
    return w, b


def init_module_d(key, in_channel, out1_1, out1_3, out2_1, out2_3):
    ks = jax.random.split(key, 6)
    return {
        "b1_c1": init_conv(ks[0], out1_1, in_channel, 1, 1),
        "b1_c2": init_conv(ks[1], out1_3, out1_1, 3, 3),
        "b2_c1": init_conv(ks[2], out2_1, in_channel, 1, 1),
        "b2_c2": init_conv(ks[3], out2_1, out2_1, 1, 7),
        "b2_c3": init_conv(ks[4], out2_1, out2_1, 7, 1),
        "b2_c4": init_conv(ks[5], out2_3, out2_1, 3, 3),
    }


def module_d_forward(x_nchw, params):
    # One NCHW->NHWC transpose at entry, all compute in NHWC, one transpose out.
    x = jnp.transpose(x_nchw, (0, 2, 3, 1))
    # branch 1: 1x1 -> 3x3 stride 2 pad 1
    f1 = conv_relu_nhwc(x, *params["b1_c1"])
    f1 = conv_relu_nhwc(f1, *params["b1_c2"], stride=(2, 2), padding=(1, 1))
    # branch 2: 1x1 -> 1x7 pad(0,3) -> 7x1 pad(3,0) -> 3x3 stride 2 pad 1
    f2 = conv_relu_nhwc(x, *params["b2_c1"])
    f2 = conv_relu_nhwc(f2, *params["b2_c2"], padding=(0, 3))
    f2 = conv_relu_nhwc(f2, *params["b2_c3"], padding=(3, 0))
    f2 = conv_relu_nhwc(f2, *params["b2_c4"], stride=(2, 2), padding=(1, 1))
    # branch 3: MaxPool2d(3, 2, padding=1)
    f3 = maxpool_3x3_s2_p1_nhwc(x)
    out = jnp.concatenate([f1, f2, f3], axis=-1)        # concat on channels (lane axis)
    return jnp.transpose(out, (0, 3, 1, 2))


# ----------------------------------------------------------------------------
# Pure-JAX reference (same bf16-operand / f32-accumulate numerics as kernels)
# ----------------------------------------------------------------------------
def _ref_conv_relu(x, w, b, stride, padding):
    out = jax.lax.conv_general_dilated(
        x.astype(jnp.bfloat16), w.astype(jnp.bfloat16),
        window_strides=stride,
        padding=[(padding[0], padding[0]), (padding[1], padding[1])],
        dimension_numbers=("NCHW", "OIHW", "NCHW"),
        preferred_element_type=jnp.float32,
    )
    return jnp.maximum(out + b[None, :, None, None], 0.0)


def _ref_forward(x, params):
    f1 = _ref_conv_relu(x, *params["b1_c1"], (1, 1), (0, 0))
    f1 = _ref_conv_relu(f1, *params["b1_c2"], (2, 2), (1, 1))
    f2 = _ref_conv_relu(x, *params["b2_c1"], (1, 1), (0, 0))
    f2 = _ref_conv_relu(f2, *params["b2_c2"], (1, 1), (0, 3))
    f2 = _ref_conv_relu(f2, *params["b2_c3"], (1, 1), (3, 0))
    f2 = _ref_conv_relu(f2, *params["b2_c4"], (2, 2), (1, 1))
    f3 = jax.lax.reduce_window(
        x, -jnp.inf, jax.lax.max,
        window_dimensions=(1, 1, 3, 3), window_strides=(1, 1, 2, 2),
        padding=[(0, 0), (0, 0), (1, 1), (1, 1)],
    )
    return jnp.concatenate([f1, f2, f3], axis=1)


# ----------------------------------------------------------------------------
if __name__ == "__main__":
    key = jax.random.PRNGKey(0)
    kx, kp = jax.random.split(key)

    # small shapes consistent with the module
    N, IN_C, H, W = 2, 4, 16, 16
    OUT1_1, OUT1_3, OUT2_1, OUT2_3 = 8, 8, 8, 8

    x = jax.random.normal(kx, (N, IN_C, H, W), jnp.float32)
    params = init_module_d(kp, IN_C, OUT1_1, OUT1_3, OUT2_1, OUT2_3)

    fwd = jax.jit(module_d_forward)
    out = jax.block_until_ready(fwd(x, params))

    expected_shape = (N, OUT1_3 + OUT2_3 + IN_C, 8, 8)
    assert out.shape == expected_shape, (out.shape, expected_shape)

    ref = jax.block_until_ready(_ref_forward(x, params))
    assert jnp.allclose(out, ref, atol=2e-3, rtol=2e-3), (
        "mismatch vs reference", float(jnp.max(jnp.abs(out - ref))))

    print("KERNEL_OK")
</pallas_src>

<mosaic_0001>
module attributes {stable_mosaic.version = 11 : i64} {
  func.func @_maxpool_kernel(%arg0: i32, %arg1: memref<4x9x9x4xf32, #tpu.memory_space<vmem>>, %arg2: memref<1x8x8x4xf32, #tpu.memory_space<vmem>>) attributes {dimension_semantics = [#tpu.dimension_semantics<parallel>], iteration_bounds = array<i64: 2>, scalar_prefetch = 0 : i64, scratch_operands = 0 : i64, tpu.core_type = #tpu.core_type<tc>, window_params = [{transform_indices = @transform_0, window_bounds = array<i64: 4, 9, 9, 4>}, {transform_indices = @transform_1, window_bounds = array<i64: 1, 8, 8, 4>}]} {
    %c0 = arith.constant 0 : index
    %c0_0 = arith.constant 0 : index
    %c0_1 = arith.constant 0 : index
    %c0_2 = arith.constant 0 : index
    %0 = vector.load %arg1[%c0, %c0_0, %c0_1, %c0_2] : memref<4x9x9x4xf32, #tpu.memory_space<vmem>>, vector<1x8x8x4xf32>
    %1 = vector.shape_cast %0 : vector<1x8x8x4xf32> to vector<8x8x4xf32>
    %c1 = arith.constant 1 : index
    %c0_3 = arith.constant 0 : index
    %c0_4 = arith.constant 0 : index
    %c0_5 = arith.constant 0 : index
    %2 = vector.load %arg1[%c1, %c0_3, %c0_4, %c0_5] : memref<4x9x9x4xf32, #tpu.memory_space<vmem>>, vector<1x8x8x4xf32>
    %3 = vector.shape_cast %2 : vector<1x8x8x4xf32> to vector<8x8x4xf32>
    %4 = arith.maximumf %1, %3 : vector<8x8x4xf32>
    %c0_6 = arith.constant 0 : index
    %c0_7 = arith.constant 0 : index
    %c1_8 = arith.constant 1 : index
    %c0_9 = arith.constant 0 : index
    %5 = vector.load %arg1[%c0_6, %c0_7, %c1_8, %c0_9] : memref<4x9x9x4xf32, #tpu.memory_space<vmem>>, vector<1x8x8x4xf32>
    %6 = vector.shape_cast %5 : vector<1x8x8x4xf32> to vector<8x8x4xf32>
    %7 = arith.maximumf %4, %6 : vector<8x8x4xf32>
    %c2 = arith.constant 2 : index
    %c0_10 = arith.constant 0 : index
    %c0_11 = arith.constant 0 : index
    %c0_12 = arith.constant 0 : index
    %8 = vector.load %arg1[%c2, %c0_10, %c0_11, %c0_12] : memref<4x9x9x4xf32, #tpu.memory_space<vmem>>, vector<1x8x8x4xf32>
    %9 = vector.shape_cast %8 : vector<1x8x8x4xf32> to vector<8x8x4xf32>
    %10 = arith.maximumf %7, %9 : vector<8x8x4xf32>
    %c3 = arith.constant 3 : index
    %c0_13 = arith.constant 0 : index
    %c0_14 = arith.constant 0 : index
    %c0_15 = arith.constant 0 : index
    %11 = vector.load %arg1[%c3, %c0_13, %c0_14, %c0_15] : memref<4x9x9x4xf32, #tpu.memory_space<vmem>>, vector<1x8x8x4xf32>
    %12 = vector.shape_cast %11 : vector<1x8x8x4xf32> to vector<8x8x4xf32>
    %13 = arith.maximumf %10, %12 : vector<8x8x4xf32>
    %c2_16 = arith.constant 2 : index
    %c0_17 = arith.constant 0 : index
    %c1_18 = arith.constant 1 : index
    %c0_19 = arith.constant 0 : index
    %14 = vector.load %arg1[%c2_16, %c0_17, %c1_18, %c0_19] : memref<4x9x9x4xf32, #tpu.memory_space<vmem>>, vector<1x8x8x4xf32>
    %15 = vector.shape_cast %14 : vector<1x8x8x4xf32> to vector<8x8x4xf32>
    %16 = arith.maximumf %13, %15 : vector<8x8x4xf32>
    %c0_20 = arith.constant 0 : index
    %c1_21 = arith.constant 1 : index
    %c0_22 = arith.constant 0 : index
    %c0_23 = arith.constant 0 : index
    %17 = vector.load %arg1[%c0_20, %c1_21, %c0_22, %c0_23] : memref<4x9x9x4xf32, #tpu.memory_space<vmem>>, vector<1x8x8x4xf32>
    %18 = vector.shape_cast %17 : vector<1x8x8x4xf32> to vector<8x8x4xf32>
    %19 = arith.maximumf %16, %18 : vector<8x8x4xf32>
    %c1_24 = arith.constant 1 : index
    %c1_25 = arith.constant 1 : index
    %c0_26 = arith.constant 0 : index
    %c0_27 = arith.constant 0 : index
    %20 = vector.load %arg1[%c1_24, %c1_25, %c0_26, %c0_27] : memref<4x9x9x4xf32, #tpu.memory_space<vmem>>, vector<1x8x8x4xf32>
    %21 = vector.shape_cast %20 : vector<1x8x8x4xf32> to vector<8x8x4xf32>
    %22 = arith.maximumf %19, %21 : vector<8x8x4xf32>
    %c0_28 = arith.constant 0 : index
    %c1_29 = arith.constant 1 : index
    %c1_30 = arith.constant 1 : index
    %c0_31 = arith.constant 0 : index
    %23 = vector.load %arg1[%c0_28, %c1_29, %c1_30, %c0_31] : memref<4x9x9x4xf32, #tpu.memory_space<vmem>>, vector<1x8x8x4xf32>
    %24 = vector.shape_cast %23 : vector<1x8x8x4xf32> to vector<8x8x4xf32>
    %25 = arith.maximumf %22, %24 : vector<8x8x4xf32>
    %26 = vector.shape_cast %25 : vector<8x8x4xf32> to vector<1x8x8x4xf32>
    %c0_32 = arith.constant 0 : index
    %c0_33 = arith.constant 0 : index
    %c0_34 = arith.constant 0 : index
    %c0_35 = arith.constant 0 : index
    %27 = vector.load %arg2[%c0_32, %c0_33, %c0_34, %c0_35] : memref<1x8x8x4xf32, #tpu.memory_space<vmem>>, vector<1x8x8x4xf32>
    tpu.vector_store %arg2[%c0_32, %c0_33, %c0_34, %c0_35], %26 {strides = array<i32>} : memref<1x8x8x4xf32, #tpu.memory_space<vmem>>, vector<1x8x8x4xf32>,
    return
  }
  func.func @transform_0(%arg0: i32) -> (i32, i32, i32, i32) {
    %c0_i32 = arith.constant 0 : i32
    %c0_i32_0 = arith.constant 0 : i32
    %c0_i32_1 = arith.constant 0 : i32
    %c0_i32_2 = arith.constant 0 : i32
    return %arg0, %c0_i32, %c0_i32_0, %c0_i32_1 : i32, i32, i32, i32
  }
  func.func @transform_1(%arg0: i32) -> (i32, i32, i32, i32) {
    %c0_i32 = arith.constant 0 : i32
    %c0_i32_0 = arith.constant 0 : i32
    %c0_i32_1 = arith.constant 0 : i32
    %c0_i32_2 = arith.constant 0 : i32
    return %arg0, %c0_i32, %c0_i32_0, %c0_i32_1 : i32, i32, i32, i32
  }
}

module attributes {stable_mosaic.version = 11 : i64} {
  func.func @_matmul_bias_relu_kernel(%arg0: i32, %arg1: i32, %arg2: memref<256x4xbf16, #tpu.memory_space<vmem>>, %arg3: memref<4x128xbf16, #tpu.memory_space<vmem>>, %arg4: memref<1x128xf32, #tpu.memory_space<vmem>>, %arg5: memref<256x128xf32, #tpu.memory_space<vmem>>) attributes {dimension_semantics = [#tpu.dimension_semantics<parallel>, #tpu.dimension_semantics<parallel>], iteration_bounds = array<i64: 2, 1>, scalar_prefetch = 0 : i64, scratch_operands = 0 : i64, tpu.core_type = #tpu.core_type<tc>, window_params = [{transform_indices = @transform_0, window_bounds = array<i64: 256, 4>}, {transform_indices = @transform_1, window_bounds = array<i64: 4, 128>}, {transform_indices = @transform_2, window_bounds = array<i64: 1, 128>}, {transform_indices = @transform_3, window_bounds = array<i64: 256, 128>}]} {
    %c0 = arith.constant 0 : index
    %c0_0 = arith.constant 0 : index
    %0 = vector.load %arg2[%c0, %c0_0] : memref<256x4xbf16, #tpu.memory_space<vmem>>, vector<256x4xbf16>
    %c0_1 = arith.constant 0 : index
    %c0_2 = arith.constant 0 : index
    %1 = vector.load %arg3[%c0_1, %c0_2] : memref<4x128xbf16, #tpu.memory_space<vmem>>, vector<4x128xbf16>
    %cst = arith.constant dense<0.000000e+00> : vector<256x128xf32>
    %2 = tpu.matmul %0, %1, %cst {dimension_numbers = #tpu.dot_dimension_numbers<[1], [0], [0], [1], [0, 0, 1, 1], [], []>} : vector<256x4xbf16>, vector<4x128xbf16>, vector<256x128xf32> -> vector<256x128xf32>
    %c0_3 = arith.constant 0 : index
    %c0_4 = arith.constant 0 : index
    %3 = vector.load %arg4[%c0_3, %c0_4] : memref<1x128xf32, #tpu.memory_space<vmem>>, vector<1x128xf32>
    %4 = vector.broadcast %3 : vector<1x128xf32> to vector<256x128xf32>
    %5 = arith.addf %2, %4 : vector<256x128xf32>
    %cst_5 = arith.constant 0.000000e+00 : f32
    %6 = vector.broadcast %cst_5 : f32 to vector<256x128xf32>
    %7 = arith.maximumf %5, %6 : vector<256x128xf32>
    %c0_6 = arith.constant 0 : index
    %c0_7 = arith.constant 0 : index
    %8 = vector.load %arg5[%c0_6, %c0_7] : memref<256x128xf32, #tpu.memory_space<vmem>>, vector<256x128xf32>
    tpu.vector_store %arg5[%c0_6, %c0_7], %7 {strides = array<i32>} : memref<256x128xf32, #tpu.memory_space<vmem>>, vector<256x128xf32>,
    return
  }
  func.func @transform_0(%arg0: i32, %arg1: i32) -> (i32, i32) {
    %c0_i32 = arith.constant 0 : i32
    %c0_i32_0 = arith.constant 0 : i32
    return %arg0, %c0_i32 : i32, i32
  }
  func.func @transform_1(%arg0: i32, %arg1: i32) -> (i32, i32) {
    %c0_i32 = arith.constant 0 : i32
    %c0_i32_0 = arith.constant 0 : i32
    return %c0_i32, %arg1 : i32, i32
  }
  func.func @transform_2(%arg0: i32, %arg1: i32) -> (i32, i32) {
    %c0_i32 = arith.constant 0 : i32
    %c0_i32_0 = arith.constant 0 : i32
    return %c0_i32, %arg1 : i32, i32
  }
  func.func @transform_3(%arg0: i32, %arg1: i32) -> (i32, i32) {
    %c0_i32 = arith.constant 0 : i32
    return %arg0, %arg1 : i32, i32
  }
}

module attributes {stable_mosaic.version = 11 : i64} {
  func.func @_fused_conv_kernel(%arg0: i32, %arg1: i32, %arg2: memref<1x16x22x8xbf16, #tpu.memory_space<vmem>>, %arg3: memref<7x8x128xbf16, #tpu.memory_space<vmem>>, %arg4: memref<1x128xf32, #tpu.memory_space<vmem>>, %arg5: memref<1x16x16x128xf32, #tpu.memory_space<vmem>>) attributes {dimension_semantics = [#tpu.dimension_semantics<parallel>, #tpu.dimension_semantics<parallel>], iteration_bounds = array<i64: 2, 1>, scalar_prefetch = 0 : i64, scratch_operands = 0 : i64, tpu.core_type = #tpu.core_type<tc>, window_params = [{transform_indices = @transform_0, window_bounds = array<i64: 1, 16, 22, 8>}, {transform_indices = @transform_1, window_bounds = array<i64: 7, 8, 128>}, {transform_indices = @transform_2, window_bounds = array<i64: 1, 128>}, {transform_indices = @transform_3, window_bounds = array<i64: 1, 16, 16, 128>}]} {
    %cst = arith.constant 0.000000e+00 : f32
    %0 = vector.broadcast %cst : f32 to vector<256x128xf32>
    %c0 = arith.constant 0 : index
    %c0_0 = arith.constant 0 : index
    %c0_1 = arith.constant 0 : index
    %c0_2 = arith.constant 0 : index
    %1 = vector.load %arg2[%c0, %c0_0, %c0_1, %c0_2] : memref<1x16x22x8xbf16, #tpu.memory_space<vmem>>, vector<1x16x16x8xbf16>
    %2 = vector.shape_cast %1 : vector<1x16x16x8xbf16> to vector<16x16x8xbf16>
    %3 = vector.shape_cast %2 : vector<16x16x8xbf16> to vector<256x8xbf16>
    %c0_3 = arith.constant 0 : index
    %c0_4 = arith.constant 0 : index
    %c0_5 = arith.constant 0 : index
    %4 = vector.load %arg3[%c0_3, %c0_4, %c0_5] : memref<7x8x128xbf16, #tpu.memory_space<vmem>>, vector<1x8x128xbf16>
    %5 = vector.shape_cast %4 : vector<1x8x128xbf16> to vector<8x128xbf16>
    %cst_6 = arith.constant dense<0.000000e+00> : vector<256x128xf32>
    %6 = tpu.matmul %3, %5, %cst_6 {dimension_numbers = #tpu.dot_dimension_numbers<[1], [0], [0], [1], [0, 0, 1, 1], [], []>} : vector<256x8xbf16>, vector<8x128xbf16>, vector<256x128xf32> -> vector<256x128xf32>
    %7 = arith.addf %0, %6 : vector<256x128xf32>
    %c0_7 = arith.constant 0 : index
    %c0_8 = arith.constant 0 : index
    %c1 = arith.constant 1 : index
    %c0_9 = arith.constant 0 : index
    %8 = vector.load %arg2[%c0_7, %c0_8, %c1, %c0_9] : memref<1x16x22x8xbf16, #tpu.memory_space<vmem>>, vector<1x16x16x8xbf16>
    %9 = vector.shape_cast %8 : vector<1x16x16x8xbf16> to vector<16x16x8xbf16>
    %10 = vector.shape_cast %9 : vector<16x16x8xbf16> to vector<256x8xbf16>
    %c1_10 = arith.constant 1 : index
    %c0_11 = arith.constant 0 : index
    %c0_12 = arith.constant 0 : index
    %11 = vector.load %arg3[%c1_10, %c0_11, %c0_12] : memref<7x8x128xbf16, #tpu.memory_space<vmem>>, vector<1x8x128xbf16>
    %12 = vector.shape_cast %11 : vector<1x8x128xbf16> to vector<8x128xbf16>
    %cst_13 = arith.constant dense<0.000000e+00> : vector<256x128xf32>
    %13 = tpu.matmul %10, %12, %cst_13 {dimension_numbers = #tpu.dot_dimension_numbers<[1], [0], [0], [1], [0, 0, 1, 1], [], []>} : vector<256x8xbf16>, vector<8x128xbf16>, vector<256x128xf32> -> vector<256x128xf32>
    %14 = arith.addf %7, %13 : vector<256x128xf32>
    %c0_14 = arith.constant 0 : index
    %c0_15 = arith.constant 0 : index
    %c2 = arith.constant 2 : index
    %c0_16 = arith.constant 0 : index
    %15 = vector.load %arg2[%c0_14, %c0_15, %c2, %c0_16] : memref<1x16x22x8xbf16, #tpu.memory_space<vmem>>, vector<1x16x16x8xbf16>
    %16 = vector.shape_cast %15 : vector<1x16x16x8xbf16> to vector<16x16x8xbf16>
    %17 = vector.shape_cast %16 : vector<16x16x8xbf16> to vector<256x8xbf16>
    %c2_17 = arith.constant 2 : index
    %c0_18 = arith.constant 0 : index
    %c0_19 = arith.constant 0 : index
    %18 = vector.load %arg3[%c2_17, %c0_18, %c0_19] : memref<7x8x128xbf16, #tpu.memory_space<vmem>>, vector<1x8x128xbf16>
    %19 = vector.shape_cast %18 : vector<1x8x128xbf16> to vector<8x128xbf16>
    %cst_20 = arith.constant dense<0.000000e+00> : vector<256x128xf32>
    %20 = tpu.matmul %17, %19, %cst_20 {dimension_numbers = #tpu.dot_dimension_numbers<[1], [0], [0], [1], [0, 0, 1, 1], [], []>} : vector<256x8xbf16>, vector<8x128xbf16>, vector<256x128xf32> -> vector<256x128xf32>
    %21 = arith.addf %14, %20 : vector<256x128xf32>
    %c0_21 = arith.constant 0 : index
    %c0_22 = arith.constant 0 : index
    %c3 = arith.constant 3 : index
    %c0_23 = arith.constant 0 : index
    %22 = vector.load %arg2[%c0_21, %c0_22, %c3, %c0_23] : memref<1x16x22x8xbf16, #tpu.memory_space<vmem>>, vector<1x16x16x8xbf16>
    %23 = vector.shape_cast %22 : vector<1x16x16x8xbf16> to vector<16x16x8xbf16>
    %24 = vector.shape_cast %23 : vector<16x16x8xbf16> to vector<256x8xbf16>
    %c3_24 = arith.constant 3 : index
    %c0_25 = arith.constant 0 : index
    %c0_26 = arith.constant 0 : index
    %25 = vector.load %arg3[%c3_24, %c0_25, %c0_26] : memref<7x8x128xbf16, #tpu.memory_space<vmem>>, vector<1x8x128xbf16>
    %26 = vector.shape_cast %25 : vector<1x8x128xbf16> to vector<8x128xbf16>
    %cst_27 = arith.constant dense<0.000000e+00> : vector<256x128xf32>
    %27 = tpu.matmul %24, %26, %cst_27 {dimension_numbers = #tpu.dot_dimension_numbers<[1], [0], [0], [1], [0, 0, 1, 1], [], []>} : vector<256x8xbf16>, vector<8x128xbf16>, vector<256x128xf32> -> vector<256x128xf32>
    %28 = arith.addf %21, %27 : vector<256x128xf32>
    %c0_28 = arith.constant 0 : index
    %c0_29 = arith.constant 0 : index
    %c4 = arith.constant 4 : index
    %c0_30 = arith.constant 0 : index
    %29 = vector.load %arg2[%c0_28, %c0_29, %c4, %c0_30] : memref<1x16x22x8xbf16, #tpu.memory_space<vmem>>, vector<1x16x16x8xbf16>
    %30 = vector.shape_cast %29 : vector<1x16x16x8xbf16> to vector<16x16x8xbf16>
    %31 = vector.shape_cast %30 : vector<16x16x8xbf16> to vector<256x8xbf16>
    %c4_31 = arith.constant 4 : index
    %c0_32 = arith.constant 0 : index
    %c0_33 = arith.constant 0 : index
    %32 = vector.load %arg3[%c4_31, %c0_32, %c0_33] : memref<7x8x128xbf16, #tpu.memory_space<vmem>>, vector<1x8x128xbf16>
    %33 = vector.shape_cast %32 : vector<1x8x128xbf16> to vector<8x128xbf16>
    %cst_34 = arith.constant dense<0.000000e+00> : vector<256x128xf32>
    %34 = tpu.matmul %31, %33, %cst_34 {dimension_numbers = #tpu.dot_dimension_numbers<[1], [0], [0], [1], [0, 0, 1, 1], [], []>} : vector<256x8xbf16>, vector<8x128xbf16>, vector<256x128xf32> -> vector<256x128xf32>
    %35 = arith.addf %28, %34 : vector<256x128xf32>
    %c0_35 = arith.constant 0 : index
    %c0_36 = arith.constant 0 : index
    %c5 = arith.constant 5 : index
    %c0_37 = arith.constant 0 : index
    %36 = vector.load %arg2[%c0_35, %c0_36, %c5, %c0_37] : memref<1x16x22x8xbf16, #tpu.memory_space<vmem>>, vector<1x16x16x8xbf16>
    %37 = vector.shape_cast %36 : vector<1x16x16x8xbf16> to vector<16x16x8xbf16>
    %38 = vector.shape_cast %37 : vector<16x16x8xbf16> to vector<256x8xbf16>
    %c5_38 = arith.constant 5 : index
    %c0_39 = arith.constant 0 : index
    %c0_40 = arith.constant 0 : index
    %39 = vector.load %arg3[%c5_38, %c0_39, %c0_40] : memref<7x8x128xbf16, #tpu.memory_space<vmem>>, vector<1x8x128xbf16>
    %40 = vector.shape_cast %39 : vector<1x8x128xbf16> to vector<8x128xbf16>
    %cst_41 = arith.constant dense<0.000000e+00> : vector<256x128xf32>
    %41 = tpu.matmul %38, %40, %cst_41 {dimension_numbers = #tpu.dot_dimension_numbers<[1], [0], [0], [1], [0, 0, 1, 1], [], []>} : vector<256x8xbf16>, vector<8x128xbf16>, vector<256x128xf32> -> vector<256x128xf32>
    %42 = arith.addf %35, %41 : vector<256x128xf32>
    %c0_42 = arith.constant 0 : index
    %c0_43 = arith.constant 0 : index
    %c6 = arith.constant 6 : index
    %c0_44 = arith.constant 0 : index
    %43 = vector.load %arg2[%c0_42, %c0_43, %c6, %c0_44] : memref<1x16x22x8xbf16, #tpu.memory_space<vmem>>, vector<1x16x16x8xbf16>
    %44 = vector.shape_cast %43 : vector<1x16x16x8xbf16> to vector<16x16x8xbf16>
    %45 = vector.shape_cast %44 : vector<16x16x8xbf16> to vector<256x8xbf16>
    %c6_45 = arith.constant 6 : index
    %c0_46 = arith.constant 0 : index
    %c0_47 = arith.constant 0 : index
    %46 = vector.load %arg3[%c6_45, %c0_46, %c0_47] : memref<7x8x128xbf16, #tpu.memory_space<vmem>>, vector<1x8x128xbf16>
    %47 = vector.shape_cast %46 : vector<1x8x128xbf16> to vector<8x128xbf16>
    %cst_48 = arith.constant dense<0.000000e+00> : vector<256x128xf32>
    %48 = tpu.matmul %45, %47, %cst_48 {dimension_numbers = #tpu.dot_dimension_numbers<[1], [0], [0], [1], [0, 0, 1, 1], [], []>} : vector<256x8xbf16>, vector<8x128xbf16>, vector<256x128xf32> -> vector<256x128xf32>
    %49 = arith.addf %42, %48 : vector<256x128xf32>
    %c0_49 = arith.constant 0 : index
    %c0_50 = arith.constant 0 : index
    %50 = vector.load %arg4[%c0_49, %c0_50] : memref<1x128xf32, #tpu.memory_space<vmem>>, vector<1x128xf32>
    %51 = vector.broadcast %50 : vector<1x128xf32> to vector<256x128xf32>
    %52 = arith.addf %49, %51 : vector<256x128xf32>
    %cst_51 = arith.constant 0.000000e+00 : f32
    %53 = vector.broadcast %cst_51 : f32 to vector<256x128xf32>
    %54 = arith.maximumf %52, %53 : vector<256x128xf32>
    %55 = vector.shape_cast %54 : vector<256x128xf32> to vector<1x16x16x128xf32>
    %c0_52 = arith.constant 0 : index
    %c0_53 = arith.constant 0 : index
    %c0_54 = arith.constant 0 : index
    %c0_55 = arith.constant 0 : index
    %56 = vector.load %arg5[%c0_52, %c0_53, %c0_54, %c0_55] : memref<1x16x16x128xf32, #tpu.memory_space<vmem>>, vector<1x16x16x128xf32>
    tpu.vector_store %arg5[%c0_52, %c0_53, %c0_54, %c0_55], %55 {strides = array<i32>} : memref<1x16x16x128xf32, #tpu.memory_space<vmem>>, vector<1x16x16x128xf32>,
    return
  }
  func.func @transform_0(%arg0: i32, %arg1: i32) -> (i32, i32, i32, i32) {
    %c0_i32 = arith.constant 0 : i32
    %c0_i32_0 = arith.constant 0 : i32
    %c0_i32_1 = arith.constant 0 : i32
    %c0_i32_2 = arith.constant 0 : i32
    return %arg0, %c0_i32, %c0_i32_0, %c0_i32_1 : i32, i32, i32, i32
  }
  func.func @transform_1(%arg0: i32, %arg1: i32) -> (i32, i32, i32) {
    %c0_i32 = arith.constant 0 : i32
    %c0_i32_0 = arith.constant 0 : i32
    %c0_i32_1 = arith.constant 0 : i32
    return %c0_i32, %c0_i32_0, %arg1 : i32, i32, i32
  }
  func.func @transform_2(%arg0: i32, %arg1: i32) -> (i32, i32) {
    %c0_i32 = arith.constant 0 : i32
    %c0_i32_0 = arith.constant 0 : i32
    return %c0_i32, %arg1 : i32, i32
  }
  func.func @transform_3(%arg0: i32, %arg1: i32) -> (i32, i32, i32, i32) {
    %c0_i32 = arith.constant 0 : i32
    %c0_i32_0 = arith.constant 0 : i32
    %c0_i32_1 = arith.constant 0 : i32
    return %arg0, %c0_i32, %c0_i32_0, %arg1 : i32, i32, i32, i32
  }
}

module attributes {stable_mosaic.version = 11 : i64} {
  func.func @_fused_conv_kernel(%arg0: i32, %arg1: i32, %arg2: memref<1x22x16x8xbf16, #tpu.memory_space<vmem>>, %arg3: memref<7x8x128xbf16, #tpu.memory_space<vmem>>, %arg4: memref<1x128xf32, #tpu.memory_space<vmem>>, %arg5: memref<1x16x16x128xf32, #tpu.memory_space<vmem>>) attributes {dimension_semantics = [#tpu.dimension_semantics<parallel>, #tpu.dimension_semantics<parallel>], iteration_bounds = array<i64: 2, 1>, scalar_prefetch = 0 : i64, scratch_operands = 0 : i64, tpu.core_type = #tpu.core_type<tc>, window_params = [{transform_indices = @transform_0, window_bounds = array<i64: 1, 22, 16, 8>}, {transform_indices = @transform_1, window_bounds = array<i64: 7, 8, 128>}, {transform_indices = @transform_2, window_bounds = array<i64: 1, 128>}, {transform_indices = @transform_3, window_bounds = array<i64: 1, 16, 16, 128>}]} {
    %cst = arith.constant 0.000000e+00 : f32
    %0 = vector.broadcast %cst : f32 to vector<256x128xf32>
    %c0 = arith.constant 0 : index
    %c0_0 = arith.constant 0 : index
    %c0_1 = arith.constant 0 : index
    %c0_2 = arith.constant 0 : index
    %1 = vector.load %arg2[%c0, %c0_0, %c0_1, %c0_2] : memref<1x22x16x8xbf16, #tpu.memory_space<vmem>>, vector<1x16x16x8xbf16>
    %2 = vector.shape_cast %1 : vector<1x16x16x8xbf16> to vector<16x16x8xbf16>
    %3 = vector.shape_cast %2 : vector<16x16x8xbf16> to vector<256x8xbf16>
    %c0_3 = arith.constant 0 : index
    %c0_4 = arith.constant 0 : index
    %c0_5 = arith.constant 0 : index
    %4 = vector.load %arg3[%c0_3, %c0_4, %c0_5] : memref<7x8x128xbf16, #tpu.memory_space<vmem>>, vector<1x8x128xbf16>
    %5 = vector.shape_cast %4 : vector<1x8x128xbf16> to vector<8x128xbf16>
    %cst_6 = arith.constant dense<0.000000e+00> : vector<256x128xf32>
    %6 = tpu.matmul %3, %5, %cst_6 {dimension_numbers = #tpu.dot_dimension_numbers<[1], [0], [0], [1], [0, 0, 1, 1], [], []>} : vector<256x8xbf16>, vector<8x128xbf16>, vector<256x128xf32> -> vector<256x128xf32>
    %7 = arith.addf %0, %6 : vector<256x128xf32>
    %c0_7 = arith.constant 0 : index
    %c1 = arith.constant 1 : index
    %c0_8 = arith.constant 0 : index
    %c0_9 = arith.constant 0 : index
    %8 = vector.load %arg2[%c0_7, %c1, %c0_8, %c0_9] : memref<1x22x16x8xbf16, #tpu.memory_space<vmem>>, vector<1x16x16x8xbf16>
    %9 = vector.shape_cast %8 : vector<1x16x16x8xbf16> to vector<16x16x8xbf16>
    %10 = vector.shape_cast %9 : vector<16x16x8xbf16> to vector<256x8xbf16>
    %c1_10 = arith.constant 1 : index
    %c0_11 = arith.constant 0 : index
    %c0_12 = arith.constant 0 : index
    %11 = vector.load %arg3[%c1_10, %c0_11, %c0_12] : memref<7x8x128xbf16, #tpu.memory_space<vmem>>, vector<1x8x128xbf16>
    %12 = vector.shape_cast %11 : vector<1x8x128xbf16> to vector<8x128xbf16>
    %cst_13 = arith.constant dense<0.000000e+00> : vector<256x128xf32>
    %13 = tpu.matmul %10, %12, %cst_13 {dimension_numbers = #tpu.dot_dimension_numbers<[1], [0], [0], [1], [0, 0, 1, 1], [], []>} : vector<256x8xbf16>, vector<8x128xbf16>, vector<256x128xf32> -> vector<256x128xf32>
    %14 = arith.addf %7, %13 : vector<256x128xf32>
    %c0_14 = arith.constant 0 : index
    %c2 = arith.constant 2 : index
    %c0_15 = arith.constant 0 : index
    %c0_16 = arith.constant 0 : index
    %15 = vector.load %arg2[%c0_14, %c2, %c0_15, %c0_16] : memref<1x22x16x8xbf16, #tpu.memory_space<vmem>>, vector<1x16x16x8xbf16>
    %16 = vector.shape_cast %15 : vector<1x16x16x8xbf16> to vector<16x16x8xbf16>
    %17 = vector.shape_cast %16 : vector<16x16x8xbf16> to vector<256x8xbf16>
    %c2_17 = arith.constant 2 : index
    %c0_18 = arith.constant 0 : index
    %c0_19 = arith.constant 0 : index
    %18 = vector.load %arg3[%c2_17, %c0_18, %c0_19] : memref<7x8x128xbf16, #tpu.memory_space<vmem>>, vector<1x8x128xbf16>
    %19 = vector.shape_cast %18 : vector<1x8x128xbf16> to vector<8x128xbf16>
    %cst_20 = arith.constant dense<0.000000e+00> : vector<256x128xf32>
    %20 = tpu.matmul %17, %19, %cst_20 {dimension_numbers = #tpu.dot_dimension_numbers<[1], [0], [0], [1], [0, 0, 1, 1], [], []>} : vector<256x8xbf16>, vector<8x128xbf16>, vector<256x128xf32> -> vector<256x128xf32>
    %21 = arith.addf %14, %20 : vector<256x128xf32>
    %c0_21 = arith.constant 0 : index
    %c3 = arith.constant 3 : index
    %c0_22 = arith.constant 0 : index
    %c0_23 = arith.constant 0 : index
    %22 = vector.load %arg2[%c0_21, %c3, %c0_22, %c0_23] : memref<1x22x16x8xbf16, #tpu.memory_space<vmem>>, vector<1x16x16x8xbf16>
    %23 = vector.shape_cast %22 : vector<1x16x16x8xbf16> to vector<16x16x8xbf16>
    %24 = vector.shape_cast %23 : vector<16x16x8xbf16> to vector<256x8xbf16>
    %c3_24 = arith.constant 3 : index
    %c0_25 = arith.constant 0 : index
    %c0_26 = arith.constant 0 : index
    %25 = vector.load %arg3[%c3_24, %c0_25, %c0_26] : memref<7x8x128xbf16, #tpu.memory_space<vmem>>, vector<1x8x128xbf16>
    %26 = vector.shape_cast %25 : vector<1x8x128xbf16> to vector<8x128xbf16>
    %cst_27 = arith.constant dense<0.000000e+00> : vector<256x128xf32>
    %27 = tpu.matmul %24, %26, %cst_27 {dimension_numbers = #tpu.dot_dimension_numbers<[1], [0], [0], [1], [0, 0, 1, 1], [], []>} : vector<256x8xbf16>, vector<8x128xbf16>, vector<256x128xf32> -> vector<256x128xf32>
    %28 = arith.addf %21, %27 : vector<256x128xf32>
    %c0_28 = arith.constant 0 : index
    %c4 = arith.constant 4 : index
    %c0_29 = arith.constant 0 : index
    %c0_30 = arith.constant 0 : index
    %29 = vector.load %arg2[%c0_28, %c4, %c0_29, %c0_30] : memref<1x22x16x8xbf16, #tpu.memory_space<vmem>>, vector<1x16x16x8xbf16>
    %30 = vector.shape_cast %29 : vector<1x16x16x8xbf16> to vector<16x16x8xbf16>
    %31 = vector.shape_cast %30 : vector<16x16x8xbf16> to vector<256x8xbf16>
    %c4_31 = arith.constant 4 : index
    %c0_32 = arith.constant 0 : index
    %c0_33 = arith.constant 0 : index
    %32 = vector.load %arg3[%c4_31, %c0_32, %c0_33] : memref<7x8x128xbf16, #tpu.memory_space<vmem>>, vector<1x8x128xbf16>
    %33 = vector.shape_cast %32 : vector<1x8x128xbf16> to vector<8x128xbf16>
    %cst_34 = arith.constant dense<0.000000e+00> : vector<256x128xf32>
    %34 = tpu.matmul %31, %33, %cst_34 {dimension_numbers = #tpu.dot_dimension_numbers<[1], [0], [0], [1], [0, 0, 1, 1], [], []>} : vector<256x8xbf16>, vector<8x128xbf16>, vector<256x128xf32> -> vector<256x128xf32>
    %35 = arith.addf %28, %34 : vector<256x128xf32>
    %c0_35 = arith.constant 0 : index
    %c5 = arith.constant 5 : index
    %c0_36 = arith.constant 0 : index
    %c0_37 = arith.constant 0 : index
    %36 = vector.load %arg2[%c0_35, %c5, %c0_36, %c0_37] : memref<1x22x16x8xbf16, #tpu.memory_space<vmem>>, vector<1x16x16x8xbf16>
    %37 = vector.shape_cast %36 : vector<1x16x16x8xbf16> to vector<16x16x8xbf16>
    %38 = vector.shape_cast %37 : vector<16x16x8xbf16> to vector<256x8xbf16>
    %c5_38 = arith.constant 5 : index
    %c0_39 = arith.constant 0 : index
    %c0_40 = arith.constant 0 : index
    %39 = vector.load %arg3[%c5_38, %c0_39, %c0_40] : memref<7x8x128xbf16, #tpu.memory_space<vmem>>, vector<1x8x128xbf16>
    %40 = vector.shape_cast %39 : vector<1x8x128xbf16> to vector<8x128xbf16>
    %cst_41 = arith.constant dense<0.000000e+00> : vector<256x128xf32>
    %41 = tpu.matmul %38, %40, %cst_41 {dimension_numbers = #tpu.dot_dimension_numbers<[1], [0], [0], [1], [0, 0, 1, 1], [], []>} : vector<256x8xbf16>, vector<8x128xbf16>, vector<256x128xf32> -> vector<256x128xf32>
    %42 = arith.addf %35, %41 : vector<256x128xf32>
    %c0_42 = arith.constant 0 : index
    %c6 = arith.constant 6 : index
    %c0_43 = arith.constant 0 : index
    %c0_44 = arith.constant 0 : index
    %43 = vector.load %arg2[%c0_42, %c6, %c0_43, %c0_44] : memref<1x22x16x8xbf16, #tpu.memory_space<vmem>>, vector<1x16x16x8xbf16>
    %44 = vector.shape_cast %43 : vector<1x16x16x8xbf16> to vector<16x16x8xbf16>
    %45 = vector.shape_cast %44 : vector<16x16x8xbf16> to vector<256x8xbf16>
    %c6_45 = arith.constant 6 : index
    %c0_46 = arith.constant 0 : index
    %c0_47 = arith.constant 0 : index
    %46 = vector.load %arg3[%c6_45, %c0_46, %c0_47] : memref<7x8x128xbf16, #tpu.memory_space<vmem>>, vector<1x8x128xbf16>
    %47 = vector.shape_cast %46 : vector<1x8x128xbf16> to vector<8x128xbf16>
    %cst_48 = arith.constant dense<0.000000e+00> : vector<256x128xf32>
    %48 = tpu.matmul %45, %47, %cst_48 {dimension_numbers = #tpu.dot_dimension_numbers<[1], [0], [0], [1], [0, 0, 1, 1], [], []>} : vector<256x8xbf16>, vector<8x128xbf16>, vector<256x128xf32> -> vector<256x128xf32>
    %49 = arith.addf %42, %48 : vector<256x128xf32>
    %c0_49 = arith.constant 0 : index
    %c0_50 = arith.constant 0 : index
    %50 = vector.load %arg4[%c0_49, %c0_50] : memref<1x128xf32, #tpu.memory_space<vmem>>, vector<1x128xf32>
    %51 = vector.broadcast %50 : vector<1x128xf32> to vector<256x128xf32>
    %52 = arith.addf %49, %51 : vector<256x128xf32>
    %cst_51 = arith.constant 0.000000e+00 : f32
    %53 = vector.broadcast %cst_51 : f32 to vector<256x128xf32>
    %54 = arith.maximumf %52, %53 : vector<256x128xf32>
    %55 = vector.shape_cast %54 : vector<256x128xf32> to vector<1x16x16x128xf32>
    %c0_52 = arith.constant 0 : index
    %c0_53 = arith.constant 0 : index
    %c0_54 = arith.constant 0 : index
    %c0_55 = arith.constant 0 : index
    %56 = vector.load %arg5[%c0_52, %c0_53, %c0_54, %c0_55] : memref<1x16x16x128xf32, #tpu.memory_space<vmem>>, vector<1x16x16x128xf32>
    tpu.vector_store %arg5[%c0_52, %c0_53, %c0_54, %c0_55], %55 {strides = array<i32>} : memref<1x16x16x128xf32, #tpu.memory_space<vmem>>, vector<1x16x16x128xf32>,
    return
  }
  func.func @transform_0(%arg0: i32, %arg1: i32) -> (i32, i32, i32, i32) {
    %c0_i32 = arith.constant 0 : i32
    %c0_i32_0 = arith.constant 0 : i32
    %c0_i32_1 = arith.constant 0 : i32
    %c0_i32_2 = arith.constant 0 : i32
    return %arg0, %c0_i32, %c0_i32_0, %c0_i32_1 : i32, i32, i32, i32
  }
  func.func @transform_1(%arg0: i32, %arg1: i32) -> (i32, i32, i32) {
    %c0_i32 = arith.constant 0 : i32
    %c0_i32_0 = arith.constant 0 : i32
    %c0_i32_1 = arith.constant 0 : i32
    return %c0_i32, %c0_i32_0, %arg1 : i32, i32, i32
  }
  func.func @transform_2(%arg0: i32, %arg1: i32) -> (i32, i32) {
    %c0_i32 = arith.constant 0 : i32
    %c0_i32_0 = arith.constant 0 : i32
    return %c0_i32, %arg1 : i32, i32
  }
  func.func @transform_3(%arg0: i32, %arg1: i32) -> (i32, i32, i32, i32) {
    %c0_i32 = arith.constant 0 : i32
    %c0_i32_0 = arith.constant 0 : i32
    %c0_i32_1 = arith.constant 0 : i32
    return %arg0, %c0_i32, %c0_i32_0, %arg1 : i32, i32, i32, i32
  }
}

module attributes {stable_mosaic.version = 11 : i64} {
  func.func @_fused_conv_kernel(%arg0: i32, %arg1: i32, %arg2: memref<4x9x9x8xbf16, #tpu.memory_space<vmem>>, %arg3: memref<9x8x128xbf16, #tpu.memory_space<vmem>>, %arg4: memref<1x128xf32, #tpu.memory_space<vmem>>, %arg5: memref<1x8x8x128xf32, #tpu.memory_space<vmem>>) attributes {dimension_semantics = [#tpu.dimension_semantics<parallel>, #tpu.dimension_semantics<parallel>], iteration_bounds = array<i64: 2, 1>, scalar_prefetch = 0 : i64, scratch_operands = 0 : i64, tpu.core_type = #tpu.core_type<tc>, window_params = [{transform_indices = @transform_0, window_bounds = array<i64: 4, 9, 9, 8>}, {transform_indices = @transform_1, window_bounds = array<i64: 9, 8, 128>}, {transform_indices = @transform_2, window_bounds = array<i64: 1, 128>}, {transform_indices = @transform_3, window_bounds = array<i64: 1, 8, 8, 128>}]} {
    %cst = arith.constant 0.000000e+00 : f32
    %0 = vector.broadcast %cst : f32 to vector<64x128xf32>
    %c0 = arith.constant 0 : index
    %c0_0 = arith.constant 0 : index
    %c0_1 = arith.constant 0 : index
    %c0_2 = arith.constant 0 : index
    %1 = vector.load %arg2[%c0, %c0_0, %c0_1, %c0_2] : memref<4x9x9x8xbf16, #tpu.memory_space<vmem>>, vector<1x8x8x8xbf16>
    %2 = vector.shape_cast %1 : vector<1x8x8x8xbf16> to vector<8x8x8xbf16>
    %3 = vector.shape_cast %2 : vector<8x8x8xbf16> to vector<64x8xbf16>
    %c0_3 = arith.constant 0 : index
    %c0_4 = arith.constant 0 : index
    %c0_5 = arith.constant 0 : index
    %4 = vector.load %arg3[%c0_3, %c0_4, %c0_5] : memref<9x8x128xbf16, #tpu.memory_space<vmem>>, vector<1x8x128xbf16>
    %5 = vector.shape_cast %4 : vector<1x8x128xbf16> to vector<8x128xbf16>
    %cst_6 = arith.constant dense<0.000000e+00> : vector<64x128xf32>
    %6 = tpu.matmul %3, %5, %cst_6 {dimension_numbers = #tpu.dot_dimension_numbers<[1], [0], [0], [1], [0, 0, 1, 1], [], []>} : vector<64x8xbf16>, vector<8x128xbf16>, vector<64x128xf32> -> vector<64x128xf32>
    %7 = arith.addf %0, %6 : vector<64x128xf32>
    %c1 = arith.constant 1 : index
    %c0_7 = arith.constant 0 : index
    %c0_8 = arith.constant 0 : index
    %c0_9 = arith.constant 0 : index
    %8 = vector.load %arg2[%c1, %c0_7, %c0_8, %c0_9] : memref<4x9x9x8xbf16, #tpu.memory_space<vmem>>, vector<1x8x8x8xbf16>
    %9 = vector.shape_cast %8 : vector<1x8x8x8xbf16> to vector<8x8x8xbf16>
    %10 = vector.shape_cast %9 : vector<8x8x8xbf16> to vector<64x8xbf16>
    %c1_10 = arith.constant 1 : index
    %c0_11 = arith.constant 0 : index
    %c0_12 = arith.constant 0 : index
    %11 = vector.load %arg3[%c1_10, %c0_11, %c0_12] : memref<9x8x128xbf16, #tpu.memory_space<vmem>>, vector<1x8x128xbf16>
    %12 = vector.shape_cast %11 : vector<1x8x128xbf16> to vector<8x128xbf16>
    %cst_13 = arith.constant dense<0.000000e+00> : vector<64x128xf32>
    %13 = tpu.matmul %10, %12, %cst_13 {dimension_numbers = #tpu.dot_dimension_numbers<[1], [0], [0], [1], [0, 0, 1, 1], [], []>} : vector<64x8xbf16>, vector<8x128xbf16>, vector<64x128xf32> -> vector<64x128xf32>
    %14 = arith.addf %7, %13 : vector<64x128xf32>
    %c0_14 = arith.constant 0 : index
    %c0_15 = arith.constant 0 : index
    %c1_16 = arith.constant 1 : index
    %c0_17 = arith.constant 0 : index
    %15 = vector.load %arg2[%c0_14, %c0_15, %c1_16, %c0_17] : memref<4x9x9x8xbf16, #tpu.memory_space<vmem>>, vector<1x8x8x8xbf16>
    %16 = vector.shape_cast %15 : vector<1x8x8x8xbf16> to vector<8x8x8xbf16>
    %17 = vector.shape_cast %16 : vector<8x8x8xbf16> to vector<64x8xbf16>
    %c2 = arith.constant 2 : index
    %c0_18 = arith.constant 0 : index
    %c0_19 = arith.constant 0 : index
    %18 = vector.load %arg3[%c2, %c0_18, %c0_19] : memref<9x8x128xbf16, #tpu.memory_space<vmem>>, vector<1x8x128xbf16>
    %19 = vector.shape_cast %18 : vector<1x8x128xbf16> to vector<8x128xbf16>
    %cst_20 = arith.constant dense<0.000000e+00> : vector<64x128xf32>
    %20 = tpu.matmul %17, %19, %cst_20 {dimension_numbers = #tpu.dot_dimension_numbers<[1], [0], [0], [1], [0, 0, 1, 1], [], []>} : vector<64x8xbf16>, vector<8x128xbf16>, vector<64x128xf32> -> vector<64x128xf32>
    %21 = arith.addf %14, %20 : vector<64x128xf32>
    %c2_21 = arith.constant 2 : index
    %c0_22 = arith.constant 0 : index
    %c0_23 = arith.constant 0 : index
    %c0_24 = arith.constant 0 : index
    %22 = vector.load %arg2[%c2_21, %c0_22, %c0_23, %c0_24] : memref<4x9x9x8xbf16, #tpu.memory_space<vmem>>, vector<1x8x8x8xbf16>
    %23 = vector.shape_cast %22 : vector<1x8x8x8xbf16> to vector<8x8x8xbf16>
    %24 = vector.shape_cast %23 : vector<8x8x8xbf16> to vector<64x8xbf16>
    %c3 = arith.constant 3 : index
    %c0_25 = arith.constant 0 : index
    %c0_26 = arith.constant 0 : index
    %25 = vector.load %arg3[%c3, %c0_25, %c0_26] : memref<9x8x128xbf16, #tpu.memory_space<vmem>>, vector<1x8x128xbf16>
    %26 = vector.shape_cast %25 : vector<1x8x128xbf16> to vector<8x128xbf16>
    %cst_27 = arith.constant dense<0.000000e+00> : vector<64x128xf32>
    %27 = tpu.matmul %24, %26, %cst_27 {dimension_numbers = #tpu.dot_dimension_numbers<[1], [0], [0], [1], [0, 0, 1, 1], [], []>} : vector<64x8xbf16>, vector<8x128xbf16>, vector<64x128xf32> -> vector<64x128xf32>
    %28 = arith.addf %21, %27 : vector<64x128xf32>
    %c3_28 = arith.constant 3 : index
    %c0_29 = arith.constant 0 : index
    %c0_30 = arith.constant 0 : index
    %c0_31 = arith.constant 0 : index
    %29 = vector.load %arg2[%c3_28, %c0_29, %c0_30, %c0_31] : memref<4x9x9x8xbf16, #tpu.memory_space<vmem>>, vector<1x8x8x8xbf16>
    %30 = vector.shape_cast %29 : vector<1x8x8x8xbf16> to vector<8x8x8xbf16>
    %31 = vector.shape_cast %30 : vector<8x8x8xbf16> to vector<64x8xbf16>
    %c4 = arith.constant 4 : index
    %c0_32 = arith.constant 0 : index
    %c0_33 = arith.constant 0 : index
    %32 = vector.load %arg3[%c4, %c0_32, %c0_33] : memref<9x8x128xbf16, #tpu.memory_space<vmem>>, vector<1x8x128xbf16>
    %33 = vector.shape_cast %32 : vector<1x8x128xbf16> to vector<8x128xbf16>
    %cst_34 = arith.constant dense<0.000000e+00> : vector<64x128xf32>
    %34 = tpu.matmul %31, %33, %cst_34 {dimension_numbers = #tpu.dot_dimension_numbers<[1], [0], [0], [1], [0, 0, 1, 1], [], []>} : vector<64x8xbf16>, vector<8x128xbf16>, vector<64x128xf32> -> vector<64x128xf32>
    %35 = arith.addf %28, %34 : vector<64x128xf32>
    %c2_35 = arith.constant 2 : index
    %c0_36 = arith.constant 0 : index
    %c1_37 = arith.constant 1 : index
    %c0_38 = arith.constant 0 : index
    %36 = vector.load %arg2[%c2_35, %c0_36, %c1_37, %c0_38] : memref<4x9x9x8xbf16, #tpu.memory_space<vmem>>, vector<1x8x8x8xbf16>
    %37 = vector.shape_cast %36 : vector<1x8x8x8xbf16> to vector<8x8x8xbf16>
    %38 = vector.shape_cast %37 : vector<8x8x8xbf16> to vector<64x8xbf16>
    %c5 = arith.constant 5 : index
    %c0_39 = arith.constant 0 : index
    %c0_40 = arith.constant 0 : index
    %39 = vector.load %arg3[%c5, %c0_39, %c0_40] : memref<9x8x128xbf16, #tpu.memory_space<vmem>>, vector<1x8x128xbf16>
    %40 = vector.shape_cast %39 : vector<1x8x128xbf16> to vector<8x128xbf16>
    %cst_41 = arith.constant dense<0.000000e+00> : vector<64x128xf32>
    %41 = tpu.matmul %38, %40, %cst_41 {dimension_numbers = #tpu.dot_dimension_numbers<[1], [0], [0], [1], [0, 0, 1, 1], [], []>} : vector<64x8xbf16>, vector<8x128xbf16>, vector<64x128xf32> -> vector<64x128xf32>
    %42 = arith.addf %35, %41 : vector<64x128xf32>
    %c0_42 = arith.constant 0 : index
    %c1_43 = arith.constant 1 : index
    %c0_44 = arith.constant 0 : index
    %c0_45 = arith.constant 0 : index
    %43 = vector.load %arg2[%c0_42, %c1_43, %c0_44, %c0_45] : memref<4x9x9x8xbf16, #tpu.memory_space<vmem>>, vector<1x8x8x8xbf16>
    %44 = vector.shape_cast %43 : vector<1x8x8x8xbf16> to vector<8x8x8xbf16>
    %45 = vector.shape_cast %44 : vector<8x8x8xbf16> to vector<64x8xbf16>
    %c6 = arith.constant 6 : index
    %c0_46 = arith.constant 0 : index
    %c0_47 = arith.constant 0 : index
    %46 = vector.load %arg3[%c6, %c0_46, %c0_47] : memref<9x8x128xbf16, #tpu.memory_space<vmem>>, vector<1x8x128xbf16>
    %47 = vector.shape_cast %46 : vector<1x8x128xbf16> to vector<8x128xbf16>
    %cst_48 = arith.constant dense<0.000000e+00> : vector<64x128xf32>
    %48 = tpu.matmul %45, %47, %cst_48 {dimension_numbers = #tpu.dot_dimension_numbers<[1], [0], [0], [1], [0, 0, 1, 1], [], []>} : vector<64x8xbf16>, vector<8x128xbf16>, vector<64x128xf32> -> vector<64x128xf32>
    %49 = arith.addf %42, %48 : vector<64x128xf32>
    %c1_49 = arith.constant 1 : index
    %c1_50 = arith.constant 1 : index
    %c0_51 = arith.constant 0 : index
    %c0_52 = arith.constant 0 : index
    %50 = vector.load %arg2[%c1_49, %c1_50, %c0_51, %c0_52] : memref<4x9x9x8xbf16, #tpu.memory_space<vmem>>, vector<1x8x8x8xbf16>
    %51 = vector.shape_cast %50 : vector<1x8x8x8xbf16> to vector<8x8x8xbf16>
    %52 = vector.shape_cast %51 : vector<8x8x8xbf16> to vector<64x8xbf16>
    %c7 = arith.constant 7 : index
    %c0_53 = arith.constant 0 : index
    %c0_54 = arith.constant 0 : index
    %53 = vector.load %arg3[%c7, %c0_53, %c0_54] : memref<9x8x128xbf16, #tpu.memory_space<vmem>>, vector<1x8x128xbf16>
    %54 = vector.shape_cast %53 : vector<1x8x128xbf16> to vector<8x128xbf16>
    %cst_55 = arith.constant dense<0.000000e+00> : vector<64x128xf32>
    %55 = tpu.matmul %52, %54, %cst_55 {dimension_numbers = #tpu.dot_dimension_numbers<[1], [0], [0], [1], [0, 0, 1, 1], [], []>} : vector<64x8xbf16>, vector<8x128xbf16>, vector<64x128xf32> -> vector<64x128xf32>
    %56 = arith.addf %49, %55 : vector<64x128xf32>
    %c0_56 = arith.constant 0 : index
    %c1_57 = arith.constant 1 : index
    %c1_58 = arith.constant 1 : index
    %c0_59 = arith.constant 0 : index
    %57 = vector.load %arg2[%c0_56, %c1_57, %c1_58, %c0_59] : memref<4x9x9x8xbf16, #tpu.memory_space<vmem>>, vector<1x8x8x8xbf16>
    %58 = vector.shape_cast %57 : vector<1x8x8x8xbf16> to vector<8x8x8xbf16>
    %59 = vector.shape_cast %58 : vector<8x8x8xbf16> to vector<64x8xbf16>
    %c8 = arith.constant 8 : index
    %c0_60 = arith.constant 0 : index
    %c0_61 = arith.constant 0 : index
    %60 = vector.load %arg3[%c8, %c0_60, %c0_61] : memref<9x8x128xbf16, #tpu.memory_space<vmem>>, vector<1x8x128xbf16>
    %61 = vector.shape_cast %60 : vector<1x8x128xbf16> to vector<8x128xbf16>
    %cst_62 = arith.constant dense<0.000000e+00> : vector<64x128xf32>
    %62 = tpu.matmul %59, %61, %cst_62 {dimension_numbers = #tpu.dot_dimension_numbers<[1], [0], [0], [1], [0, 0, 1, 1], [], []>} : vector<64x8xbf16>, vector<8x128xbf16>, vector<64x128xf32> -> vector<64x128xf32>
    %63 = arith.addf %56, %62 : vector<64x128xf32>
    %c0_63 = arith.constant 0 : index
    %c0_64 = arith.constant 0 : index
    %64 = vector.load %arg4[%c0_63, %c0_64] : memref<1x128xf32, #tpu.memory_space<vmem>>, vector<1x128xf32>
    %65 = vector.broadcast %64 : vector<1x128xf32> to vector<64x128xf32>
    %66 = arith.addf %63, %65 : vector<64x128xf32>
    %cst_65 = arith.constant 0.000000e+00 : f32
    %67 = vector.broadcast %cst_65 : f32 to vector<64x128xf32>
    %68 = arith.maximumf %66, %67 : vector<64x128xf32>
    %69 = vector.shape_cast %68 : vector<64x128xf32> to vector<1x8x8x128xf32>
    %c0_66 = arith.constant 0 : index
    %c0_67 = arith.constant 0 : index
    %c0_68 = arith.constant 0 : index
    %c0_69 = arith.constant 0 : index
    %70 = vector.load %arg5[%c0_66, %c0_67, %c0_68, %c0_69] : memref<1x8x8x128xf32, #tpu.memory_space<vmem>>, vector<1x8x8x128xf32>
    tpu.vector_store %arg5[%c0_66, %c0_67, %c0_68, %c0_69], %69 {strides = array<i32>} : memref<1x8x8x128xf32, #tpu.memory_space<vmem>>, vector<1x8x8x128xf32>,
    return
  }
  func.func @transform_0(%arg0: i32, %arg1: i32) -> (i32, i32, i32, i32) {
    %c0_i32 = arith.constant 0 : i32
    %c0_i32_0 = arith.constant 0 : i32
    %c0_i32_1 = arith.constant 0 : i32
    %c0_i32_2 = arith.constant 0 : i32
    return %arg0, %c0_i32, %c0_i32_0, %c0_i32_1 : i32, i32, i32, i32
  }
  func.func @transform_1(%arg0: i32, %arg1: i32) -> (i32, i32, i32) {
    %c0_i32 = arith.constant 0 : i32
    %c0_i32_0 = arith.constant 0 : i32
    %c0_i32_1 = arith.constant 0 : i32
    return %c0_i32, %c0_i32_0, %arg1 : i32, i32, i32
  }
  func.func @transform_2(%arg0: i32, %arg1: i32) -> (i32, i32) {
    %c0_i32 = arith.constant 0 : i32
    %c0_i32_0 = arith.constant 0 : i32
    return %c0_i32, %arg1 : i32, i32
  }
  func.func @transform_3(%arg0: i32, %arg1: i32) -> (i32, i32, i32, i32) {
    %c0_i32 = arith.constant 0 : i32
    %c0_i32_0 = arith.constant 0 : i32
    %c0_i32_1 = arith.constant 0 : i32
    return %arg0, %c0_i32, %c0_i32_0, %arg1 : i32, i32, i32, i32
  }
}

</mosaic_0001>

<bundles_post_ra>
// kernel: module_d_forward.9
= control target key start
LH: loop header
LB: loop body
LE: loop exit
PB: predicated region body
PF: predicated region fallthrough
CT: control target
= control target key end

     0   :  { %s832_s12 = smov 0   ;;  %s834_s13 = smov 0   ;;  %s959_s0 = inlined_call_operand.vmem [shape: bf16[512,4], index: 0, kind: input, shape index: {}]   ;;  %s960_s1 = inlined_call_operand.vmem [shape: bf16[4,128], index: 1, kind: input, shape index: {}]   ;;  %s961_s2 = inlined_call_operand.vmem [shape: f32[1,128], index: 2, kind: input, shape index: {}]   ;;  %s962_s3 = inlined_call_operand.vmem [shape: f32[512,128], index: 3, kind: output, shape index: {}]  }
   0x1   :  { %s836_s14 = smov 0  }
   0x2 LB: > { %s25_s15 = sadd.s32 1, %s806_s13  ;;  %p657_p0 = scmp.ge.s32.totalorder %s810_s14, 1  ;;  %s810_s14 = sphi %s836_s14, %s13_s14   ;;  %s806_s13 = sphi %s834_s13, %s964_s13   ;;  %s802_s12 = sphi %s832_s12, %s963_s12  }
   0x3   : > { %p27_p1 = scmp.ge.s32.totalorder %s25_s15, 2  ;;  %p169_p2 = scmp.lt.s32.totalorder %s810_s14, 3 }
   0x5   : > { %s966_s15 = smov (%p27_p1, %s25_s15), 0  ;;  %p170_p3 = pnand %p657_p0, %p169_p2 }
   0x6   : > { %s658_s18 = sshll.u32 (!%p170_p3), %s802_s12, 5 }
   0x7   : > { %173 = sbr.rel (%p170_p3) target bundleno = 212 (0xd4), region = 32  ;;  %p204_p4 = scmp.lt.s32.totalorder (!%p170_p3), %s658_s18, 63 }
   0xc   : > { %v258_v0 = vld [vmem:[%s960_s1] sm:$0x3]  ;;  %vm392_vm0 = vcmask 1041408   ;;  %s968_s18 = smov (!%p204_p4, %s658_s18), 63  ;;  %vm343_vm1 = vcmask 31744  }
   0xd   : > { %v394_v1 = vsel %vm392_vm0, %v258_v0, 0  ;;  %s659_s19 = sshll.u32 %s968_s18, 2  ;;  %v878_v18 = vld [vmem:[%s961_s2] ss:$0 sm:$0xff]  ;;  %s661_s25 = sshll.u32 %s968_s18, 3 }
   0xe   : > { %403 = vmatpush.bf16.msra.mxu0 %v394_v1  ;;  %760 = vmatpush.bf16.msra.mxu1 %v394_v1  ;;  %s207_s22 = scalar_lea.vmem %s959_s0, %s659_s19  ;;  %s886_s28 = scalar_lea.vmem %s962_s3, %s661_s25 }
   0xf   : > { %761 = vmatpush.bf16.msra.mxu2 %v394_v1  ;;  %762 = vmatpush.bf16.msra.mxu3 %v394_v1  ;;  %v744_v2 = vld [vmem:[%s207_s22] sm:$0xff]  ;;  %v745_v6 = vld [vmem:[%s207_s22 + $0x8] sm:$0xff]  ;;  %v746_v10 = vld [vmem:[%s207_s22 + $0x10] sm:$0xff] }
  0x10   : > { %v748_v3 = vld [vmem:[%s207_s22 + $0x20] sm:$0xff]  ;;  %v749_v7 = vld [vmem:[%s207_s22 + $0x28] sm:$0xff]  ;;  %v750_v11 = vld [vmem:[%s207_s22 + $0x30] sm:$0xff] }
  0x11   : > { %v752_v4 = vld [vmem:[%s207_s22 + $0x40] sm:$0xff]  ;;  %726 = vmatmul.msk.bf16.vlgmr.msra.gmra.mxu0 %vm343_vm1, %v744_v2  ;;  %730 = vmatmul.msk.bf16.vlgmr.msra.gmra.mxu1 %vm343_vm1, %v748_v3  ;;  %v753_v8 = vld [vmem:[%s207_s22 + $0x48] sm:$0xff]  ;;  %v754_v12 = vld [vmem:[%s207_s22 + $0x50] sm:$0xff] }
  0x12   : > { %v756_v5 = vld [vmem:[%s207_s22 + $0x60] sm:$0xff]  ;;  %734 = vmatmul.msk.bf16.vlgmr.msra.gmra.mxu2 %vm343_vm1, %v752_v4  ;;  %v757_v9 = vld [vmem:[%s207_s22 + $0x68] sm:$0xff]  ;;  %v758_v13 = vld [vmem:[%s207_s22 + $0x70] sm:$0xff] }
  0x13   : > { %738 = vmatmul.msk.bf16.vlgmr.msra.gmra.mxu3 %vm343_vm1, %v756_v5  ;;  %v747_v14 = vld [vmem:[%s207_s22 + $0x18] sm:$0xff] }
  0x14   : > { %v751_v15 = vld [vmem:[%s207_s22 + $0x38] sm:$0xff] }
  0x15   : > { %v755_v16 = vld [vmem:[%s207_s22 + $0x58] sm:$0xff] }
  0x16   : > { %v759_v17 = vld [vmem:[%s207_s22 + $0x78] sm:$0xff] }
  0x21   : > { %727 = vmatmul.msk.bf16.gmra.mxu0 %vm343_vm1, %v745_v6  ;;  %731 = vmatmul.msk.bf16.gmra.mxu1 %vm343_vm1, %v749_v7 }
  0x22   : > { %735 = vmatmul.msk.bf16.gmra.mxu2 %vm343_vm1, %v753_v8 }
  0x23   : > { %739 = vmatmul.msk.bf16.gmra.mxu3 %vm343_vm1, %v757_v9 }
  0x31   : > { %728 = vmatmul.msk.bf16.gmra.mxu0 %vm343_vm1, %v746_v10  ;;  %732 = vmatmul.msk.bf16.gmra.mxu1 %vm343_vm1, %v750_v11 }
  0x32   : > { %736 = vmatmul.msk.bf16.gmra.mxu2 %vm343_vm1, %v754_v12 }
  0x33   : > { %740 = vmatmul.msk.bf16.gmra.mxu3 %vm343_vm1, %v758_v13 }
  0x41   : > { %729 = vmatmul.msk.bf16.gmra.mxu0 %vm343_vm1, %v747_v14  ;;  %733 = vmatmul.msk.bf16.gmra.mxu1 %vm343_vm1, %v751_v15 }
  0x42   : > { %737 = vmatmul.msk.bf16.gmra.mxu2 %vm343_vm1, %v755_v16 }
  0x43   : > { %741 = vmatmul.msk.bf16.gmra.mxu3 %vm343_vm1, %v759_v17 }
  0x8e   : > { %v405_v19 = vpop.f32.mrf.mxu0  ;;  %v425_v20 = vpop.f32.mrf.mxu1 }
  0x8f   : > { %v406_v21 = vadd.f32 %v878_v18, %v405_v19  ;;  %v426_v22 = vadd.f32 %v878_v18, %v425_v20 }
  0x91   : > { %v485_v23 = vmax.f32 %v406_v21, 0.0  ;;  %v493_v24 = vmax.f32 %v426_v22, 0.0 }
  0x93   : > { %517 = vst [vmem:[%s886_s28] sm:$0xff] %v485_v23 }
  0x94   : > { %525 = vst [vmem:[%s886_s28 + $0x40] sm:$0xff] %v493_v24 }
  0x95   : > { %v445_v25 = vpop.f32.mrf.mxu2 }
  0x96   : > { %v465_v26 = vpop.f32.mrf.mxu3  ;;  %v446_v27 = vadd.f32 %v878_v18, %v445_v25  ;;  %v407_v29 = vpop.f32.mrf.mxu0 }
  0x97   : > { %v466_v28 = vadd.f32 %v878_v18, %v465_v26  ;;  %v427_v30 = vpop.f32.mrf.mxu1  ;;  %v408_v31 = vadd.f32 %v878_v18, %v407_v29 }
  0x98   : > { %v428_v32 = vadd.f32 %v878_v18, %v427_v30  ;;  %v501_v33 = vmax.f32 %v446_v27, 0.0 }
  0x99   : > { %v509_v34 = vmax.f32 %v466_v28, 0.0  ;;  %v486_v35 = vmax.f32 %v408_v31, 0.0 }
  0x9a   : > { %v494_v36 = vmax.f32 %v428_v32, 0.0  ;;  %533 = vst [vmem:[%s886_s28 + $0x80] sm:$0xff] %v501_v33 }
  0x9b   : > { %541 = vst [vmem:[%s886_s28 + $0xc0] sm:$0xff] %v509_v34 }
  0x9c   : > { %518 = vst [vmem:[%s886_s28 + $0x8] sm:$0xff] %v486_v35 }
  0x9d   : > { %526 = vst [vmem:[%s886_s28 + $0x48] sm:$0xff] %v494_v36  ;;  %v447_v37 = vpop.f32.mrf.mxu2 }
  0x9e   : > { %v467_v38 = vpop.f32.mrf.mxu3  ;;  %v448_v39 = vadd.f32 %v878_v18, %v447_v37  ;;  %v410_v41 = vpop.f32.mrf.mxu0 }
  0x9f   : > { %v468_v40 = vadd.f32 %v878_v18, %v467_v38  ;;  %v430_v42 = vpop.f32.mrf.mxu1  ;;  %v411_v43 = vadd.f32 %v878_v18, %v410_v41 }
  0xa0   : > { %v431_v44 = vadd.f32 %v878_v18, %v430_v42  ;;  %v502_v45 = vmax.f32 %v448_v39, 0.0 }
  0xa1   : > { %v510_v46 = vmax.f32 %v468_v40, 0.0  ;;  %v487_v47 = vmax.f32 %v411_v43, 0.0 }
  0xa2   : > { %v495_v48 = vmax.f32 %v431_v44, 0.0  ;;  %534 = vst [vmem:[%s886_s28 + $0x88] sm:$0xff] %v502_v45 }
  0xa3   : > { %542 = vst [vmem:[%s886_s28 + $0xc8] sm:$0xff] %v510_v46 }
  0xa4   : > { %519 = vst [vmem:[%s886_s28 + $0x10] sm:$0xff] %v487_v47 }
  0xa5   : > { %527 = vst [vmem:[%s886_s28 + $0x50] sm:$0xff] %v495_v48  ;;  %v450_v49 = vpop.f32.mrf.mxu2 }
  0xa6   : > { %v470_v50 = vpop.f32.mrf.mxu3  ;;  %v451_v51 = vadd.f32 %v878_v18, %v450_v49  ;;  %v412_v53 = vpop.f32.mrf.mxu0 }
  0xa7   : > { %v471_v52 = vadd.f32 %v878_v18, %v470_v50  ;;  %v432_v54 = vpop.f32.mrf.mxu1  ;;  %v413_v55 = vadd.f32 %v878_v18, %v412_v53 }
  0xa8   : > { %v433_v56 = vadd.f32 %v878_v18, %v432_v54  ;;  %v503_v57 = vmax.f32 %v451_v51, 0.0 }
  0xa9   : > { %v511_v58 = vmax.f32 %v471_v52, 0.0  ;;  %v488_v59 = vmax.f32 %v413_v55, 0.0 }
  0xaa   : > { %v496_v60 = vmax.f32 %v433_v56, 0.0  ;;  %535 = vst [vmem:[%s886_s28 + $0x90] sm:$0xff] %v503_v57 }
  0xab   : > { %543 = vst [vmem:[%s886_s28 + $0xd0] sm:$0xff] %v511_v58 }
  0xac   : > { %520 = vst [vmem:[%s886_s28 + $0x18] sm:$0xff] %v488_v59 }
  0xad   : > { %528 = vst [vmem:[%s886_s28 + $0x58] sm:$0xff] %v496_v60  ;;  %v452_v61 = vpop.f32.mrf.mxu2 }
  0xae   : > { %v472_v62 = vpop.f32.mrf.mxu3  ;;  %v453_v63 = vadd.f32 %v878_v18, %v452_v61  ;;  %v415_v1 = vpop.f32.mrf.mxu0 }
  0xaf   : > { %v473_v0 = vadd.f32 %v878_v18, %v472_v62  ;;  %v435_v2 = vpop.f32.mrf.mxu1  ;;  %v416_v3 = vadd.f32 %v878_v18, %v415_v1 }
  0xb0   : > { %v436_v4 = vadd.f32 %v878_v18, %v435_v2  ;;  %v504_v5 = vmax.f32 %v453_v63, 0.0 }
  0xb1   : > { %v512_v6 = vmax.f32 %v473_v0, 0.0  ;;  %v489_v7 = vmax.f32 %v416_v3, 0.0 }
  0xb2   : > { %v497_v8 = vmax.f32 %v436_v4, 0.0  ;;  %536 = vst [vmem:[%s886_s28 + $0x98] sm:$0xff] %v504_v5 }
  0xb3   : > { %544 = vst [vmem:[%s886_s28 + $0xd8] sm:$0xff] %v512_v6 }
  0xb4   : > { %521 = vst [vmem:[%s886_s28 + $0x20] sm:$0xff] %v489_v7 }
  0xb5   : > { %529 = vst [vmem:[%s886_s28 + $0x60] sm:$0xff] %v497_v8  ;;  %v455_v9 = vpop.f32.mrf.mxu2 }
  0xb6   : > { %v475_v10 = vpop.f32.mrf.mxu3  ;;  %v456_v11 = vadd.f32 %v878_v18, %v455_v9  ;;  %v417_v13 = vpop.f32.mrf.mxu0 }
  0xb7   : > { %v476_v12 = vadd.f32 %v878_v18, %v475_v10  ;;  %v437_v14 = vpop.f32.mrf.mxu1  ;;  %v418_v15 = vadd.f32 %v878_v18, %v417_v13 }
  0xb8   : > { %v438_v16 = vadd.f32 %v878_v18, %v437_v14  ;;  %v505_v17 = vmax.f32 %v456_v11, 0.0 }
  0xb9   : > { %v513_v19 = vmax.f32 %v476_v12, 0.0  ;;  %v490_v20 = vmax.f32 %v418_v15, 0.0 }
  0xba   : > { %v498_v21 = vmax.f32 %v438_v16, 0.0  ;;  %537 = vst [vmem:[%s886_s28 + $0xa0] sm:$0xff] %v505_v17 }
  0xbb   : > { %545 = vst [vmem:[%s886_s28 + $0xe0] sm:$0xff] %v513_v19 }
  0xbc   : > { %522 = vst [vmem:[%s886_s28 + $0x28] sm:$0xff] %v490_v20 }
  0xbd   : > { %530 = vst [vmem:[%s886_s28 + $0x68] sm:$0xff] %v498_v21  ;;  %v457_v22 = vpop.f32.mrf.mxu2 }
  0xbe   : > { %v477_v23 = vpop.f32.mrf.mxu3  ;;  %v458_v24 = vadd.f32 %v878_v18, %v457_v22  ;;  %v420_v26 = vpop.f32.mrf.mxu0 }
  0xbf   : > { %v478_v25 = vadd.f32 %v878_v18, %v477_v23  ;;  %v440_v27 = vpop.f32.mrf.mxu1  ;;  %v421_v28 = vadd.f32 %v878_v18, %v420_v26 }
  0xc0   : > { %v441_v29 = vadd.f32 %v878_v18, %v440_v27  ;;  %v506_v30 = vmax.f32 %v458_v24, 0.0 }
  0xc1   : > { %v514_v31 = vmax.f32 %v478_v25, 0.0  ;;  %v491_v32 = vmax.f32 %v421_v28, 0.0 }
  0xc2   : > { %v499_v33 = vmax.f32 %v441_v29, 0.0  ;;  %538 = vst [vmem:[%s886_s28 + $0xa8] sm:$0xff] %v506_v30 }
  0xc3   : > { %546 = vst [vmem:[%s886_s28 + $0xe8] sm:$0xff] %v514_v31 }
  0xc4   : > { %523 = vst [vmem:[%s886_s28 + $0x30] sm:$0xff] %v491_v32 }
  0xc5   : > { %531 = vst [vmem:[%s886_s28 + $0x70] sm:$0xff] %v499_v33  ;;  %v460_v34 = vpop.f32.mrf.mxu2 }
  0xc6   : > { %v480_v35 = vpop.f32.mrf.mxu3  ;;  %v461_v36 = vadd.f32 %v878_v18, %v460_v34  ;;  %v422_v38 = vpop.f32.mrf.mxu0 }
  0xc7   : > { %v481_v37 = vadd.f32 %v878_v18, %v480_v35  ;;  %v442_v39 = vpop.f32.mrf.mxu1  ;;  %v423_v40 = vadd.f32 %v878_v18, %v422_v38 }
  0xc8   : > { %v443_v41 = vadd.f32 %v878_v18, %v442_v39  ;;  %v507_v42 = vmax.f32 %v461_v36, 0.0 }
  0xc9   : > { %v515_v43 = vmax.f32 %v481_v37, 0.0  ;;  %v492_v44 = vmax.f32 %v423_v40, 0.0 }
  0xca   : > { %v500_v45 = vmax.f32 %v443_v41, 0.0  ;;  %539 = vst [vmem:[%s886_s28 + $0xb0] sm:$0xff] %v507_v42 }
  0xcb   : > { %547 = vst [vmem:[%s886_s28 + $0xf0] sm:$0xff] %v515_v43 }
  0xcc   : > { %524 = vst [vmem:[%s886_s28 + $0x38] sm:$0xff] %v492_v44 }
  0xcd   : > { %532 = vst [vmem:[%s886_s28 + $0x78] sm:$0xff] %v500_v45  ;;  %v462_v46 = vpop.f32.mrf.mxu2 }
  0xce   : > { %v482_v47 = vpop.f32.mrf.mxu3  ;;  %v463_v48 = vadd.f32 %v878_v18, %v462_v46 }
  0xcf   : > { %v483_v49 = vadd.f32 %v878_v18, %v482_v47 }
  0xd0   : > { %v508_v50 = vmax.f32 %v463_v48, 0.0 }
  0xd1   : > { %v516_v51 = vmax.f32 %v483_v49, 0.0 }
  0xd2   : > { %540 = vst [vmem:[%s886_s28 + $0xb8] sm:$0xff] %v508_v50 }
  0xd3   : > { %548 = vst [vmem:[%s886_s28 + $0xf8] sm:$0xff] %v516_v51 }
  0xd4 PF: > { %s13_s14 = sadd.s32 1, %s810_s14   ;;  %s963_s12 = smov %s806_s13 }
  0xd5   : > { %p10_p5 = scmp.ge.s32.totalorder %s13_s14, 4   ;;  %s964_s13 = smov %s966_s15 }
  0xd7   :  { %12 = sbr.rel (!%p10_p5) target bundleno = 2 (0x2), region = 68 }

// kernel: module_d_forward.13
= control target key start
LH: loop header
LB: loop body
LE: loop exit
PB: predicated region body
PF: predicated region fallthrough
CT: control target
= control target key end

     0   :  { %s422_s6 = smov 0   ;;  %s560_s0 = inlined_call_operand.vmem [shape: f32[8,9,9,4], index: 0, kind: input, shape index: {}]   ;;  %s561_s1 = inlined_call_operand.vmem [shape: f32[2,8,8,4], index: 1, kind: output, shape index: {}]  }
   0x1 LB: > { %s428_s7 = sadd.s32 4294967295, %s410_s6   ;;  %p331_p0 = scmp.ge.s32.totalorder %s410_s6, 1  ;;  %s410_s6 = sphi %s422_s6, %s11_s6  }
   0x2   : > { %p89_p1 = scmp.lt.s32.totalorder %s410_s6, 3 }
   0x4   : > { %p90_p2 = pnand %p331_p0, %p89_p1 }
   0x5   : > { %s332_s8 = sshll.u32 (!%p90_p2), %s428_s7, 2  ;;  %p117_p4 = scmp.lt.s32.totalorder (!%p90_p2), %s428_s7, 1 }
   0x6   : > { %93 = sbr.rel (%p90_p2) target bundleno = 52 (0x34), region = 24  ;;  %p111_p3 = scmp.lt.s32.totalorder (!%p90_p2), %s332_s8, 7 }
   0xb   : > { %s563_s8 = smov (!%p111_p3, %s332_s8), 7  ;;  %s565_s7 = smov (!%p117_p4, %s428_s7), 1  ;;  %vm263_vm0 = vcmask 31744  }
   0xc   : > { %s395_s9 = smul.u32 144, %s563_s8  ;;  %s394_s13 = sshll.u32 %s565_s7, 6 }
   0xd   : > { %s514_s16 = scalar_lea.vmem %s561_s1, %s394_s13 }
   0xe   : > { %s436_s12 = scalar_lea.vmem %s560_s0, %s395_s9 }
   0xf   : > { %v122_v0 = vld [vmem:[%s436_s12] sm:$0xff]  ;;  %v336_v1 = vld [vmem:[%s436_s12 + $0x90] sm:$0xff] }
  0x10   : > { %v147_v2 = vld [vmem:[%s436_s12 + $0x1] sm:$0xff]  ;;  %v139_v3 = vmax.f32 %v122_v0, %v336_v1  ;;  %v368_v5 = vld [vmem:[%s436_s12 + $0x10] sm:$0xff] }
  0x11   : > { %v344_v4 = vld [vmem:[%s436_s12 + $0x120] sm:$0xff]  ;;  %v447_v7 = vld [vmem:[%s436_s12 + $0x11] sm:$0xff] }
  0x12   : > { %v444_v6 = vld [vmem:[%s436_s12 + $0xa0] sm:$0xff]  ;;  %v155_v8 = vmax.f32 %v139_v3, %v147_v2  ;;  %v352_v9 = vld [vmem:[%s436_s12 + $0x1b0] sm:$0xff] }
  0x13   : > { %v140_v10 = vmax.f32 %v368_v5, %v444_v6  ;;  %v345_v11 = vld [vmem:[%s436_s12 + $0x130] sm:$0xff]  ;;  %v369_v12 = vld [vmem:[%s436_s12 + $0x20] sm:$0xff] }
  0x14   : > { %v455_v13 = vld [vmem:[%s436_s12 + $0xb0] sm:$0xff]  ;;  %v458_v14 = vld [vmem:[%s436_s12 + $0x21] sm:$0xff]  ;;  %v172_v15 = vmax.f32 %v155_v8, %v344_v4 }
  0x15   : > { %v360_v16 = vld [vmem:[%s436_s12 + $0x121] sm:$0xff]  ;;  %v156_v17 = vmax.f32 %v140_v10, %v447_v7  ;;  %v141_v19 = vmax.f32 %v369_v12, %v455_v13  ;;  %v370_v21 = vld [vmem:[%s436_s12 + $0x30] sm:$0xff] }
  0x16   : > { %v353_v18 = vld [vmem:[%s436_s12 + $0x1c0] sm:$0xff]  ;;  %v470_v23 = vld [vmem:[%s436_s12 + $0x31] sm:$0xff]  ;;  %v189_v24 = vmax.f32 %v172_v15, %v352_v9 }
  0x17   : > { %v346_v20 = vld [vmem:[%s436_s12 + $0x140] sm:$0xff]  ;;  %v173_v25 = vmax.f32 %v156_v17, %v345_v11  ;;  %v361_v26 = vld [vmem:[%s436_s12 + $0x131] sm:$0xff]  ;;  %v157_v27 = vmax.f32 %v141_v19, %v458_v14 }
  0x18   : > { %v467_v22 = vld [vmem:[%s436_s12 + $0xc0] sm:$0xff]  ;;  %v354_v28 = vld [vmem:[%s436_s12 + $0x1d0] sm:$0xff]  ;;  %v205_v33 = vmax.f32 %v189_v24, %v360_v16 }
  0x19   : > { %v142_v29 = vmax.f32 %v370_v21, %v467_v22  ;;  %v347_v30 = vld [vmem:[%s436_s12 + $0x150] sm:$0xff]  ;;  %v371_v31 = vld [vmem:[%s436_s12 + $0x40] sm:$0xff]  ;;  %v190_v34 = vmax.f32 %v173_v25, %v353_v18  ;;  %v174_v35 = vmax.f32 %v157_v27, %v346_v20 }
  0x1a   : > { %v484_v32 = vld [vmem:[%s436_s12 + $0xd0] sm:$0xff]  ;;  %v362_v36 = vld [vmem:[%s436_s12 + $0x141] sm:$0xff]  ;;  %v222_v43 = vmax.f32 %v205_v33, %v368_v5 }
  0x1b   : > { %v158_v37 = vmax.f32 %v142_v29, %v470_v23  ;;  %v489_v38 = vld [vmem:[%s436_s12 + $0x41] sm:$0xff]  ;;  %v143_v40 = vmax.f32 %v371_v31, %v484_v32  ;;  %v372_v41 = vld [vmem:[%s436_s12 + $0x50] sm:$0xff]  ;;  %v206_v44 = vmax.f32 %v190_v34, %v361_v26  ;;  %v191_v45 = vmax.f32 %v174_v35, %v354_v28 }
  0x1c   : > { %v355_v39 = vld [vmem:[%s436_s12 + $0x1e0] sm:$0xff]  ;;  %v388_v48 = vld [vmem:[%s436_s12 + $0x51] sm:$0xff]  ;;  %v239_v54 = vmax.f32 %v222_v43, %v444_v6 }
  0x1d   : > { %v495_v42 = vld [vmem:[%s436_s12 + $0xe0] sm:$0xff]  ;;  %v175_v46 = vmax.f32 %v158_v37, %v347_v30  ;;  %v363_v49 = vld [vmem:[%s436_s12 + $0x151] sm:$0xff]  ;;  %v159_v50 = vmax.f32 %v143_v40, %v489_v38  ;;  %v223_v55 = vmax.f32 %v206_v44, %v369_v12  ;;  %v207_v56 = vmax.f32 %v191_v45, %v362_v36 }
  0x1e   : > { %v348_v47 = vld [vmem:[%s436_s12 + $0x160] sm:$0xff]  ;;  %v144_v51 = vmax.f32 %v372_v41, %v495_v42  ;;  %v505_v53 = vld [vmem:[%s436_s12 + $0xf0] sm:$0xff]  ;;  %v255_v3 = vmax.f32 %v239_v54, %v447_v7 }
  0x1f   : > { %v373_v52 = vld [vmem:[%s436_s12 + $0x60] sm:$0xff]  ;;  %v192_v57 = vmax.f32 %v175_v46, %v355_v39  ;;  %v356_v58 = vld [vmem:[%s436_s12 + $0x1f0] sm:$0xff]  ;;  %v176_v61 = vmax.f32 %v159_v50, %v348_v47  ;;  %v240_v4 = vmax.f32 %v223_v55, %v455_v13  ;;  %v224_v5 = vmax.f32 %v207_v56, %v370_v21 }
  0x20   : > { %v349_v59 = vld [vmem:[%s436_s12 + $0x170] sm:$0xff]  ;;  %v389_v60 = vld [vmem:[%s436_s12 + $0x61] sm:$0xff]  ;;  %v160_v63 = vmax.f32 %v144_v51, %v388_v48  ;;  %v145_v0 = vmax.f32 %v373_v52, %v505_v53  ;;  %264 = vst.msk [vmem:[%s514_s16] sm:$0xff] %vm263_vm0, %v255_v3 }
  0x21   : > { %v364_v62 = vld [vmem:[%s436_s12 + $0x161] sm:$0xff]  ;;  %v374_v1 = vld [vmem:[%s436_s12 + $0x70] sm:$0xff]  ;;  %v208_v6 = vmax.f32 %v192_v57, %v363_v49  ;;  %v193_v11 = vmax.f32 %v176_v61, %v356_v58  ;;  %v256_v7 = vmax.f32 %v240_v4, %v458_v14  ;;  %v241_v17 = vmax.f32 %v224_v5, %v467_v22 }
  0x22   : > { %v382_v2 = vld [vmem:[%s436_s12 + $0x100] sm:$0xff]  ;;  %v390_v10 = vld [vmem:[%s436_s12 + $0x71] sm:$0xff]  ;;  %v177_v12 = vmax.f32 %v160_v63, %v349_v59  ;;  %v161_v15 = vmax.f32 %v145_v0, %v389_v60 }
  0x23   : > { %v357_v8 = vld [vmem:[%s436_s12 + $0x200] sm:$0xff]  ;;  %v146_v16 = vmax.f32 %v374_v1, %v382_v2  ;;  %v225_v13 = vmax.f32 %v208_v6, %v371_v31  ;;  %v365_v18 = vld [vmem:[%s436_s12 + $0x171] sm:$0xff]  ;;  %v209_v21 = vmax.f32 %v193_v11, %v364_v62  ;;  %265 = vst.msk [vmem:[%s514_s16 + $0x8] sm:$0xff] %vm263_vm0, %v256_v7  ;;  %v257_v27 = vmax.f32 %v241_v17, %v470_v23 }
  0x24   : > { %v350_v9 = vld [vmem:[%s436_s12 + $0x180] sm:$0xff]  ;;  %v358_v19 = vld [vmem:[%s436_s12 + $0x210] sm:$0xff]  ;;  %v194_v24 = vmax.f32 %v177_v12, %v357_v8 }
  0x25   : > { %v351_v20 = vld [vmem:[%s436_s12 + $0x190] sm:$0xff]  ;;  %v178_v25 = vmax.f32 %v161_v15, %v350_v9  ;;  %v162_v26 = vmax.f32 %v146_v16, %v390_v10  ;;  %v242_v14 = vmax.f32 %v225_v13, %v484_v32  ;;  %v366_v28 = vld [vmem:[%s436_s12 + $0x181] sm:$0xff]  ;;  %v226_v29 = vmax.f32 %v209_v21, %v372_v41  ;;  %266 = vst.msk [vmem:[%s514_s16 + $0x10] sm:$0xff] %vm263_vm0, %v257_v27 }
  0x26   : > { %v359_v22 = vld [vmem:[%s436_s12 + $0x220] sm:$0xff]  ;;  %v210_v30 = vmax.f32 %v194_v24, %v365_v18  ;;  %v367_v35 = vld [vmem:[%s436_s12 + $0x191] sm:$0xff] }
  0x27   : > { %v195_v31 = vmax.f32 %v178_v25, %v358_v19  ;;  %v179_v33 = vmax.f32 %v162_v26, %v351_v20  ;;  %v258_v34 = vmax.f32 %v242_v14, %v489_v38  ;;  %v243_v36 = vmax.f32 %v226_v29, %v495_v42  ;;  %v375_v39 = vld [vmem:[%s436_s12 + $0x80] sm:$0xff]  ;;  %v383_v45 = vld [vmem:[%s436_s12 + $0x110] sm:$0xff] }
  0x28   : > { %v227_v23 = vmax.f32 %v210_v30, %v373_v52  ;;  %v391_v47 = vld [vmem:[%s436_s12 + $0x81] sm:$0xff] }
  0x29   : > { %v211_v37 = vmax.f32 %v195_v31, %v366_v28  ;;  %v196_v32 = vmax.f32 %v179_v33, %v359_v22  ;;  %267 = vst.msk [vmem:[%s514_s16 + $0x18] sm:$0xff] %vm263_vm0, %v258_v34  ;;  %v259_v40 = vmax.f32 %v243_v36, %v388_v48 }
  0x2a   : > { %v244_v41 = vmax.f32 %v227_v23, %v505_v53 }
  0x2b   : > { %v228_v43 = vmax.f32 %v211_v37, %v374_v1  ;;  %v212_v44 = vmax.f32 %v196_v32, %v367_v35  ;;  %268 = vst.msk [vmem:[%s514_s16 + $0x20] sm:$0xff] %vm263_vm0, %v259_v40 }
  0x2c   : > { %v260_v38 = vmax.f32 %v244_v41, %v389_v60 }
  0x2d   : > { %v245_v46 = vmax.f32 %v228_v43, %v382_v2  ;;  %v229_v42 = vmax.f32 %v212_v44, %v375_v39 }
  0x2e   : > { %269 = vst.msk [vmem:[%s514_s16 + $0x28] sm:$0xff] %vm263_vm0, %v260_v38 }
  0x2f   : > { %v261_v49 = vmax.f32 %v245_v46, %v390_v10  ;;  %v246_v50 = vmax.f32 %v229_v42, %v383_v45 }
  0x31   : > { %270 = vst.msk [vmem:[%s514_s16 + $0x30] sm:$0xff] %vm263_vm0, %v261_v49  ;;  %v262_v51 = vmax.f32 %v246_v50, %v391_v47 }
  0x33   : > { %271 = vst.msk [vmem:[%s514_s16 + $0x38] sm:$0xff] %vm263_vm0, %v262_v51 }
  0x34 PF: > { %s11_s6 = sadd.s32 1, %s410_s6  }
  0x35   : > { %p8_p5 = scmp.ge.s32.totalorder %s11_s6, 4  }
  0x37   :  { %10 = sbr.rel (!%p8_p5) target bundleno = 1 (0x1), region = 59 }

// kernel: module_d_forward.11
= control target key start
LH: loop header
LB: loop body
LE: loop exit
PB: predicated region body
PF: predicated region fallthrough
CT: control target
= control target key end

     0   :  { %s3329_s12 = smov 0   ;;  %s3331_s13 = smov 0   ;;  %s3835_s0 = inlined_call_operand.vmem [shape: bf16[2,22,16,8], index: 0, kind: input, shape index: {}]   ;;  %s3836_s1 = inlined_call_operand.vmem [shape: bf16[7,8,128], index: 1, kind: input, shape index: {}]   ;;  %s3837_s2 = inlined_call_operand.vmem [shape: f32[1,128], index: 2, kind: input, shape index: {}]   ;;  %s3838_s3 = inlined_call_operand.vmem [shape: f32[2,16,16,128], index: 3, kind: output, shape index: {}]  }
   0x1   :  { %s3333_s14 = smov 0  }
   0x2 LB: > { %s25_s15 = sadd.s32 1, %s3303_s13  ;;  %p2379_p0 = scmp.ge.s32.totalorder %s3307_s14, 1  ;;  %s3307_s14 = sphi %s3333_s14, %s13_s14   ;;  %s3303_s13 = sphi %s3331_s13, %s3840_s13   ;;  %s3299_s12 = sphi %s3329_s12, %s3839_s12  }
   0x3   : > { %p27_p1 = scmp.ge.s32.totalorder %s25_s15, 2  ;;  %p168_p2 = scmp.lt.s32.totalorder %s3307_s14, 3 }
   0x5   : > { %s3842_s15 = smov (%p27_p1, %s25_s15), 0  ;;  %p169_p3 = pnand %p2379_p0, %p168_p2 }
   0x6   : > { %p202_p4 = scmp.lt.s32.totalorder (!%p169_p3), %s3299_s12, 1 }
   0x7   : > { %172 = sbr.rel (%p169_p3) target bundleno = 605 (0x25d), region = 32 }
   0xc   : > { %v2415_v0 = vld [vmem:[%s3836_s1 + $0x4] sm:$0xf]  ;;  %vm420_vm0 = vcmask 1043456   ;;  %v255_v1 = vld [vmem:[%s3836_s1] sm:$0xf]  ;;  %s3844_s12 = smov (!%p202_p4, %s3299_s12), 1 }
   0xd   : > { %v422_v2 = vsel %vm420_vm0, %v2415_v0, 0  ;;  %v642_v3 = vsel %vm420_vm0, %v255_v1, 0  ;;  %v2608_v4 = vld [vmem:[%s3836_s1 + $0x8] sm:$0xf]  ;;  %v3060_v6 = vld [vmem:[%s3836_s1 + $0x18] sm:$0xf] }
   0xe   : > { %431 = vmatpush.bf16.msra.mxu0 %v422_v2  ;;  %3256 = vmatpush.bf16.msra.mxu3 %v422_v2  ;;  %v897_v5 = vsel %vm420_vm0, %v2608_v4, 0  ;;  %v2834_v7 = vld [vmem:[%s3836_s1 + $0x10] sm:$0xf]  ;;  %v2045_v8 = vsel %vm420_vm0, %v3060_v6, 0  ;;  %v2947_v10 = vld [vmem:[%s3836_s1 + $0x14] sm:$0xf] }
   0xf   : > { %651 = vmatpush.bf16.msra.mxu1 %v642_v3  ;;  %906 = vmatpush.bf16.msra.mxu2 %v897_v5  ;;  %v1471_v9 = vsel %vm420_vm0, %v2834_v7, 0  ;;  %s3259_s28 = smul.u32 176, %s3844_s12  ;;  %v1758_v11 = vsel %vm420_vm0, %v2947_v10, 0  ;;  %vm371_vm1 = vcmask 64512   ;;  %v2721_v40 = vld [vmem:[%s3836_s1 + $0xc] sm:$0xf] }
  0x10   : > { %v1184_v41 = vsel %vm420_vm0, %v2721_v40, 0  ;;  %s3143_s9 = sshll.u32 %s3844_s12, 8 }
  0x11   : > { %s3377_s4 = scalar_lea.vmem %s3835_s0, %s3259_s28  ;;  %s3677_s16 = scalar_lea.vmem %s3838_s3, %s3143_s9 }
  0x12   : > { %3257 = vmatpush.bf16.msrb.mxu3 %v642_v3  ;;  %1480 = vmatpush.bf16.msrb.mxu0 %v1471_v9  ;;  %v3160_v12 = vld [vmem:[%s3377_s4 + $0x8] sm:$0xff]  ;;  %v3144_v14 = vld [vmem:[%s3377_s4] sm:$0xff]  ;;  %v3176_v15 = vld [vmem:[%s3377_s4 + $0x10] sm:$0xff] }
  0x13   : > { %2054 = vmatpush.bf16.msrb.mxu2 %v2045_v8  ;;  %1767 = vmatpush.bf16.msrb.mxu1 %v1758_v11  ;;  %v3172_v13 = vld [vmem:[%s3377_s4 + $0x68] sm:$0xff]  ;;  %v3161_v16 = vld [vmem:[%s3377_s4 + $0x10] sm:$0xff]  ;;  %v3177_v19 = vld [vmem:[%s3377_s4 + $0x18] sm:$0xff] }
  0x14   : > { %2480 = vmatmul.msk.bf16.vlgmr.msra.gmra.mxu0 %vm371_vm1, %v3160_v12  ;;  %2492 = vmatmul.msk.bf16.vlgmr.msra.gmra.mxu3 %vm371_vm1, %v3172_v13  ;;  %v3173_v17 = vld [vmem:[%s3377_s4 + $0x70] sm:$0xff]  ;;  %v3145_v18 = vld [vmem:[%s3377_s4 + $0x8] sm:$0xff]  ;;  %v3162_v20 = vld [vmem:[%s3377_s4 + $0x18] sm:$0xff] }
  0x15   : > { %2560 = vmatmul.msk.bf16.vlgmr.msra.gmra.mxu1 %vm371_vm1, %v3144_v14  ;;  %2673 = vmatmul.msk.bf16.vlgmr.msra.gmra.mxu2 %vm371_vm1, %v3176_v15  ;;  %v3174_v21 = vld [vmem:[%s3377_s4 + $0x78] sm:$0xff]  ;;  %v3146_v22 = vld [vmem:[%s3377_s4 + $0x10] sm:$0xff]  ;;  %v3178_v23 = vld [vmem:[%s3377_s4 + $0x20] sm:$0xff] }
  0x16   : > { %3258 = vmatpush.bf16.msra.mxu3 %v897_v5  ;;  %v3163_v24 = vld [vmem:[%s3377_s4 + $0x20] sm:$0xff]  ;;  %v3147_v26 = vld [vmem:[%s3377_s4 + $0x18] sm:$0xff]  ;;  %v3179_v27 = vld [vmem:[%s3377_s4 + $0x28] sm:$0xff] }
  0x17   : > { %v3175_v25 = vld [vmem:[%s3377_s4 + $0x80] sm:$0xff]  ;;  %v3164_v28 = vld [vmem:[%s3377_s4 + $0x28] sm:$0xff]  ;;  %v3180_v31 = vld [vmem:[%s3377_s4 + $0x30] sm:$0xff] }
  0x18   : > { %v3156_v29 = vld [vmem:[%s3377_s4 + $0x60] sm:$0xff]  ;;  %v3165_v32 = vld [vmem:[%s3377_s4 + $0x30] sm:$0xff]  ;;  %v3157_v33 = vld [vmem:[%s3377_s4 + $0x68] sm:$0xff] }
  0x19   : > { %v3148_v30 = vld [vmem:[%s3377_s4 + $0x20] sm:$0xff]  ;;  %v3149_v34 = vld [vmem:[%s3377_s4 + $0x28] sm:$0xff]  ;;  %v3181_v35 = vld [vmem:[%s3377_s4 + $0x38] sm:$0xff] }
  0x1a   : > { %v3166_v36 = vld [vmem:[%s3377_s4 + $0x38] sm:$0xff]  ;;  %v3158_v37 = vld [vmem:[%s3377_s4 + $0x70] sm:$0xff]  ;;  %v3182_v39 = vld [vmem:[%s3377_s4 + $0x40] sm:$0xff] }
  0x1b   : > { %v3150_v38 = vld [vmem:[%s3377_s4 + $0x30] sm:$0xff]  ;;  %v3167_v42 = vld [vmem:[%s3377_s4 + $0x40] sm:$0xff]  ;;  %v3159_v43 = vld [vmem:[%s3377_s4 + $0x78] sm:$0xff] }
  0x1c   : > { %v3151_v44 = vld [vmem:[%s3377_s4 + $0x38] sm:$0xff]  ;;  %v3183_v45 = vld [vmem:[%s3377_s4 + $0x48] sm:$0xff]  ;;  %v3188_v47 = vld [vmem:[%s3377_s4 + $0x70] sm:$0xff] }
  0x1d   : > { %v3168_v46 = vld [vmem:[%s3377_s4 + $0x48] sm:$0xff]  ;;  %v3152_v49 = vld [vmem:[%s3377_s4 + $0x40] sm:$0xff]  ;;  %v3184_v50 = vld [vmem:[%s3377_s4 + $0x50] sm:$0xff] }
  0x1e   : > { %v3169_v61 = vld [vmem:[%s3377_s4 + $0x50] sm:$0xff]  ;;  %v3189_v62 = vld [vmem:[%s3377_s4 + $0x78] sm:$0xff]  ;;  %v3153_v1 = vld [vmem:[%s3377_s4 + $0x48] sm:$0xff] }
  0x1f   : > { %v3185_v2 = vld [vmem:[%s3377_s4 + $0x58] sm:$0xff]  ;;  %v3190_v14 = vld [vmem:[%s3377_s4 + $0x80] sm:$0xff] }
  0x20   : > { %v3170_v13 = vld [vmem:[%s3377_s4 + $0x58] sm:$0xff] }
  0x24   : > { %2481 = vmatmul.msk.bf16.gmra.mxu0 %vm371_vm1, %v3161_v16  ;;  %2493 = vmatmul.msk.bf16.gmra.mxu3 %vm371_vm1, %v3173_v17  ;;  %v3154_v17 = vld [vmem:[%s3377_s4 + $0x50] sm:$0xff] }
  0x25   : > { %2561 = vmatmul.msk.bf16.gmra.mxu1 %vm371_vm1, %v3145_v18  ;;  %2674 = vmatmul.msk.bf16.gmra.mxu2 %vm371_vm1, %v3177_v19  ;;  %v3186_v18 = vld [vmem:[%s3377_s4 + $0x60] sm:$0xff] }
  0x34   : > { %2482 = vmatmul.msk.bf16.gmra.mxu0 %vm371_vm1, %v3162_v20  ;;  %2494 = vmatmul.msk.bf16.gmra.mxu3 %vm371_vm1, %v3174_v21 }
  0x35   : > { %2562 = vmatmul.msk.bf16.gmra.mxu1 %vm371_vm1, %v3146_v22  ;;  %2675 = vmatmul.msk.bf16.gmra.mxu2 %vm371_vm1, %v3178_v23 }
  0x44   : > { %2483 = vmatmul.msk.bf16.gmra.mxu0 %vm371_vm1, %v3163_v24  ;;  %2495 = vmatmul.msk.bf16.gmra.mxu3 %vm371_vm1, %v3175_v25 }
  0x45   : > { %2563 = vmatmul.msk.bf16.gmra.mxu1 %vm371_vm1, %v3147_v26  ;;  %2676 = vmatmul.msk.bf16.gmra.mxu2 %vm371_vm1, %v3179_v27 }
  0x54   : > { %2484 = vmatmul.msk.bf16.gmra.mxu0 %vm371_vm1, %v3164_v28  ;;  %2572 = vmatmul.msk.bf16.vlgmr.msrb.gmra.mxu3 %vm371_vm1, %v3156_v29  ;;  %v3171_v29 = vld [vmem:[%s3377_s4 + $0x60] sm:$0xff] }
  0x55   : > { %2564 = vmatmul.msk.bf16.gmra.mxu1 %vm371_vm1, %v3148_v30  ;;  %2677 = vmatmul.msk.bf16.gmra.mxu2 %vm371_vm1, %v3180_v31  ;;  %v3191_v30 = vld [vmem:[%s3377_s4 + $0x88] sm:$0xff] }
  0x56   : > { %1193 = vmatpush.bf16.msrb.mxu3 %v1184_v41 }
  0x64   : > { %2485 = vmatmul.msk.bf16.gmra.mxu0 %vm371_vm1, %v3165_v32  ;;  %2573 = vmatmul.msk.bf16.gmra.mxu3 %vm371_vm1, %v3157_v33  ;;  %v3155_v33 = vld [vmem:[%s3377_s4 + $0x58] sm:$0xff] }
  0x65   : > { %2565 = vmatmul.msk.bf16.gmra.mxu1 %vm371_vm1, %v3149_v34  ;;  %2678 = vmatmul.msk.bf16.gmra.mxu2 %vm371_vm1, %v3181_v35  ;;  %v3187_v34 = vld [vmem:[%s3377_s4 + $0x68] sm:$0xff] }
  0x74   : > { %2486 = vmatmul.msk.bf16.gmra.mxu0 %vm371_vm1, %v3166_v36  ;;  %2574 = vmatmul.msk.bf16.gmra.mxu3 %vm371_vm1, %v3158_v37 }
  0x75   : > { %2566 = vmatmul.msk.bf16.gmra.mxu1 %vm371_vm1, %v3150_v38  ;;  %2679 = vmatmul.msk.bf16.gmra.mxu2 %vm371_vm1, %v3182_v39 }
  0x84   : > { %2487 = vmatmul.msk.bf16.gmra.mxu0 %vm371_vm1, %v3167_v42  ;;  %2575 = vmatmul.msk.bf16.gmra.mxu3 %vm371_vm1, %v3159_v43 }
  0x85   : > { %2567 = vmatmul.msk.bf16.gmra.mxu1 %vm371_vm1, %v3151_v44  ;;  %2680 = vmatmul.msk.bf16.gmra.mxu2 %vm371_vm1, %v3183_v45  ;;  %v3192_v45 = vld [vmem:[%s3377_s4 + $0x18] sm:$0xff] }
  0x91   : > { %v433_v48 = vpop.f32.mrf.mxu0 }
  0x92   : > { %v653_v51 = vpop.f32.mrf.mxu1 }
  0x93   : > { %v654_v52 = vadd.f32 %v653_v51, %v433_v48 }
  0x94   : > { %2488 = vmatmul.msk.bf16.gmra.mxu0 %vm371_vm1, %v3168_v46  ;;  %2685 = vmatmul.msk.bf16.vlgmr.msra.gmra.mxu3 %vm371_vm1, %v3188_v47  ;;  %v3208_v46 = vld [vmem:[%s3377_s4 + $0x20] sm:$0xff] }
  0x95   : > { %2568 = vmatmul.msk.bf16.gmra.mxu1 %vm371_vm1, %v3152_v49  ;;  %2681 = vmatmul.msk.bf16.gmra.mxu2 %vm371_vm1, %v3184_v50  ;;  %v3240_v49 = vld [vmem:[%s3377_s4 + $0x30] sm:$0xff]  ;;  %v3224_v50 = vld [vmem:[%s3377_s4 + $0x28] sm:$0xff] }
  0x97   : > { %v3455_v53 = vpop.f32.mrf.mxu3 }
  0x98   : > { %v908_v54 = vpop.f32.mrf.mxu2 }
  0x99   : > { %v3457_v55 = vadd.f32 %v908_v54, %v654_v52  ;;  %v435_v56 = vpop.f32.mrf.mxu0 }
  0x9a   : > { %v655_v57 = vpop.f32.mrf.mxu1 }
  0x9b   : > { %v656_v58 = vadd.f32 %v655_v57, %v435_v56 }
  0x9f   : > { %v3459_v59 = vpop.f32.mrf.mxu3 }
  0xa0   : > { %v910_v60 = vpop.f32.mrf.mxu2 }
  0xa1   : > { %v3463_v63 = vadd.f32 %v910_v60, %v656_v58  ;;  %v438_v0 = vpop.f32.mrf.mxu0 }
  0xa2   : > { %v658_v3 = vpop.f32.mrf.mxu1 }
  0xa3   : > { %v659_v4 = vadd.f32 %v658_v3, %v438_v0  ;;  %v3193_v3 = vld [vmem:[%s3377_s4 + $0x20] sm:$0xff] }
  0xa4   : > { %2489 = vmatmul.msk.bf16.gmra.mxu0 %vm371_vm1, %v3169_v61  ;;  %2686 = vmatmul.msk.bf16.gmra.mxu3 %vm371_vm1, %v3189_v62 }
  0xa5   : > { %2569 = vmatmul.msk.bf16.gmra.mxu1 %vm371_vm1, %v3153_v1  ;;  %2682 = vmatmul.msk.bf16.gmra.mxu2 %vm371_vm1, %v3185_v2 }
  0xa7   : > { %v3471_v5 = vpop.f32.mrf.mxu3 }
  0xa8   : > { %v913_v6 = vpop.f32.mrf.mxu2 }
  0xa9   : > { %v3473_v7 = vadd.f32 %v913_v6, %v659_v4  ;;  %v440_v8 = vpop.f32.mrf.mxu0  ;;  %v3209_v4 = vld [vmem:[%s3377_s4 + $0x28] sm:$0xff] }
  0xaa   : > { %v660_v9 = vpop.f32.mrf.mxu1 }
  0xab   : > { %v661_v10 = vadd.f32 %v660_v9, %v440_v8  ;;  %v3241_v9 = vld [vmem:[%s3377_s4 + $0x38] sm:$0xff] }
  0xaf   : > { %v3475_v11 = vpop.f32.mrf.mxu3 }
  0xb0   : > { %v915_v12 = vpop.f32.mrf.mxu2 }
  0xb1   : > { %v3479_v15 = vadd.f32 %v915_v12, %v661_v10  ;;  %v443_v16 = vpop.f32.mrf.mxu0  ;;  %v3225_v10 = vld [vmem:[%s3377_s4 + $0x30] sm:$0xff] }
  0xb2   : > { %v663_v19 = vpop.f32.mrf.mxu1 }
  0xb3   : > { %v664_v20 = vadd.f32 %v663_v19, %v443_v16 }
  0xb4   : > { %2490 = vmatmul.msk.bf16.gmra.mxu0 %vm371_vm1, %v3170_v13  ;;  %2687 = vmatmul.msk.bf16.gmra.mxu3 %vm371_vm1, %v3190_v14 }
  0xb5   : > { %2570 = vmatmul.msk.bf16.gmra.mxu1 %vm371_vm1, %v3154_v17  ;;  %2683 = vmatmul.msk.bf16.gmra.mxu2 %vm371_vm1, %v3186_v18 }
  0xb7   : > { %v3487_v21 = vpop.f32.mrf.mxu3 }
  0xb8   : > { %v918_v22 = vpop.f32.mrf.mxu2 }
  0xb9   : > { %v3489_v23 = vadd.f32 %v918_v22, %v664_v20  ;;  %v445_v24 = vpop.f32.mrf.mxu0 }
  0xba   : > { %v665_v25 = vpop.f32.mrf.mxu1 }
  0xbb   : > { %v666_v26 = vadd.f32 %v665_v25, %v445_v24  ;;  %v3194_v25 = vld [vmem:[%s3377_s4 + $0x28] sm:$0xff] }
  0xbf   : > { %v3491_v27 = vpop.f32.mrf.mxu3 }
  0xc0   : > { %v920_v28 = vpop.f32.mrf.mxu2 }
  0xc1   : > { %v3495_v31 = vadd.f32 %v920_v28, %v666_v26  ;;  %v448_v32 = vpop.f32.mrf.mxu0  ;;  %v3210_v26 = vld [vmem:[%s3377_s4 + $0x30] sm:$0xff] }
  0xc2   : > { %v668_v35 = vpop.f32.mrf.mxu1 }
  0xc3   : > { %v669_v36 = vadd.f32 %v668_v35, %v448_v32  ;;  %v3226_v32 = vld [vmem:[%s3377_s4 + $0x38] sm:$0xff] }
  0xc4   : > { %2491 = vmatmul.msk.bf16.gmra.mxu0 %vm371_vm1, %v3171_v29  ;;  %2688 = vmatmul.msk.bf16.gmra.mxu3 %vm371_vm1, %v3191_v30  ;;  %v3242_v30 = vld [vmem:[%s3377_s4 + $0x40] sm:$0xff] }
  0xc5   : > { %2571 = vmatmul.msk.bf16.gmra.mxu1 %vm371_vm1, %v3155_v33  ;;  %2684 = vmatmul.msk.bf16.gmra.mxu2 %vm371_vm1, %v3187_v34 }
  0xc7   : > { %v3503_v37 = vpop.f32.mrf.mxu3 }
  0xc8   : > { %v923_v38 = vpop.f32.mrf.mxu2 }
  0xc9   : > { %v3505_v39 = vadd.f32 %v923_v38, %v669_v36  ;;  %v450_v40 = vpop.f32.mrf.mxu0 }
  0xca   : > { %v670_v41 = vpop.f32.mrf.mxu1 }
  0xcb   : > { %v671_v42 = vadd.f32 %v670_v41, %v450_v40 }
  0xcf   : > { %v3507_v43 = vpop.f32.mrf.mxu3 }
  0xd0   : > { %v925_v44 = vpop.f32.mrf.mxu2 }
  0xd1   : > { %v3511_v47 = vadd.f32 %v925_v44, %v671_v42  ;;  %v453_v48 = vpop.f32.mrf.mxu0 }
  0xd2   : > { %v673_v51 = vpop.f32.mrf.mxu1 }
  0xd3   : > { %v674_v52 = vadd.f32 %v673_v51, %v453_v48  ;;  %v3211_v48 = vld [vmem:[%s3377_s4 + $0x38] sm:$0xff]  ;;  %v3243_v51 = vld [vmem:[%s3377_s4 + $0x48] sm:$0xff] }
  0xd4   : > { %2786 = vmatmul.msk.bf16.vlgmr.msrb.gmra.mxu3 %vm371_vm1, %v3192_v45  ;;  %2899 = vmatmul.msk.bf16.vlgmr.msrb.gmra.mxu0 %vm371_vm1, %v3208_v46  ;;  %v3195_v46 = vld [vmem:[%s3377_s4 + $0x30] sm:$0xff] }
  0xd5   : > { %3125 = vmatmul.msk.bf16.vlgmr.msrb.gmra.mxu2 %vm371_vm1, %v3240_v49  ;;  %3012 = vmatmul.msk.bf16.vlgmr.msrb.gmra.mxu1 %vm371_vm1, %v3224_v50 }
  0xd7   : > { %v713_v54 = vpop.f32.mrf.mxu3 }
  0xd8   : > { %v3520_v56 = vadd.f32 %v713_v54, %v3455_v53  ;;  %v928_v57 = vpop.f32.mrf.mxu2 }
  0xd9   : > { %v3522_v58 = vadd.f32 %v928_v57, %v674_v52  ;;  %v455_v60 = vpop.f32.mrf.mxu0  ;;  %v3227_v52 = vld [vmem:[%s3377_s4 + $0x40] sm:$0xff] }
  0xda   : > { %v675_v61 = vpop.f32.mrf.mxu1 }
  0xdb   : > { %v676_v62 = vadd.f32 %v675_v61, %v455_v60 }
  0xdf   : > { %v715_v0 = vpop.f32.mrf.mxu3 }
  0xe0   : > { %v3525_v1 = vadd.f32 %v715_v0, %v3459_v59  ;;  %v930_v2 = vpop.f32.mrf.mxu2 }
  0xe1   : > { %v3529_v6 = vadd.f32 %v930_v2, %v676_v62  ;;  %v458_v8 = vpop.f32.mrf.mxu0 }
  0xe2   : > { %v678_v53 = vpop.f32.mrf.mxu1 }
  0xe3   : > { %v679_v12 = vadd.f32 %v678_v53, %v458_v8 }
  0xe4   : > { %2787 = vmatmul.msk.bf16.gmra.mxu3 %vm371_vm1, %v3193_v3  ;;  %2900 = vmatmul.msk.bf16.gmra.mxu0 %vm371_vm1, %v3209_v4 }
  0xe5   : > { %3126 = vmatmul.msk.bf16.gmra.mxu2 %vm371_vm1, %v3241_v9  ;;  %3013 = vmatmul.msk.bf16.gmra.mxu1 %vm371_vm1, %v3225_v10  ;;  %v3196_v9 = vld [vmem:[%s3377_s4 + $0x38] sm:$0xff]  ;;  %v3212_v10 = vld [vmem:[%s3377_s4 + $0x40] sm:$0xff] }
  0xe7   : > { %v718_v59 = vpop.f32.mrf.mxu3 }
  0xe8   : > { %v3538_v13 = vadd.f32 %v718_v59, %v3471_v5  ;;  %v933_v14 = vpop.f32.mrf.mxu2  ;;  %v3244_v59 = vld [vmem:[%s3377_s4 + $0x50] sm:$0xff] }
  0xe9   : > { %v3540_v16 = vadd.f32 %v933_v14, %v679_v12  ;;  %v460_v17 = vpop.f32.mrf.mxu0  ;;  %v3228_v14 = vld [vmem:[%s3377_s4 + $0x48] sm:$0xff] }
  0xea   : > { %v680_v18 = vpop.f32.mrf.mxu1 }
  0xeb   : > { %v681_v19 = vadd.f32 %v680_v18, %v460_v17 }
  0xef   : > { %v720_v20 = vpop.f32.mrf.mxu3 }
  0xf0   : > { %v3543_v22 = vadd.f32 %v720_v20, %v3475_v11  ;;  %v935_v24 = vpop.f32.mrf.mxu2 }
  0xf1   : > { %v3547_v28 = vadd.f32 %v935_v24, %v681_v19  ;;  %v463_v29 = vpop.f32.mrf.mxu0 }
  0xf2   : > { %v683_v5 = vpop.f32.mrf.mxu1 }
  0xf3   : > { %v684_v33 = vadd.f32 %v683_v5, %v463_v29  ;;  %v3197_v5 = vld [vmem:[%s3377_s4 + $0x40] sm:$0xff] }
  0xf4   : > { %2788 = vmatmul.msk.bf16.gmra.mxu3 %vm371_vm1, %v3194_v25  ;;  %2901 = vmatmul.msk.bf16.gmra.mxu0 %vm371_vm1, %v3210_v26 }
  0xf5   : > { %3127 = vmatmul.msk.bf16.gmra.mxu2 %vm371_vm1, %v3242_v30  ;;  %3014 = vmatmul.msk.bf16.gmra.mxu1 %vm371_vm1, %v3226_v32 }
  0xf7   : > { %v723_v11 = vpop.f32.mrf.mxu3 }
  0xf8   : > { %v3556_v34 = vadd.f32 %v723_v11, %v3487_v21  ;;  %v938_v35 = vpop.f32.mrf.mxu2 }
  0xf9   : > { %v3558_v36 = vadd.f32 %v938_v35, %v684_v33  ;;  %v465_v38 = vpop.f32.mrf.mxu0  ;;  %v3213_v33 = vld [vmem:[%s3377_s4 + $0x48] sm:$0xff] }
  0xfa   : > { %v685_v40 = vpop.f32.mrf.mxu1 }
  0xfb   : > { %v686_v41 = vadd.f32 %v685_v40, %v465_v38  ;;  %v3245_v38 = vld [vmem:[%s3377_s4 + $0x58] sm:$0xff]  ;;  %v3229_v40 = vld [vmem:[%s3377_s4 + $0x50] sm:$0xff] }
  0xff   : > { %v725_v42 = vpop.f32.mrf.mxu3 }
 0x100   : > { %v3561_v44 = vadd.f32 %v725_v42, %v3491_v27  ;;  %v940_v45 = vpop.f32.mrf.mxu2 }
 0x101   : > { %v3565_v49 = vadd.f32 %v940_v45, %v686_v41  ;;  %v468_v50 = vpop.f32.mrf.mxu0 }
 0x102   : > { %v688_v21 = vpop.f32.mrf.mxu1 }
 0x103   : > { %v689_v54 = vadd.f32 %v688_v21, %v468_v50 }
 0x104   : > { %2789 = vmatmul.msk.bf16.gmra.mxu3 %vm371_vm1, %v3195_v46  ;;  %2902 = vmatmul.msk.bf16.gmra.mxu0 %vm371_vm1, %v3211_v48 }
 0x105   : > { %3128 = vmatmul.msk.bf16.gmra.mxu2 %vm371_vm1, %v3243_v51  ;;  %3015 = vmatmul.msk.bf16.gmra.mxu1 %vm371_vm1, %v3227_v52 }
 0x107   : > { %v728_v27 = vpop.f32.mrf.mxu3 }
 0x108   : > { %v3574_v57 = vadd.f32 %v728_v27, %v3503_v37  ;;  %v943_v60 = vpop.f32.mrf.mxu2  ;;  %v3198_v27 = vld [vmem:[%s3377_s4 + $0x48] sm:$0xff] }
 0x109   : > { %v3576_v61 = vadd.f32 %v943_v60, %v689_v54  ;;  %v470_v62 = vpop.f32.mrf.mxu0  ;;  %v3214_v60 = vld [vmem:[%s3377_s4 + $0x50] sm:$0xff] }
 0x10a   : > { %v690_v0 = vpop.f32.mrf.mxu1 }
 0x10b   : > { %v691_v2 = vadd.f32 %v690_v0, %v470_v62 }
 0x10f   : > { %v730_v3 = vpop.f32.mrf.mxu3 }
 0x110   : > { %v3579_v4 = vadd.f32 %v730_v3, %v3507_v43  ;;  %v945_v8 = vpop.f32.mrf.mxu2  ;;  %v3230_v3 = vld [vmem:[%s3377_s4 + $0x58] sm:$0xff] }
 0x111   : > { %v3583_v53 = vadd.f32 %v945_v8, %v691_v2  ;;  %v473_v12 = vpop.f32.mrf.mxu0  ;;  %v3246_v2 = vld [vmem:[%s3377_s4 + $0x60] sm:$0xff] }
 0x112   : > { %v693_v37 = vpop.f32.mrf.mxu1 }
 0x113   : > { %v694_v17 = vadd.f32 %v693_v37, %v473_v12 }
 0x114   : > { %2790 = vmatmul.msk.bf16.gmra.mxu3 %vm371_vm1, %v3196_v9  ;;  %2903 = vmatmul.msk.bf16.gmra.mxu0 %vm371_vm1, %v3212_v10 }
 0x115   : > { %3129 = vmatmul.msk.bf16.gmra.mxu2 %vm371_vm1, %v3244_v59  ;;  %3016 = vmatmul.msk.bf16.gmra.mxu1 %vm371_vm1, %v3228_v14 }
 0x117   : > { %v968_v43 = vpop.f32.mrf.mxu3 }
 0x118   : > { %v948_v18 = vpop.f32.mrf.mxu2  ;;  %v3592_v19 = vadd.f32 %v968_v43, %v3520_v56 }
 0x119   : > { %v3594_v20 = vadd.f32 %v948_v18, %v694_v17  ;;  %v475_v24 = vpop.f32.mrf.mxu0 }
 0x11a   : > { %v695_v25 = vpop.f32.mrf.mxu1 }
 0x11b   : > { %v696_v26 = vadd.f32 %v695_v25, %v475_v24  ;;  %v3199_v24 = vld [vmem:[%s3377_s4 + $0x50] sm:$0xff]  ;;  %v3215_v25 = vld [vmem:[%s3377_s4 + $0x58] sm:$0xff] }
 0x11f   : > { %v970_v29 = vpop.f32.mrf.mxu3 }
 0x120   : > { %v950_v30 = vpop.f32.mrf.mxu2  ;;  %v3597_v32 = vadd.f32 %v970_v29, %v3525_v1 }
 0x121   : > { %v3601_v11 = vadd.f32 %v950_v30, %v696_v26  ;;  %v478_v35 = vpop.f32.mrf.mxu0  ;;  %v3247_v30 = vld [vmem:[%s3377_s4 + $0x68] sm:$0xff] }
 0x122   : > { %v698_v41 = vpop.f32.mrf.mxu1 }
 0x123   : > { %v699_v56 = vadd.f32 %v698_v41, %v478_v35 }
 0x124   : > { %2791 = vmatmul.msk.bf16.gmra.mxu3 %vm371_vm1, %v3197_v5  ;;  %2904 = vmatmul.msk.bf16.gmra.mxu0 %vm371_vm1, %v3213_v33  ;;  %v3231_v5 = vld [vmem:[%s3377_s4 + $0x60] sm:$0xff] }
 0x125   : > { %3130 = vmatmul.msk.bf16.gmra.mxu2 %vm371_vm1, %v3245_v38  ;;  %3017 = vmatmul.msk.bf16.gmra.mxu1 %vm371_vm1, %v3229_v40 }
 0x127   : > { %v973_v1 = vpop.f32.mrf.mxu3 }
 0x128   : > { %v953_v42 = vpop.f32.mrf.mxu2  ;;  %v3610_v45 = vadd.f32 %v973_v1, %v3538_v13 }
 0x129   : > { %v3612_v46 = vadd.f32 %v953_v42, %v699_v56  ;;  %v480_v48 = vpop.f32.mrf.mxu0 }
 0x12a   : > { %v700_v50 = vpop.f32.mrf.mxu1 }
 0x12b   : > { %v701_v51 = vadd.f32 %v700_v50, %v480_v48 }
 0x12f   : > { %v975_v52 = vpop.f32.mrf.mxu3 }
 0x130   : > { %v955_v21 = vpop.f32.mrf.mxu2  ;;  %v3615_v54 = vadd.f32 %v975_v52, %v3543_v22  ;;  %v3216_v52 = vld [vmem:[%s3377_s4 + $0x60] sm:$0xff] }
 0x131   : > { %v3619_v62 = vadd.f32 %v955_v21, %v701_v51  ;;  %v483_v0 = vpop.f32.mrf.mxu0  ;;  %v3200_v51 = vld [vmem:[%s3377_s4 + $0x58] sm:$0xff] }
 0x132   : > { %v703_v8 = vpop.f32.mrf.mxu1 }
 0x133   : > { %v704_v13 = vadd.f32 %v703_v8, %v483_v0  ;;  %v3232_v0 = vld [vmem:[%s3377_s4 + $0x68] sm:$0xff] }
 0x134   : > { %2792 = vmatmul.msk.bf16.gmra.mxu3 %vm371_vm1, %v3198_v27  ;;  %2905 = vmatmul.msk.bf16.gmra.mxu0 %vm371_vm1, %v3214_v60  ;;  %v3248_v60 = vld [vmem:[%s3377_s4 + $0x70] sm:$0xff] }
 0x135   : > { %3131 = vmatmul.msk.bf16.gmra.mxu2 %vm371_vm1, %v3246_v2  ;;  %3018 = vmatmul.msk.bf16.gmra.mxu1 %vm371_vm1, %v3230_v3 }
 0x137   : > { %v978_v22 = vpop.f32.mrf.mxu3 }
 0x138   : > { %v958_v9 = vpop.f32.mrf.mxu2  ;;  %v3628_v10 = vadd.f32 %v978_v22, %v3556_v34 }
 0x139   : > { %v3630_v12 = vadd.f32 %v958_v9, %v704_v13  ;;  %v485_v59 = vpop.f32.mrf.mxu0 }
 0x13a   : > { %v705_v14 = vpop.f32.mrf.mxu1 }
 0x13b   : > { %v706_v37 = vadd.f32 %v705_v14, %v485_v59  ;;  %v3667_v59 = vld [vmem:[%s3837_s2] ss:$0 sm:$0xff] }
 0x13f   : > { %v980_v17 = vpop.f32.mrf.mxu3 }
 0x140   : > { %v960_v43 = vpop.f32.mrf.mxu2  ;;  %v3633_v18 = vadd.f32 %v980_v17, %v3561_v44 }
 0x141   : > { %v3637_v26 = vadd.f32 %v960_v43, %v706_v37  ;;  %v488_v29 = vpop.f32.mrf.mxu0 }
 0x142   : > { %v708_v33 = vpop.f32.mrf.mxu1 }
 0x143   : > { %v709_v34 = vadd.f32 %v708_v33, %v488_v29 }
 0x144   : > { %2793 = vmatmul.msk.bf16.gmra.mxu3 %vm371_vm1, %v3199_v24  ;;  %2906 = vmatmul.msk.bf16.gmra.mxu0 %vm371_vm1, %v3215_v25  ;;  %v3201_v24 = vld [vmem:[%s3377_s4 + $0x60] sm:$0xff]  ;;  %v3217_v25 = vld [vmem:[%s3377_s4 + $0x68] sm:$0xff] }
 0x145   : > { %3132 = vmatmul.msk.bf16.gmra.mxu2 %vm371_vm1, %v3247_v30  ;;  %3019 = vmatmul.msk.bf16.gmra.mxu1 %vm371_vm1, %v3231_v5  ;;  %v3249_v30 = vld [vmem:[%s3377_s4 + $0x78] sm:$0xff]  ;;  %v3233_v5 = vld [vmem:[%s3377_s4 + $0x70] sm:$0xff] }
 0x147   : > { %v983_v44 = vpop.f32.mrf.mxu3 }
 0x148   : > { %v963_v35 = vpop.f32.mrf.mxu2  ;;  %v3646_v38 = vadd.f32 %v983_v44, %v3574_v57 }
 0x149   : > { %v3648_v40 = vadd.f32 %v963_v35, %v709_v34  ;;  %v490_v41 = vpop.f32.mrf.mxu0 }
 0x14a   : > { %v710_v56 = vpop.f32.mrf.mxu1 }
 0x14b   : > { %v711_v1 = vadd.f32 %v710_v56, %v490_v41 }
 0x14f   : > { %v985_v42 = vpop.f32.mrf.mxu3 }
 0x150   : > { %v965_v48 = vpop.f32.mrf.mxu2  ;;  %v3651_v50 = vadd.f32 %v985_v42, %v3579_v4 }
 0x151   : > { %v3655_v21 = vadd.f32 %v965_v48, %v711_v1  ;;  %v1482_v27 = vpop.f32.mrf.mxu0 }
 0x152   : > { %v1769_v57 = vpop.f32.mrf.mxu1 }
 0x154   : > { %2794 = vmatmul.msk.bf16.gmra.mxu3 %vm371_vm1, %v3200_v51  ;;  %2907 = vmatmul.msk.bf16.gmra.mxu0 %vm371_vm1, %v3216_v52 }
 0x155   : > { %3133 = vmatmul.msk.bf16.gmra.mxu2 %vm371_vm1, %v3248_v60  ;;  %3020 = vmatmul.msk.bf16.gmra.mxu1 %vm371_vm1, %v3232_v0 }
 0x157   : > { %v1195_v4 = vpop.f32.mrf.mxu3 }
 0x158   : > { %v1275_v2 = vadd.f32 %v1195_v4, %v3457_v55  ;;  %v2056_v3 = vpop.f32.mrf.mxu2 }
 0x159   : > { %v1484_v8 = vpop.f32.mrf.mxu0 }
 0x15a   : > { %v1562_v13 = vadd.f32 %v1482_v27, %v1275_v2  ;;  %v1771_v22 = vpop.f32.mrf.mxu1 }
 0x15c   : > { %v1849_v9 = vadd.f32 %v1769_v57, %v1562_v13  ;;  %v3218_v13 = vld [vmem:[%s3377_s4 + $0x70] sm:$0xff] }
 0x15e   : > { %v2136_v14 = vadd.f32 %v2056_v3, %v1849_v9  ;;  %v3234_v9 = vld [vmem:[%s3377_s4 + $0x78] sm:$0xff] }
 0x15f   : > { %v1197_v37 = vpop.f32.mrf.mxu3 }
 0x160   : > { %v2172_v17 = vadd.f32 %v3667_v59, %v2136_v14  ;;  %v1276_v43 = vadd.f32 %v1197_v37, %v3463_v63  ;;  %v2058_v55 = vpop.f32.mrf.mxu2 }
 0x161   : > { %v1487_v29 = vpop.f32.mrf.mxu0 }
 0x162   : > { %v2204_v33 = vmax.f32 %v2172_v17, 0.0  ;;  %v1563_v34 = vadd.f32 %v1484_v8, %v1276_v43  ;;  %v1774_v44 = vpop.f32.mrf.mxu1  ;;  %v3202_v8 = vld [vmem:[%s3377_s4 + $0x68] sm:$0xff] }
 0x164   : > { %2236 = vst [vmem:[%s3677_s16] sm:$0xff] %v2204_v33  ;;  %v1850_v35 = vadd.f32 %v1771_v22, %v1563_v34  ;;  %2795 = vmatmul.msk.bf16.gmra.mxu3 %vm371_vm1, %v3201_v24  ;;  %2908 = vmatmul.msk.bf16.gmra.mxu0 %vm371_vm1, %v3217_v25  ;;  %v3250_v22 = vld [vmem:[%s3377_s4 + $0x80] sm:$0xff] }
 0x165   : > { %3134 = vmatmul.msk.bf16.gmra.mxu2 %vm371_vm1, %v3249_v30  ;;  %3021 = vmatmul.msk.bf16.gmra.mxu1 %vm371_vm1, %v3233_v5 }
 0x166   : > { %v2137_v63 = vadd.f32 %v2058_v55, %v1850_v35 }
 0x167   : > { %v1200_v41 = vpop.f32.mrf.mxu3 }
 0x168   : > { %v2173_v56 = vadd.f32 %v3667_v59, %v2137_v63  ;;  %v1277_v1 = vadd.f32 %v1200_v41, %v3473_v7  ;;  %v2061_v42 = vpop.f32.mrf.mxu2 }
 0x169   : > { %v1489_v48 = vpop.f32.mrf.mxu0 }
 0x16a   : > { %v2205_v51 = vmax.f32 %v2173_v56, 0.0  ;;  %v1564_v52 = vadd.f32 %v1487_v29, %v1277_v1  ;;  %v1776_v27 = vpop.f32.mrf.mxu1 }
 0x16c   : > { %2237 = vst [vmem:[%s3677_s16 + $0x8] sm:$0xff] %v2205_v51  ;;  %v1851_v60 = vadd.f32 %v1774_v44, %v1564_v52  ;;  %v3251_v51 = vld [vmem:[%s3377_s4 + $0x88] sm:$0xff]  ;;  %v3235_v52 = vld [vmem:[%s3377_s4 + $0x80] sm:$0xff] }
 0x16e   : > { %v2138_v0 = vadd.f32 %v2061_v42, %v1851_v60  ;;  %v3203_v42 = vld [vmem:[%s3377_s4 + $0x70] sm:$0xff] }
 0x16f   : > { %v1202_v57 = vpop.f32.mrf.mxu3 }
 0x170   : > { %v2174_v4 = vadd.f32 %v3667_v59, %v2138_v0  ;;  %v1278_v2 = vadd.f32 %v1202_v57, %v3479_v15  ;;  %v2063_v3 = vpop.f32.mrf.mxu2 }
 0x171   : > { %v1492_v7 = vpop.f32.mrf.mxu0 }
 0x172   : > { %v2206_v14 = vmax.f32 %v2174_v4, 0.0  ;;  %v1565_v37 = vadd.f32 %v1489_v48, %v1278_v2  ;;  %v1779_v17 = vpop.f32.mrf.mxu1  ;;  %v3219_v48 = vld [vmem:[%s3377_s4 + $0x78] sm:$0xff] }
 0x174   : > { %2238 = vst [vmem:[%s3677_s16 + $0x10] sm:$0xff] %v2206_v14  ;;  %v1852_v43 = vadd.f32 %v1776_v27, %v1565_v37  ;;  %2796 = vmatmul.msk.bf16.gmra.mxu3 %vm371_vm1, %v3202_v8  ;;  %2909 = vmatmul.msk.bf16.gmra.mxu0 %vm371_vm1, %v3218_v13 }
 0x175   : > { %3135 = vmatmul.msk.bf16.gmra.mxu2 %vm371_vm1, %v3250_v22  ;;  %3022 = vmatmul.msk.bf16.gmra.mxu1 %vm371_vm1, %v3234_v9 }
 0x176   : > { %v2139_v15 = vadd.f32 %v2063_v3, %v1852_v43 }
 0x177   : > { %v1205_v55 = vpop.f32.mrf.mxu3 }
 0x178   : > { %v2175_v24 = vadd.f32 %v3667_v59, %v2139_v15  ;;  %v1279_v25 = vadd.f32 %v1205_v55, %v3489_v23  ;;  %v2066_v29 = vpop.f32.mrf.mxu2 }
 0x179   : > { %v1494_v30 = vpop.f32.mrf.mxu0 }
 0x17a   : > { %v2207_v5 = vmax.f32 %v2175_v24, 0.0  ;;  %v1566_v33 = vadd.f32 %v1492_v7, %v1279_v25  ;;  %v1781_v34 = vpop.f32.mrf.mxu1  ;;  %v3204_v24 = vld [vmem:[%s3377_s4 + $0x78] sm:$0xff]  ;;  %v3220_v25 = vld [vmem:[%s3377_s4 + $0x80] sm:$0xff] }
 0x17c   : > { %2239 = vst [vmem:[%s3677_s16 + $0x18] sm:$0xff] %v2207_v5  ;;  %v1853_v44 = vadd.f32 %v1779_v17, %v1566_v33 }
 0x17e   : > { %v2140_v35 = vadd.f32 %v2066_v29, %v1853_v44  ;;  %v3252_v29 = vld [vmem:[%s3377_s4 + $0x90] sm:$0xff] }
 0x17f   : > { %v1207_v63 = vpop.f32.mrf.mxu3 }
 0x180   : > { %v2176_v41 = vadd.f32 %v3667_v59, %v2140_v35  ;;  %v1280_v56 = vadd.f32 %v1207_v63, %v3495_v31  ;;  %v2068_v1 = vpop.f32.mrf.mxu2 }
 0x181   : > { %v1497_v23 = vpop.f32.mrf.mxu0 }
 0x182   : > { %v2208_v27 = vmax.f32 %v2176_v41, 0.0  ;;  %v1567_v60 = vadd.f32 %v1494_v30, %v1280_v56  ;;  %v1784_v0 = vpop.f32.mrf.mxu1  ;;  %v3236_v30 = vld [vmem:[%s3377_s4 + $0x88] sm:$0xff] }
 0x184   : > { %2240 = vst [vmem:[%s3677_s16 + $0x20] sm:$0xff] %v2208_v27  ;;  %v1854_v57 = vadd.f32 %v1781_v34, %v1567_v60  ;;  %2797 = vmatmul.msk.bf16.gmra.mxu3 %vm371_vm1, %v3203_v42  ;;  %2910 = vmatmul.msk.bf16.gmra.mxu0 %vm371_vm1, %v3219_v48 }
 0x185   : > { %3136 = vmatmul.msk.bf16.gmra.mxu2 %vm371_vm1, %v3251_v51  ;;  %3023 = vmatmul.msk.bf16.gmra.mxu1 %vm371_vm1, %v3235_v52 }
 0x186   : > { %v2141_v31 = vadd.f32 %v2068_v1, %v1854_v57 }
 0x187   : > { %v1210_v4 = vpop.f32.mrf.mxu3 }
 0x188   : > { %v2177_v2 = vadd.f32 %v3667_v59, %v2141_v31  ;;  %v1281_v3 = vadd.f32 %v1210_v4, %v3505_v39  ;;  %v2071_v8 = vpop.f32.mrf.mxu2  ;;  %v3205_v31 = vld [vmem:[%s3377_s4 + $0x80] sm:$0xff]  ;;  %v3221_v4 = vld [vmem:[%s3377_s4 + $0x88] sm:$0xff] }
 0x189   : > { %v1499_v13 = vpop.f32.mrf.mxu0 }
 0x18a   : > { %v2209_v7 = vmax.f32 %v2177_v2, 0.0  ;;  %v1568_v22 = vadd.f32 %v1497_v23, %v1281_v3  ;;  %v1786_v9 = vpop.f32.mrf.mxu1  ;;  %v3253_v2 = vld [vmem:[%s3377_s4 + $0x98] sm:$0xff]  ;;  %v3237_v3 = vld [vmem:[%s3377_s4 + $0x90] sm:$0xff] }
 0x18c   : > { %2241 = vst [vmem:[%s3677_s16 + $0x28] sm:$0xff] %v2209_v7  ;;  %v1855_v14 = vadd.f32 %v1784_v0, %v1568_v22 }
 0x18e   : > { %v2142_v37 = vadd.f32 %v2071_v8, %v1855_v14 }
 0x18f   : > { %v1212_v17 = vpop.f32.mrf.mxu3 }
 0x190   : > { %v2178_v43 = vadd.f32 %v3667_v59, %v2142_v37  ;;  %v1282_v15 = vadd.f32 %v1212_v17, %v3511_v47  ;;  %v2073_v55 = vpop.f32.mrf.mxu2 }
 0x191   : > { %v1502_v39 = vpop.f32.mrf.mxu0 }
 0x192   : > { %v2210_v5 = vmax.f32 %v2178_v43, 0.0  ;;  %v1569_v33 = vadd.f32 %v1499_v13, %v1282_v15  ;;  %v1789_v34 = vpop.f32.mrf.mxu1 }
 0x194   : > { %2242 = vst [vmem:[%s3677_s16 + $0x30] sm:$0xff] %v2210_v5  ;;  %v1856_v44 = vadd.f32 %v1786_v9, %v1569_v33  ;;  %2798 = vmatmul.msk.bf16.gmra.mxu3 %vm371_vm1, %v3204_v24  ;;  %2911 = vmatmul.msk.bf16.gmra.mxu0 %vm371_vm1, %v3220_v25 }
 0x195   : > { %3137 = vmatmul.msk.bf16.gmra.mxu2 %vm371_vm1, %v3252_v29  ;;  %3024 = vmatmul.msk.bf16.gmra.mxu1 %vm371_vm1, %v3236_v30 }
 0x196   : > { %v2143_v47 = vadd.f32 %v2073_v55, %v1856_v44  ;;  %v3222_v44 = vld [vmem:[%s3377_s4 + $0x90] sm:$0xff] }
 0x197   : > { %v1215_v35 = vpop.f32.mrf.mxu3 }
 0x198   : > { %v2179_v63 = vadd.f32 %v3667_v59, %v2143_v47  ;;  %v1283_v41 = vadd.f32 %v1215_v35, %v3522_v58  ;;  %v2076_v56 = vpop.f32.mrf.mxu2  ;;  %v3254_v47 = vld [vmem:[%s3377_s4 + $0xa0] sm:$0xff]  ;;  %v3238_v35 = vld [vmem:[%s3377_s4 + $0x98] sm:$0xff] }
 0x199   : > { %v1504_v1 = vpop.f32.mrf.mxu0 }
 0x19a   : > { %v2211_v42 = vmax.f32 %v2179_v63, 0.0  ;;  %v1570_v48 = vadd.f32 %v1502_v39, %v1283_v41  ;;  %v1791_v23 = vpop.f32.mrf.mxu1 }
 0x19c   : > { %2243 = vst [vmem:[%s3677_s16 + $0x38] sm:$0xff] %v2211_v42  ;;  %v1857_v51 = vadd.f32 %v1789_v34, %v1570_v48  ;;  %v3206_v34 = vld [vmem:[%s3377_s4 + $0x88] sm:$0xff] }
 0x19e   : > { %v2144_v52 = vadd.f32 %v2076_v56, %v1857_v51 }
 0x19f   : > { %v1217_v27 = vpop.f32.mrf.mxu3 }
 0x1a0   : > { %v2180_v60 = vadd.f32 %v3667_v59, %v2144_v52  ;;  %v1284_v0 = vadd.f32 %v1217_v27, %v3529_v6  ;;  %v2078_v57 = vpop.f32.mrf.mxu2 }
 0x1a1   : > { %v1507_v58 = vpop.f32.mrf.mxu0 }
 0x1a2   : > { %v2212_v8 = vmax.f32 %v2180_v60, 0.0  ;;  %v1571_v13 = vadd.f32 %v1504_v1, %v1284_v0  ;;  %v1794_v7 = vpop.f32.mrf.mxu1 }
 0x1a4   : > { %2244 = vst [vmem:[%s3677_s16 + $0x40] sm:$0xff] %v2212_v8  ;;  %v1858_v22 = vadd.f32 %v1791_v23, %v1571_v13  ;;  %2799 = vmatmul.msk.bf16.gmra.mxu3 %vm371_vm1, %v3205_v31  ;;  %2912 = vmatmul.msk.bf16.gmra.mxu0 %vm371_vm1, %v3221_v4  ;;  %v3207_v8 = vld [vmem:[%s3377_s4 + $0x90] sm:$0xff]  ;;  %v3223_v13 = vld [vmem:[%s3377_s4 + $0x98] sm:$0xff] }
 0x1a5   : > { %3138 = vmatmul.msk.bf16.gmra.mxu2 %vm371_vm1, %v3253_v2  ;;  %3025 = vmatmul.msk.bf16.gmra.mxu1 %vm371_vm1, %v3237_v3 }
 0x1a6   : > { %v2145_v6 = vadd.f32 %v2078_v57, %v1858_v22  ;;  %v3239_v22 = vld [vmem:[%s3377_s4 + $0xa0] sm:$0xff] }
 0x1a7   : > { %v1220_v9 = vpop.f32.mrf.mxu3 }
 0x1a8   : > { %v2181_v14 = vadd.f32 %v3667_v59, %v2145_v6  ;;  %v1285_v37 = vadd.f32 %v1220_v9, %v3540_v16  ;;  %v2081_v17 = vpop.f32.mrf.mxu2 }
 0x1a9   : > { %v1509_v43 = vpop.f32.mrf.mxu0 }
 0x1aa   : > { %v2213_v15 = vmax.f32 %v2181_v14, 0.0  ;;  %v1572_v55 = vadd.f32 %v1507_v58, %v1285_v37  ;;  %v1796_v24 = vpop.f32.mrf.mxu1 }
 0x1ac   : > { %2245 = vst [vmem:[%s3677_s16 + $0x48] sm:$0xff] %v2213_v15  ;;  %v1859_v25 = vadd.f32 %v1794_v7, %v1572_v55  ;;  %v3255_v7 = vld [vmem:[%s3377_s4 + $0xa8] sm:$0xff] }
 0x1ae   : > { %v2146_v39 = vadd.f32 %v2081_v17, %v1859_v25 }
 0x1af   : > { %v1222_v29 = vpop.f32.mrf.mxu3 }
 0x1b0   : > { %v2182_v30 = vadd.f32 %v3667_v59, %v2146_v39  ;;  %v1286_v5 = vadd.f32 %v1222_v29, %v3547_v28  ;;  %v2083_v33 = vpop.f32.mrf.mxu2 }
 0x1b1   : > { %v1512_v16 = vpop.f32.mrf.mxu0 }
 0x1b2   : > { %v2214_v63 = vmax.f32 %v2182_v30, 0.0  ;;  %v1573_v41 = vadd.f32 %v1509_v43, %v1286_v5  ;;  %v1799_v56 = vpop.f32.mrf.mxu1 }
 0x1b4   : > { %2246 = vst [vmem:[%s3677_s16 + $0x50] sm:$0xff] %v2214_v63  ;;  %v1860_v1 = vadd.f32 %v1796_v24, %v1573_v41  ;;  %2800 = vmatmul.msk.bf16.gmra.mxu3 %vm371_vm1, %v3206_v34  ;;  %2913 = vmatmul.msk.bf16.gmra.mxu0 %vm371_vm1, %v3222_v44 }
 0x1b5   : > { %3139 = vmatmul.msk.bf16.gmra.mxu2 %vm371_vm1, %v3254_v47  ;;  %3026 = vmatmul.msk.bf16.gmra.mxu1 %vm371_vm1, %v3238_v35 }
 0x1b6   : > { %v2147_v28 = vadd.f32 %v2083_v33, %v1860_v1 }
 0x1b7   : > { %v1225_v42 = vpop.f32.mrf.mxu3 }
 0x1b8   : > { %v2183_v48 = vadd.f32 %v3667_v59, %v2147_v28  ;;  %v1287_v23 = vadd.f32 %v1225_v42, %v3558_v36  ;;  %v2086_v51 = vpop.f32.mrf.mxu2 }
 0x1b9   : > { %v1514_v52 = vpop.f32.mrf.mxu0 }
 0x1ba   : > { %v2215_v27 = vmax.f32 %v2183_v48, 0.0  ;;  %v1574_v60 = vadd.f32 %v1512_v16, %v1287_v23  ;;  %v1801_v0 = vpop.f32.mrf.mxu1 }
 0x1bc   : > { %2247 = vst [vmem:[%s3677_s16 + $0x58] sm:$0xff] %v2215_v27  ;;  %v1861_v57 = vadd.f32 %v1799_v56, %v1574_v60 }
 0x1be   : > { %v2148_v31 = vadd.f32 %v2086_v51, %v1861_v57 }
 0x1bf   : > { %v1227_v4 = vpop.f32.mrf.mxu3 }
 0x1c0   : > { %v2184_v58 = vadd.f32 %v3667_v59, %v2148_v31  ;;  %v1288_v2 = vadd.f32 %v1227_v4, %v3565_v49  ;;  %v2088_v3 = vpop.f32.mrf.mxu2 }
 0x1c1   : > { %v1517_v36 = vpop.f32.mrf.mxu0 }
 0x1c2   : > { %v2216_v6 = vmax.f32 %v2184_v58, 0.0  ;;  %v1575_v9 = vadd.f32 %v1514_v52, %v1288_v2  ;;  %v1804_v14 = vpop.f32.mrf.mxu1 }
 0x1c4   : > { %2248 = vst [vmem:[%s3677_s16 + $0x60] sm:$0xff] %v2216_v6  ;;  %v1862_v37 = vadd.f32 %v1801_v0, %v1575_v9  ;;  %2801 = vmatmul.msk.bf16.gmra.mxu3 %vm371_vm1, %v3207_v8  ;;  %2914 = vmatmul.msk.bf16.gmra.mxu0 %vm371_vm1, %v3223_v13 }
 0x1c5   : > { %3140 = vmatmul.msk.bf16.gmra.mxu2 %vm371_vm1, %v3255_v7  ;;  %3027 = vmatmul.msk.bf16.gmra.mxu1 %vm371_vm1, %v3239_v22 }
 0x1c6   : > { %v2149_v49 = vadd.f32 %v2088_v3, %v1862_v37 }
 0x1c7   : > { %v1230_v17 = vpop.f32.mrf.mxu3 }
 0x1c8   : > { %v2185_v43 = vadd.f32 %v3667_v59, %v2149_v49  ;;  %v1289_v15 = vadd.f32 %v1230_v17, %v3576_v61  ;;  %v2091_v55 = vpop.f32.mrf.mxu2 }
 0x1c9   : > { %v1519_v24 = vpop.f32.mrf.mxu0 }
 0x1ca   : > { %v2217_v25 = vmax.f32 %v2185_v43, 0.0  ;;  %v1576_v39 = vadd.f32 %v1517_v36, %v1289_v15  ;;  %v1806_v29 = vpop.f32.mrf.mxu1 }
 0x1cc   : > { %2249 = vst [vmem:[%s3677_s16 + $0x68] sm:$0xff] %v2217_v25  ;;  %v1863_v30 = vadd.f32 %v1804_v14, %v1576_v39 }
 0x1ce   : > { %v2150_v5 = vadd.f32 %v2091_v55, %v1863_v30 }
 0x1cf   : > { %v1232_v33 = vpop.f32.mrf.mxu3 }
 0x1d0   : > { %v2186_v34 = vadd.f32 %v3667_v59, %v2150_v5  ;;  %v1290_v44 = vadd.f32 %v1232_v33, %v3583_v53  ;;  %v2093_v16 = vpop.f32.mrf.mxu2 }
 0x1d1   : > { %v1522_v47 = vpop.f32.mrf.mxu0 }
 0x1d2   : > { %v2218_v35 = vmax.f32 %v2186_v34, 0.0  ;;  %v1577_v63 = vadd.f32 %v1519_v24, %v1290_v44  ;;  %v1809_v61 = vpop.f32.mrf.mxu1 }
 0x1d4   : > { %2250 = vst [vmem:[%s3677_s16 + $0x70] sm:$0xff] %v2218_v35  ;;  %v1864_v41 = vadd.f32 %v1806_v29, %v1577_v63 }
 0x1d6   : > { %v2151_v56 = vadd.f32 %v2093_v16, %v1864_v41 }
 0x1d7   : > { %v1235_v1 = vpop.f32.mrf.mxu3 }
 0x1d8   : > { %v2187_v28 = vadd.f32 %v3667_v59, %v2151_v56  ;;  %v1291_v42 = vadd.f32 %v1235_v1, %v3594_v20  ;;  %v2096_v48 = vpop.f32.mrf.mxu2 }
 0x1d9   : > { %v1524_v23 = vpop.f32.mrf.mxu0 }
 0x1da   : > { %v2219_v51 = vmax.f32 %v2187_v28, 0.0  ;;  %v1578_v52 = vadd.f32 %v1522_v47, %v1291_v42  ;;  %v1811_v53 = vpop.f32.mrf.mxu1 }
 0x1dc   : > { %2251 = vst [vmem:[%s3677_s16 + $0x78] sm:$0xff] %v2219_v51  ;;  %v1865_v27 = vadd.f32 %v1809_v61, %v1578_v52 }
 0x1de   : > { %v2152_v60 = vadd.f32 %v2096_v48, %v1865_v27 }
 0x1df   : > { %v1237_v0 = vpop.f32.mrf.mxu3 }
 0x1e0   : > { %v2188_v57 = vadd.f32 %v3667_v59, %v2152_v60  ;;  %v1292_v31 = vadd.f32 %v1237_v0, %v3601_v11  ;;  %v2098_v4 = vpop.f32.mrf.mxu2 }
 0x1e1   : > { %v1527_v58 = vpop.f32.mrf.mxu0 }
 0x1e2   : > { %v2220_v2 = vmax.f32 %v2188_v57, 0.0  ;;  %v1579_v3 = vadd.f32 %v1524_v23, %v1292_v31  ;;  %v1814_v20 = vpop.f32.mrf.mxu1 }
 0x1e4   : > { %2252 = vst [vmem:[%s3677_s16 + $0x80] sm:$0xff] %v2220_v2  ;;  %v1866_v8 = vadd.f32 %v1811_v53, %v1579_v3 }
 0x1e6   : > { %v2153_v13 = vadd.f32 %v2098_v4, %v1866_v8 }
 0x1e7   : > { %v1240_v36 = vpop.f32.mrf.mxu3 }
 0x1e8   : > { %v2189_v7 = vadd.f32 %v3667_v59, %v2153_v13  ;;  %v1293_v22 = vadd.f32 %v1240_v36, %v3612_v46  ;;  %v2101_v6 = vpop.f32.mrf.mxu2 }
 0x1e9   : > { %v1529_v9 = vpop.f32.mrf.mxu0 }
 0x1ea   : > { %v2221_v14 = vmax.f32 %v2189_v7, 0.0  ;;  %v1580_v37 = vadd.f32 %v1527_v58, %v1293_v22  ;;  %v1816_v11 = vpop.f32.mrf.mxu1 }
 0x1ec   : > { %2253 = vst [vmem:[%s3677_s16 + $0x88] sm:$0xff] %v2221_v14  ;;  %v1867_v49 = vadd.f32 %v1814_v20, %v1580_v37 }
 0x1ee   : > { %v2154_v17 = vadd.f32 %v2101_v6, %v1867_v49 }
 0x1ef   : > { %v1242_v43 = vpop.f32.mrf.mxu3 }
 0x1f0   : > { %v2190_v15 = vadd.f32 %v3667_v59, %v2154_v17  ;;  %v1294_v55 = vadd.f32 %v1242_v43, %v3619_v62  ;;  %v2103_v24 = vpop.f32.mrf.mxu2 }
 0x1f1   : > { %v1532_v25 = vpop.f32.mrf.mxu0 }
 0x1f2   : > { %v2222_v39 = vmax.f32 %v2190_v15, 0.0  ;;  %v1581_v29 = vadd.f32 %v1529_v9, %v1294_v55  ;;  %v1819_v46 = vpop.f32.mrf.mxu1 }
 0x1f4   : > { %2254 = vst [vmem:[%s3677_s16 + $0x90] sm:$0xff] %v2222_v39  ;;  %v1868_v30 = vadd.f32 %v1816_v11, %v1581_v29 }
 0x1f6   : > { %v2155_v5 = vadd.f32 %v2103_v24, %v1868_v30 }
 0x1f7   : > { %v1245_v33 = vpop.f32.mrf.mxu3 }
 0x1f8   : > { %v2191_v34 = vadd.f32 %v3667_v59, %v2155_v5  ;;  %v1295_v44 = vadd.f32 %v1245_v33, %v3630_v12  ;;  %v2106_v16 = vpop.f32.mrf.mxu2 }
 0x1f9   : > { %v1534_v47 = vpop.f32.mrf.mxu0 }
 0x1fa   : > { %v2223_v35 = vmax.f32 %v2191_v34, 0.0  ;;  %v1582_v63 = vadd.f32 %v1532_v25, %v1295_v44  ;;  %v1821_v62 = vpop.f32.mrf.mxu1 }
 0x1fc   : > { %2255 = vst [vmem:[%s3677_s16 + $0x98] sm:$0xff] %v2223_v35  ;;  %v1869_v61 = vadd.f32 %v1819_v46, %v1582_v63 }
 0x1fe   : > { %v2156_v41 = vadd.f32 %v2106_v16, %v1869_v61 }
 0x1ff   : > { %v1247_v56 = vpop.f32.mrf.mxu3 }
 0x200   : > { %v2192_v1 = vadd.f32 %v3667_v59, %v2156_v41  ;;  %v1296_v28 = vadd.f32 %v1247_v56, %v3637_v26  ;;  %v2108_v42 = vpop.f32.mrf.mxu2 }
 0x201   : > { %v1537_v48 = vpop.f32.mrf.mxu0 }
 0x202   : > { %v2224_v23 = vmax.f32 %v2192_v1, 0.0  ;;  %v1583_v51 = vadd.f32 %v1534_v47, %v1296_v28  ;;  %v1824_v12 = vpop.f32.mrf.mxu1 }
 0x204   : > { %2256 = vst [vmem:[%s3677_s16 + $0xa0] sm:$0xff] %v2224_v23  ;;  %v1870_v52 = vadd.f32 %v1821_v62, %v1583_v51 }
 0x206   : > { %v2157_v53 = vadd.f32 %v2108_v42, %v1870_v52 }
 0x207   : > { %v1250_v27 = vpop.f32.mrf.mxu3 }
 0x208   : > { %v2193_v60 = vadd.f32 %v3667_v59, %v2157_v53  ;;  %v1297_v0 = vadd.f32 %v1250_v27, %v3648_v40  ;;  %v2111_v57 = vpop.f32.mrf.mxu2 }
 0x209   : > { %v1539_v31 = vpop.f32.mrf.mxu0 }
 0x20a   : > { %v2225_v4 = vmax.f32 %v2193_v60, 0.0  ;;  %v1584_v58 = vadd.f32 %v1537_v48, %v1297_v0  ;;  %v1826_v26 = vpop.f32.mrf.mxu1 }
 0x20c   : > { %2257 = vst [vmem:[%s3677_s16 + $0xa8] sm:$0xff] %v2225_v4  ;;  %v1871_v2 = vadd.f32 %v1824_v12, %v1584_v58 }
 0x20e   : > { %v2158_v3 = vadd.f32 %v2111_v57, %v1871_v2 }
 0x20f   : > { %v1252_v20 = vpop.f32.mrf.mxu3 }
 0x210   : > { %v2194_v8 = vadd.f32 %v3667_v59, %v2158_v3  ;;  %v1298_v13 = vadd.f32 %v1252_v20, %v3655_v21  ;;  %v2113_v36 = vpop.f32.mrf.mxu2 }
 0x211   : > { %v1542_v7 = vpop.f32.mrf.mxu0 }
 0x212   : > { %v2226_v22 = vmax.f32 %v2194_v8, 0.0  ;;  %v1585_v6 = vadd.f32 %v1539_v31, %v1298_v13  ;;  %v1829_v40 = vpop.f32.mrf.mxu1 }
 0x214   : > { %2258 = vst [vmem:[%s3677_s16 + $0xb0] sm:$0xff] %v2226_v22  ;;  %v1872_v9 = vadd.f32 %v1826_v26, %v1585_v6 }
 0x216   : > { %v2159_v14 = vadd.f32 %v2113_v36, %v1872_v9 }
 0x217   : > { %v1255_v37 = vpop.f32.mrf.mxu3 }
 0x218   : > { %v2195_v11 = vadd.f32 %v3667_v59, %v2159_v14  ;;  %v1299_v49 = vadd.f32 %v1255_v37, %v3592_v19  ;;  %v2116_v17 = vpop.f32.mrf.mxu2 }
 0x219   : > { %v1544_v43 = vpop.f32.mrf.mxu0 }
 0x21a   : > { %v2227_v15 = vmax.f32 %v2195_v11, 0.0  ;;  %v1586_v55 = vadd.f32 %v1542_v7, %v1299_v49  ;;  %v1831_v21 = vpop.f32.mrf.mxu1 }
 0x21c   : > { %2259 = vst [vmem:[%s3677_s16 + $0xb8] sm:$0xff] %v2227_v15  ;;  %v1873_v24 = vadd.f32 %v1829_v40, %v1586_v55 }
 0x21e   : > { %v2160_v25 = vadd.f32 %v2116_v17, %v1873_v24 }
 0x21f   : > { %v1257_v39 = vpop.f32.mrf.mxu3 }
 0x220   : > { %v2196_v29 = vadd.f32 %v3667_v59, %v2160_v25  ;;  %v1300_v46 = vadd.f32 %v1257_v39, %v3597_v32  ;;  %v2118_v30 = vpop.f32.mrf.mxu2 }
 0x221   : > { %v1547_v5 = vpop.f32.mrf.mxu0 }
 0x222   : > { %v2228_v33 = vmax.f32 %v2196_v29, 0.0  ;;  %v1587_v34 = vadd.f32 %v1544_v43, %v1300_v46  ;;  %v1834_v19 = vpop.f32.mrf.mxu1 }
 0x224   : > { %2260 = vst [vmem:[%s3677_s16 + $0xc0] sm:$0xff] %v2228_v33  ;;  %v1874_v44 = vadd.f32 %v1831_v21, %v1587_v34 }
 0x226   : > { %v2161_v16 = vadd.f32 %v2118_v30, %v1874_v44 }
 0x227   : > { %v1260_v47 = vpop.f32.mrf.mxu3 }
 0x228   : > { %v2197_v35 = vadd.f32 %v3667_v59, %v2161_v16  ;;  %v1301_v63 = vadd.f32 %v1260_v47, %v3610_v45  ;;  %v2121_v62 = vpop.f32.mrf.mxu2 }
 0x229   : > { %v1549_v61 = vpop.f32.mrf.mxu0 }
 0x22a   : > { %v2229_v41 = vmax.f32 %v2197_v35, 0.0  ;;  %v1588_v56 = vadd.f32 %v1547_v5, %v1301_v63  ;;  %v1836_v32 = vpop.f32.mrf.mxu1 }
 0x22c   : > { %2261 = vst [vmem:[%s3677_s16 + $0xc8] sm:$0xff] %v2229_v41  ;;  %v1875_v1 = vadd.f32 %v1834_v19, %v1588_v56 }
 0x22e   : > { %v2162_v28 = vadd.f32 %v2121_v62, %v1875_v1 }
 0x22f   : > { %v1262_v42 = vpop.f32.mrf.mxu3 }
 0x230   : > { %v2198_v48 = vadd.f32 %v3667_v59, %v2162_v28  ;;  %v1302_v23 = vadd.f32 %v1262_v42, %v3615_v54  ;;  %v2123_v51 = vpop.f32.mrf.mxu2 }
 0x231   : > { %v1552_v53 = vpop.f32.mrf.mxu0 }
 0x232   : > { %v2230_v12 = vmax.f32 %v2198_v48, 0.0  ;;  %v1589_v52 = vadd.f32 %v1549_v61, %v1302_v23  ;;  %v1839_v27 = vpop.f32.mrf.mxu1 }
 0x234   : > { %2262 = vst [vmem:[%s3677_s16 + $0xd0] sm:$0xff] %v2230_v12  ;;  %v1876_v45 = vadd.f32 %v1836_v32, %v1589_v52 }
 0x236   : > { %v2163_v60 = vadd.f32 %v2123_v51, %v1876_v45 }
 0x237   : > { %v1265_v0 = vpop.f32.mrf.mxu3 }
 0x238   : > { %v2199_v57 = vadd.f32 %v3667_v59, %v2163_v60  ;;  %v1303_v31 = vadd.f32 %v1265_v0, %v3628_v10  ;;  %v2126_v4 = vpop.f32.mrf.mxu2 }
 0x239   : > { %v1554_v54 = vpop.f32.mrf.mxu0 }
 0x23a   : > { %v2231_v58 = vmax.f32 %v2199_v57, 0.0  ;;  %v1590_v26 = vadd.f32 %v1552_v53, %v1303_v31  ;;  %v1841_v20 = vpop.f32.mrf.mxu1 }
 0x23c   : > { %2263 = vst [vmem:[%s3677_s16 + $0xd8] sm:$0xff] %v2231_v58  ;;  %v1877_v2 = vadd.f32 %v1839_v27, %v1590_v26 }
 0x23e   : > { %v2164_v3 = vadd.f32 %v2126_v4, %v1877_v2 }
 0x23f   : > { %v1267_v8 = vpop.f32.mrf.mxu3 }
 0x240   : > { %v2200_v13 = vadd.f32 %v3667_v59, %v2164_v3  ;;  %v1304_v36 = vadd.f32 %v1267_v8, %v3633_v18  ;;  %v2128_v7 = vpop.f32.mrf.mxu2 }
 0x241   : > { %v1557_v9 = vpop.f32.mrf.mxu0 }
 0x242   : > { %v2232_v22 = vmax.f32 %v2200_v13, 0.0  ;;  %v1591_v6 = vadd.f32 %v1554_v54, %v1304_v36  ;;  %v1844_v49 = vpop.f32.mrf.mxu1 }
 0x244   : > { %2264 = vst [vmem:[%s3677_s16 + $0xe0] sm:$0xff] %v2232_v22  ;;  %v1878_v40 = vadd.f32 %v1841_v20, %v1591_v6 }
 0x246   : > { %v2165_v10 = vadd.f32 %v2128_v7, %v1878_v40 }
 0x247   : > { %v1270_v14 = vpop.f32.mrf.mxu3 }
 0x248   : > { %v2201_v37 = vadd.f32 %v3667_v59, %v2165_v10  ;;  %v1305_v11 = vadd.f32 %v1270_v14, %v3646_v38  ;;  %v2131_v15 = vpop.f32.mrf.mxu2 }
 0x249   : > { %v1559_v39 = vpop.f32.mrf.mxu0 }
 0x24a   : > { %v2233_v17 = vmax.f32 %v2201_v37, 0.0  ;;  %v1592_v43 = vadd.f32 %v1557_v9, %v1305_v11  ;;  %v1846_v30 = vpop.f32.mrf.mxu1 }
 0x24c   : > { %2265 = vst [vmem:[%s3677_s16 + $0xe8] sm:$0xff] %v2233_v17  ;;  %v1879_v18 = vadd.f32 %v1844_v49, %v1592_v43 }
 0x24e   : > { %v2166_v55 = vadd.f32 %v2131_v15, %v1879_v18 }
 0x24f   : > { %v1272_v21 = vpop.f32.mrf.mxu3 }
 0x250   : > { %v2202_v24 = vadd.f32 %v3667_v59, %v2166_v55  ;;  %v1306_v25 = vadd.f32 %v1272_v21, %v3651_v50  ;;  %v2133_v38 = vpop.f32.mrf.mxu2 }
 0x252   : > { %v2234_v29 = vmax.f32 %v2202_v24, 0.0  ;;  %v1593_v46 = vadd.f32 %v1559_v39, %v1306_v25 }
 0x254   : > { %2266 = vst [vmem:[%s3677_s16 + $0xf0] sm:$0xff] %v2234_v29  ;;  %v1880_v5 = vadd.f32 %v1846_v30, %v1593_v46 }
 0x256   : > { %v2167_v33 = vadd.f32 %v2133_v38, %v1880_v5 }
 0x258   : > { %v2203_v34 = vadd.f32 %v3667_v59, %v2167_v33 }
 0x25a   : > { %v2235_v19 = vmax.f32 %v2203_v34, 0.0 }
 0x25c   : > { %2267 = vst [vmem:[%s3677_s16 + $0xf8] sm:$0xff] %v2235_v19 }
 0x25d PF: > { %s13_s14 = sadd.s32 1, %s3307_s14   ;;  %s3839_s12 = smov %s3303_s13 }
 0x25e   : > { %p10_p5 = scmp.ge.s32.totalorder %s13_s14, 4   ;;  %s3840_s13 = smov %s3842_s15 }
 0x260   :  { %12 = sbr.rel (!%p10_p5) target bundleno = 2 (0x2), region = 80 }

// kernel: module_d_forward.10
= control target key start
LH: loop header
LB: loop body
LE: loop exit
PB: predicated region body
PF: predicated region fallthrough
CT: control target
= control target key end

     0   :  { %s4012_s12 = smov 0   ;;  %s4014_s13 = smov 0   ;;  %s5868_s0 = inlined_call_operand.vmem [shape: bf16[2,16,22,8], index: 0, kind: input, shape index: {}]   ;;  %s5869_s1 = inlined_call_operand.vmem [shape: bf16[7,8,128], index: 1, kind: input, shape index: {}]   ;;  %s5870_s2 = inlined_call_operand.vmem [shape: f32[1,128], index: 2, kind: input, shape index: {}]   ;;  %s5871_s3 = inlined_call_operand.vmem [shape: f32[2,16,16,128], index: 3, kind: output, shape index: {}]  }
   0x1   :  { %s4016_s14 = smov 0  }
   0x2 LB: > { %s25_s15 = sadd.s32 1, %s3986_s13  ;;  %p3655_p0 = scmp.ge.s32.totalorder %s3990_s14, 1  ;;  %s3990_s14 = sphi %s4016_s14, %s13_s14   ;;  %s3986_s13 = sphi %s4014_s13, %s6029_s13   ;;  %s3982_s12 = sphi %s4012_s12, %s6028_s12  }
   0x3   : > { %p27_p1 = scmp.ge.s32.totalorder %s25_s15, 2  ;;  %p168_p2 = scmp.lt.s32.totalorder %s3990_s14, 3 }
   0x5   : > { %s6031_s15 = smov (%p27_p1, %s25_s15), 0  ;;  %p169_p3 = pnand %p3655_p0, %p168_p2 }
   0x7   : > { %172 = sbr.rel (%p169_p3) target bundleno = 623 (0x26f), region = 32 }
   0xc   : > { %vm758_vm0 = vcmask 1043456   ;;  %v3772_v0 = vld [vmem:[%s5869_s1 + $0x8] sm:$0xf]  ;;  %p202_p4 = scmp.lt.s32.totalorder %s3982_s12, 1  ;;  %v3659_v2 = vld [vmem:[%s5869_s1 + $0x4] sm:$0xf] }
   0xd   : > { %v4034_v1 = vsel %vm758_vm0, %v3772_v0, 0  ;;  %v255_v3 = vld [vmem:[%s5869_s1] sm:$0xf]  ;;  %v760_v4 = vsel %vm758_vm0, %v3659_v2, 0  ;;  %vm1119_vm1 = vcmask 1042432   ;;  %vm1120_vm2 = vcmask 1046532  }
   0xe   : > { %1342 = vmatpush.bf16.msra.mxu2 %v4034_v1  ;;  %s6033_s12 = smov (!%p202_p4, %s3982_s12), 1  ;;  %v980_v5 = vsel %vm758_vm0, %v255_v3, 0  ;;  %769 = vmatpush.bf16.msra.mxu0 %v760_v4  ;;  %v3872_v6 = vld [vmem:[%s5869_s1 + $0x18] sm:$0xf]  ;;  %v3822_v7 = vld [vmem:[%s5869_s1 + $0x10] sm:$0xf]  ;;  %vm4067_vm3 = vmor %vm1119_vm1, %vm1120_vm2 }
   0xf   : > { %3908 = vmatpush.bf16.msra.mxu3 %v760_v4  ;;  %s3911_s26 = smul.u32 192, %s6033_s12  ;;  %989 = vmatpush.bf16.msra.mxu1 %v980_v5  ;;  %v3321_v8 = vsel %vm758_vm0, %v3872_v6, 0  ;;  %v2327_v9 = vsel %vm758_vm0, %v3822_v7, 0  ;;  %v3839_v10 = vld [vmem:[%s5869_s1 + $0x14] sm:$0xf]  ;;  %vm709_vm4 = vcmask 64512  }
  0x10   : > { %v2936_v11 = vsel %vm758_vm0, %v3839_v10, 0  ;;  %vm272_vm5 = vsmask.f32 3328  ;;  %vm273_vm6 = vsmask.f32 7440  ;;  %vm3107_vm11 = vcmask 1040384  }
  0x11   : > { %s4063_s4 = scalar_lea.vmem %s5868_s0, %s3911_s26  ;;  %vm4095_vm7 = vmor %vm272_vm5, %vm273_vm6  ;;  %vm1472_vm8 = vsmask.f32 2304  ;;  %vm1473_vm9 = vsmask.f32 6416  ;;  %vm3108_vm12 = vcmask 1044484   ;;  %vm2113_vm1 = vcmask 1041408  }
  0x12   : > { %3330 = vmatpush.bf16.msrb.mxu2 %v3321_v8  ;;  %2336 = vmatpush.bf16.msrb.mxu0 %v2327_v9  ;;  %v224_v13 = vld [vmem:[%s4063_s4 + $0x4] sm:$0xf]  ;;  %v256_v14 = vld [vmem:[%s4063_s4 + $0x8] sm:$0x1]  ;;  %v4074_v15 = vld [vmem:[%s4063_s4] sm:$0xe] }
  0x13   : > { %3909 = vmatpush.bf16.msrb.mxu3 %v980_v5  ;;  %2945 = vmatpush.bf16.msrb.mxu1 %v2936_v11  ;;  %v3756_v16 = vrot.slane %v4074_v15, 9  ;;  %v1124_v17 = vrot.slane %v224_v13, 5  ;;  %v1127_v18 = vrot.slane %v256_v14, 5  ;;  %v223_v19 = vld [vmem:[%s4063_s4] sm:$0xf]  ;;  %v4078_v22 = vshll.u32 %v224_v13, 16  ;;  %vm4519_vm10 = vmor %vm1472_vm8, %vm1473_vm9 }
  0x14   : > { %v276_v20 = vshrl.u32 %v223_v19, 16  ;;  %v279_v21 = vshll.u32 %v223_v19, 16  ;;  %v4082_v25 = vshrl.u32 %v224_v13, 16  ;;  %v3892_v26 = vld [vmem:[%s4063_s4] sm:$0xff]  ;;  %v295_v33 = vshll.u32 %v256_v14, 16  ;;  %vm4549_vm15 = vmor %vm3107_vm11, %vm3108_vm12  ;;  %s3891_s9 = sshll.u32 %s6033_s12, 8 }
  0x15   : > { %v1125_v23 = vsel %vm4067_vm3, %v3756_v16, %v1124_v17  ;;  %v1126_v24 = vrot.slane %v1124_v17, 4  ;;  %v287_v31 = vrot.slane %v4078_v22, 5  ;;  %v247_v34 = vld [vmem:[%s4063_s4 + $0x90] sm:$0xf]  ;;  %3740 = vmatmul.msk.bf16.vlgmr.msra.gmra.mxu1 %vm709_vm4, %v3892_v26  ;;  %v4092_v37 = vld [vmem:[%s4063_s4 + $0x94] sm:$0xf]  ;;  %s5414_s12 = scalar_lea.vmem %s5871_s3, %s3891_s9 }
  0x16   : > { %v1236_v27 = vunpack.c.l.b16 %v1125_v23  ;;  %v278_v28 = vrot.slane %v276_v20, 4  ;;  %v281_v29 = vrot.slane %v279_v21, 5  ;;  %v291_v32 = vrot.slane %v4082_v25, 4  ;;  %v4100_v41 = vld [vmem:[%s4063_s4 + $0x98] sm:$0x1] }
  0x17   : > { %v1128_v30 = vsel %vm4067_vm3, %v1126_v24, %v1127_v18  ;;  %v297_v40 = vrot.slane %v295_v33, 5  ;;  %v564_v44 = vshrl.u32 %v247_v34, 16  ;;  %v567_v46 = vshll.u32 %v247_v34, 16  ;;  %v226_v48 = vld [vmem:[%s4063_s4 + $0x10] sm:$0xf] }
  0x18   : > { %v1237_v35 = vunpack.c.l.b16 %v1128_v30  ;;  %v282_v36 = vor.u32 %v281_v29, %v278_v28  ;;  %v292_v39 = vor.u32 %v291_v32, %v287_v31  ;;  %v4103_v47 = vshll.u32 %v4092_v37, 16  ;;  %v1072_v53 = vld [vmem:[%s4063_s4 + $0xc] sm:$0xe]  ;;  %v257_v57 = vld [vmem:[%s4063_s4 + $0x14] sm:$0x1] }
  0x19   : > { %v566_v50 = vrot.slane %v564_v44, 4  ;;  %v4110_v51 = vshrl.u32 %v4092_v37, 16  ;;  %v583_v52 = vshll.u32 %v4100_v41, 16  ;;  %v569_v56 = vrot.slane %v567_v46, 5  ;;  %v225_v0 = vld [vmem:[%s4063_s4 + $0xc] sm:$0xf] }
  0x1a   : > { %v1268_v42 = vpack.c.b16 %v1237_v35, %v1236_v27  ;;  %v283_v43 = vrot.slane %v282_v36, 4  ;;  %v293_v45 = vrot.slane %v292_v39, 4  ;;  %5916 = vst [vmem:[#allocation2_spill] sm:$0xff] %v4103_v47  ;;  %v575_v59 = vrot.slane %v4103_v47, 5  ;;  %v249_v17 = vld [vmem:[%s4063_s4 + $0x9c] sm:$0xf] }
  0x1b   : > { %5917 = vst [vmem:[#allocation3_spill] sm:$0xff] %v4110_v51  ;;  %v579_v60 = vrot.slane %v4110_v51, 4  ;;  %v570_v61 = vor.u32 %v569_v56, %v566_v50  ;;  %v3757_v62 = vrot.slane %v1072_v53, 9  ;;  %v1131_v63 = vrot.slane %v226_v48, 5  ;;  %v3893_v18 = vld [vmem:[%s4063_s4 + $0xc] sm:$0xff] }
  0x1c   : > { %3773 = vmatmul.msk.bf16.vlgmr.msra.gmra.mxu2 %vm709_vm4, %v1268_v42  ;;  %v288_v49 = vsel %vm4095_vm7, %v283_v43, %v287_v31  ;;  %v298_v54 = vsel %vm4095_vm7, %v293_v45, %v297_v40  ;;  %v585_v4 = vrot.slane %v583_v52, 5  ;;  %v1134_v5 = vrot.slane %v257_v57, 5  ;;  %v4136_v29 = vld [vmem:[%s4063_s4 + $0xa0] sm:$0xf]  ;;  %v4139_v32 = vld [vmem:[%s4063_s4 + $0xa4] sm:$0x1] }
  0x1d   : > { %v661_v55 = vunpack.c.l.b16 %v288_v49  ;;  %v662_v58 = vunpack.c.l.b16 %v298_v54  ;;  %v580_v3 = vor.u32 %v579_v60, %v575_v59  ;;  %v571_v6 = vrot.slane %v570_v61, 4  ;;  %v228_v42 = vld [vmem:[%s4063_s4 + $0x1c] sm:$0xf]  ;;  %v258_v56 = vld [vmem:[%s4063_s4 + $0x20] sm:$0x1] }
  0x1e   : > { %v1132_v7 = vsel %vm4067_vm3, %v3757_v62, %v1131_v63  ;;  %v1133_v8 = vrot.slane %v1131_v63, 4  ;;  %v300_v11 = vshrl.u32 %v225_v0, 16  ;;  %v303_v16 = vshll.u32 %v225_v0, 16 }
  0x1f   : > { %v693_v2 = vpack.c.b16 %v662_v58, %v661_v55  ;;  %v581_v9 = vrot.slane %v580_v3, 4  ;;  %v1238_v10 = vunpack.c.l.b16 %v1132_v7  ;;  %v576_v13 = vsel %vm4095_vm7, %v571_v6, %v575_v59 }
  0x20   : > { %v1135_v14 = vsel %vm4067_vm3, %v1133_v8, %v1134_v5  ;;  %v685_v20 = vunpack.c.l.b16 %v576_v13  ;;  %v302_v23 = vrot.slane %v300_v11, 4  ;;  %v305_v26 = vrot.slane %v303_v16, 5  ;;  %v251_v16 = vld [vmem:[%s4063_s4 + $0xa8] sm:$0xf] }
  0x21   : > { %3660 = vmatmul.msk.bf16.vlgmr.msra.gmra.mxu0 %vm709_vm4, %v693_v2  ;;  %v586_v19 = vsel %vm4095_vm7, %v581_v9, %v585_v4  ;;  %v1239_v21 = vunpack.c.l.b16 %v1135_v14  ;;  %v4131_v27 = vshll.u32 %v226_v48, 16  ;;  %v4133_v28 = vshrl.u32 %v226_v48, 16  ;;  %v4149_v48 = vld [vmem:[%s4063_s4 + $0x18] sm:$0xe] }
  0x22   : > { %v686_v24 = vunpack.c.l.b16 %v586_v19  ;;  %v319_v31 = vshll.u32 %v257_v57, 16  ;;  %v588_v33 = vshrl.u32 %v249_v17, 16  ;;  %v591_v34 = vshll.u32 %v249_v17, 16  ;;  %v227_v2 = vld [vmem:[%s4063_s4 + $0x18] sm:$0xf] }
  0x23   : > { %v1269_v30 = vpack.c.b16 %v1239_v21, %v1238_v10  ;;  %v306_v36 = vor.u32 %v305_v26, %v302_v23  ;;  %v311_v39 = vrot.slane %v4131_v27, 5  ;;  %v315_v40 = vrot.slane %v4133_v28, 4  ;;  %v4179_v21 = vld [vmem:[%s4063_s4 + $0xac] sm:$0xf] }
  0x24   : > { %v705_v35 = vpack.c.b16 %v686_v24, %v685_v20  ;;  %v321_v43 = vrot.slane %v319_v31, 5  ;;  %v590_v44 = vrot.slane %v588_v33, 4  ;;  %v593_v45 = vrot.slane %v591_v34, 5  ;;  %v4185_v31 = vld [vmem:[%s4063_s4 + $0xb0] sm:$0x1] }
  0x25   : > { %3741 = vmatmul.msk.bf16.gmra.mxu1 %vm709_vm4, %v3893_v18  ;;  %v4146_v46 = vshll.u32 %v4136_v29, 16  ;;  %v307_v49 = vrot.slane %v306_v36, 4  ;;  %v316_v50 = vor.u32 %v315_v40, %v311_v39  ;;  %v4153_v52 = vshrl.u32 %v4136_v29, 16 }
  0x26   : > { %3672 = vmatmul.msk.bf16.vlgmr.msra.gmra.mxu3 %vm709_vm4, %v705_v35  ;;  %v607_v53 = vshll.u32 %v4139_v32, 16  ;;  %v594_v54 = vor.u32 %v593_v45, %v590_v44  ;;  %v1138_v57 = vrot.slane %v228_v42, 5  ;;  %v3758_v61 = vrot.slane %v4149_v48, 9 }
  0x27   : > { %5918 = vst [vmem:[#allocation4_spill] sm:$0xff] %v4146_v46  ;;  %v599_v55 = vrot.slane %v4146_v46, 5  ;;  %3910 = vmatpush.bf16.msra.mxu3 %v4034_v1  ;;  %v312_v58 = vsel %vm4095_vm7, %v307_v49, %v311_v39  ;;  %v317_v59 = vrot.slane %v316_v50, 4  ;;  %v603_v60 = vrot.slane %v4153_v52, 4  ;;  %v3894_v39 = vld [vmem:[%s4063_s4 + $0x18] sm:$0xff] }
  0x28   : > { %5919 = vst [vmem:[#allocation5_spill] sm:$0xff] %v4153_v52  ;;  %v663_v62 = vunpack.c.l.b16 %v312_v58  ;;  %v595_v63 = vrot.slane %v594_v54, 4  ;;  %v1140_v0 = vrot.slane %v1138_v57, 4  ;;  %v609_v1 = vrot.slane %v607_v53, 5  ;;  %v230_v54 = vld [vmem:[%s4063_s4 + $0x28] sm:$0xf] }
  0x29   : > { %v322_v3 = vsel %vm4095_vm7, %v317_v59, %v321_v43  ;;  %v604_v4 = vor.u32 %v603_v60, %v599_v55  ;;  %v1141_v5 = vrot.slane %v258_v56, 5  ;;  %v1139_v9 = vsel %vm4067_vm3, %v3758_v61, %v1138_v57  ;;  %v1074_v59 = vld [vmem:[%s4063_s4 + $0x24] sm:$0xe] }
  0x2a   : > { %v664_v6 = vunpack.c.l.b16 %v322_v3  ;;  %v600_v7 = vsel %vm4095_vm7, %v595_v63, %v599_v55  ;;  %v324_v10 = vshrl.u32 %v227_v2, 16  ;;  %v327_v19 = vshll.u32 %v227_v2, 16 }
  0x2b   : > { %v605_v8 = vrot.slane %v604_v4, 4  ;;  %v687_v13 = vunpack.c.l.b16 %v600_v7  ;;  %v1142_v14 = vsel %vm4067_vm3, %v1140_v0, %v1141_v5  ;;  %v4176_v20 = vshll.u32 %v228_v42, 16  ;;  %v259_v5 = vld [vmem:[%s4063_s4 + $0x2c] sm:$0x1]  ;;  %v229_v7 = vld [vmem:[%s4063_s4 + $0x24] sm:$0xf] }
  0x2c   : > { %3774 = vmatmul.msk.bf16.gmra.mxu2 %vm709_vm4, %v1269_v30  ;;  %v694_v11 = vpack.c.b16 %v664_v6, %v663_v62  ;;  %v326_v18 = vrot.slane %v324_v10, 4  ;;  %v1240_v24 = vunpack.c.l.b16 %v1139_v9  ;;  %v4182_v26 = vshrl.u32 %v228_v42, 16 }
  0x2d   : > { %v610_v17 = vsel %vm4095_vm7, %v605_v8, %v609_v1  ;;  %v343_v30 = vshll.u32 %v258_v56, 16  ;;  %v329_v33 = vrot.slane %v327_v19, 5  ;;  %v335_v34 = vrot.slane %v4176_v20, 5 }
  0x2e   : > { %v688_v23 = vunpack.c.l.b16 %v610_v17  ;;  %v612_v35 = vshrl.u32 %v251_v16, 16  ;;  %v615_v36 = vshll.u32 %v251_v16, 16  ;;  %v1241_v43 = vunpack.c.l.b16 %v1142_v14 }
  0x2f   : > { %v339_v44 = vrot.slane %v4182_v26, 4  ;;  %v4191_v45 = vshll.u32 %v4179_v21, 16  ;;  %v330_v42 = vor.u32 %v329_v33, %v326_v18  ;;  %v4194_v53 = vshrl.u32 %v4179_v21, 16 }
  0x30   : > { %v706_v40 = vpack.c.b16 %v688_v23, %v687_v13  ;;  %v614_v49 = vrot.slane %v612_v35, 4  ;;  %v617_v50 = vrot.slane %v615_v36, 5  ;;  %v345_v56 = vrot.slane %v343_v30, 5  ;;  %v4220_v36 = vld [vmem:[%s4063_s4 + $0xb8] sm:$0xf] }
  0x31   : > { %3661 = vmatmul.msk.bf16.gmra.mxu0 %vm709_vm4, %v694_v11  ;;  %5920 = vst [vmem:[#allocation6_spill] sm:$0xff] %v4191_v45  ;;  %v340_v55 = vor.u32 %v339_v44, %v335_v34  ;;  %v623_v57 = vrot.slane %v4191_v45, 5  ;;  %v631_v58 = vshll.u32 %v4185_v31, 16  ;;  %v331_v60 = vrot.slane %v330_v42, 4 }
  0x32   : > { %5921 = vst [vmem:[#allocation7_spill] sm:$0xff] %v4194_v53  ;;  %v618_v61 = vor.u32 %v617_v50, %v614_v49  ;;  %v627_v62 = vrot.slane %v4194_v53, 4  ;;  %v1270_v63 = vpack.c.b16 %v1241_v43, %v1240_v24  ;;  %v1145_v2 = vrot.slane %v230_v54, 5  ;;  %v253_v24 = vld [vmem:[%s4063_s4 + $0xb4] sm:$0xf] }
  0x33   : > { %v341_v0 = vrot.slane %v340_v55, 4  ;;  %v336_v3 = vsel %vm4095_vm7, %v331_v60, %v335_v34  ;;  %v3759_v6 = vrot.slane %v1074_v59, 9  ;;  %v633_v10 = vrot.slane %v631_v58, 5 }
  0x34   : > { %v619_v4 = vrot.slane %v618_v61, 4  ;;  %v628_v1 = vor.u32 %v627_v62, %v623_v57  ;;  %v665_v9 = vunpack.c.l.b16 %v336_v3  ;;  %v1147_v16 = vrot.slane %v1145_v2, 4 }
  0x35   : > { %3742 = vmatmul.msk.bf16.gmra.mxu1 %vm709_vm4, %v3894_v39  ;;  %v346_v8 = vsel %vm4095_vm7, %v341_v0, %v345_v56  ;;  %v1148_v17 = vrot.slane %v259_v5, 5  ;;  %v348_v18 = vshrl.u32 %v229_v7, 16  ;;  %v1146_v19 = vsel %vm4067_vm3, %v3759_v6, %v1145_v2  ;;  %v4236_v2 = vld [vmem:[%s4063_s4 + $0xbc] sm:$0x1] }
  0x36   : > { %3673 = vmatmul.msk.bf16.gmra.mxu3 %vm709_vm4, %v706_v40  ;;  %v666_v11 = vunpack.c.l.b16 %v346_v8  ;;  %v629_v13 = vrot.slane %v628_v1, 4  ;;  %v624_v14 = vsel %vm4095_vm7, %v619_v4, %v623_v57  ;;  %v351_v23 = vshll.u32 %v229_v7, 16  ;;  %v3895_v4 = vld [vmem:[%s4063_s4 + $0x24] sm:$0xff] }
  0x37   : > { %v350_v34 = vrot.slane %v348_v18, 4  ;;  %v4217_v35 = vshll.u32 %v230_v54, 16  ;;  %v689_v39 = vunpack.c.l.b16 %v624_v14  ;;  %v4222_v43 = vshrl.u32 %v230_v54, 16  ;;  %v231_v14 = vld [vmem:[%s4063_s4 + $0x30] sm:$0xf] }
  0x38   : > { %v695_v30 = vpack.c.b16 %v666_v11, %v665_v9  ;;  %v634_v33 = vsel %vm4095_vm7, %v629_v13, %v633_v10  ;;  %v353_v40 = vrot.slane %v351_v23, 5  ;;  %v367_v44 = vshll.u32 %v259_v5, 16  ;;  %v232_v13 = vld [vmem:[%s4063_s4 + $0x34] sm:$0xf]  ;;  %v4251_v23 = vld [vmem:[%s4063_s4 + $0x30] sm:$0xe] }
  0x39   : > { %v1149_v42 = vsel %vm4067_vm3, %v1147_v16, %v1148_v17  ;;  %v359_v49 = vrot.slane %v4217_v35, 5  ;;  %v636_v50 = vshrl.u32 %v253_v24, 16  ;;  %v639_v55 = vshll.u32 %v253_v24, 16 }
  0x3a   : > { %v690_v56 = vunpack.c.l.b16 %v634_v33  ;;  %v354_v57 = vor.u32 %v353_v40, %v350_v34  ;;  %v363_v58 = vrot.slane %v4222_v43, 4  ;;  %v4229_v59 = vshll.u32 %v4220_v36, 16 }
  0x3b   : > { %v638_v54 = vrot.slane %v636_v50, 4  ;;  %v641_v60 = vrot.slane %v639_v55, 5  ;;  %v4233_v61 = vshrl.u32 %v4220_v36, 16  ;;  %v369_v0 = vrot.slane %v367_v44, 5 }
  0x3c   : > { %3775 = vmatmul.msk.bf16.gmra.mxu2 %vm709_vm4, %v1270_v63  ;;  %5922 = vst [vmem:[#allocation8_spill] sm:$0xff] %v4229_v59  ;;  %v355_v62 = vrot.slane %v354_v57, 4  ;;  %v364_v63 = vor.u32 %v363_v58, %v359_v49  ;;  %v647_v3 = vrot.slane %v4229_v59, 5  ;;  %v1242_v1 = vunpack.c.l.b16 %v1146_v19 }
  0x3d   : > { %5923 = vst [vmem:[#allocation9_spill] sm:$0xff] %v4233_v61  ;;  %v1243_v5 = vunpack.c.l.b16 %v1149_v42  ;;  %v651_v6 = vrot.slane %v4233_v61, 4  ;;  %v707_v7 = vpack.c.b16 %v690_v56, %v689_v39  ;;  %v642_v9 = vor.u32 %v641_v60, %v638_v54  ;;  %v260_v42 = vld [vmem:[%s4063_s4 + $0x38] sm:$0x1] }
  0x3e   : > { %v365_v8 = vrot.slane %v364_v63, 4  ;;  %v655_v11 = vshll.u32 %v4236_v2, 16  ;;  %v360_v16 = vsel %vm4095_vm7, %v355_v62, %v359_v49  ;;  %v1152_v24 = vrot.slane %v232_v13, 5 }
  0x3f   : > { %v652_v10 = vor.u32 %v651_v6, %v647_v3  ;;  %v1271_v18 = vpack.c.b16 %v1243_v5, %v1242_v1  ;;  %v643_v19 = vrot.slane %v642_v9, 4  ;;  %v375_v33 = vshll.u32 %v231_v14, 16 }
  0x40   : > { %v370_v17 = vsel %vm4095_vm7, %v365_v8, %v369_v0  ;;  %v667_v34 = vunpack.c.l.b16 %v360_v16  ;;  %v657_v44 = vrot.slane %v655_v11, 5  ;;  %v4254_v55 = vshll.u32 %v232_v13, 16  ;;  %v233_v16 = vld [vmem:[%s4063_s4 + $0x3c] sm:$0xf] }
  0x41   : > { %3662 = vmatmul.msk.bf16.gmra.mxu0 %vm709_vm4, %v695_v30  ;;  %v372_v30 = vshrl.u32 %v231_v14, 16  ;;  %v668_v39 = vunpack.c.l.b16 %v370_v17  ;;  %v653_v40 = vrot.slane %v652_v10, 4  ;;  %v377_v50 = vrot.slane %v375_v33, 5  ;;  %v3896_v14 = vld [vmem:[%s4063_s4 + $0x30] sm:$0xff] }
  0x42   : > { %v3760_v56 = vrot.slane %v4251_v23, 9  ;;  %v4258_v57 = vshrl.u32 %v232_v13, 16  ;;  %v648_v58 = vsel %vm4095_vm7, %v643_v19, %v647_v3  ;;  %v1154_v54 = vrot.slane %v1152_v24, 4  ;;  %v234_v19 = vld [vmem:[%s4063_s4 + $0x40] sm:$0xf] }
  0x43   : > { %v374_v49 = vrot.slane %v372_v30, 4  ;;  %v1155_v60 = vrot.slane %v260_v42, 5  ;;  %v383_v62 = vrot.slane %v4254_v55, 5  ;;  %v696_v63 = vpack.c.b16 %v668_v39, %v667_v34 }
  0x44   : > { %v658_v0 = vsel %vm4095_vm7, %v653_v40, %v657_v44  ;;  %v387_v1 = vrot.slane %v4258_v57, 4  ;;  %v391_v5 = vshll.u32 %v260_v42, 16  ;;  %v1153_v3 = vsel %vm4067_vm3, %v3760_v56, %v1152_v24 }
  0x45   : > { %3743 = vmatmul.msk.bf16.gmra.mxu1 %vm709_vm4, %v3895_v4  ;;  %v378_v4 = vor.u32 %v377_v50, %v374_v49  ;;  %v692_v8 = vunpack.c.l.b16 %v658_v0  ;;  %v1156_v9 = vsel %vm4067_vm3, %v1154_v54, %v1155_v60  ;;  %v1244_v17 = vunpack.c.l.b16 %v1153_v3  ;;  %v4286_v54 = vld [vmem:[%s4063_s4 + $0x3c] sm:$0xe] }
  0x46   : > { %3674 = vmatmul.msk.bf16.gmra.mxu3 %vm709_vm4, %v707_v7  ;;  %v388_v6 = vor.u32 %v387_v1, %v383_v62  ;;  %v691_v7 = vunpack.c.l.b16 %v648_v58  ;;  %v393_v13 = vrot.slane %v391_v5, 5  ;;  %v396_v24 = vshrl.u32 %v233_v16, 16  ;;  %v261_v58 = vld [vmem:[%s4063_s4 + $0x44] sm:$0x1] }
  0x47   : > { %v379_v10 = vrot.slane %v378_v4, 4  ;;  %v399_v39 = vshll.u32 %v233_v16, 16  ;;  %v4279_v40 = vshll.u32 %v234_v19, 16  ;;  %v4281_v44 = vshrl.u32 %v234_v19, 16 }
  0x48   : > { %v389_v11 = vrot.slane %v388_v6, 4  ;;  %v708_v30 = vpack.c.b16 %v692_v8, %v691_v7  ;;  %v1159_v49 = vrot.slane %v234_v19, 5  ;;  %v398_v60 = vrot.slane %v396_v24, 4 }
  0x49   : > { %v384_v33 = vsel %vm4095_vm7, %v379_v10, %v383_v62  ;;  %v401_v62 = vrot.slane %v399_v39, 5  ;;  %v411_v0 = vrot.slane %v4281_v44, 4  ;;  %v3761_v4 = vrot.slane %v4286_v54, 9 }
  0x4a   : > { %v394_v34 = vsel %vm4095_vm7, %v389_v11, %v393_v13  ;;  %v669_v50 = vunpack.c.l.b16 %v384_v33  ;;  %v1161_v1 = vrot.slane %v1159_v49, 4  ;;  %v1162_v5 = vrot.slane %v261_v58, 5  ;;  %v236_v11 = vld [vmem:[%s4063_s4 + $0x4c] sm:$0xf]  ;;  %v235_v13 = vld [vmem:[%s4063_s4 + $0x48] sm:$0xf] }
  0x4b   : > { %v670_v56 = vunpack.c.l.b16 %v394_v34  ;;  %v402_v7 = vor.u32 %v401_v62, %v398_v60  ;;  %v415_v3 = vshll.u32 %v261_v58, 16  ;;  %v3904_v33 = vld [vmem:[%s4063_s4 + $0x90] sm:$0xff]  ;;  %v420_v24 = vshrl.u32 %v235_v13, 16  ;;  %v1077_v62 = vld [vmem:[%s4063_s4 + $0x48] sm:$0xe] }
  0x4c   : > { %3776 = vmatmul.msk.bf16.gmra.mxu2 %vm709_vm4, %v1271_v18  ;;  %v1245_v18 = vunpack.c.l.b16 %v1156_v9  ;;  %v1160_v9 = vsel %vm4067_vm3, %v3761_v4, %v1159_v49  ;;  %v1163_v10 = vsel %vm4067_vm3, %v1161_v1, %v1162_v5  ;;  %v423_v34 = vshll.u32 %v235_v13, 16  ;;  %v262_v58 = vld [vmem:[%s4063_s4 + $0x50] sm:$0x1] }
  0x4d   : > { %v697_v6 = vpack.c.b16 %v670_v56, %v669_v50  ;;  %v1246_v19 = vunpack.c.l.b16 %v1160_v9  ;;  %v4301_v39 = vshll.u32 %v236_v11, 16  ;;  %v1166_v60 = vrot.slane %v236_v11, 5 }
  0x4e   : > { %v1272_v42 = vpack.c.b16 %v1245_v18, %v1244_v17  ;;  %v417_v17 = vrot.slane %v415_v3, 5  ;;  %v3897_v18 = vld [vmem:[%s4063_s4 + $0x3c] sm:$0xff]  ;;  %v425_v4 = vrot.slane %v423_v34, 5  ;;  %v1476_v52 = vshrl.u32 %v4074_v15, 16 }
  0x4f   : > { %5924 = vst [vmem:[#allocation10_spill] sm:$0xff] %v4301_v39  ;;  %v431_v1 = vrot.slane %v4301_v39, 5  ;;  %v1168_v3 = vrot.slane %v1166_v60, 4  ;;  %vm2466_vm13 = vsmask.f32 1280  ;;  %vm2114_vm2 = vcmask 1045508  }
  0x50   : > { %vm2467_vm14 = vsmask.f32 5392 }
  0x51   : > { %3663 = vmatmul.msk.bf16.gmra.mxu0 %vm709_vm4, %v696_v63  ;;  %v407_v63 = vrot.slane %v4279_v40, 5 }
  0x53   : > { %v412_v8 = vor.u32 %v411_v0, %v407_v63  ;;  %v422_v0 = vrot.slane %v420_v24, 4  ;;  %v237_v24 = vld [vmem:[%s4063_s4 + $0x54] sm:$0xf] }
  0x55   : > { %3744 = vmatmul.msk.bf16.gmra.mxu1 %vm709_vm4, %v3896_v14  ;;  %v403_v14 = vrot.slane %v402_v7, 4  ;;  %v413_v16 = vrot.slane %v412_v8, 4  ;;  %v3762_v7 = vrot.slane %v1077_v62, 9  ;;  %v1169_v8 = vrot.slane %v262_v58, 5 }
  0x56   : > { %3675 = vmatmul.msk.bf16.gmra.mxu3 %vm709_vm4, %v708_v30  ;;  %v1247_v30 = vunpack.c.l.b16 %v1163_v10  ;;  %v426_v9 = vor.u32 %v425_v4, %v422_v0  ;;  %v447_v62 = vshll.u32 %v237_v24, 16 }
  0x57   : > { %v408_v49 = vsel %vm4095_vm7, %v403_v14, %v407_v63  ;;  %v418_v50 = vsel %vm4095_vm7, %v413_v16, %v417_v17  ;;  %v1167_v14 = vsel %vm4067_vm3, %v3762_v7, %v1166_v60  ;;  %v1170_v16 = vsel %vm4067_vm3, %v1168_v3, %v1169_v8  ;;  %v263_v7 = vld [vmem:[%s4063_s4 + $0x5c] sm:$0x1]  ;;  %v1078_v3 = vld [vmem:[%s4063_s4 + $0x54] sm:$0xe] }
  0x58   : > { %v1273_v56 = vpack.c.b16 %v1247_v30, %v1246_v19  ;;  %v672_v63 = vunpack.c.l.b16 %v418_v50  ;;  %v427_v17 = vrot.slane %v426_v9, 4  ;;  %v3898_v30 = vld [vmem:[%s4063_s4 + $0x48] sm:$0xff]  ;;  %v1248_v34 = vunpack.c.l.b16 %v1167_v14  ;;  %v3905_v50 = vld [vmem:[%s4063_s4 + $0x9c] sm:$0xff] }
  0x59   : > { %v444_v60 = vshrl.u32 %v237_v24, 16  ;;  %v449_v9 = vrot.slane %v447_v62, 5  ;;  %v240_v62 = vld [vmem:[%s4063_s4 + $0x64] sm:$0xf] }
  0x5c   : > { %3777 = vmatmul.msk.bf16.gmra.mxu2 %vm709_vm4, %v1272_v42  ;;  %v4303_v42 = vshrl.u32 %v236_v11, 16  ;;  %v439_v11 = vshll.u32 %v262_v58, 16 }
  0x5e   : > { %5925 = vst [vmem:[#allocation11_spill] sm:$0xff] %v4303_v42  ;;  %v435_v5 = vrot.slane %v4303_v42, 4  ;;  %v441_v19 = vrot.slane %v439_v11, 5 }
  0x60   : > { %v436_v10 = vor.u32 %v435_v5, %v431_v1 }
  0x61   : > { %3664 = vmatmul.msk.bf16.gmra.mxu0 %vm709_vm4, %v697_v6  ;;  %v671_v6 = vunpack.c.l.b16 %v408_v49  ;;  %v1249_v49 = vunpack.c.l.b16 %v1170_v16  ;;  %v1176_v16 = vrot.slane %v263_v7, 5 }
  0x63   : > { %v698_v13 = vpack.c.b16 %v672_v63, %v671_v6  ;;  %v1274_v5 = vpack.c.b16 %v1249_v49, %v1248_v34 }
  0x65   : > { %3745 = vmatmul.msk.bf16.gmra.mxu1 %vm709_vm4, %v3897_v18  ;;  %v437_v18 = vrot.slane %v436_v10, 4 }
  0x66   : > { %3752 = vmatmul.msk.bf16.vlgmr.msrb.gmra.mxu3 %vm709_vm4, %v3904_v33  ;;  %v238_v33 = vld [vmem:[%s4063_s4 + $0x58] sm:$0xf] }
  0x67   : > { %v442_v58 = vsel %vm4095_vm7, %v437_v18, %v441_v19  ;;  %v4329_v0 = vshll.u32 %v238_v33, 16  ;;  %v4331_v4 = vshrl.u32 %v238_v33, 16  ;;  %v1173_v8 = vrot.slane %v238_v33, 5 }
  0x68   : > { %v674_v63 = vunpack.c.l.b16 %v442_v58 }
  0x69   : > { %5926 = vst [vmem:[#allocation12_spill] sm:$0xff] %v4329_v0  ;;  %v455_v10 = vrot.slane %v4329_v0, 5  ;;  %v459_v11 = vrot.slane %v4331_v4, 4  ;;  %v1175_v14 = vrot.slane %v1173_v8, 4 }
  0x6a   : > { %5927 = vst [vmem:[#allocation13_spill] sm:$0xff] %v4331_v4 }
  0x6b   : > { %v460_v19 = vor.u32 %v459_v11, %v455_v10  ;;  %v1177_v24 = vsel %vm4067_vm3, %v1175_v14, %v1176_v16  ;;  %v3789_v14 = vld [vmem:[%s5869_s1 + $0xc] sm:$0xf] }
  0x6c   : > { %3778 = vmatmul.msk.bf16.gmra.mxu2 %vm709_vm4, %v1273_v56  ;;  %v432_v56 = vsel %vm4095_vm7, %v427_v17, %v431_v1  ;;  %v446_v1 = vrot.slane %v444_v60, 4  ;;  %v1251_v60 = vunpack.c.l.b16 %v1177_v24 }
  0x6d   : > { %v673_v6 = vunpack.c.l.b16 %v432_v56  ;;  %v461_v49 = vrot.slane %v460_v19, 4  ;;  %v3899_v56 = vld [vmem:[%s4063_s4 + $0x54] sm:$0xff]  ;;  %v1942_v19 = vsel %vm758_vm0, %v3789_v14, 0  ;;  %v241_v14 = vld [vmem:[%s4063_s4 + $0x6c] sm:$0xf]  ;;  %vm4559_vm0 = vmor %vm2466_vm13, %vm2467_vm14 }
  0x6e   : > { %v450_v18 = vor.u32 %v449_v9, %v446_v1  ;;  %v4354_v1 = vshll.u32 %v240_v62, 16  ;;  %v4356_v9 = vshrl.u32 %v240_v62, 16  ;;  %1951 = vmatpush.bf16.msrb.mxu3 %v1942_v19  ;;  %v242_v19 = vld [vmem:[%s4063_s4 + $0x70] sm:$0xf] }
  0x6f   : > { %v699_v17 = vpack.c.b16 %v674_v63, %v673_v6  ;;  %v3906_v6 = vld [vmem:[%s4063_s4 + $0xa8] sm:$0xff] }
  0x70   : > { %v451_v34 = vrot.slane %v450_v18, 4  ;;  %5928 = vst [vmem:[#allocation14_spill] sm:$0xff] %v4354_v1  ;;  %v1079_v18 = vld [vmem:[%s4063_s4 + $0x60] sm:$0xe]  ;;  %v479_v24 = vrot.slane %v4354_v1, 5  ;;  %v2501_v1 = vrot.slane %v4133_v28, 6 }
  0x71   : > { %3665 = vmatmul.msk.bf16.gmra.mxu0 %vm709_vm4, %v698_v13  ;;  %v3763_v13 = vrot.slane %v1078_v3, 9  ;;  %5929 = vst [vmem:[#allocation15_spill] sm:$0xff] %v4356_v9 }
  0x72   : > { %v456_v63 = vsel %vm4095_vm7, %v451_v34, %v455_v10  ;;  %v483_v34 = vrot.slane %v4356_v9, 4  ;;  %v2502_v9 = vrot.slane %v4131_v27, 7 }
  0x73   : > { %v1174_v33 = vsel %vm4067_vm3, %v3763_v13, %v1173_v8  ;;  %v1180_v13 = vrot.slane %v240_v62, 5  ;;  %v675_v10 = vunpack.c.l.b16 %v456_v63 }
  0x74   : > { %v1250_v58 = vunpack.c.l.b16 %v1174_v33  ;;  %v484_v62 = vor.u32 %v483_v34, %v479_v24  ;;  %v495_v34 = vshll.u32 %v241_v14, 16  ;;  %v2503_v42 = vor.u32 %v2502_v9, %v2501_v1 }
  0x75   : > { %3746 = vmatmul.msk.bf16.gmra.mxu1 %vm709_vm4, %v3898_v30  ;;  %v463_v30 = vshll.u32 %v263_v7, 16 }
  0x76   : > { %3753 = vmatmul.msk.bf16.gmra.mxu3 %vm709_vm4, %v3905_v50  ;;  %v1275_v11 = vpack.c.b16 %v1251_v60, %v1250_v58 }
  0x77   : > { %v465_v50 = vrot.slane %v463_v30, 5 }
  0x79   : > { %v466_v7 = vsel %vm4095_vm7, %v461_v49, %v465_v50  ;;  %v3764_v49 = vrot.slane %v1079_v18, 9  ;;  %v1182_v50 = vrot.slane %v1180_v13, 4 }
  0x7a   : > { %v676_v16 = vunpack.c.l.b16 %v466_v7 }
  0x7c   : > { %3779 = vmatmul.msk.bf16.gmra.mxu2 %vm709_vm4, %v1274_v5  ;;  %v239_v5 = vld [vmem:[%s4063_s4 + $0x60] sm:$0xf]  ;;  %v700_v58 = vpack.c.b16 %v676_v16, %v675_v10 }
  0x7d   : > { %v468_v8 = vshrl.u32 %v239_v5, 16  ;;  %v471_v3 = vshll.u32 %v239_v5, 16 }
  0x7f   : > { %v470_v30 = vrot.slane %v468_v8, 4  ;;  %v473_v33 = vrot.slane %v471_v3, 5  ;;  %v485_v8 = vrot.slane %v484_v62, 4 }
  0x81   : > { %3666 = vmatmul.msk.bf16.gmra.mxu0 %vm709_vm4, %v699_v17  ;;  %v264_v17 = vld [vmem:[%s4063_s4 + $0x68] sm:$0x1]  ;;  %v474_v60 = vor.u32 %v473_v33, %v470_v30  ;;  %v3907_v30 = vld [vmem:[%s4063_s4 + $0xb4] sm:$0xff]  ;;  %v1083_v33 = vld [vmem:[%s4063_s4 + $0x90] sm:$0xe] }
  0x82   : > { %v487_v5 = vshll.u32 %v264_v17, 16  ;;  %v3768_v62 = vrot.slane %v1083_v33, 9 }
  0x83   : > { %v475_v7 = vrot.slane %v474_v60, 4 }
  0x84   : > { %v489_v3 = vrot.slane %v487_v5, 5 }
  0x85   : > { %3747 = vmatmul.msk.bf16.gmra.mxu1 %vm709_vm4, %v3899_v56  ;;  %v1183_v56 = vrot.slane %v264_v17, 5  ;;  %v1208_v17 = vrot.slane %v4092_v37, 5  ;;  %v1211_v37 = vrot.slane %v4100_v41, 5 }
  0x86   : > { %3754 = vmatmul.msk.bf16.gmra.mxu3 %vm709_vm4, %v3906_v6  ;;  %v1181_v6 = vsel %vm4067_vm3, %v3764_v49, %v1180_v13  ;;  %v492_v13 = vshrl.u32 %v241_v14, 16  ;;  %v480_v49 = vsel %vm4095_vm7, %v475_v7, %v479_v24  ;;  %v265_v24 = vld [vmem:[%s4063_s4 + $0x74] sm:$0x1]  ;;  %v1080_v7 = vld [vmem:[%s4063_s4 + $0x6c] sm:$0xe] }
  0x87   : > { %v1184_v63 = vsel %vm4067_vm3, %v1182_v50, %v1183_v56  ;;  %v1252_v18 = vunpack.c.l.b16 %v1181_v6  ;;  %v490_v50 = vsel %vm4095_vm7, %v485_v8, %v489_v3  ;;  %v4384_v56 = vshll.u32 %v242_v19, 16 }
  0x88   : > { %v1253_v10 = vunpack.c.l.b16 %v1184_v63  ;;  %v1210_v5 = vrot.slane %v1208_v17, 4  ;;  %v1187_v6 = vrot.slane %v242_v19, 5  ;;  %v677_v63 = vunpack.c.l.b16 %v480_v49 }
  0x89   : > { %5930 = vst [vmem:[#allocation16_spill] sm:$0xff] %v4384_v56  ;;  %v678_v14 = vunpack.c.l.b16 %v490_v50  ;;  %v494_v59 = vrot.slane %v492_v13, 4  ;;  %v497_v8 = vrot.slane %v495_v34, 5  ;;  %v503_v3 = vrot.slane %v4384_v56, 5 }
  0x8a   : > { %v1276_v60 = vpack.c.b16 %v1253_v10, %v1252_v18  ;;  %v3765_v10 = vrot.slane %v1080_v7, 9  ;;  %v1189_v41 = vrot.slane %v1187_v6, 4  ;;  %v1190_v61 = vrot.slane %v265_v24, 5 }
  0x8b   : > { %v1212_v33 = vsel %vm4067_vm3, %v1210_v5, %v1211_v37  ;;  %v498_v13 = vor.u32 %v497_v8, %v494_v59  ;;  %v511_v45 = vshll.u32 %v265_v24, 16  ;;  %v243_v24 = vld [vmem:[%s4063_s4 + $0x78] sm:$0xf] }
  0x8c   : > { %3780 = vmatmul.msk.bf16.gmra.mxu2 %vm709_vm4, %v1275_v11  ;;  %v3900_v11 = vld [vmem:[%s4063_s4 + $0x60] sm:$0xff]  ;;  %v1261_v7 = vunpack.c.l.b16 %v1212_v33 }
  0x8d   : > { %v499_v59 = vrot.slane %v498_v13, 4  ;;  %v513_v5 = vrot.slane %v511_v45, 5 }
  0x91   : > { %3667 = vmatmul.msk.bf16.gmra.mxu0 %vm709_vm4, %v700_v58  ;;  %v4386_v58 = vshrl.u32 %v242_v19, 16  ;;  %v1209_v19 = vsel %vm4067_vm3, %v3768_v62, %v1208_v17  ;;  %v1191_v17 = vsel %vm4067_vm3, %v1189_v41, %v1190_v61  ;;  %v504_v61 = vsel %vm4095_vm7, %v499_v59, %v503_v3  ;;  %v266_v59 = vld [vmem:[%s4063_s4 + $0x80] sm:$0x1] }
  0x92   : > { %v991_v16 = vpop.f32.mrf.mxu1  ;;  %v1260_v53 = vunpack.c.l.b16 %v1209_v19  ;;  %v244_v19 = vld [vmem:[%s4063_s4 + $0x7c] sm:$0xf]  ;;  %v519_v41 = vshll.u32 %v243_v24, 16 }
  0x93   : > { %5931 = vst [vmem:[#allocation17_spill] sm:$0xff] %v4386_v58 }
  0x94   : > { %v1280_v33 = vpack.c.b16 %v1261_v7, %v1260_v53  ;;  %v4418_v53 = vshrl.u32 %v244_v19, 16  ;;  %v1194_v7 = vrot.slane %v244_v19, 5 }
  0x95   : > { %3748 = vmatmul.msk.bf16.gmra.mxu1 %vm709_vm4, %v3900_v11  ;;  %v507_v11 = vrot.slane %v4386_v58, 4 }
  0x96   : > { %3755 = vmatmul.msk.bf16.gmra.mxu3 %vm709_vm4, %v3907_v30  ;;  %v701_v30 = vpack.c.b16 %v678_v14, %v677_v63  ;;  %v1188_v63 = vsel %vm4067_vm3, %v3765_v10, %v1187_v6  ;;  %v3901_v14 = vld [vmem:[%s4063_s4 + $0x6c] sm:$0xff]  ;;  %v1215_v6 = vrot.slane %v4136_v29, 5  ;;  %v516_v10 = vshrl.u32 %v243_v24, 16  ;;  %5934 = vst [vmem:[#allocation20_spill] sm:$0xff] %v4418_v53  ;;  %v1081_v24 = vld [vmem:[%s4063_s4 + $0x78] sm:$0xe] }
  0x97   : > { %v508_v50 = vor.u32 %v507_v11, %v503_v3  ;;  %v1254_v8 = vunpack.c.l.b16 %v1188_v63  ;;  %v679_v3 = vunpack.c.l.b16 %v504_v61  ;;  %v1197_v61 = vrot.slane %v266_v59, 5 }
  0x98   : > { %v1217_v63 = vrot.slane %v1215_v6, 4 }
  0x99   : > { %v509_v37 = vrot.slane %v508_v50, 4 }
  0x9a   : > { %v993_v18 = vpop.f32.mrf.mxu1 }
  0x9b   : > { %v514_v45 = vsel %vm4095_vm7, %v509_v37, %v513_v5  ;;  %v518_v5 = vrot.slane %v516_v10, 4  ;;  %v535_v10 = vshll.u32 %v266_v59, 16 }
  0x9c   : > { %3781 = vmatmul.msk.bf16.gmra.mxu2 %vm709_vm4, %v1276_v60  ;;  %v680_v37 = vunpack.c.l.b16 %v514_v45  ;;  %v4437_v45 = vrot.slane %v1476_v52, 5  ;;  %v1484_v52 = vrot.slane %v4082_v25, 5 }
  0x9d   : > { %v537_v59 = vrot.slane %v535_v10, 5  ;;  %v1225_v10 = vrot.slane %v4185_v31, 5 }
  0x9e   : > { %v771_v34 = vpop.f32.mrf.mxu0 }
  0x9f   : > { %v1344_v49 = vpop.f32.mrf.mxu2  ;;  %v992_v60 = vadd.f32 %v991_v16, %v771_v34  ;;  %v1255_v16 = vunpack.c.l.b16 %v1191_v17  ;;  %v1084_v34 = vld [vmem:[%s4063_s4 + $0x9c] sm:$0xe]  ;;  %v1218_v17 = vrot.slane %v4139_v32, 5 }
  0xa1   : > { %v4403_v62 = vadd.f32 %v1344_v49, %v992_v60  ;;  %3668 = vmatmul.msk.bf16.gmra.mxu0 %vm709_vm4, %v701_v30  ;;  %v4416_v49 = vshll.u32 %v244_v19, 16  ;;  %v1277_v29 = vpack.c.b16 %v1255_v16, %v1254_v8  ;;  %v3769_v60 = vrot.slane %v1084_v34, 9 }
  0xa2   : > { %v996_v11 = vpop.f32.mrf.mxu1  ;;  %v531_v16 = vrot.slane %v4418_v53, 4  ;;  %v1196_v34 = vrot.slane %v1194_v7, 4 }
  0xa3   : > { %5932 = vst [vmem:[#allocation18_spill] sm:$0xff] %v4403_v62  ;;  %v527_v8 = vrot.slane %v4416_v49, 5 }
  0xa4   : > { %5933 = vst [vmem:[#allocation19_spill] sm:$0xff] %v4416_v49 }
  0xa5   : > { %3749 = vmatmul.msk.bf16.gmra.mxu1 %vm709_vm4, %v3901_v14  ;;  %v521_v14 = vrot.slane %v519_v41, 5  ;;  %v702_v41 = vpack.c.b16 %v680_v37, %v679_v3  ;;  %v532_v51 = vor.u32 %v531_v16, %v527_v8  ;;  %v245_v37 = vld [vmem:[%s4063_s4 + $0x84] sm:$0xf] }
  0xa6   : > { %v773_v30 = vpop.f32.mrf.mxu0  ;;  %3785 = vmatmul.msk.bf16.vlgmr.msra.gmra.mxu3 %vm709_vm4, %v1280_v33  ;;  %v3766_v33 = vrot.slane %v1081_v24, 9  ;;  %v1085_v24 = vld [vmem:[%s4063_s4 + $0xa8] sm:$0xe] }
  0xa7   : > { %v1346_v13 = vpop.f32.mrf.mxu2  ;;  %v994_v50 = vadd.f32 %v993_v18, %v773_v30  ;;  %v1479_v18 = vshll.u32 %v4074_v15, 16  ;;  %v1216_v30 = vsel %vm4067_vm3, %v3769_v60, %v1215_v6  ;;  %v1219_v15 = vsel %vm4067_vm3, %v1217_v63, %v1218_v17 }
  0xa8   : > { %v1195_v3 = vsel %vm4067_vm3, %v3766_v33, %v1194_v7  ;;  %v1198_v6 = vsel %vm4067_vm3, %v1196_v34, %v1197_v61  ;;  %v1222_v60 = vrot.slane %v4179_v21, 5  ;;  %v1262_v63 = vunpack.c.l.b16 %v1216_v30  ;;  %v3902_v34 = vld [vmem:[%s4063_s4 + $0x78] sm:$0xff]  ;;  %v267_v61 = vld [vmem:[%s4063_s4 + $0x8c] sm:$0x1]  ;;  %v1082_v21 = vld [vmem:[%s4063_s4 + $0x84] sm:$0xe] }
  0xa9   : > { %v4424_v46 = vadd.f32 %v1346_v13, %v994_v50  ;;  %v4430_v19 = vpop.f32.mrf.mxu3  ;;  %v522_v13 = vor.u32 %v521_v14, %v518_v5  ;;  %v4439_v50 = vrot.slane %v1479_v18, 6  ;;  %v1263_v17 = vunpack.c.l.b16 %v1219_v15 }
  0xaa   : > { %v998_v32 = vpop.f32.mrf.mxu1  ;;  %v3770_v7 = vrot.slane %v1085_v24, 9  ;;  %v1256_v18 = vunpack.c.l.b16 %v1195_v3  ;;  %v1257_v16 = vunpack.c.l.b16 %v1198_v6  ;;  %v533_v33 = vrot.slane %v532_v51, 4 }
  0xab   : > { %5935 = vst [vmem:[#allocation21_spill] sm:$0xff] %v4424_v46  ;;  %v246_v46 = vld [vmem:[%s4063_s4 + $0x88] sm:$0xf]  ;;  %v1224_v30 = vrot.slane %v1222_v60, 4  ;;  %v540_v15 = vshrl.u32 %v245_v37, 16  ;;  %v3767_v3 = vrot.slane %v1082_v21, 9  ;;  %v1482_v53 = vor.u32 %v4439_v50, %v4437_v45 }
  0xac   : > { %3782 = vmatmul.msk.bf16.gmra.mxu2 %vm709_vm4, %v1277_v29  ;;  %v1201_v14 = vrot.slane %v246_v46, 5  ;;  %v4462_v24 = vshrl.u32 %v246_v46, 16  ;;  %v1278_v58 = vpack.c.b16 %v1257_v16, %v1256_v18 }
  0xae   : > { %v776_v29 = vpop.f32.mrf.mxu0  ;;  %5938 = vst [vmem:[#allocation24_spill] sm:$0xff] %v4462_v24  ;;  %v1203_v6 = vrot.slane %v1201_v14, 4 }
  0xaf   : > { %v1349_v47 = vpop.f32.mrf.mxu2  ;;  %v997_v62 = vadd.f32 %v996_v11, %v776_v29  ;;  %v523_v11 = vrot.slane %v522_v13, 4  ;;  %v4460_v13 = vshll.u32 %v246_v46, 16  ;;  %v1223_v46 = vsel %vm4067_vm3, %v3770_v7, %v1222_v60 }
  0xb0   : > { %v1264_v60 = vunpack.c.l.b16 %v1223_v46  ;;  %v559_v7 = vshll.u32 %v267_v61, 16 }
  0xb1   : > { %v4450_v5 = vadd.f32 %v1349_v47, %v997_v62  ;;  %3669 = vmatmul.msk.bf16.gmra.mxu0 %vm709_vm4, %v702_v41  ;;  %v4456_v29 = vpop.f32.mrf.mxu3  ;;  %v543_v47 = vshll.u32 %v245_v37, 16  ;;  %v1485_v62 = vrot.slane %v4078_v22, 6  ;;  %v1281_v41 = vpack.c.b16 %v1263_v17, %v1262_v63  ;;  %5937 = vst [vmem:[#allocation23_spill] sm:$0xff] %v4460_v13 }
  0xb2   : > { %v1001_v49 = vpop.f32.mrf.mxu1  ;;  %v528_v51 = vsel %vm4095_vm7, %v523_v11, %v527_v8  ;;  %v538_v37 = vsel %vm4095_vm7, %v533_v33, %v537_v59  ;;  %v1226_v8 = vsel %vm4067_vm3, %v1224_v30, %v1225_v10  ;;  %v542_v17 = vrot.slane %v540_v15, 4 }
  0xb3   : > { %5936 = vst [vmem:[#allocation22_spill] sm:$0xff] %v4450_v5  ;;  %v1204_v5 = vrot.slane %v267_v61, 5  ;;  %v545_v11 = vrot.slane %v543_v47, 5  ;;  %v4475_v21 = vor.u32 %v1485_v62, %v1484_v52  ;;  %v681_v45 = vunpack.c.l.b16 %v528_v51  ;;  %v4495_v51 = vld [vmem:[%s4063_s4 + $0x8] sm:$0x3] }
  0xb4   : > { %v551_v50 = vrot.slane %v4460_v13, 5  ;;  %v555_v59 = vrot.slane %v4462_v24, 4  ;;  %v682_v16 = vunpack.c.l.b16 %v538_v37  ;;  %v1265_v52 = vunpack.c.l.b16 %v1226_v8  ;;  %v4498_v61 = vld [vmem:[%s4063_s4 + $0xc] sm:$0xe]  ;;  %v4513_v37 = vld [vmem:[%s4063_s4 + $0x4] sm:$0xf] }
  0xb5   : > { %3750 = vmatmul.msk.bf16.gmra.mxu1 %vm709_vm4, %v3902_v34  ;;  %v1483_v33 = vrot.slane %v1482_v53, 4  ;;  %v546_v15 = vor.u32 %v545_v11, %v542_v17  ;;  %v561_v17 = vrot.slane %v559_v7, 5 }
  0xb6   : > { %v778_v56 = vpop.f32.mrf.mxu0  ;;  %3786 = vmatmul.msk.bf16.gmra.mxu3 %vm709_vm4, %v1281_v41  ;;  %v556_v41 = vor.u32 %v555_v59, %v551_v50  ;;  %v1282_v8 = vpack.c.b16 %v1265_v52, %v1264_v60  ;;  %v3112_v60 = vrot.slane %v4513_v37, 7  ;;  %v3059_v52 = vld [vmem:[%s4063_s4] sm:$0x8] }
  0xb7   : > { %v1351_v31 = vpop.f32.mrf.mxu2  ;;  %v999_v63 = vadd.f32 %v998_v32, %v778_v56  ;;  %v1202_v56 = vsel %vm4067_vm3, %v3767_v3, %v1201_v14  ;;  %v1205_v32 = vsel %vm4067_vm3, %v1203_v6, %v1204_v5  ;;  %v1488_v14 = vrot.slane %v4475_v21, 4  ;;  %v1086_v5 = vld [vmem:[%s4063_s4 + $0xb4] sm:$0xe] }
  0xb8   : > { %v1258_v47 = vunpack.c.l.b16 %v1202_v56  ;;  %v1259_v62 = vunpack.c.l.b16 %v1205_v32  ;;  %v703_v3 = vpack.c.b16 %v682_v16, %v681_v45  ;;  %v1490_v6 = vshrl.u32 %v4495_v51, 16  ;;  %v4507_v16 = vld [vmem:[%s4063_s4] sm:$0xc] }
  0xb9   : > { %v4480_v18 = vadd.f32 %v1351_v31, %v999_v63  ;;  %v4487_v30 = vpop.f32.mrf.mxu3  ;;  %v547_v59 = vrot.slane %v546_v15, 4  ;;  %v3771_v56 = vrot.slane %v1086_v5, 9  ;;  %v1229_v45 = vrot.slane %v4220_v36, 5 }
  0xba   : > { %v4490_v10 = vpop.f32.mrf.mxu1  ;;  %v1279_v32 = vpack.c.b16 %v1259_v62, %v1258_v47  ;;  %v557_v53 = vrot.slane %v556_v41, 4  ;;  %v1492_v34 = vrot.slane %v1490_v6, 5  ;;  %v1232_v36 = vrot.slane %v4236_v2, 5 }
  0xbb   : > { %5939 = vst [vmem:[#allocation25_spill] sm:$0xff] %v4480_v18  ;;  %v2470_v47 = vshrl.u32 %v4507_v16, 16  ;;  %v2473_v62 = vshll.u32 %v4507_v16, 16  ;;  %v4531_v6 = vsel %vm4067_vm3, %v3771_v56, %v1229_v45  ;;  %v1231_v2 = vrot.slane %v1229_v45, 4 }
  0xbc   : > { %3783 = vmatmul.msk.bf16.gmra.mxu2 %vm709_vm4, %v1278_v58  ;;  %v1493_v58 = vshll.u32 %v4495_v51, 16 }
  0xbe   : > { %v781_v46 = vpop.f32.mrf.mxu0  ;;  %v1495_v31 = vrot.slane %v1493_v58, 6  ;;  %v1487_v58 = vsel %vm4519_vm10, %v1483_v33, %v4475_v21  ;;  %v2472_v21 = vrot.slane %v2470_v47, 6  ;;  %v2475_v33 = vrot.slane %v2473_v62, 7 }
  0xbf   : > { %v1354_v63 = vpop.f32.mrf.mxu2  ;;  %v1002_v11 = vadd.f32 %v1001_v49, %v781_v46  ;;  %v3903_v49 = vld [vmem:[%s4063_s4 + $0x84] sm:$0xff] }
  0xc0   : > { %v1496_v15 = vor.u32 %v1495_v31, %v1492_v34  ;;  %v562_v34 = vsel %vm4095_vm7, %v557_v53, %v561_v17  ;;  %v2450_v31 = vld [vmem:[%s4063_s4 + $0x8] sm:$0x7] }
  0xc1   : > { %v4509_v18 = vadd.f32 %v1354_v63, %v1002_v11  ;;  %3670 = vmatmul.msk.bf16.gmra.mxu0 %vm709_vm4, %v703_v3  ;;  %v4525_v41 = vpop.f32.mrf.mxu3  ;;  %v552_v3 = vsel %vm4095_vm7, %v547_v59, %v551_v50  ;;  %v1845_v63 = vunpack.c.l.b16 %v1487_v58  ;;  %v3856_v50 = vrot.slane %v3059_v52, 11 }
  0xc2   : > { %v1006_v5 = vpop.f32.mrf.mxu1  ;;  %v1497_v46 = vsel %vm4519_vm10, %v1488_v14, %v1496_v15  ;;  %v3114_v11 = vrot.slane %v3112_v60, 4  ;;  %v3115_v53 = vrot.slane %v2450_v31, 7  ;;  %v2478_v14 = vrot.slane %v4082_v25, 6 }
  0xc3   : > { %5940 = vst [vmem:[#allocation26_spill] sm:$0xff] %v4509_v18  ;;  %v1846_v59 = vunpack.c.l.b16 %v1497_v46  ;;  %v683_v45 = vunpack.c.l.b16 %v552_v3  ;;  %v2484_v15 = vshrl.u32 %v2450_v31, 16  ;;  %v2487_v47 = vshll.u32 %v2450_v31, 16 }
  0xc4   : > { %v1233_v58 = vsel %vm4067_vm3, %v1231_v2, %v1232_v36  ;;  %v2118_v46 = vrot.slane %v4513_v37, 6  ;;  %v3113_v36 = vsel %vm4549_vm15, %v3856_v50, %v3112_v60  ;;  %v3116_v2 = vsel %vm4549_vm15, %v3114_v11, %v3115_v53  ;;  %vm4583_vm3 = vmor %vm2113_vm1, %vm2114_vm2 }
  0xc5   : > { %3751 = vmatmul.msk.bf16.gmra.mxu1 %vm709_vm4, %v3903_v49  ;;  %v4543_v17 = vpack.c.b16 %v1846_v59, %v1845_v63  ;;  %v2476_v49 = vor.u32 %v2475_v33, %v2472_v21  ;;  %v2486_v59 = vrot.slane %v2484_v15, 6  ;;  %v2489_v31 = vrot.slane %v2487_v47, 7 }
  0xc6   : > { %v783_v56 = vpop.f32.mrf.mxu0  ;;  %3787 = vmatmul.msk.bf16.gmra.mxu3 %vm709_vm4, %v1282_v8  ;;  %v5948_v8 = vrot.slane %v4078_v22, 7  ;;  %v2120_v60 = vrot.slane %v2118_v46, 4  ;;  %v2121_v50 = vrot.slane %v4495_v51, 6 }
  0xc7   : > { %v1356_v18 = vpop.f32.mrf.mxu2  ;;  %v1004_v38 = vadd.f32 %v4490_v10, %v783_v56  ;;  %v684_v10 = vunpack.c.l.b16 %v562_v34  ;;  %v2477_v63 = vrot.slane %v2476_v49, 4  ;;  %v2490_v21 = vor.u32 %v2489_v31, %v2486_v59 }
  0xc8   : > { %v2480_v3 = vor.u32 %v5948_v8, %v2478_v14  ;;  %v1267_v14 = vunpack.c.l.b16 %v1233_v58  ;;  %v3224_v8 = vunpack.c.l.b16 %v3113_v36  ;;  %v5952_v58 = vshll.u32 %v4498_v61, 16  ;;  %v4606_v36 = vld [vmem:[%s4063_s4 + $0xc] sm:$0xc] }
  0xc9   : > { %v4553_v62 = vadd.f32 %v1356_v18, %v1004_v38  ;;  %v3939_v18 = vld [vmem:[%s4063_s4 + $0x18] sm:$0xe]  ;;  %v4567_v34 = vpop.f32.mrf.mxu3  ;;  %v704_v33 = vpack.c.b16 %v684_v10, %v683_v45  ;;  %v1266_v38 = vunpack.c.l.b16 %v4531_v6  ;;  %v3225_v45 = vunpack.c.l.b16 %v3116_v2 }
  0xca   : > { %v1525_v56 = vshll.u32 %v3939_v18, 16  ;;  %v1008_v12 = vpop.f32.mrf.mxu1  ;;  %v2482_v22 = vrot.slane %v2480_v3, 4  ;;  %v2481_v37 = vsel %vm4559_vm0, %v2477_v63, %v2480_v3  ;;  %v5951_v10 = vshrl.u32 %v4498_v61, 16  ;;  %v4603_v18 = vld [vmem:[%s4063_s4 + $0x14] sm:$0x3] }
  0xcb   : > { %5945 = vst [vmem:[#allocation27_spill] sm:$0xff] %v4553_v62  ;;  %v2839_v53 = vunpack.c.l.b16 %v2481_v37  ;;  %v1504_v3 = vrot.slane %v5952_v58, 6  ;;  %v2122_v61 = vsel %vm4583_vm3, %v2120_v60, %v2121_v50  ;;  %v4614_v37 = vld [vmem:[%s4063_s4 + $0x10] sm:$0xf]  ;;  %v1513_v60 = vshrl.u32 %v4603_v18, 16 }
  0xcc   : > { %3784 = vmatmul.msk.bf16.gmra.mxu2 %vm709_vm4, %v1279_v32  ;;  %v3806_v32 = vrot.slane %v4507_v16, 10  ;;  %v2491_v11 = vsel %vm4559_vm0, %v2482_v22, %v2490_v21  ;;  %v4589_v51 = vrot.slane %v5951_v10, 5  ;;  %v4597_v59 = vrot.slane %v1525_v56, 6  ;;  %v3060_v22 = vld [vmem:[%s4063_s4 + $0xc] sm:$0x8] }
  0xcd   : > { %v2840_v6 = vunpack.c.l.b16 %v2491_v11  ;;  %v3119_v56 = vrot.slane %v4614_v37, 7  ;;  %v4618_v21 = vld [vmem:[%s4063_s4 + $0x24] sm:$0xe]  ;;  %v2451_v10 = vld [vmem:[%s4063_s4 + $0x14] sm:$0x7]  ;;  %v2493_v50 = vshrl.u32 %v4606_v36, 16  ;;  %v2231_v58 = vunpack.c.l.b16 %v2122_v61 }
  0xce   : > { %v786_v49 = vpop.f32.mrf.mxu0  ;;  %v2119_v2 = vsel %vm4583_vm3, %v3806_v32, %v2118_v46  ;;  %v1507_v46 = vrot.slane %v4133_v28, 5  ;;  %v1508_v32 = vrot.slane %v4131_v27, 6  ;;  %v1515_v61 = vrot.slane %v1513_v60, 5 }
  0xcf   : > { %v1359_v15 = vpop.f32.mrf.mxu2  ;;  %v1007_v47 = vadd.f32 %v1006_v5, %v786_v49  ;;  %v5953_v5 = vshrl.u32 %v4149_v48, 16  ;;  %v2871_v48 = vpack.c.b16 %v2840_v6, %v2839_v53  ;;  %v2496_v53 = vshll.u32 %v4606_v36, 16 }
  0xd0   : > { %v2230_v6 = vunpack.c.l.b16 %v2119_v2  ;;  %v2495_v62 = vrot.slane %v2493_v50, 6  ;;  %v1509_v2 = vor.u32 %v1508_v32, %v1507_v46  ;;  %v2510_v0 = vshll.u32 %v2451_v10, 16  ;;  %v3942_v32 = vld [vmem:[%s4063_s4 + $0x30] sm:$0xe] }
  0xd1   : > { %v4595_v63 = vrot.slane %v5953_v5, 5  ;;  %v4599_v31 = vadd.f32 %v1359_v15, %v1007_v47  ;;  %3671 = vmatmul.msk.bf16.gmra.mxu0 %vm709_vm4, %v704_v33  ;;  %v4621_v49 = vpop.f32.mrf.mxu3  ;;  %v1283_v15 = vpack.c.b16 %v1267_v14, %v1266_v38  ;;  %v3256_v47 = vpack.c.b16 %v3225_v45, %v3224_v8 }
  0xd2   : > { %v1011_v11 = vpop.f32.mrf.mxu1  ;;  %v3857_v5 = vrot.slane %v3060_v22, 11  ;;  %v1516_v33 = vshll.u32 %v4603_v18, 16  ;;  %v3121_v14 = vrot.slane %v3119_v56, 4  ;;  %v3122_v8 = vrot.slane %v2451_v10, 7 }
  0xd3   : > { %5954 = vst [vmem:[#allocation28_spill] sm:$0xff] %v4599_v31  ;;  %v1505_v45 = vor.u32 %v1504_v3, %v4589_v51  ;;  %v2498_v24 = vrot.slane %v2496_v53, 7  ;;  %v2507_v22 = vshrl.u32 %v2451_v10, 16  ;;  %v1548_v51 = vshll.u32 %v4618_v21, 16 }
  0xd4   : > { %v2262_v27 = vpack.c.b16 %v2231_v58, %v2230_v6  ;;  %v3123_v1 = vsel %vm4549_vm15, %v3121_v14, %v3122_v8  ;;  %v2125_v46 = vrot.slane %v4614_v37, 6  ;;  %v1571_v60 = vshll.u32 %v3942_v32, 16  ;;  %v2452_v32 = vld [vmem:[%s4063_s4 + $0x20] sm:$0x7] }
  0xd5   : > { %3840 = vmatmul.msk.bf16.vlgmr.msrb.gmra.mxu1 %vm709_vm4, %v2871_v48  ;;  %v1518_v48 = vrot.slane %v1516_v33, 6  ;;  %v2499_v39 = vor.u32 %v2498_v24, %v2495_v62  ;;  %v2509_v3 = vrot.slane %v2507_v22, 6  ;;  %v2505_v33 = vrot.slane %v2503_v42, 4 }
  0xd6   : > { %v788_v31 = vpop.f32.mrf.mxu0  ;;  %3788 = vmatmul.msk.bf16.gmra.mxu3 %vm709_vm4, %v1283_v15  ;;  %v1506_v9 = vrot.slane %v1505_v45, 4  ;;  %v1511_v24 = vrot.slane %v1509_v2, 4  ;;  %v5956_v37 = vshrl.u32 %v4618_v21, 16  ;;  %v4658_v14 = vrot.slane %v1548_v51, 6 }
  0xd7   : > { %v1361_v38 = vpop.f32.mrf.mxu2  ;;  %v1009_v13 = vadd.f32 %v1008_v12, %v788_v31  ;;  %v1568_v12 = vshrl.u32 %v4251_v23, 16  ;;  %v2512_v31 = vrot.slane %v2510_v0, 7  ;;  %v2500_v10 = vrot.slane %v2499_v39, 4 }
  0xd8   : > { %v1519_v62 = vor.u32 %v1518_v48, %v1515_v61  ;;  %v3807_v0 = vrot.slane %v4606_v36, 10  ;;  %v3227_v36 = vunpack.c.l.b16 %v3123_v1  ;;  %v1510_v8 = vsel %vm4519_vm10, %v1506_v9, %v1509_v2  ;;  %v4673_v48 = vld [vmem:[%s4063_s4 + $0x18] sm:$0xc] }
  0xd9   : > { %v4635_v4 = vadd.f32 %v1361_v38, %v1009_v13  ;;  %v4639_v28 = vpop.f32.mrf.mxu3  ;;  %v3120_v13 = vsel %vm4549_vm15, %v3857_v5, %v3119_v56  ;;  %v2513_v23 = vor.u32 %v2512_v31, %v2509_v3  ;;  %v1591_v56 = vshrl.u32 %v4286_v54, 16  ;;  %v4680_v3 = vld [vmem:[%s4063_s4 + $0x1c] sm:$0xf] }
  0xda   : > { %v1013_v15 = vpop.f32.mrf.mxu1  ;;  %v3226_v5 = vunpack.c.l.b16 %v3120_v13  ;;  %v2128_v45 = vrot.slane %v4603_v18, 6  ;;  %v2126_v21 = vsel %vm4583_vm3, %v3807_v0, %v2125_v46  ;;  %v2127_v22 = vrot.slane %v2125_v46, 4 }
  0xdb   : > { %5955 = vst [vmem:[#allocation29_spill] sm:$0xff] %v4635_v4  ;;  %v2514_v53 = vsel %vm4559_vm0, %v2505_v33, %v2513_v23  ;;  %v4675_v51 = vrot.slane %v1568_v12, 5  ;;  %v4677_v2 = vrot.slane %v1571_v60, 6  ;;  %v3126_v31 = vrot.slane %v4680_v3, 7 }
  0xdc   : > { %3873 = vmatmul.msk.bf16.vlgmr.msrb.gmra.mxu2 %vm709_vm4, %v3256_v47  ;;  %v2504_v47 = vsel %vm4559_vm0, %v2500_v10, %v2503_v42  ;;  %v2842_v38 = vunpack.c.l.b16 %v2514_v53  ;;  %v4656_v42 = vrot.slane %v5956_v37, 5  ;;  %v4686_v13 = vrot.slane %v1591_v56, 5 }
  0xdd   : > { %v2841_v6 = vunpack.c.l.b16 %v2504_v47  ;;  %v3257_v9 = vpack.c.b16 %v3227_v36, %v3226_v5  ;;  %v4691_v12 = vunpack.c.l.b16 %v1510_v8  ;;  %v2516_v0 = vshrl.u32 %v4673_v48, 16 }
  0xde   : > { %v791_v39 = vpop.f32.mrf.mxu0  ;;  %v2519_v46 = vshll.u32 %v4673_v48, 16  ;;  %v2129_v47 = vsel %vm4583_vm3, %v2127_v22, %v2128_v45  ;;  %v1530_v60 = vrot.slane %v4182_v26, 5  ;;  %v1531_v56 = vrot.slane %v4176_v20, 6 }
  0xdf   : > { %v1364_v50 = vpop.f32.mrf.mxu2  ;;  %v1012_v58 = vadd.f32 %v1011_v11, %v791_v39  ;;  %v4668_v11 = vsel %vm4519_vm10, %v1511_v24, %v1519_v62  ;;  %v2872_v18 = vpack.c.b16 %v2842_v38, %v2841_v6  ;;  %v3061_v24 = vld [vmem:[%s4063_s4 + $0x18] sm:$0x8]  ;;  %v2232_v62 = vunpack.c.l.b16 %v2126_v21 }
  0xe0   : > { %v3858_v6 = vrot.slane %v3061_v24, 11  ;;  %v2518_v36 = vrot.slane %v2516_v0, 6  ;;  %v2521_v37 = vrot.slane %v2519_v46, 7  ;;  %v2524_v8 = vrot.slane %v4182_v26, 6 }
  0xe1   : > { %v4663_v61 = vadd.f32 %v1364_v50, %v1012_v58  ;;  %3823 = vmatmul.msk.bf16.vlgmr.msrb.gmra.mxu0 %vm709_vm4, %v2262_v27  ;;  %v4684_v27 = vld [vmem:[%s4063_s4 + $0x20] sm:$0x3]  ;;  %v4689_v33 = vpop.f32.mrf.mxu3  ;;  %v3128_v58 = vrot.slane %v3126_v31, 4  ;;  %v2525_v45 = vrot.slane %v4176_v20, 7  ;;  %v3129_v21 = vrot.slane %v2452_v32, 7 }
  0xe2   : > { %5958 = vst [vmem:[#allocation31_spill] sm:$0xff] %v4689_v33  ;;  %v1016_v1 = vpop.f32.mrf.mxu1  ;;  %v1536_v39 = vshrl.u32 %v4684_v27, 16  ;;  %v1539_v5 = vshll.u32 %v4684_v27, 16  ;;  %v1528_v22 = vor.u32 %v4597_v59, %v4595_v63  ;;  %v2530_v23 = vshrl.u32 %v2452_v32, 16 }
  0xe3   : > { %5957 = vst [vmem:[#allocation30_spill] sm:$0xff] %v4663_v61  ;;  %v2233_v10 = vunpack.c.l.b16 %v2129_v47  ;;  %v2522_v61 = vor.u32 %v2521_v37, %v2518_v36  ;;  %v2526_v0 = vor.u32 %v2525_v45, %v2524_v8  ;;  %v1532_v26 = vor.u32 %v1531_v56, %v1530_v60  ;;  %v4732_v8 = vld [vmem:[%s4063_s4 + $0x48] sm:$0xe] }
  0xe4   : > { %v2532_v46 = vrot.slane %v2530_v23, 6  ;;  %v1538_v4 = vrot.slane %v1536_v39, 5  ;;  %v1541_v33 = vrot.slane %v1539_v5, 6  ;;  %v3130_v47 = vsel %vm4549_vm15, %v3128_v58, %v3129_v21 }
  0xe5   : > { %3841 = vmatmul.msk.bf16.gmra.mxu1 %vm709_vm4, %v2872_v18  ;;  %v2533_v18 = vshll.u32 %v2452_v32, 16  ;;  %v2523_v63 = vrot.slane %v2522_v61, 4  ;;  %v2528_v59 = vrot.slane %v2526_v0, 4  ;;  %v2132_v60 = vrot.slane %v4680_v3, 6 }
  0xe6   : > { %v793_v50 = vpop.f32.mrf.mxu0  ;;  %3790 = vmatmul.msk.bf16.vlgmr.msrb.gmra.mxu3 %vm709_vm4, %v4543_v17  ;;  %v1534_v61 = vrot.slane %v1532_v26, 4  ;;  %v1614_v45 = vshrl.u32 %v4732_v8, 16  ;;  %v2135_v21 = vrot.slane %v4684_v27, 6  ;;  %v1553_v27 = vrot.slane %v4222_v43, 5 }
  0xe7   : > { %v1366_v53 = vpop.f32.mrf.mxu2  ;;  %v1014_v38 = vadd.f32 %v1013_v15, %v793_v50  ;;  %v3127_v15 = vsel %vm4549_vm15, %v3858_v6, %v3126_v31  ;;  %v2535_v20 = vrot.slane %v2533_v18, 7  ;;  %v2263_v31 = vpack.c.b16 %v2233_v10, %v2232_v62  ;;  %v4749_v18 = vld [vmem:[%s4063_s4 + $0x24] sm:$0xc] }
  0xe8   : > { %v3228_v23 = vunpack.c.l.b16 %v3127_v15  ;;  %v3229_v10 = vunpack.c.l.b16 %v3130_v47  ;;  %v1542_v62 = vor.u32 %v1541_v33, %v1538_v4  ;;  %v2134_v4 = vrot.slane %v2132_v60, 4  ;;  %v4742_v33 = vld [vmem:[%s4063_s4 + $0x28] sm:$0xf] }
  0xe9   : > { %v4711_v24 = vadd.f32 %v1366_v53, %v1014_v38  ;;  %v1051_v50 = vpop.f32.mrf.mxu3  ;;  %v1529_v53 = vrot.slane %v1528_v22, 4  ;;  %v2536_v36 = vor.u32 %v2535_v20, %v2532_v46  ;;  %v5959_v38 = vshll.u32 %v4286_v54, 16 }
  0xea   : > { %v1018_v17 = vpop.f32.mrf.mxu1  ;;  %v4717_v32 = vadd.f32 %v1051_v50, %v4430_v19  ;;  %v3808_v19 = vrot.slane %v4673_v48, 10  ;;  %v3133_v54 = vrot.slane %v4742_v33, 7  ;;  %v1554_v46 = vrot.slane %v4217_v35, 6 }
  0xeb   : > { %v2537_v6 = vsel %vm4559_vm0, %v2528_v59, %v2536_v36  ;;  %v4729_v37 = vrot.slane %v5959_v38, 6  ;;  %v1533_v48 = vsel %vm4519_vm10, %v1529_v53, %v1532_v26  ;;  %v3062_v26 = vld [vmem:[%s4063_s4 + $0x24] sm:$0x8]  ;;  %v5960_v50 = vunpack.c.l.b16 %v4668_v11 }
  0xec   : > { %3874 = vmatmul.msk.bf16.gmra.mxu2 %vm709_vm4, %v3257_v9  ;;  %v2527_v9 = vsel %vm4559_vm0, %v2523_v63, %v2526_v0  ;;  %v2844_v3 = vunpack.c.l.b16 %v2537_v6  ;;  %v2133_v0 = vsel %vm4583_vm3, %v3808_v19, %v2132_v60  ;;  %v3258_v47 = vpack.c.b16 %v3229_v10, %v3228_v23 }
  0xed   : > { %v2843_v58 = vunpack.c.l.b16 %v2527_v9  ;;  %v1878_v63 = vpack.c.b16 %v5960_v50, %v4691_v12  ;;  %v4761_v53 = vsel %vm4519_vm10, %v1534_v61, %v1542_v62  ;;  %v4763_v36 = vunpack.c.l.b16 %v1533_v48 }
  0xee   : > { %v796_v56 = vpop.f32.mrf.mxu0  ;;  %v2136_v11 = vsel %vm4583_vm3, %v2134_v4, %v2135_v21  ;;  %v2234_v12 = vunpack.c.l.b16 %v2133_v0  ;;  %v3859_v23 = vrot.slane %v3062_v26, 11  ;;  %v3135_v19 = vrot.slane %v3133_v54, 4 }
  0xef   : > { %v1369_v39 = vpop.f32.mrf.mxu2  ;;  %v1017_v5 = vadd.f32 %v1016_v1, %v796_v56  ;;  %v4746_v1 = vld [vmem:[%s4063_s4 + $0x2c] sm:$0x3]  ;;  %v2873_v15 = vpack.c.b16 %v2844_v3, %v2843_v58  ;;  %v2542_v3 = vshll.u32 %v4749_v18, 16  ;;  %v2547_v38 = vrot.slane %v4222_v43, 6 }
  0xf0   : > { %v1559_v9 = vshrl.u32 %v4746_v1, 16  ;;  %v1562_v56 = vshll.u32 %v4746_v1, 16  ;;  %v2548_v48 = vrot.slane %v4217_v35, 7 }
  0xf1   : > { %v4738_v22 = vadd.f32 %v1369_v39, %v1017_v5  ;;  %3824 = vmatmul.msk.bf16.gmra.mxu0 %vm709_vm4, %v2263_v31  ;;  %v1053_v20 = vpop.f32.mrf.mxu3  ;;  %v2453_v31 = vld [vmem:[%s4063_s4 + $0x2c] sm:$0x7]  ;;  %v2539_v39 = vshrl.u32 %v4749_v18, 16  ;;  %v4777_v5 = vor.u32 %v1554_v46, %v1553_v27  ;;  %v2139_v27 = vrot.slane %v4742_v33, 6 }
  0xf2   : > { %v1021_v59 = vpop.f32.mrf.mxu1  ;;  %v4767_v60 = vadd.f32 %v1053_v20, %v4456_v29  ;;  %v3136_v58 = vrot.slane %v2453_v31, 7  ;;  %v1551_v29 = vor.u32 %v4658_v14, %v4656_v42  ;;  %v1561_v21 = vrot.slane %v1559_v9, 5 }
  0xf3   : > { %v2541_v10 = vrot.slane %v2539_v39, 6  ;;  %v1564_v4 = vrot.slane %v1562_v56, 6  ;;  %v2553_v0 = vshrl.u32 %v2453_v31, 16  ;;  %v2235_v20 = vunpack.c.l.b16 %v2136_v11 }
  0xf4   : > { %v2544_v42 = vrot.slane %v2542_v3, 7  ;;  %v2549_v14 = vor.u32 %v2548_v48, %v2547_v38  ;;  %v1617_v48 = vshll.u32 %v4732_v8, 16  ;;  %v4898_v8 = vld [vmem:[%s4063_s4 + $0x60] sm:$0xe] }
  0xf5   : > { %3842 = vmatmul.msk.bf16.gmra.mxu1 %vm709_vm4, %v2873_v15  ;;  %v2556_v15 = vshll.u32 %v2453_v31, 16  ;;  %v2555_v46 = vrot.slane %v2553_v0, 6  ;;  %v1552_v31 = vrot.slane %v1551_v29, 4  ;;  %v1565_v11 = vor.u32 %v1564_v4, %v1561_v21  ;;  %v4817_v4 = vld [vmem:[%s4063_s4 + $0x54] sm:$0xe] }
  0xf6   : > { %v798_v61 = vpop.f32.mrf.mxu0  ;;  %3791 = vmatmul.msk.bf16.gmra.mxu3 %vm709_vm4, %v1878_v63  ;;  %v3137_v63 = vsel %vm4549_vm15, %v3135_v19, %v3136_v58  ;;  %v2545_v9 = vor.u32 %v2544_v42, %v2541_v10  ;;  %v2551_v56 = vrot.slane %v2549_v14, 4  ;;  %v3809_v19 = vrot.slane %v4749_v18, 10 }
  0xf7   : > { %v1371_v6 = vpop.f32.mrf.mxu2  ;;  %v1019_v62 = vadd.f32 %v1018_v17, %v798_v61  ;;  %v3134_v17 = vsel %vm4549_vm15, %v3859_v23, %v3133_v54  ;;  %v2558_v43 = vrot.slane %v2556_v15, 7  ;;  %v1557_v54 = vrot.slane %v4777_v5, 4 }
  0xf8   : > { %v1850_v23 = vunpack.c.l.b16 %v4761_v53  ;;  %v2264_v61 = vpack.c.b16 %v2235_v20, %v2234_v12  ;;  %v2141_v58 = vrot.slane %v2139_v27, 4  ;;  %v2142_v29 = vrot.slane %v4746_v1, 6 }
  0xf9   : > { %v4783_v26 = vadd.f32 %v1371_v6, %v1019_v62  ;;  %v1056_v50 = vpop.f32.mrf.mxu3  ;;  %v2559_v33 = vor.u32 %v2558_v43, %v2555_v46  ;;  %v3230_v6 = vunpack.c.l.b16 %v3134_v17  ;;  %v3231_v38 = vunpack.c.l.b16 %v3137_v63  ;;  %v4830_v17 = vld [vmem:[%s4063_s4 + $0x34] sm:$0xf]  ;;  %v4834_v43 = vld [vmem:[%s4063_s4 + $0x38] sm:$0x3] }
  0xfa   : > { %v4789_v35 = vpop.f32.mrf.mxu1  ;;  %v4794_v39 = vadd.f32 %v1056_v50, %v4487_v30  ;;  %v1556_v18 = vsel %vm4519_vm10, %v1552_v31, %v4777_v5  ;;  %v4810_v1 = vsel %vm4519_vm10, %v1557_v54, %v1565_v11  ;;  %v1637_v0 = vshrl.u32 %v4817_v4, 16  ;;  %v3063_v5 = vld [vmem:[%s4063_s4 + $0x30] sm:$0x8] }
  0xfb   : > { %v2560_v30 = vsel %vm4559_vm0, %v2551_v56, %v2559_v33  ;;  %v2140_v42 = vsel %vm4583_vm3, %v3809_v19, %v2139_v27  ;;  %v3140_v46 = vrot.slane %v4830_v17, 7  ;;  %v4837_v50 = vld [vmem:[%s4063_s4 + $0x30] sm:$0xc]  ;;  %v1879_v31 = vpack.c.b16 %v1850_v23, %v4763_v36  ;;  %v2454_v33 = vld [vmem:[%s4063_s4 + $0x38] sm:$0x7] }
  0xfc   : > { %3875 = vmatmul.msk.bf16.gmra.mxu2 %vm709_vm4, %v3258_v47  ;;  %v2546_v47 = vrot.slane %v2545_v9, 4  ;;  %v2846_v12 = vunpack.c.l.b16 %v2560_v30  ;;  %v3259_v56 = vpack.c.b16 %v3231_v38, %v3230_v6  ;;  %v4840_v54 = vunpack.c.l.b16 %v1556_v18 }
  0xfd   : > { %v2562_v36 = vshrl.u32 %v4837_v50, 16  ;;  %v2565_v30 = vshll.u32 %v4837_v50, 16  ;;  %v2579_v27 = vshll.u32 %v2454_v33, 16 }
  0xfe   : > { %v801_v62 = vpop.f32.mrf.mxu0  ;;  %v2550_v53 = vsel %vm4559_vm0, %v2546_v47, %v2549_v14  ;;  %v2143_v14 = vsel %vm4583_vm3, %v2141_v58, %v2142_v29  ;;  %v1576_v47 = vrot.slane %v4258_v57, 5  ;;  %v1582_v58 = vshrl.u32 %v4834_v43, 16 }
  0xff   : > { %v1374_v3 = vpop.f32.mrf.mxu2  ;;  %v1022_v10 = vadd.f32 %v1021_v59, %v801_v62  ;;  %v2845_v21 = vunpack.c.l.b16 %v2550_v53  ;;  %v4814_v59 = vrot.slane %v1614_v45, 5  ;;  %v1577_v62 = vrot.slane %v4254_v55, 6 }
 0x100   : > { %v2237_v19 = vunpack.c.l.b16 %v2143_v14  ;;  %v3142_v29 = vrot.slane %v3140_v46, 4  ;;  %v3143_v53 = vrot.slane %v2454_v33, 7  ;;  %v2564_v18 = vrot.slane %v2562_v36, 6 }
 0x101   : > { %v4821_v20 = vadd.f32 %v1374_v3, %v1022_v10  ;;  %3825 = vmatmul.msk.bf16.gmra.mxu0 %vm709_vm4, %v2264_v61  ;;  %v2874_v45 = vpack.c.b16 %v2846_v12, %v2845_v21  ;;  %v1058_v63 = vpop.f32.mrf.mxu3  ;;  %v3860_v61 = vrot.slane %v3063_v5, 11  ;;  %v2236_v3 = vunpack.c.l.b16 %v2140_v42 }
 0x102   : > { %v1026_v9 = vpop.f32.mrf.mxu1  ;;  %v4844_v11 = vadd.f32 %v1058_v63, %v4525_v41  ;;  %v1585_v41 = vshll.u32 %v4834_v43, 16  ;;  %v2570_v10 = vrot.slane %v4258_v57, 6  ;;  %v1574_v12 = vor.u32 %v4677_v2, %v4675_v51 }
 0x103   : > { %v3141_v21 = vsel %vm4549_vm15, %v3860_v61, %v3140_v46  ;;  %v1578_v5 = vor.u32 %v1577_v62, %v1576_v47  ;;  %v2567_v42 = vrot.slane %v2565_v30, 7  ;;  %v2571_v14 = vrot.slane %v4254_v55, 7 }
 0x104   : > { %v1584_v63 = vrot.slane %v1582_v58, 5  ;;  %v2576_v57 = vshrl.u32 %v2454_v33, 16  ;;  %v3144_v46 = vsel %vm4549_vm15, %v3142_v29, %v3143_v53  ;;  %v1575_v61 = vrot.slane %v1574_v12, 4 }
 0x105   : > { %3843 = vmatmul.msk.bf16.gmra.mxu1 %vm709_vm4, %v2874_v45  ;;  %v2568_v15 = vor.u32 %v2567_v42, %v2564_v18  ;;  %v2572_v51 = vor.u32 %v2571_v14, %v2570_v10  ;;  %v2581_v47 = vrot.slane %v2579_v27, 7  ;;  %v3810_v33 = vrot.slane %v4837_v50, 10 }
 0x106   : > { %v803_v23 = vpop.f32.mrf.mxu0  ;;  %3792 = vmatmul.msk.bf16.gmra.mxu3 %vm709_vm4, %v1879_v31  ;;  %v2578_v55 = vrot.slane %v2576_v57, 6  ;;  %v2265_v36 = vpack.c.b16 %v2237_v19, %v2236_v3  ;;  %v2149_v29 = vrot.slane %v4834_v43, 6  ;;  %v3233_v53 = vunpack.c.l.b16 %v3144_v46  ;;  %v4912_v57 = vld [vmem:[%s4063_s4 + $0x40] sm:$0xf] }
 0x107   : > { %v1376_v6 = vpop.f32.mrf.mxu2  ;;  %v1024_v38 = vadd.f32 %v4789_v35, %v803_v23  ;;  %v1587_v35 = vrot.slane %v1585_v41, 6  ;;  %v2146_v23 = vrot.slane %v4830_v17, 6  ;;  %v2569_v58 = vrot.slane %v2568_v15, 4 }
 0x108   : > { %v2574_v17 = vrot.slane %v2572_v51, 4  ;;  %v1580_v41 = vrot.slane %v1578_v5, 4  ;;  %v2582_v30 = vor.u32 %v2581_v47, %v2578_v55  ;;  %v4881_v3 = vrot.slane %v1617_v48, 6 }
 0x109   : > { %v4862_v45 = vadd.f32 %v1376_v6, %v1024_v38  ;;  %v1061_v2 = vpop.f32.mrf.mxu3  ;;  %v3232_v6 = vunpack.c.l.b16 %v3141_v21  ;;  %v1588_v38 = vor.u32 %v1587_v35, %v1584_v63  ;;  %v2148_v18 = vrot.slane %v2146_v23, 4 }
 0x10a   : > { %v4866_v31 = vpop.f32.mrf.mxu1  ;;  %v4871_v62 = vadd.f32 %v1061_v2, %v4567_v34  ;;  %v2573_v34 = vsel %vm4559_vm0, %v2569_v58, %v2572_v51  ;;  %v2583_v15 = vsel %vm4559_vm0, %v2574_v17, %v2582_v30  ;;  %v1579_v19 = vsel %vm4519_vm10, %v1575_v61, %v1578_v5  ;;  %v3064_v5 = vld [vmem:[%s4063_s4 + $0x3c] sm:$0x8] }
 0x10b   : > { %v2847_v50 = vunpack.c.l.b16 %v2573_v34  ;;  %v4887_v43 = vsel %vm4583_vm3, %v3810_v33, %v2146_v23  ;;  %v4891_v12 = vrot.slane %v1637_v0, 5  ;;  %v5961_v21 = vshll.u32 %v4817_v4, 16  ;;  %v4916_v23 = vld [vmem:[%s4063_s4 + $0x44] sm:$0x3]  ;;  %v4919_v51 = vld [vmem:[%s4063_s4 + $0x3c] sm:$0xc] }
 0x10c   : > { %3876 = vmatmul.msk.bf16.gmra.mxu2 %vm709_vm4, %v3259_v56  ;;  %v1660_v48 = vshrl.u32 %v4898_v8, 16  ;;  %v4907_v63 = vsel %vm4519_vm10, %v1580_v41, %v1588_v38  ;;  %v2150_v0 = vsel %vm4583_vm3, %v2148_v18, %v2149_v29  ;;  %v3147_v35 = vrot.slane %v4912_v57, 7 }
 0x10d   : > { %v4895_v42 = vrot.slane %v5961_v21, 6  ;;  %v5962_v46 = vunpack.c.l.b16 %v4810_v1  ;;  %v3260_v47 = vpack.c.b16 %v3233_v53, %v3232_v6  ;;  %v4924_v33 = vunpack.c.l.b16 %v1579_v19 }
 0x10e   : > { %v806_v56 = vpop.f32.mrf.mxu0  ;;  %v2238_v58 = vunpack.c.l.b16 %v4887_v43  ;;  %v3861_v41 = vrot.slane %v3064_v5, 11  ;;  %v1599_v30 = vrot.slane %v4281_v44, 5  ;;  %v2239_v38 = vunpack.c.l.b16 %v2150_v0 }
 0x10f   : > { %v1379_v10 = vpop.f32.mrf.mxu2  ;;  %v1027_v27 = vadd.f32 %v1026_v9, %v806_v56  ;;  %v2848_v9 = vunpack.c.l.b16 %v2583_v15  ;;  %v1880_v61 = vpack.c.b16 %v5962_v46, %v4840_v54  ;;  %v1600_v56 = vrot.slane %v4279_v40, 6 }
 0x110   : > { %v1605_v1 = vshrl.u32 %v4916_v23, 16  ;;  %v2585_v54 = vshrl.u32 %v4919_v51, 16  ;;  %v3149_v29 = vrot.slane %v3147_v35, 4  ;;  %v2588_v34 = vshll.u32 %v4919_v51, 16 }
 0x111   : > { %v4901_v14 = vadd.f32 %v1379_v10, %v1027_v27  ;;  %3826 = vmatmul.msk.bf16.gmra.mxu0 %vm709_vm4, %v2265_v36  ;;  %v2875_v4 = vpack.c.b16 %v2848_v9, %v2847_v50  ;;  %v1063_v2 = vpop.f32.mrf.mxu3  ;;  %v2455_v36 = vld [vmem:[%s4063_s4 + $0x44] sm:$0x7]  ;;  %v1854_v10 = vunpack.c.l.b16 %v4907_v63  ;;  %v2593_v27 = vrot.slane %v4281_v44, 6 }
 0x112   : > { %v1031_v55 = vpop.f32.mrf.mxu1  ;;  %v4928_v17 = vadd.f32 %v1063_v2, %v4621_v49  ;;  %v1608_v49 = vshll.u32 %v4916_v23, 16  ;;  %v3150_v15 = vrot.slane %v2455_v36, 7  ;;  %v1597_v50 = vor.u32 %v4729_v37, %v4686_v13 }
 0x113   : > { %v2587_v19 = vrot.slane %v2585_v54, 6  ;;  %v3148_v43 = vsel %vm4549_vm15, %v3861_v41, %v3147_v35  ;;  %v1601_v9 = vor.u32 %v1600_v56, %v1599_v30  ;;  %v2590_v21 = vrot.slane %v2588_v34, 7 }
 0x114   : > { %v2594_v5 = vrot.slane %v4279_v40, 7  ;;  %v2599_v44 = vshrl.u32 %v2455_v36, 16  ;;  %v2602_v2 = vshll.u32 %v2455_v36, 16  ;;  %v2153_v46 = vrot.slane %v4912_v57, 6 }
 0x115   : > { %3844 = vmatmul.msk.bf16.gmra.mxu1 %vm709_vm4, %v2875_v4  ;;  %v1607_v4 = vrot.slane %v1605_v1, 5  ;;  %v3151_v35 = vsel %vm4549_vm15, %v3149_v29, %v3150_v15  ;;  %v1598_v41 = vrot.slane %v1597_v50, 4  ;;  %v3811_v36 = vrot.slane %v4919_v51, 10 }
 0x116   : > { %v808_v6 = vpop.f32.mrf.mxu0  ;;  %3793 = vmatmul.msk.bf16.gmra.mxu3 %vm709_vm4, %v1880_v61  ;;  %v2595_v13 = vor.u32 %v2594_v5, %v2593_v27  ;;  %v2601_v40 = vrot.slane %v2599_v44, 6  ;;  %v2604_v30 = vrot.slane %v2602_v2, 7  ;;  %v2266_v54 = vpack.c.b16 %v2239_v38, %v2238_v58  ;;  %v4976_v5 = vld [vmem:[%s4063_s4 + $0x6c] sm:$0xe] }
 0x117   : > { %v1381_v18 = vpop.f32.mrf.mxu2  ;;  %v1029_v53 = vadd.f32 %v4866_v31, %v808_v6  ;;  %v1610_v31 = vrot.slane %v1608_v49, 6  ;;  %v2591_v6 = vor.u32 %v2590_v21, %v2587_v19  ;;  %v1603_v49 = vrot.slane %v1601_v9, 4 }
 0x118   : > { %v2597_v57 = vrot.slane %v2595_v13, 4  ;;  %v2605_v34 = vor.u32 %v2604_v30, %v2601_v40  ;;  %v2155_v19 = vrot.slane %v2153_v46, 4  ;;  %v2156_v29 = vrot.slane %v4916_v23, 6 }
 0x119   : > { %v4947_v0 = vadd.f32 %v1381_v18, %v1029_v53  ;;  %v1066_v37 = vpop.f32.mrf.mxu3  ;;  %v2592_v1 = vrot.slane %v2591_v6, 4  ;;  %v3234_v18 = vunpack.c.l.b16 %v3148_v43  ;;  %v1611_v53 = vor.u32 %v1610_v31, %v1607_v4  ;;  %v4991_v6 = vld [vmem:[%s4063_s4 + $0x4c] sm:$0xf] }
 0x11a   : > { %v4951_v61 = vpop.f32.mrf.mxu1  ;;  %v4956_v56 = vadd.f32 %v1066_v37, %v4639_v28  ;;  %v3235_v50 = vunpack.c.l.b16 %v3151_v35  ;;  %v2606_v51 = vsel %vm4559_vm0, %v2597_v57, %v2605_v34  ;;  %v1602_v43 = vsel %vm4519_vm10, %v1598_v41, %v1601_v9  ;;  %v3065_v9 = vld [vmem:[%s4063_s4 + $0x48] sm:$0x8]  ;;  %v4995_v37 = vld [vmem:[%s4063_s4 + $0x50] sm:$0x3] }
 0x11b   : > { %v2596_v28 = vsel %vm4559_vm0, %v2592_v1, %v2595_v13  ;;  %v4969_v23 = vsel %vm4583_vm3, %v3811_v36, %v2153_v46  ;;  %v2850_v21 = vunpack.c.l.b16 %v2606_v51  ;;  %v4986_v31 = vsel %vm4519_vm10, %v1603_v49, %v1611_v53  ;;  %v4998_v35 = vld [vmem:[%s4063_s4 + $0x48] sm:$0xc]  ;;  %v2456_v34 = vld [vmem:[%s4063_s4 + $0x50] sm:$0x7] }
 0x11c   : > { %3877 = vmatmul.msk.bf16.gmra.mxu2 %vm709_vm4, %v3260_v47  ;;  %v2849_v58 = vunpack.c.l.b16 %v2596_v28  ;;  %v3154_v13 = vrot.slane %v4991_v6, 7  ;;  %v1881_v40 = vpack.c.b16 %v1854_v10, %v4924_v33  ;;  %v3261_v36 = vpack.c.b16 %v3235_v50, %v3234_v18 }
 0x11d   : > { %v5003_v1 = vunpack.c.l.b16 %v1602_v43  ;;  %v2240_v57 = vunpack.c.l.b16 %v4969_v23  ;;  %v1628_v63 = vshrl.u32 %v4995_v37, 16  ;;  %v2608_v33 = vshrl.u32 %v4998_v35, 16 }
 0x11e   : > { %v811_v47 = vpop.f32.mrf.mxu0  ;;  %v2876_v46 = vpack.c.b16 %v2850_v21, %v2849_v58  ;;  %v3156_v50 = vrot.slane %v3154_v13, 4  ;;  %v1631_v51 = vshll.u32 %v4995_v37, 16  ;;  %v2611_v58 = vshll.u32 %v4998_v35, 16 }
 0x11f   : > { %v1384_v27 = vpop.f32.mrf.mxu2  ;;  %v1032_v15 = vadd.f32 %v1031_v55, %v811_v47  ;;  %v4973_v55 = vrot.slane %v1660_v48, 5  ;;  %v2157_v48 = vsel %vm4583_vm3, %v2155_v19, %v2156_v29  ;;  %v3862_v47 = vrot.slane %v3065_v9, 11  ;;  %v5966_v19 = vld [vmem:[#allocation10_spill] sm:$0xff] }
 0x120   : > { %v1623_v29 = vrot.slane %v5966_v19, 6  ;;  %v3157_v21 = vrot.slane %v2456_v34, 7  ;;  %v1620_v9 = vor.u32 %v4881_v3, %v4814_v59  ;;  %v2617_v28 = vrot.slane %v5966_v19, 7 }
 0x121   : > { %v4980_v2 = vadd.f32 %v1384_v27, %v1032_v15  ;;  %3827 = vmatmul.msk.bf16.gmra.mxu0 %vm709_vm4, %v2266_v54  ;;  %v1068_v41 = vpop.f32.mrf.mxu3  ;;  %v5964_v54 = vld [vmem:[#allocation31_spill] sm:$0xff]  ;;  %v2241_v15 = vunpack.c.l.b16 %v2157_v48  ;;  %v2610_v48 = vrot.slane %v2608_v33, 6  ;;  %v1630_v4 = vrot.slane %v1628_v63, 5 }
 0x122   : > { %v1036_v30 = vpop.f32.mrf.mxu1  ;;  %v5007_v49 = vadd.f32 %v1068_v41, %v5964_v54  ;;  %v5965_v27 = vld [vmem:[#allocation11_spill] sm:$0xff]  ;;  %v3155_v41 = vsel %vm4549_vm15, %v3862_v47, %v3154_v13  ;;  %v2613_v54 = vrot.slane %v2611_v58, 7  ;;  %v2625_v38 = vshll.u32 %v2456_v34, 16 }
 0x123   : > { %5963 = vst [vmem:[#allocation32_spill] sm:$0xff] %v4980_v2  ;;  %v1622_v53 = vrot.slane %v5965_v27, 5  ;;  %v2616_v43 = vrot.slane %v5965_v27, 6  ;;  %v2622_v27 = vshrl.u32 %v2456_v34, 16  ;;  %v3158_v13 = vsel %vm4549_vm15, %v3156_v50, %v3157_v21 }
 0x124   : > { %v2614_v2 = vor.u32 %v2613_v54, %v2610_v48  ;;  %v1621_v47 = vrot.slane %v1620_v9, 4  ;;  %v2627_v19 = vrot.slane %v2625_v38, 7  ;;  %v3812_v34 = vrot.slane %v4998_v35, 10 }
 0x125   : > { %3845 = vmatmul.msk.bf16.gmra.mxu1 %vm709_vm4, %v2876_v46  ;;  %v1624_v46 = vor.u32 %v1623_v29, %v1622_v53  ;;  %v2618_v59 = vor.u32 %v2617_v28, %v2616_v43  ;;  %v2624_v53 = vrot.slane %v2622_v27, 6  ;;  %v2267_v33 = vpack.c.b16 %v2241_v15, %v2240_v57 }
 0x126   : > { %v813_v10 = vpop.f32.mrf.mxu0  ;;  %3794 = vmatmul.msk.bf16.gmra.mxu3 %vm709_vm4, %v1881_v40  ;;  %v2615_v63 = vrot.slane %v2614_v2, 4  ;;  %v3236_v28 = vunpack.c.l.b16 %v3155_v41  ;;  %v2163_v50 = vrot.slane %v4995_v37, 6  ;;  %v3237_v21 = vunpack.c.l.b16 %v3158_v13 }
 0x127   : > { %v1386_v18 = vpop.f32.mrf.mxu2  ;;  %v1034_v23 = vadd.f32 %v4951_v61, %v813_v10  ;;  %v1633_v61 = vrot.slane %v1631_v51, 6  ;;  %v2160_v10 = vrot.slane %v4991_v6, 6  ;;  %v2620_v6 = vrot.slane %v2618_v59, 4 }
 0x128   : > { %v2628_v51 = vor.u32 %v2627_v19, %v2624_v53  ;;  %v5968_v57 = vshll.u32 %v4898_v8, 16  ;;  %v5969_v9 = vshrl.u32 %v4976_v5, 16  ;;  %v5970_v41 = vshll.u32 %v4976_v5, 16  ;;  %v5062_v8 = vld [vmem:[%s4063_s4 + $0x9c] sm:$0xe] }
 0x129   : > { %v5026_v44 = vadd.f32 %v1386_v18, %v1034_v23  ;;  %v1404_v3 = vpop.f32.mrf.mxu3  ;;  %v1626_v18 = vrot.slane %v1624_v46, 4  ;;  %v1634_v43 = vor.u32 %v1633_v61, %v1630_v4  ;;  %v2162_v23 = vrot.slane %v2160_v10, 4  ;;  %v5083_v53 = vld [vmem:[%s4063_s4 + $0x54] sm:$0xc] }
 0x12a   : > { %v5030_v40 = vpop.f32.mrf.mxu1  ;;  %v5035_v29 = vadd.f32 %v1404_v3, %v4717_v32  ;;  %v2619_v32 = vsel %vm4559_vm0, %v2615_v63, %v2618_v59  ;;  %v2629_v2 = vsel %vm4559_vm0, %v2620_v6, %v2628_v51  ;;  %v5045_v15 = vrot.slane %v5968_v57, 6  ;;  %v5076_v3 = vld [vmem:[%s4063_s4 + $0x58] sm:$0xf] }
 0x12b   : > { %v2851_v35 = vunpack.c.l.b16 %v2619_v32  ;;  %v1625_v4 = vsel %vm4519_vm10, %v1621_v47, %v1624_v46  ;;  %v5051_v37 = vsel %vm4583_vm3, %v3812_v34, %v2160_v10  ;;  %v5055_v48 = vrot.slane %v5969_v9, 5  ;;  %v3066_v46 = vld [vmem:[%s4063_s4 + $0x54] sm:$0x8]  ;;  %v5080_v47 = vld [vmem:[%s4063_s4 + $0x5c] sm:$0x3] }
 0x12c   : > { %3878 = vmatmul.msk.bf16.gmra.mxu2 %vm709_vm4, %v3261_v36  ;;  %5967 = vst [vmem:[#allocation31_spill] sm:$0xff] %v5035_v29  ;;  %v5059_v54 = vrot.slane %v5970_v41, 6  ;;  %v5071_v10 = vsel %vm4519_vm10, %v1626_v18, %v1634_v43  ;;  %v2164_v59 = vsel %vm4583_vm3, %v2162_v23, %v2163_v50  ;;  %v3161_v13 = vrot.slane %v5076_v3, 7  ;;  %v5973_v23 = vld [vmem:[#allocation13_spill] sm:$0xff]  ;;  %v5974_v32 = vld [vmem:[#allocation12_spill] sm:$0xff] }
 0x12d   : > { %v5971_v34 = vunpack.c.l.b16 %v4986_v31  ;;  %v5088_v18 = vunpack.c.l.b16 %v1625_v4  ;;  %v2242_v51 = vunpack.c.l.b16 %v5051_v37  ;;  %v3863_v43 = vrot.slane %v3066_v46, 11 }
 0x12e   : > { %v816_v36 = vpop.f32.mrf.mxu0  ;;  %v1645_v50 = vrot.slane %v5973_v23, 5  ;;  %v1651_v31 = vshrl.u32 %v5080_v47, 16  ;;  %v3163_v57 = vrot.slane %v3161_v13, 4  ;;  %v2634_v4 = vshll.u32 %v5083_v53, 16 }
 0x12f   : > { %v1389_v58 = vpop.f32.mrf.mxu2  ;;  %v1037_v38 = vadd.f32 %v1036_v30, %v816_v36  ;;  %v2852_v30 = vunpack.c.l.b16 %v2629_v2  ;;  %v1882_v63 = vpack.c.b16 %v5971_v34, %v5003_v1  ;;  %v2631_v1 = vshrl.u32 %v5083_v53, 16 }
 0x130   : > { %v2639_v37 = vrot.slane %v5973_v23, 6  ;;  %v1643_v41 = vor.u32 %v4895_v42, %v4891_v12  ;;  %v2640_v34 = vrot.slane %v5974_v32, 7  ;;  %v1653_v27 = vrot.slane %v1651_v31, 5 }
 0x131   : > { %v5065_v61 = vadd.f32 %v1389_v58, %v1037_v38  ;;  %3828 = vmatmul.msk.bf16.gmra.mxu0 %vm709_vm4, %v2267_v33  ;;  %v2877_v5 = vpack.c.b16 %v2852_v30, %v2851_v35  ;;  %v1406_v19 = vpop.f32.mrf.mxu3  ;;  %v3262_v33 = vpack.c.b16 %v3237_v21, %v3236_v28  ;;  %v2457_v58 = vld [vmem:[%s4063_s4 + $0x5c] sm:$0x7]  ;;  %v1646_v38 = vrot.slane %v5974_v32, 6 }
 0x132   : > { %v1041_v6 = vpop.f32.mrf.mxu1  ;;  %v5092_v36 = vadd.f32 %v1406_v19, %v4767_v60  ;;  %v2243_v35 = vunpack.c.l.b16 %v2164_v59  ;;  %v1654_v60 = vshll.u32 %v5080_v47, 16  ;;  %v3164_v9 = vrot.slane %v2457_v58, 7 }
 0x133   : > { %v2633_v46 = vrot.slane %v2631_v1, 6  ;;  %v3162_v59 = vsel %vm4549_vm15, %v3863_v43, %v3161_v13  ;;  %v2636_v19 = vrot.slane %v2634_v4, 7  ;;  %v2645_v23 = vshrl.u32 %v2457_v58, 16 }
 0x134   : > { %5972 = vst [vmem:[#allocation11_spill] sm:$0xff] %v5092_v36  ;;  %v2648_v36 = vshll.u32 %v2457_v58, 16  ;;  %v2641_v12 = vor.u32 %v2640_v34, %v2639_v37  ;;  %v3165_v13 = vsel %vm4549_vm15, %v3163_v57, %v3164_v9  ;;  %v1644_v43 = vrot.slane %v1643_v41, 4 }
 0x135   : > { %3846 = vmatmul.msk.bf16.gmra.mxu1 %vm709_vm4, %v2877_v5  ;;  %v1647_v5 = vor.u32 %v1646_v38, %v1645_v50  ;;  %v2637_v29 = vor.u32 %v2636_v19, %v2633_v46  ;;  %v2647_v50 = vrot.slane %v2645_v23, 6  ;;  %v3813_v58 = vrot.slane %v5083_v53, 10 }
 0x136   : > { %v818_v28 = vpop.f32.mrf.mxu0  ;;  %3795 = vmatmul.msk.bf16.gmra.mxu3 %vm709_vm4, %v1882_v63  ;;  %v2650_v32 = vrot.slane %v2648_v36, 7  ;;  %v2268_v1 = vpack.c.b16 %v2243_v35, %v2242_v51  ;;  %v2170_v57 = vrot.slane %v5080_v47, 6  ;;  %v3239_v9 = vunpack.c.l.b16 %v3165_v13 }
 0x137   : > { %v1391_v21 = vpop.f32.mrf.mxu2  ;;  %v1039_v30 = vadd.f32 %v5030_v40, %v818_v28  ;;  %v1656_v40 = vrot.slane %v1654_v60, 6  ;;  %v2167_v28 = vrot.slane %v5076_v3, 6  ;;  %v2638_v31 = vrot.slane %v2637_v29, 4 }
 0x138   : > { %v2643_v3 = vrot.slane %v2641_v12, 4  ;;  %v1649_v60 = vrot.slane %v1647_v5, 4  ;;  %v2651_v4 = vor.u32 %v2650_v32, %v2647_v50  ;;  %v5162_v50 = vld [vmem:[%s4063_s4 + $0x60] sm:$0xc] }
 0x139   : > { %v5111_v2 = vadd.f32 %v1391_v21, %v1039_v30  ;;  %v1409_v42 = vpop.f32.mrf.mxu3  ;;  %v3238_v21 = vunpack.c.l.b16 %v3162_v59  ;;  %v1657_v30 = vor.u32 %v1656_v40, %v1653_v27  ;;  %v2169_v46 = vrot.slane %v2167_v28, 4  ;;  %v5140_v59 = vld [vmem:[%s4063_s4 + $0x78] sm:$0xe] }
 0x13a   : > { %v5115_v63 = vpop.f32.mrf.mxu1  ;;  %v5120_v38 = vadd.f32 %v1409_v42, %v4794_v39  ;;  %v2642_v39 = vsel %vm4559_vm0, %v2638_v31, %v2641_v12  ;;  %v2652_v29 = vsel %vm4559_vm0, %v2643_v3, %v2651_v4  ;;  %v1648_v27 = vsel %vm4519_vm10, %v1644_v43, %v1647_v5  ;;  %v3067_v5 = vld [vmem:[%s4063_s4 + $0x60] sm:$0x8]  ;;  %v5155_v42 = vld [vmem:[%s4063_s4 + $0x64] sm:$0xf]  ;;  %v5159_v43 = vld [vmem:[%s4063_s4 + $0x68] sm:$0x3] }
 0x13b   : > { %v2853_v53 = vunpack.c.l.b16 %v2642_v39  ;;  %v5133_v47 = vsel %vm4583_vm3, %v3813_v58, %v2167_v28  ;;  %v2854_v35 = vunpack.c.l.b16 %v2652_v29  ;;  %v5150_v40 = vsel %vm4519_vm10, %v1649_v60, %v1657_v30  ;;  %v5980_v39 = vld [vmem:[#allocation14_spill] sm:$0xff] }
 0x13c   : > { %3879 = vmatmul.msk.bf16.gmra.mxu2 %vm709_vm4, %v3262_v33  ;;  %5975 = vst [vmem:[#allocation10_spill] sm:$0xff] %v5120_v38  ;;  %v2171_v28 = vsel %vm4583_vm3, %v2169_v46, %v2170_v57  ;;  %v3168_v13 = vrot.slane %v5155_v42, 7  ;;  %v5977_v58 = vunpack.c.l.b16 %v5071_v10  ;;  %v5167_v60 = vunpack.c.l.b16 %v1648_v27  ;;  %v5979_v46 = vld [vmem:[#allocation15_spill] sm:$0xff] }
 0x13d   : > { %v2878_v12 = vpack.c.b16 %v2854_v35, %v2853_v53  ;;  %v2244_v4 = vunpack.c.l.b16 %v5133_v47  ;;  %v3864_v30 = vrot.slane %v3067_v5, 11  ;;  %v1668_v57 = vrot.slane %v5979_v46, 5 }
 0x13e   : > { %v821_v33 = vpop.f32.mrf.mxu0  ;;  %v1883_v31 = vpack.c.b16 %v5977_v58, %v5088_v18  ;;  %v2245_v53 = vunpack.c.l.b16 %v2171_v28  ;;  %v1674_v10 = vshrl.u32 %v5159_v43, 16  ;;  %v2654_v18 = vshrl.u32 %v5162_v50, 16 }
 0x13f   : > { %v1394_v37 = vpop.f32.mrf.mxu2  ;;  %v1042_v36 = vadd.f32 %v1041_v6, %v821_v33  ;;  %v5976_v6 = vshrl.u32 %v5062_v8, 16  ;;  %v3170_v27 = vrot.slane %v3168_v13, 4  ;;  %v2657_v47 = vshll.u32 %v5162_v50, 16 }
 0x140   : > { %v2662_v35 = vrot.slane %v5979_v46, 6  ;;  %v1666_v28 = vor.u32 %v5045_v15, %v4973_v55  ;;  %v3169_v58 = vsel %vm4549_vm15, %v3864_v30, %v3168_v13  ;;  %v2663_v29 = vrot.slane %v5980_v39, 7 }
 0x141   : > { %v5137_v41 = vrot.slane %v5976_v6, 5  ;;  %v5144_v23 = vadd.f32 %v1394_v37, %v1042_v36  ;;  %3829 = vmatmul.msk.bf16.gmra.mxu0 %vm709_vm4, %v2268_v1  ;;  %v1411_v32 = vpop.f32.mrf.mxu3  ;;  %v3263_v1 = vpack.c.b16 %v3239_v9, %v3238_v21  ;;  %v2458_v37 = vld [vmem:[%s4063_s4 + $0x68] sm:$0x7]  ;;  %v1669_v36 = vrot.slane %v5980_v39, 6 }
 0x142   : > { %v1046_v3 = vpop.f32.mrf.mxu1  ;;  %v5171_v33 = vadd.f32 %v1411_v32, %v4844_v11  ;;  %v1677_v11 = vshll.u32 %v5159_v43, 16  ;;  %v3171_v5 = vrot.slane %v2458_v37, 7  ;;  %v2656_v32 = vrot.slane %v2654_v18, 6 }
 0x143   : > { %v2659_v51 = vrot.slane %v2657_v47, 7  ;;  %v1676_v19 = vrot.slane %v1674_v10, 5  ;;  %v2668_v46 = vshrl.u32 %v2458_v37, 16  ;;  %v2664_v55 = vor.u32 %v2663_v29, %v2662_v35 }
 0x144   : > { %5978 = vst [vmem:[#allocation13_spill] sm:$0xff] %v5171_v33  ;;  %v2671_v33 = vshll.u32 %v2458_v37, 16  ;;  %v3172_v13 = vsel %vm4549_vm15, %v3170_v27, %v3171_v5  ;;  %v1667_v30 = vrot.slane %v1666_v28, 4  ;;  %v3814_v37 = vrot.slane %v5162_v50, 10 }
 0x145   : > { %3847 = vmatmul.msk.bf16.gmra.mxu1 %vm709_vm4, %v2878_v12  ;;  %v1670_v12 = vor.u32 %v1669_v36, %v1668_v57  ;;  %v2660_v38 = vor.u32 %v2659_v51, %v2656_v32  ;;  %v2670_v57 = vrot.slane %v2668_v46, 6  ;;  %v2269_v51 = vpack.c.b16 %v2245_v53, %v2244_v4  ;;  %v5222_v32 = vld [vmem:[%s4063_s4 + $0x84] sm:$0xe] }
 0x146   : > { %v823_v21 = vpop.f32.mrf.mxu0  ;;  %3796 = vmatmul.msk.bf16.gmra.mxu3 %vm709_vm4, %v1883_v31  ;;  %v2673_v39 = vrot.slane %v2671_v33, 7  ;;  %v3240_v29 = vunpack.c.l.b16 %v3169_v58  ;;  %v2177_v27 = vrot.slane %v5159_v43, 6  ;;  %v5982_v4 = vshrl.u32 %v5140_v59, 16 }
 0x147   : > { %v1396_v9 = vpop.f32.mrf.mxu2  ;;  %v1044_v6 = vadd.f32 %v5115_v63, %v823_v21  ;;  %v1679_v63 = vrot.slane %v1677_v11, 6  ;;  %v2174_v21 = vrot.slane %v5155_v42, 6  ;;  %v2661_v10 = vrot.slane %v2660_v38, 4 }
 0x148   : > { %v2666_v42 = vrot.slane %v2664_v55, 4  ;;  %v1672_v18 = vrot.slane %v1670_v12, 4  ;;  %v5209_v53 = vrot.slane %v5982_v4, 5  ;;  %v5983_v5 = vshll.u32 %v5140_v59, 16 }
 0x149   : > { %v5190_v34 = vadd.f32 %v1396_v9, %v1044_v6  ;;  %v1414_v15 = vpop.f32.mrf.mxu3  ;;  %v2674_v9 = vor.u32 %v2673_v39, %v2670_v57  ;;  %v1680_v47 = vor.u32 %v1679_v63, %v1676_v19  ;;  %v2176_v35 = vrot.slane %v2174_v21, 4  ;;  %v5244_v57 = vld [vmem:[%s4063_s4 + $0x6c] sm:$0xc] }
 0x14a   : > { %v5194_v31 = vpop.f32.mrf.mxu1  ;;  %v5199_v36 = vadd.f32 %v1414_v15, %v4871_v62  ;;  %v2665_v62 = vsel %vm4559_vm0, %v2661_v10, %v2664_v55  ;;  %v3241_v6 = vunpack.c.l.b16 %v3172_v13  ;;  %v1671_v19 = vsel %vm4519_vm10, %v1667_v30, %v1670_v12  ;;  %v3068_v12 = vld [vmem:[%s4063_s4 + $0x6c] sm:$0x8]  ;;  %v5237_v15 = vld [vmem:[%s4063_s4 + $0x70] sm:$0xf]  ;;  %v5241_v30 = vld [vmem:[%s4063_s4 + $0x74] sm:$0x3] }
 0x14b   : > { %v2675_v38 = vsel %vm4559_vm0, %v2666_v42, %v2674_v9  ;;  %v2855_v50 = vunpack.c.l.b16 %v2665_v62  ;;  %v5215_v43 = vsel %vm4583_vm3, %v3814_v37, %v2174_v21  ;;  %v5219_v28 = vrot.slane %v5983_v5, 6  ;;  %v5988_v62 = vld [vmem:[#allocation16_spill] sm:$0xff] }
 0x14c   : > { %3880 = vmatmul.msk.bf16.gmra.mxu2 %vm709_vm4, %v3263_v1  ;;  %5981 = vst [vmem:[#allocation12_spill] sm:$0xff] %v5199_v36  ;;  %v5232_v21 = vsel %vm4519_vm10, %v1672_v18, %v1680_v47  ;;  %v2178_v59 = vsel %vm4583_vm3, %v2176_v35, %v2177_v27  ;;  %v3175_v13 = vrot.slane %v5237_v15, 7  ;;  %v5985_v37 = vunpack.c.l.b16 %v5150_v40  ;;  %v5987_v35 = vld [vmem:[#allocation17_spill] sm:$0xff] }
 0x14d   : > { %v3264_v42 = vpack.c.b16 %v3241_v6, %v3240_v29  ;;  %v5251_v18 = vunpack.c.l.b16 %v1671_v19  ;;  %v2246_v9 = vunpack.c.l.b16 %v5215_v43  ;;  %v3865_v47 = vrot.slane %v3068_v12, 11 }
 0x14e   : > { %v826_v1 = vpop.f32.mrf.mxu0  ;;  %v1884_v10 = vpack.c.b16 %v5985_v37, %v5167_v60  ;;  %v1691_v27 = vrot.slane %v5987_v35, 5  ;;  %v2247_v40 = vunpack.c.l.b16 %v2178_v59  ;;  %v1697_v60 = vshrl.u32 %v5241_v30, 16 }
 0x14f   : > { %v1399_v11 = vpop.f32.mrf.mxu2  ;;  %v1047_v33 = vadd.f32 %v1046_v3, %v826_v1  ;;  %v2856_v3 = vunpack.c.l.b16 %v2675_v38  ;;  %v2459_v1 = vld [vmem:[%s4063_s4 + $0x74] sm:$0x7]  ;;  %v2677_v29 = vshrl.u32 %v5244_v57, 16  ;;  %v3177_v4 = vrot.slane %v3175_v13, 4 }
 0x150   : > { %v3178_v19 = vrot.slane %v2459_v1, 7  ;;  %v2685_v43 = vrot.slane %v5987_v35, 6  ;;  %v1689_v5 = vor.u32 %v5059_v54, %v5055_v48  ;;  %v1700_v12 = vshll.u32 %v5241_v30, 16 }
 0x151   : > { %v5226_v63 = vadd.f32 %v1399_v11, %v1047_v33  ;;  %3830 = vmatmul.msk.bf16.gmra.mxu0 %vm709_vm4, %v2269_v51  ;;  %v2879_v55 = vpack.c.b16 %v2856_v3, %v2855_v50  ;;  %v1416_v39 = vpop.f32.mrf.mxu3  ;;  %v1692_v33 = vrot.slane %v5988_v62, 6  ;;  %v2679_v59 = vrot.slane %v2677_v29, 6 }
 0x152   : > { %v5249_v51 = vpop.f32.mrf.mxu1  ;;  %v5256_v11 = vadd.f32 %v1416_v39, %v4928_v17  ;;  %v2680_v17 = vshll.u32 %v5244_v57, 16  ;;  %v3176_v39 = vsel %vm4549_vm15, %v3865_v47, %v3175_v13  ;;  %v2686_v38 = vrot.slane %v5988_v62, 7 }
 0x153   : > { %5984 = vst [vmem:[#allocation15_spill] sm:$0xff] %v5226_v63  ;;  %v1699_v35 = vrot.slane %v1697_v60, 5  ;;  %v2691_v58 = vshrl.u32 %v2459_v1, 16  ;;  %v3179_v48 = vsel %vm4549_vm15, %v3177_v4, %v3178_v19  ;;  %v2181_v54 = vrot.slane %v5237_v15, 6 }
 0x154   : > { %5986 = vst [vmem:[#allocation14_spill] sm:$0xff] %v5256_v11  ;;  %v2682_v37 = vrot.slane %v2680_v17, 7  ;;  %v1690_v47 = vrot.slane %v1689_v5, 4  ;;  %v2270_v15 = vpack.c.b16 %v2247_v40, %v2246_v9  ;;  %v3242_v19 = vunpack.c.l.b16 %v3176_v39 }
 0x155   : > { %3848 = vmatmul.msk.bf16.gmra.mxu1 %vm709_vm4, %v2879_v55  ;;  %v1693_v55 = vor.u32 %v1692_v33, %v1691_v27  ;;  %v1702_v27 = vrot.slane %v1700_v12, 6  ;;  %v2693_v62 = vrot.slane %v2691_v58, 6  ;;  %v2183_v5 = vrot.slane %v2181_v54, 4  ;;  %v5294_v12 = vld [vmem:[%s4063_s4 + $0x80] sm:$0x3] }
 0x156   : > { %v828_v6 = vpop.f32.mrf.mxu0  ;;  %3797 = vmatmul.msk.bf16.gmra.mxu3 %vm709_vm4, %v1884_v10  ;;  %v2683_v29 = vor.u32 %v2682_v37, %v2679_v59  ;;  %v2184_v58 = vrot.slane %v5241_v30, 6  ;;  %v5991_v37 = vld [vmem:[#allocation20_spill] sm:$0xff] }
 0x157   : > { %v1401_v50 = vpop.f32.mrf.mxu2  ;;  %v1049_v3 = vadd.f32 %v5194_v31, %v828_v6  ;;  %v2694_v31 = vshll.u32 %v2459_v1, 16  ;;  %v2687_v6 = vor.u32 %v2686_v38, %v2685_v43  ;;  %v3815_v1 = vrot.slane %v5244_v57, 10 }
 0x158   : > { %v3243_v38 = vunpack.c.l.b16 %v3179_v48  ;;  %v1694_v57 = vsel %vm4519_vm10, %v1690_v47, %v1693_v55  ;;  %v1703_v9 = vor.u32 %v1702_v27, %v1699_v35  ;;  %v5992_v48 = vld [vmem:[#allocation19_spill] sm:$0xff]  ;;  %v1720_v47 = vshrl.u32 %v5294_v12, 16  ;;  %v2075_v27 = vld [vmem:[%s4063_s4 + $0x78] sm:$0xc] }
 0x159   : > { %v5274_v46 = vadd.f32 %v1401_v50, %v1049_v3  ;;  %v1419_v10 = vpop.f32.mrf.mxu3  ;;  %v2696_v33 = vrot.slane %v2694_v31, 7  ;;  %v2684_v50 = vrot.slane %v2683_v29, 4  ;;  %v2689_v4 = vrot.slane %v2687_v6, 4 }
 0x15a   : > { %v5280_v13 = vpop.f32.mrf.mxu1  ;;  %v5283_v60 = vadd.f32 %v1419_v10, %v4956_v56  ;;  %v1695_v3 = vrot.slane %v1693_v55, 4  ;;  %v2182_v39 = vsel %vm4583_vm3, %v3815_v1, %v2181_v54  ;;  %v1714_v31 = vrot.slane %v5991_v37, 5 }
 0x15b   : > { %5989 = vst [vmem:[#allocation17_spill] sm:$0xff] %v5274_v46  ;;  %v2697_v17 = vor.u32 %v2696_v33, %v2693_v62  ;;  %v2688_v56 = vsel %vm4559_vm0, %v2684_v50, %v2687_v6  ;;  %v1715_v29 = vrot.slane %v5992_v48, 6  ;;  %v5993_v6 = vshrl.u32 %v5222_v32, 16 }
 0x15c   : > { %3881 = vmatmul.msk.bf16.gmra.mxu2 %vm709_vm4, %v3264_v42  ;;  %5990 = vst [vmem:[#allocation16_spill] sm:$0xff] %v5283_v60  ;;  %v2857_v59 = vunpack.c.l.b16 %v2688_v56  ;;  %v5994_v55 = vshll.u32 %v5222_v32, 16  ;;  %v1723_v54 = vshll.u32 %v5294_v12, 16  ;;  %v5995_v62 = vunpack.c.l.b16 %v5232_v21  ;;  %v3958_v32 = vld [vmem:[%s4063_s4 + $0x7c] sm:$0xf] }
 0x15d   : > { %v2698_v40 = vsel %vm4559_vm0, %v2689_v4, %v2697_v17  ;;  %v5306_v10 = vrot.slane %v5993_v6, 5  ;;  %v2185_v1 = vsel %vm4583_vm3, %v2183_v5, %v2184_v58  ;;  %v3069_v4 = vld [vmem:[%s4063_s4 + $0x78] sm:$0x8]  ;;  %v3182_v17 = vrot.slane %v3958_v32, 7  ;;  %v2460_v21 = vld [vmem:[%s4063_s4 + $0x80] sm:$0x7] }
 0x15e   : > { %v5286_v43 = vpop.f32.mrf.mxu0  ;;  %v2858_v30 = vunpack.c.l.b16 %v2698_v40  ;;  %v5310_v35 = vrot.slane %v5994_v55, 6  ;;  %v1885_v33 = vpack.c.b16 %v5995_v62, %v5251_v18  ;;  %v3265_v40 = vpack.c.b16 %v3243_v38, %v3242_v19 }
 0x15f   : > { %v5288_v42 = vpop.f32.mrf.mxu2  ;;  %v5327_v6 = vsel %vm4519_vm10, %v1695_v3, %v1703_v9  ;;  %v5329_v55 = vunpack.c.l.b16 %v1694_v57  ;;  %v2248_v60 = vunpack.c.l.b16 %v2182_v39  ;;  %v1712_v5 = vor.u32 %v5219_v28, %v5209_v53 }
 0x160   : > { %v2880_v50 = vpack.c.b16 %v2858_v30, %v2857_v59  ;;  %v1716_v58 = vor.u32 %v1715_v29, %v1714_v31  ;;  %v2700_v59 = vshrl.u32 %v2075_v27, 16  ;;  %v2249_v30 = vunpack.c.l.b16 %v2185_v1 }
 0x161   : > { %3831 = vmatmul.msk.bf16.gmra.mxu0 %vm709_vm4, %v2270_v15  ;;  %v1421_v56 = vpop.f32.mrf.mxu3  ;;  %v3866_v19 = vrot.slane %v3069_v4, 11  ;;  %v1722_v38 = vrot.slane %v1720_v47, 5  ;;  %v1725_v62 = vrot.slane %v1723_v54, 6  ;;  %v3184_v57 = vrot.slane %v3182_v17, 4 }
 0x162   : > { %v5323_v15 = vpop.f32.mrf.mxu1  ;;  %v5333_v18 = vadd.f32 %v1421_v56, %v5007_v49  ;;  %v3185_v9 = vrot.slane %v2460_v21, 7  ;;  %v2188_v39 = vrot.slane %v3958_v32, 6  ;;  %v2702_v49 = vrot.slane %v2700_v59, 6 }
 0x163   : > { %v2703_v56 = vshll.u32 %v2075_v27, 16  ;;  %v2709_v53 = vrot.slane %v5992_v48, 7  ;;  %v2714_v28 = vshrl.u32 %v2460_v21, 16  ;;  %v1713_v31 = vrot.slane %v1712_v5, 4 }
 0x164   : > { %5996 = vst [vmem:[#allocation20_spill] sm:$0xff] %v5333_v18  ;;  %v2708_v18 = vrot.slane %v5991_v37, 6  ;;  %v1718_v29 = vrot.slane %v1716_v58, 4  ;;  %v3816_v47 = vrot.slane %v2075_v27, 10  ;;  %v2717_v54 = vshll.u32 %v2460_v21, 16 }
 0x165   : > { %3849 = vmatmul.msk.bf16.gmra.mxu1 %vm709_vm4, %v2880_v50  ;;  %v1726_v1 = vor.u32 %v1725_v62, %v1722_v38  ;;  %v2705_v4 = vrot.slane %v2703_v56, 7  ;;  %v2716_v50 = vrot.slane %v2714_v28, 6  ;;  %v3183_v32 = vsel %vm4549_vm15, %v3866_v19, %v3182_v17  ;;  %v5372_v56 = vld [vmem:[%s4063_s4 + $0x88] sm:$0xf] }
 0x166   : > { %v5337_v11 = vpop.f32.mrf.mxu0  ;;  %3798 = vmatmul.msk.bf16.gmra.mxu3 %vm709_vm4, %v1885_v33  ;;  %v2710_v36 = vor.u32 %v2709_v53, %v2708_v18  ;;  %v2190_v59 = vrot.slane %v2188_v39, 4  ;;  %v2191_v46 = vrot.slane %v5294_v12, 6  ;;  %v2719_v37 = vrot.slane %v2717_v54, 7  ;;  %v5997_v18 = vld [vmem:[#allocation18_spill] sm:$0xff] }
 0x167   : > { %v5339_v3 = vpop.f32.mrf.mxu2  ;;  %v1864_v48 = vunpack.c.l.b16 %v5327_v6  ;;  %v2271_v33 = vpack.c.b16 %v2249_v30, %v2248_v60  ;;  %v2706_v27 = vor.u32 %v2705_v4, %v2702_v49  ;;  %v3186_v17 = vsel %vm4549_vm15, %v3184_v57, %v3185_v9  ;;  %v3070_v9 = vld [vmem:[%s4063_s4 + $0x84] sm:$0x8] }
 0x168   : > { %v2712_v21 = vrot.slane %v2710_v36, 4  ;;  %v1717_v12 = vsel %vm4519_vm10, %v1713_v31, %v1716_v58  ;;  %v2720_v19 = vor.u32 %v2719_v37, %v2716_v50  ;;  %v3244_v62 = vunpack.c.l.b16 %v3183_v32  ;;  %v5387_v50 = vld [vmem:[%s4063_s4 + $0x8c] sm:$0x3] }
 0x169   : > { %v1953_v63 = vpop.f32.mrf.mxu3  ;;  %v1727_v60 = vsel %vm4519_vm10, %v1718_v29, %v1726_v1  ;;  %v2707_v6 = vrot.slane %v2706_v27, 4  ;;  %v2192_v58 = vsel %vm4583_vm3, %v2190_v59, %v2191_v46  ;;  %v3189_v53 = vrot.slane %v5372_v56, 7  ;;  %v5378_v29 = vld [vmem:[%s4063_s4 + $0x8c] sm:$0x7]  ;;  %v5384_v46 = vld [vmem:[%s5870_s2] ss:$0 sm:$0xff] }
 0x16a   : > { %v5350_v5 = vpop.f32.mrf.mxu1  ;;  %v2033_v38 = vadd.f32 %v1953_v63, %v5997_v18  ;;  %v2721_v57 = vsel %vm4559_vm0, %v2712_v21, %v2720_v19  ;;  %v1865_v28 = vunpack.c.l.b16 %v1717_v12  ;;  %v1866_v54 = vunpack.c.l.b16 %v1727_v60  ;;  %v5998_v59 = vld [vmem:[#allocation24_spill] sm:$0xff]  ;;  %v5999_v27 = vld [vmem:[#allocation23_spill] sm:$0xff] }
 0x16b   : > { %v2860_v31 = vunpack.c.l.b16 %v2721_v57  ;;  %v2251_v32 = vunpack.c.l.b16 %v2192_v58  ;;  %v1737_v37 = vrot.slane %v5998_v59, 5  ;;  %v1738_v21 = vrot.slane %v5999_v27, 6  ;;  %v5400_v60 = vld [vmem:[%s4063_s4 + $0xa8] sm:$0xe]  ;;  %v6001_v57 = vld [vmem:[#allocation21_spill] sm:$0xff] }
 0x16c   : > { %3882 = vmatmul.msk.bf16.gmra.mxu2 %vm709_vm4, %v3265_v40  ;;  %v2189_v40 = vsel %vm4583_vm3, %v3816_v47, %v2188_v39  ;;  %v2418_v30 = vadd.f32 %v5286_v43, %v2033_v38  ;;  %v3245_v39 = vunpack.c.l.b16 %v3186_v17  ;;  %v2711_v43 = vsel %vm4559_vm0, %v2707_v6, %v2710_v36 }
 0x16d   : > { %v2250_v1 = vunpack.c.l.b16 %v2189_v40  ;;  %v2859_v4 = vunpack.c.l.b16 %v2711_v43  ;;  %v3867_v36 = vrot.slane %v3070_v9, 11  ;;  %v3191_v38 = vrot.slane %v3189_v53, 4 }
 0x16e   : > { %v5362_v49 = vpop.f32.mrf.mxu0  ;;  %v3027_v47 = vadd.f32 %v5249_v51, %v2418_v30  ;;  %v3192_v17 = vrot.slane %v5378_v29, 7  ;;  %v6000_v12 = vshll.u32 %v5062_v8, 16  ;;  %v1743_v30 = vshrl.u32 %v5387_v50, 16 }
 0x16f   : > { %v5364_v63 = vpop.f32.mrf.mxu2  ;;  %v2881_v18 = vpack.c.b16 %v2860_v31, %v2859_v4  ;;  %v1746_v58 = vshll.u32 %v5387_v50, 16  ;;  %v1886_v43 = vpack.c.b16 %v1864_v48, %v5329_v55  ;;  %v3266_v8 = vpack.c.b16 %v3245_v39, %v3244_v62  ;;  %v2076_v31 = vld [vmem:[%s4063_s4 + $0x84] sm:$0xc] }
 0x170   : > { %v3412_v51 = vadd.f32 %v5288_v42, %v3027_v47  ;;  %v5397_v19 = vrot.slane %v6000_v12, 6  ;;  %v5416_v47 = vpack.c.b16 %v1866_v54, %v1865_v28  ;;  %v2272_v4 = vpack.c.b16 %v2251_v32, %v2250_v1 }
 0x171   : > { %3832 = vmatmul.msk.bf16.gmra.mxu0 %vm709_vm4, %v2271_v33  ;;  %v1798_v33 = vshrl.u32 %v5400_v60, 16  ;;  %v1955_v40 = vpop.f32.mrf.mxu3  ;;  %v5420_v12 = vsel %vm4549_vm15, %v3867_v36, %v3189_v53  ;;  %v3193_v39 = vsel %vm4549_vm15, %v3191_v38, %v3192_v17  ;;  %v1739_v28 = vor.u32 %v1738_v21, %v1737_v37 }
 0x172   : > { %v5403_v6 = vpop.f32.mrf.mxu1  ;;  %v3448_v42 = vadd.f32 %v5384_v46, %v3412_v51  ;;  %v2034_v9 = vadd.f32 %v1955_v40, %v6001_v57  ;;  %v1735_v51 = vor.u32 %v5310_v35, %v5306_v10  ;;  %v1745_v54 = vrot.slane %v1743_v30, 5 }
 0x173   : > { %v1748_v1 = vrot.slane %v1746_v58, 6  ;;  %v2723_v53 = vshrl.u32 %v2076_v31, 16  ;;  %v2726_v32 = vshll.u32 %v2076_v31, 16  ;;  %v2195_v35 = vrot.slane %v5372_v56, 6 }
 0x174   : > { %v3480_v40 = vmax.f32 %v3448_v42, 0.0  ;;  %v2419_v55 = vadd.f32 %v5337_v11, %v2034_v9  ;;  %v3246_v11 = vunpack.c.l.b16 %v5420_v12  ;;  %v2731_v36 = vrot.slane %v5998_v59, 6  ;;  %v6002_v12 = vld [vmem:[#allocation22_spill] sm:$0xff] }
 0x175   : > { %3850 = vmatmul.msk.bf16.gmra.mxu1 %vm709_vm4, %v2881_v18  ;;  %v3247_v18 = vunpack.c.l.b16 %v3193_v39  ;;  %v2725_v42 = vrot.slane %v2723_v53, 6  ;;  %v2728_v57 = vrot.slane %v2726_v32, 7  ;;  %v2732_v37 = vrot.slane %v5999_v27, 7 }
 0x176   : > { %v5425_v48 = vpop.f32.mrf.mxu0  ;;  %3512 = vst [vmem:[%s5414_s12] sm:$0xff] %v3480_v40  ;;  %v3028_v10 = vadd.f32 %v5280_v13, %v2419_v55  ;;  %3799 = vmatmul.msk.bf16.gmra.mxu3 %vm709_vm4, %v1886_v43  ;;  %v1736_v38 = vrot.slane %v1735_v51, 4  ;;  %v2737_v17 = vshrl.u32 %v5378_v29, 16  ;;  %v2740_v13 = vshll.u32 %v5378_v29, 16 }
 0x177   : > { %v5427_v62 = vpop.f32.mrf.mxu2  ;;  %v3817_v56 = vrot.slane %v2076_v31, 10  ;;  %v2198_v59 = vrot.slane %v5387_v50, 6  ;;  %v2729_v9 = vor.u32 %v2728_v57, %v2725_v42  ;;  %v2733_v43 = vor.u32 %v2732_v37, %v2731_v36  ;;  %v3071_v42 = vld [vmem:[%s4063_s4 + $0x90] sm:$0x8] }
 0x178   : > { %v3413_v21 = vadd.f32 %v5339_v3, %v3028_v10  ;;  %v2197_v51 = vrot.slane %v2195_v35, 4  ;;  %v2739_v40 = vrot.slane %v2737_v17, 6  ;;  %v1741_v55 = vrot.slane %v1739_v28, 4  ;;  %v5461_v17 = vld [vmem:[%s4063_s4 + $0x94] sm:$0xf] }
 0x179   : > { %v1958_v30 = vpop.f32.mrf.mxu3  ;;  %v2730_v29 = vrot.slane %v2729_v9, 4  ;;  %v2735_v39 = vrot.slane %v2733_v43, 4  ;;  %v1740_v10 = vsel %vm4519_vm10, %v1736_v38, %v1739_v28  ;;  %v1749_v36 = vor.u32 %v1748_v1, %v1745_v54  ;;  %v5469_v54 = vld [vmem:[%s4063_s4 + $0x98] sm:$0x7]  ;;  %v3962_v1 = vld [vmem:[%s4063_s4 + $0x90] sm:$0xe] }
 0x17a   : > { %v5443_v58 = vpop.f32.mrf.mxu1  ;;  %v3449_v27 = vadd.f32 %v5384_v46, %v3413_v21  ;;  %v2035_v3 = vadd.f32 %v1958_v30, %v6002_v12  ;;  %v2196_v57 = vsel %vm4583_vm3, %v3817_v56, %v2195_v35  ;;  %v2199_v30 = vsel %vm4583_vm3, %v2197_v51, %v2198_v59 }
 0x17b   : > { %v2734_v37 = vsel %vm4559_vm0, %v2730_v29, %v2733_v43  ;;  %v1752_v38 = vshrl.u32 %v3962_v1, 16  ;;  %v3267_v35 = vpack.c.b16 %v3247_v18, %v3246_v11  ;;  %v3868_v9 = vrot.slane %v3071_v42, 11  ;;  %v5486_v29 = vld [vmem:[%s4063_s4 + $0x98] sm:$0x3]  ;;  %v6004_v42 = vld [vmem:[#allocation3_spill] sm:$0xff] }
 0x17c   : > { %3883 = vmatmul.msk.bf16.gmra.mxu2 %vm709_vm4, %v3266_v8  ;;  %v2742_v8 = vrot.slane %v2740_v13, 7  ;;  %v3481_v53 = vmax.f32 %v3449_v27, 0.0  ;;  %v2420_v31 = vadd.f32 %v5362_v49, %v2035_v3  ;;  %v3196_v49 = vrot.slane %v5461_v17, 7 }
 0x17d   : > { %v2861_v28 = vunpack.c.l.b16 %v2734_v37  ;;  %v1755_v43 = vshll.u32 %v3962_v1, 16  ;;  %v5478_v59 = vsel %vm4519_vm10, %v1741_v55, %v1749_v36  ;;  %v5480_v27 = vunpack.c.l.b16 %v1740_v10  ;;  %v6005_v37 = vld [vmem:[#allocation2_spill] sm:$0xff] }
 0x17e   : > { %v5449_v50 = vpop.f32.mrf.mxu0  ;;  %v2743_v21 = vor.u32 %v2742_v8, %v2739_v40  ;;  %3513 = vst [vmem:[%s5414_s12 + $0x8] sm:$0xff] %v3481_v53  ;;  %v3029_v13 = vadd.f32 %v5323_v15, %v2420_v31  ;;  %v2253_v11 = vunpack.c.l.b16 %v2199_v30  ;;  %v3198_v18 = vrot.slane %v3196_v49, 4  ;;  %v2077_v31 = vld [vmem:[%s4063_s4 + $0x90] sm:$0xc] }
 0x17f   : > { %v5451_v32 = vpop.f32.mrf.mxu2  ;;  %v3199_v40 = vrot.slane %v5469_v54, 7  ;;  %v1754_v55 = vrot.slane %v1752_v38, 5  ;;  %v5493_v10 = vsel %vm4549_vm15, %v3868_v9, %v3196_v49  ;;  %v1757_v36 = vrot.slane %v1755_v43, 6 }
 0x180   : > { %v2744_v56 = vsel %vm4559_vm0, %v2735_v39, %v2743_v21  ;;  %v3414_v15 = vadd.f32 %v5364_v63, %v3029_v13  ;;  %v6003_v63 = vld [vmem:[#allocation25_spill] sm:$0xff]  ;;  %v1761_v21 = vrot.slane %v6005_v37, 6  ;;  %v1769_v38 = vshll.u32 %v5486_v29, 16 }
 0x181   : > { %3833 = vmatmul.msk.bf16.gmra.mxu0 %vm709_vm4, %v2272_v4  ;;  %v2862_v12 = vunpack.c.l.b16 %v2744_v56  ;;  %v1960_v3 = vpop.f32.mrf.mxu3  ;;  %v2252_v4 = vunpack.c.l.b16 %v2196_v57  ;;  %v1760_v57 = vrot.slane %v6004_v42, 5  ;;  %v1868_v49 = vunpack.c.l.b16 %v5478_v59 }
 0x182   : > { %v5482_v51 = vpop.f32.mrf.mxu1  ;;  %v3450_v39 = vadd.f32 %v5384_v46, %v3414_v15  ;;  %v2036_v8 = vadd.f32 %v1960_v3, %v6003_v63  ;;  %v3200_v43 = vsel %vm4549_vm15, %v3198_v18, %v3199_v40  ;;  %v2746_v15 = vshrl.u32 %v2077_v31, 16 }
 0x183   : > { %v2882_v53 = vpack.c.b16 %v2862_v12, %v2861_v28  ;;  %v1766_v28 = vshrl.u32 %v5486_v29, 16  ;;  %v2273_v9 = vpack.c.b16 %v2253_v11, %v2252_v4  ;;  %v3248_v12 = vunpack.c.l.b16 %v5493_v10 }
 0x184   : > { %v3482_v13 = vmax.f32 %v3450_v39, 0.0  ;;  %v2421_v30 = vadd.f32 %v5425_v48, %v2036_v8  ;;  %v2202_v3 = vrot.slane %v5461_v17, 6  ;;  %v2749_v39 = vshll.u32 %v2077_v31, 16 }
 0x185   : > { %3851 = vmatmul.msk.bf16.gmra.mxu1 %vm709_vm4, %v2882_v53  ;;  %v1758_v63 = vor.u32 %v1757_v36, %v1754_v55  ;;  %v5514_v8 = vor.u32 %v1761_v21, %v1760_v57  ;;  %v2748_v59 = vrot.slane %v2746_v15, 6  ;;  %v2754_v4 = vrot.slane %v6004_v42, 6  ;;  %v6006_v42 = vld [vmem:[#allocation26_spill] sm:$0xff] }
 0x186   : > { %v5498_v1 = vpop.f32.mrf.mxu0  ;;  %3514 = vst [vmem:[%s5414_s12 + $0x10] sm:$0xff] %v3482_v13  ;;  %v3030_v48 = vadd.f32 %v5350_v5, %v2421_v30  ;;  %3800 = vmatmul.msk.bf16.gmra.mxu3 %vm709_vm4, %v5416_v47  ;;  %v1768_v18 = vrot.slane %v1766_v28, 5  ;;  %v1771_v40 = vrot.slane %v1769_v38, 6  ;;  %v2751_v53 = vrot.slane %v2749_v39, 7 }
 0x187   : > { %v5500_v56 = vpop.f32.mrf.mxu2  ;;  %v3818_v10 = vrot.slane %v2077_v31, 10  ;;  %v2205_v17 = vrot.slane %v5486_v29, 6  ;;  %v2755_v55 = vrot.slane %v6005_v37, 7  ;;  %v2760_v36 = vshrl.u32 %v5469_v54, 16 }
 0x188   : > { %v3415_v11 = vadd.f32 %v5427_v62, %v3030_v48  ;;  %v2204_v62 = vrot.slane %v2202_v3, 4  ;;  %v2752_v13 = vor.u32 %v2751_v53, %v2748_v59  ;;  %v3249_v30 = vunpack.c.l.b16 %v3200_v43 }
 0x189   : > { %v1963_v5 = vpop.f32.mrf.mxu3  ;;  %v2756_v28 = vor.u32 %v2755_v55, %v2754_v4  ;;  %v2762_v38 = vrot.slane %v2760_v36, 6  ;;  %v1759_v48 = vrot.slane %v1758_v63, 4  ;;  %v1801_v53 = vshll.u32 %v5400_v60, 16  ;;  %v5546_v36 = vld [vmem:[%s4063_s4 + $0xa0] sm:$0xf]  ;;  %v6011_v60 = vld [vmem:[#allocation29_spill] sm:$0xff] }
 0x18a   : > { %v5519_v47 = vpop.f32.mrf.mxu1  ;;  %v3451_v57 = vadd.f32 %v5384_v46, %v3415_v11  ;;  %v2037_v21 = vadd.f32 %v1963_v5, %v6006_v42  ;;  %v2753_v39 = vrot.slane %v2752_v13, 4  ;;  %v1764_v11 = vrot.slane %v5514_v8, 4  ;;  %v5554_v42 = vld [vmem:[%s4063_s4 + $0xa4] sm:$0x7]  ;;  %v6007_v13 = vld [vmem:[#allocation27_spill] sm:$0xff] }
 0x18b   : > { %v1772_v5 = vor.u32 %v1771_v40, %v1768_v18  ;;  %v2758_v59 = vrot.slane %v2756_v28, 4  ;;  %v2206_v4 = vsel %vm4583_vm3, %v2204_v62, %v2205_v17  ;;  %v1888_v55 = vpack.c.b16 %v1868_v49, %v5480_v27  ;;  %v3072_v40 = vld [vmem:[%s4063_s4 + $0x9c] sm:$0x8] }
 0x18c   : > { %3884 = vmatmul.msk.bf16.gmra.mxu2 %vm709_vm4, %v3267_v35  ;;  %v2763_v35 = vshll.u32 %v5469_v54, 16  ;;  %v3483_v15 = vmax.f32 %v3451_v57, 0.0  ;;  %v2422_v31 = vadd.f32 %v5449_v50, %v2037_v21  ;;  %v2203_v50 = vsel %vm4583_vm3, %v3818_v10, %v2202_v3 }
 0x18d   : > { %v2757_v63 = vsel %vm4559_vm0, %v2753_v39, %v2756_v28  ;;  %v3268_v10 = vpack.c.b16 %v3249_v30, %v3248_v12  ;;  %v1763_v17 = vsel %vm4519_vm10, %v1759_v48, %v5514_v8  ;;  %v2254_v21 = vunpack.c.l.b16 %v2203_v50  ;;  %v5565_v12 = vld [vmem:[%s4063_s4 + $0xa4] sm:$0x3]  ;;  %v6009_v39 = vld [vmem:[#allocation4_spill] sm:$0xff] }
 0x18e   : > { %v5528_v29 = vpop.f32.mrf.mxu0  ;;  %v2765_v43 = vrot.slane %v2763_v35, 7  ;;  %3515 = vst [vmem:[%s5414_s12 + $0x18] sm:$0xff] %v3483_v15  ;;  %v3031_v54 = vadd.f32 %v5403_v6, %v2422_v31  ;;  %v3203_v6 = vrot.slane %v5546_v36, 7  ;;  %v2863_v57 = vunpack.c.l.b16 %v2757_v63  ;;  %v6008_v31 = vld [vmem:[#allocation5_spill] sm:$0xff] }
 0x18f   : > { %v5530_v37 = vpop.f32.mrf.mxu2  ;;  %v2255_v62 = vunpack.c.l.b16 %v2206_v4  ;;  %v3206_v15 = vrot.slane %v5554_v42, 7  ;;  %v1783_v48 = vrot.slane %v6008_v31, 5  ;;  %v1789_v63 = vshrl.u32 %v5565_v12, 16 }
 0x190   : > { %v2766_v18 = vor.u32 %v2765_v43, %v2762_v38  ;;  %v3416_v3 = vadd.f32 %v5451_v32, %v3031_v54  ;;  %v3869_v38 = vrot.slane %v3072_v40, 11  ;;  %v3205_v35 = vrot.slane %v3203_v6, 4 }
 0x191   : > { %3834 = vmatmul.msk.bf16.gmra.mxu0 %vm709_vm4, %v2273_v9  ;;  %v1965_v27 = vpop.f32.mrf.mxu3  ;;  %v5560_v9 = vsel %vm4519_vm10, %v1764_v11, %v1772_v5  ;;  %v1784_v11 = vrot.slane %v6009_v39, 6  ;;  %v2078_v5 = vld [vmem:[%s4063_s4 + $0x9c] sm:$0xc] }
 0x192   : > { %v5556_v49 = vpop.f32.mrf.mxu1  ;;  %v2767_v32 = vsel %vm4559_vm0, %v2758_v59, %v2766_v18  ;;  %v3452_v8 = vadd.f32 %v5384_v46, %v3416_v3  ;;  %v2038_v30 = vadd.f32 %v1965_v27, %v6007_v13  ;;  %v1869_v18 = vunpack.c.l.b16 %v1763_v17 }
 0x193   : > { %v2864_v28 = vunpack.c.l.b16 %v2767_v32  ;;  %v1870_v40 = vunpack.c.l.b16 %v5560_v9  ;;  %v2274_v3 = vpack.c.b16 %v2255_v62, %v2254_v21  ;;  %v1792_v27 = vshll.u32 %v5565_v12, 16 }
 0x194   : > { %v3484_v43 = vmax.f32 %v3452_v8, 0.0  ;;  %v2423_v59 = vadd.f32 %v5498_v1, %v2038_v30  ;;  %v1781_v1 = vor.u32 %v5397_v19, %v5137_v41  ;;  %v2769_v8 = vshrl.u32 %v2078_v5, 16 }
 0x195   : > { %v2883_v4 = vpack.c.b16 %v2864_v28, %v2863_v57  ;;  %v2209_v57 = vrot.slane %v5546_v36, 6  ;;  %v3204_v17 = vsel %vm4549_vm15, %v3869_v38, %v3203_v6  ;;  %v3207_v9 = vsel %vm4549_vm15, %v3205_v35, %v3206_v15  ;;  %v6010_v15 = vld [vmem:[#allocation28_spill] sm:$0xff] }
 0x196   : > { %v5574_v54 = vpop.f32.mrf.mxu0  ;;  %3516 = vst [vmem:[%s5414_s12 + $0x20] sm:$0xff] %v3484_v43  ;;  %v3032_v32 = vadd.f32 %v5443_v58, %v2423_v59  ;;  %3801 = vmatmul.msk.bf16.gmra.mxu3 %vm709_vm4, %v1888_v55  ;;  %v5592_v21 = vor.u32 %v1784_v11, %v1783_v48  ;;  %v2772_v62 = vshll.u32 %v2078_v5, 16  ;;  %v1791_v55 = vrot.slane %v1789_v63, 5 }
 0x197   : > { %v5576_v50 = vpop.f32.mrf.mxu2  ;;  %3852 = vmatmul.msk.bf16.gmra.mxu1 %vm709_vm4, %v2883_v4  ;;  %v2771_v13 = vrot.slane %v2769_v8, 6  ;;  %v2777_v30 = vrot.slane %v6008_v31, 6  ;;  %v1794_v19 = vrot.slane %v1792_v27, 6  ;;  %v3819_v36 = vrot.slane %v2078_v5, 10 }
 0x198   : > { %v3417_v58 = vadd.f32 %v5500_v56, %v3032_v32  ;;  %v2774_v6 = vrot.slane %v2772_v62, 7  ;;  %v2778_v38 = vrot.slane %v6009_v39, 7  ;;  %v2211_v11 = vrot.slane %v2209_v57, 4 }
 0x199   : > { %v1968_v28 = vpop.f32.mrf.mxu3  ;;  %v2212_v56 = vrot.slane %v5565_v12, 6  ;;  %v2783_v59 = vshrl.u32 %v5554_v42, 16  ;;  %v3250_v27 = vunpack.c.l.b16 %v3204_v17  ;;  %v1782_v32 = vrot.slane %v1781_v1, 4 }
 0x19a   : > { %v5597_v41 = vpop.f32.mrf.mxu1  ;;  %v3453_v35 = vadd.f32 %v5384_v46, %v3417_v58  ;;  %v2039_v48 = vadd.f32 %v1968_v28, %v6010_v15  ;;  %v2775_v43 = vor.u32 %v2774_v6, %v2771_v13  ;;  %v2779_v31 = vor.u32 %v2778_v38, %v2777_v30 }
 0x19b   : > { %v2785_v58 = vrot.slane %v2783_v59, 6  ;;  %v3251_v30 = vunpack.c.l.b16 %v3207_v9  ;;  %v1787_v17 = vrot.slane %v5592_v21, 4  ;;  %v1795_v1 = vor.u32 %v1794_v19, %v1791_v55 }
 0x19c   : > { %3885 = vmatmul.msk.bf16.gmra.mxu2 %vm709_vm4, %v3268_v10  ;;  %v2786_v10 = vshll.u32 %v5554_v42, 16  ;;  %v3485_v4 = vmax.f32 %v3453_v35, 0.0  ;;  %v2424_v5 = vadd.f32 %v5528_v29, %v2039_v48  ;;  %v2776_v8 = vrot.slane %v2775_v43, 4  ;;  %v5640_v43 = vld [vmem:[%s4063_s4 + $0xb0] sm:$0x3] }
 0x19d   : > { %v2781_v62 = vrot.slane %v2779_v31, 4  ;;  %v2210_v42 = vsel %vm4583_vm3, %v3819_v36, %v2209_v57  ;;  %v2213_v29 = vsel %vm4583_vm3, %v2211_v11, %v2212_v56  ;;  %v1800_v38 = vrot.slane %v1798_v33, 5  ;;  %v3073_v36 = vld [vmem:[%s4063_s4 + $0xa8] sm:$0x8] }
 0x19e   : > { %v5606_v63 = vpop.f32.mrf.mxu0  ;;  %v2788_v12 = vrot.slane %v2786_v10, 7  ;;  %3517 = vst [vmem:[%s5414_s12 + $0x28] sm:$0xff] %v3485_v4  ;;  %v3033_v13 = vadd.f32 %v5482_v51, %v2424_v5  ;;  %v2780_v28 = vsel %vm4559_vm0, %v2776_v8, %v2779_v31  ;;  %v1803_v51 = vrot.slane %v1801_v53, 6 }
 0x19f   : > { %v5608_v39 = vpop.f32.mrf.mxu2  ;;  %v2865_v9 = vunpack.c.l.b16 %v2780_v28  ;;  %v2256_v55 = vunpack.c.l.b16 %v2210_v42  ;;  %v2257_v19 = vunpack.c.l.b16 %v2213_v29  ;;  %v3870_v56 = vrot.slane %v3073_v36, 11 }
 0x1a0   : > { %v2789_v6 = vor.u32 %v2788_v12, %v2785_v58  ;;  %v3418_v57 = vadd.f32 %v5530_v37, %v3033_v13  ;;  %v1786_v37 = vsel %vm4519_vm10, %v1782_v32, %v5592_v21  ;;  %v5648_v21 = vld [vmem:[%s4063_s4 + $0xac] sm:$0xf]  ;;  %v5652_v32 = vld [vmem:[%s4063_s4 + $0xa8] sm:$0xc]  ;;  %v2464_v58 = vld [vmem:[%s4063_s4 + $0xb0] sm:$0x7] }
 0x1a1   : > { %3835 = vmatmul.msk.bf16.gmra.mxu0 %vm709_vm4, %v2274_v3  ;;  %v1970_v35 = vpop.f32.mrf.mxu3  ;;  %v1889_v3 = vpack.c.b16 %v1870_v40, %v1869_v18  ;;  %v3269_v18 = vpack.c.b16 %v3251_v30, %v3250_v27  ;;  %v5637_v40 = vsel %vm4519_vm10, %v1787_v17, %v1795_v1  ;;  %v3210_v27 = vrot.slane %v5648_v21, 7  ;;  %v6012_v12 = vld [vmem:[#allocation7_spill] sm:$0xff]  ;;  %v6013_v30 = vld [vmem:[#allocation6_spill] sm:$0xff] }
 0x1a2   : > { %v5626_v15 = vpop.f32.mrf.mxu1  ;;  %v2790_v48 = vsel %vm4559_vm0, %v2781_v62, %v2789_v6  ;;  %v3454_v33 = vadd.f32 %v5384_v46, %v3418_v57  ;;  %v2040_v53 = vadd.f32 %v1970_v35, %v6011_v60  ;;  %v1871_v8 = vunpack.c.l.b16 %v1786_v37 }
 0x1a3   : > { %v2866_v11 = vunpack.c.l.b16 %v2790_v48  ;;  %v2275_v62 = vpack.c.b16 %v2257_v19, %v2256_v55  ;;  %v1806_v13 = vrot.slane %v6012_v12, 5  ;;  %v1807_v42 = vrot.slane %v6013_v30, 6 }
 0x1a4   : > { %v3486_v31 = vmax.f32 %v3454_v33, 0.0  ;;  %v2425_v59 = vadd.f32 %v5574_v54, %v2040_v53  ;;  %v1872_v29 = vunpack.c.l.b16 %v5637_v40  ;;  %v1804_v17 = vor.u32 %v1803_v51, %v1800_v38  ;;  %v6014_v53 = vld [vmem:[#allocation30_spill] sm:$0xff] }
 0x1a5   : > { %v2884_v5 = vpack.c.b16 %v2866_v11, %v2865_v9  ;;  %v1812_v1 = vshrl.u32 %v5640_v43, 16  ;;  %v1815_v28 = vshll.u32 %v5640_v43, 16  ;;  %v2792_v6 = vshrl.u32 %v5652_v32, 16 }
 0x1a6   : > { %v5643_v10 = vpop.f32.mrf.mxu0  ;;  %3518 = vst [vmem:[%s5414_s12 + $0x30] sm:$0xff] %v3486_v31  ;;  %v3034_v54 = vadd.f32 %v5519_v47, %v2425_v59  ;;  %3802 = vmatmul.msk.bf16.gmra.mxu3 %vm709_vm4, %v1889_v3  ;;  %v2795_v57 = vshll.u32 %v5652_v32, 16  ;;  %v2800_v9 = vrot.slane %v6012_v12, 6  ;;  %v5670_v47 = vsel %vm4549_vm15, %v3870_v56, %v3210_v27 }
 0x1a7   : > { %v5645_v4 = vpop.f32.mrf.mxu2  ;;  %3853 = vmatmul.msk.bf16.gmra.mxu1 %vm709_vm4, %v2884_v5  ;;  %v3212_v35 = vrot.slane %v3210_v27, 4  ;;  %v3213_v3 = vrot.slane %v2464_v58, 7  ;;  %v1808_v51 = vor.u32 %v1807_v42, %v1806_v13  ;;  %v2794_v19 = vrot.slane %v2792_v6, 6 }
 0x1a8   : > { %v3419_v36 = vadd.f32 %v5576_v50, %v3034_v54  ;;  %v2797_v48 = vrot.slane %v2795_v57, 7  ;;  %v2801_v33 = vrot.slane %v6013_v30, 7  ;;  %v1805_v37 = vrot.slane %v1804_v17, 4 }
 0x1a9   : > { %v1973_v55 = vpop.f32.mrf.mxu3  ;;  %v1814_v11 = vrot.slane %v1812_v1, 5  ;;  %v1817_v40 = vrot.slane %v1815_v28, 6  ;;  %v2216_v56 = vrot.slane %v5648_v21, 6  ;;  %v2806_v13 = vshrl.u32 %v2464_v58, 16 }
 0x1aa   : > { %v5673_v38 = vpop.f32.mrf.mxu1  ;;  %v3455_v60 = vadd.f32 %v5384_v46, %v3419_v36  ;;  %v2041_v50 = vadd.f32 %v1973_v55, %v6014_v53  ;;  %v2798_v31 = vor.u32 %v2797_v48, %v2794_v19  ;;  %v2802_v59 = vor.u32 %v2801_v33, %v2800_v9 }
 0x1ab   : > { %v2809_v30 = vshll.u32 %v2464_v58, 16  ;;  %v3214_v42 = vsel %vm4549_vm15, %v3212_v35, %v3213_v3  ;;  %v1810_v54 = vrot.slane %v1808_v51, 4  ;;  %v3820_v17 = vrot.slane %v5652_v32, 10  ;;  %v3965_v35 = vld [vmem:[%s4063_s4 + $0xb4] sm:$0xe] }
 0x1ac   : > { %3886 = vmatmul.msk.bf16.gmra.mxu2 %vm709_vm4, %v3269_v18  ;;  %v3487_v18 = vmax.f32 %v3455_v60, 0.0  ;;  %v2426_v5 = vadd.f32 %v5606_v63, %v2041_v50  ;;  %v2799_v1 = vrot.slane %v2798_v31, 4  ;;  %v2804_v28 = vrot.slane %v2802_v59, 4 }
 0x1ad   : > { %v2808_v6 = vrot.slane %v2806_v13, 6  ;;  %v2811_v63 = vrot.slane %v2809_v30, 7  ;;  %v1818_v57 = vor.u32 %v1817_v40, %v1814_v11  ;;  %v2218_v9 = vrot.slane %v2216_v56, 4 }
 0x1ae   : > { %v5680_v27 = vpop.f32.mrf.mxu0  ;;  %3519 = vst [vmem:[%s5414_s12 + $0x38] sm:$0xff] %v3487_v18  ;;  %v3035_v21 = vadd.f32 %v5556_v49, %v2426_v5  ;;  %v2219_v36 = vrot.slane %v5640_v43, 6  ;;  %v2803_v58 = vsel %vm4559_vm0, %v2799_v1, %v2802_v59  ;;  %v1821_v3 = vshrl.u32 %v3965_v35, 16  ;;  %v3074_v59 = vld [vmem:[%s4063_s4 + $0xb4] sm:$0x8] }
 0x1af   : > { %v5682_v12 = vpop.f32.mrf.mxu2  ;;  %v2812_v55 = vor.u32 %v2811_v63, %v2808_v6  ;;  %v1890_v48 = vpack.c.b16 %v1872_v29, %v1871_v8  ;;  %v3252_v49 = vunpack.c.l.b16 %v5670_v47  ;;  %v3253_v33 = vunpack.c.l.b16 %v3214_v42  ;;  %v5717_v18 = vld [vmem:[%s4063_s4 + $0xb4] sm:$0xc] }
 0x1b0   : > { %v3420_v32 = vadd.f32 %v5608_v39, %v3035_v21  ;;  %v1809_v50 = vsel %vm4519_vm10, %v1805_v37, %v1808_v51  ;;  %v1819_v8 = vsel %vm4519_vm10, %v1810_v54, %v1818_v57  ;;  %v2217_v29 = vsel %vm4583_vm3, %v3820_v17, %v2216_v56  ;;  %v5720_v56 = vld [vmem:[%s4063_s4 + $0xb8] sm:$0xf]  ;;  %v2465_v21 = vld [vmem:[%s4063_s4 + $0xbc] sm:$0x7] }
 0x1b1   : > { %3836 = vmatmul.msk.bf16.gmra.mxu0 %vm709_vm4, %v2275_v62  ;;  %v1975_v19 = vpop.f32.mrf.mxu3  ;;  %v2867_v62 = vunpack.c.l.b16 %v2803_v58  ;;  %v2813_v39 = vsel %vm4559_vm0, %v2804_v28, %v2812_v55  ;;  %v2220_v47 = vsel %vm4583_vm3, %v2218_v9, %v2219_v36  ;;  %v1824_v40 = vshll.u32 %v3965_v35, 16  ;;  %v6015_v36 = vld [vmem:[#allocation9_spill] sm:$0xff] }
 0x1b2   : > { %v5696_v60 = vpop.f32.mrf.mxu1  ;;  %v3456_v43 = vadd.f32 %v5384_v46, %v3420_v32  ;;  %v2042_v53 = vadd.f32 %v1975_v19, %v4711_v24  ;;  %v2868_v11 = vunpack.c.l.b16 %v2813_v39  ;;  %v3270_v5 = vpack.c.b16 %v3253_v33, %v3252_v49 }
 0x1b3   : > { %v1873_v13 = vunpack.c.l.b16 %v1809_v50  ;;  %v3217_v42 = vrot.slane %v5720_v56, 7  ;;  %v2258_v17 = vunpack.c.l.b16 %v2217_v29  ;;  %v2259_v1 = vunpack.c.l.b16 %v2220_v47  ;;  %v1471_v50 = vld [vmem:[%s4063_s4 + $0xbc] sm:$0x3] }
 0x1b4   : > { %v3488_v24 = vmax.f32 %v3456_v43, 0.0  ;;  %v2427_v31 = vadd.f32 %v5643_v10, %v2042_v53  ;;  %v2885_v30 = vpack.c.b16 %v2868_v11, %v2867_v62  ;;  %v1874_v10 = vunpack.c.l.b16 %v1819_v8 }
 0x1b5   : > { %v5727_v28 = vrot.slane %v1821_v3, 5  ;;  %v3871_v6 = vrot.slane %v3074_v59, 11  ;;  %v2815_v63 = vshrl.u32 %v5717_v18, 16  ;;  %v5731_v57 = vrot.slane %v1824_v40, 6 }
 0x1b6   : > { %v5711_v51 = vpop.f32.mrf.mxu0  ;;  %3520 = vst [vmem:[%s5414_s12 + $0x40] sm:$0xff] %v3488_v24  ;;  %v3036_v54 = vadd.f32 %v5597_v41, %v2427_v31  ;;  %3803 = vmatmul.msk.bf16.gmra.mxu3 %vm709_vm4, %v1890_v48  ;;  %v2818_v41 = vshll.u32 %v5717_v18, 16  ;;  %v2823_v58 = vrot.slane %v6015_v36, 6  ;;  %v3219_v3 = vrot.slane %v3217_v42, 4  ;;  %v6016_v48 = vld [vmem:[#allocation8_spill] sm:$0xff] }
 0x1b7   : > { %v5713_v37 = vpop.f32.mrf.mxu2  ;;  %3854 = vmatmul.msk.bf16.gmra.mxu1 %vm709_vm4, %v2885_v30  ;;  %v3220_v55 = vrot.slane %v2465_v21, 7  ;;  %v2817_v19 = vrot.slane %v2815_v63, 6  ;;  %v2824_v49 = vrot.slane %v6016_v48, 7  ;;  %v1891_v43 = vpack.c.b16 %v1874_v10, %v1873_v13 }
 0x1b8   : > { %v3421_v9 = vadd.f32 %v5645_v4, %v3036_v54  ;;  %v2276_v4 = vpack.c.b16 %v2259_v1, %v2258_v17  ;;  %v3218_v53 = vsel %vm4549_vm15, %v3871_v6, %v3217_v42  ;;  %v1829_v39 = vrot.slane %v6015_v36, 5 }
 0x1b9   : > { %v1978_v35 = vpop.f32.mrf.mxu3  ;;  %v2820_v8 = vrot.slane %v2818_v41, 7  ;;  %v2825_v29 = vor.u32 %v2824_v49, %v2823_v58  ;;  %v2829_v31 = vshrl.u32 %v2465_v21, 16  ;;  %v3221_v59 = vsel %vm4549_vm15, %v3219_v3, %v3220_v55 }
 0x1ba   : > { %v5737_v32 = vpop.f32.mrf.mxu1  ;;  %v3457_v33 = vadd.f32 %v5384_v46, %v3421_v9  ;;  %v2043_v62 = vadd.f32 %v1978_v35, %v4738_v22  ;;  %v2223_v22 = vrot.slane %v5720_v56, 6  ;;  %v2832_v30 = vshll.u32 %v2465_v21, 16 }
 0x1bb   : > { %v2821_v13 = vor.u32 %v2820_v8, %v2817_v19  ;;  %v1835_v54 = vshrl.u32 %v1471_v50, 16  ;;  %v1838_v10 = vshll.u32 %v1471_v50, 16  ;;  %v3821_v17 = vrot.slane %v5717_v18, 10 }
 0x1bc   : > { %3887 = vmatmul.msk.bf16.gmra.mxu2 %vm709_vm4, %v3270_v5  ;;  %v3489_v47 = vmax.f32 %v3457_v33, 0.0  ;;  %v2428_v11 = vadd.f32 %v5680_v27, %v2043_v62  ;;  %v1830_v5 = vrot.slane %v6016_v48, 6  ;;  %v2831_v27 = vrot.slane %v2829_v31, 6 }
 0x1bd   : > { %v2822_v1 = vrot.slane %v2821_v13, 4  ;;  %v2827_v56 = vrot.slane %v2825_v29, 4  ;;  %v2834_v6 = vrot.slane %v2832_v30, 7  ;;  %v1827_v63 = vor.u32 %v5731_v57, %v5727_v28 }
 0x1be   : > { %v5747_v40 = vpop.f32.mrf.mxu0  ;;  %3521 = vst [vmem:[%s5414_s12 + $0x48] sm:$0xff] %v3489_v47  ;;  %v3037_v42 = vadd.f32 %v5626_v15, %v2428_v11  ;;  %v2225_v9 = vrot.slane %v2223_v22, 4  ;;  %v2226_v21 = vrot.slane %v1471_v50, 6  ;;  %v3254_v36 = vunpack.c.l.b16 %v3218_v53 }
 0x1bf   : > { %v5749_v24 = vpop.f32.mrf.mxu2  ;;  %v3255_v15 = vunpack.c.l.b16 %v3221_v59  ;;  %v2826_v35 = vsel %vm4559_vm0, %v2822_v1, %v2825_v29  ;;  %v2835_v3 = vor.u32 %v2834_v6, %v2831_v27  ;;  %v1837_v48 = vrot.slane %v1835_v54, 5 }
 0x1c0   : > { %v3422_v52 = vadd.f32 %v5682_v12, %v3037_v42  ;;  %v1831_v12 = vor.u32 %v1830_v5, %v1829_v39  ;;  %v2869_v19 = vunpack.c.l.b16 %v2826_v35  ;;  %v1840_v28 = vrot.slane %v1838_v10, 6 }
 0x1c1   : > { %3837 = vmatmul.msk.bf16.gmra.mxu0 %vm709_vm4, %v2276_v4  ;;  %v1980_v41 = vpop.f32.mrf.mxu3  ;;  %v2224_v57 = vsel %vm4583_vm3, %v3821_v17, %v2223_v22  ;;  %v2836_v49 = vsel %vm4559_vm0, %v2827_v56, %v2835_v3  ;;  %v2227_v50 = vsel %vm4583_vm3, %v2225_v9, %v2226_v21  ;;  %v1828_v29 = vrot.slane %v1827_v63, 4 }
 0x1c2   : > { %v5762_v58 = vpop.f32.mrf.mxu1  ;;  %v3458_v18 = vadd.f32 %v5384_v46, %v3422_v52  ;;  %v2044_v55 = vadd.f32 %v1980_v41, %v4783_v26  ;;  %v2870_v8 = vunpack.c.l.b16 %v2836_v49  ;;  %v3271_v26 = vpack.c.b16 %v3255_v15, %v3254_v36 }
 0x1c3   : > { %v1833_v11 = vrot.slane %v1831_v12, 4  ;;  %v1841_v25 = vor.u32 %v1840_v28, %v1837_v48  ;;  %v2260_v22 = vunpack.c.l.b16 %v2224_v57  ;;  %v2261_v31 = vunpack.c.l.b16 %v2227_v50 }
 0x1c4   : > { %v3490_v33 = vmax.f32 %v3458_v18, 0.0  ;;  %v2429_v62 = vadd.f32 %v5711_v51, %v2044_v55  ;;  %v2886_v47 = vpack.c.b16 %v2870_v8, %v2869_v19 }
 0x1c5   : > { %v1842_v13 = vsel %vm4519_vm10, %v1833_v11, %v1841_v25  ;;  %v2277_v30 = vpack.c.b16 %v2261_v31, %v2260_v22 }
 0x1c6   : > { %v2370_v4 = vpop.f32.mrf.mxu0  ;;  %3522 = vst [vmem:[%s5414_s12 + $0x50] sm:$0xff] %v3490_v33  ;;  %v3038_v39 = vadd.f32 %v5673_v38, %v2429_v62  ;;  %3804 = vmatmul.msk.bf16.gmra.mxu3 %vm709_vm4, %v1891_v43  ;;  %v1832_v43 = vsel %vm4519_vm10, %v1828_v29, %v1831_v12  ;;  %v1876_v1 = vunpack.c.l.b16 %v1842_v13 }
 0x1c7   : > { %v3364_v53 = vpop.f32.mrf.mxu2  ;;  %3855 = vmatmul.msk.bf16.gmra.mxu1 %vm709_vm4, %v2886_v47  ;;  %v1875_v17 = vunpack.c.l.b16 %v1832_v43 }
 0x1c8   : > { %v3423_v51 = vadd.f32 %v5713_v37, %v3038_v39  ;;  %v6017_v39 = vld [vmem:[#allocation32_spill] sm:$0xff] }
 0x1c9   : > { %v1983_v16 = vpop.f32.mrf.mxu3  ;;  %v1892_v63 = vpack.c.b16 %v1876_v1, %v1875_v17 }
 0x1ca   : > { %v2984_v59 = vpop.f32.mrf.mxu1  ;;  %v3459_v5 = vadd.f32 %v5384_v46, %v3423_v51  ;;  %v2045_v38 = vadd.f32 %v1983_v16, %v4821_v20  ;;  %v5810_v16 = vld [vmem:[%s5870_s2] ss:$0 sm:$0xff] }
 0x1cc   : > { %3888 = vmatmul.msk.bf16.gmra.mxu2 %vm709_vm4, %v3271_v26  ;;  %v3491_v42 = vmax.f32 %v3459_v5, 0.0  ;;  %v2430_v37 = vadd.f32 %v5747_v40, %v2045_v38 }
 0x1ce   : > { %v2373_v54 = vpop.f32.mrf.mxu0  ;;  %3523 = vst [vmem:[%s5414_s12 + $0x58] sm:$0xff] %v3491_v42  ;;  %v3039_v27 = vadd.f32 %v5696_v60, %v2430_v37 }
 0x1cf   : > { %v3367_v10 = vpop.f32.mrf.mxu2 }
 0x1d0   : > { %v3424_v20 = vadd.f32 %v5749_v24, %v3039_v27 }
 0x1d1   : > { %3838 = vmatmul.msk.bf16.gmra.mxu0 %vm709_vm4, %v2277_v30  ;;  %v1985_v56 = vpop.f32.mrf.mxu3 }
 0x1d2   : > { %v2987_v6 = vpop.f32.mrf.mxu1  ;;  %v3460_v7 = vadd.f32 %v5384_v46, %v3424_v20  ;;  %v2046_v52 = vadd.f32 %v1985_v56, %v4862_v45 }
 0x1d4   : > { %v3492_v40 = vmax.f32 %v3460_v7, 0.0  ;;  %v2431_v9 = vadd.f32 %v2370_v4, %v2046_v52 }
 0x1d6   : > { %v2375_v21 = vpop.f32.mrf.mxu0  ;;  %3524 = vst [vmem:[%s5414_s12 + $0x60] sm:$0xff] %v3492_v40  ;;  %v3040_v60 = vadd.f32 %v5737_v32, %v2431_v9  ;;  %3805 = vmatmul.msk.bf16.gmra.mxu3 %vm709_vm4, %v1892_v63 }
 0x1d7   : > { %v3369_v41 = vpop.f32.mrf.mxu2 }
 0x1d8   : > { %v3425_v36 = vadd.f32 %v3364_v53, %v3040_v60 }
 0x1d9   : > { %v1988_v15 = vpop.f32.mrf.mxu3 }
 0x1da   : > { %v2989_v24 = vpop.f32.mrf.mxu1  ;;  %v3461_v35 = vadd.f32 %v5384_v46, %v3425_v36  ;;  %v2047_v3 = vadd.f32 %v1988_v15, %v4901_v14 }
 0x1dc   : > { %v3493_v45 = vmax.f32 %v3461_v35, 0.0  ;;  %v2432_v18 = vadd.f32 %v2373_v54, %v2047_v3 }
 0x1de   : > { %v2378_v55 = vpop.f32.mrf.mxu0  ;;  %3525 = vst [vmem:[%s5414_s12 + $0x68] sm:$0xff] %v3493_v45  ;;  %v3041_v19 = vadd.f32 %v5762_v58, %v2432_v18 }
 0x1df   : > { %v3372_v12 = vpop.f32.mrf.mxu2 }
 0x1e0   : > { %v3426_v48 = vadd.f32 %v3367_v10, %v3041_v19 }
 0x1e1   : > { %v1990_v28 = vpop.f32.mrf.mxu3 }
 0x1e2   : > { %v3462_v32 = vadd.f32 %v5384_v46, %v3426_v48  ;;  %v2048_v57 = vadd.f32 %v1990_v28, %v4947_v0  ;;  %v2992_v49 = vpop.f32.mrf.mxu1 }
 0x1e4   : > { %v3494_v33 = vmax.f32 %v3462_v32, 0.0  ;;  %v2433_v62 = vadd.f32 %v2375_v21, %v2048_v57 }
 0x1e6   : > { %v2380_v4 = vpop.f32.mrf.mxu0  ;;  %3526 = vst [vmem:[%s5414_s12 + $0x70] sm:$0xff] %v3494_v33  ;;  %v3042_v53 = vadd.f32 %v2984_v59, %v2433_v62 }
 0x1e7   : > { %v3374_v14 = vpop.f32.mrf.mxu2 }
 0x1e8   : > { %v3427_v50 = vadd.f32 %v3369_v41, %v3042_v53 }
 0x1e9   : > { %v1993_v8 = vpop.f32.mrf.mxu3 }
 0x1ea   : > { %v3463_v26 = vadd.f32 %v5384_v46, %v3427_v50  ;;  %v2049_v58 = vadd.f32 %v1993_v8, %v6017_v39  ;;  %v2994_v0 = vpop.f32.mrf.mxu1  ;;  %v6018_v8 = vld [vmem:[#allocation15_spill] sm:$0xff] }
 0x1ec   : > { %v3495_v29 = vmax.f32 %v3463_v26, 0.0  ;;  %v2434_v47 = vadd.f32 %v2378_v55, %v2049_v58 }
 0x1ee   : > { %v2383_v11 = vpop.f32.mrf.mxu0  ;;  %3527 = vst [vmem:[%s5414_s12 + $0x78] sm:$0xff] %v3495_v29  ;;  %v3043_v22 = vadd.f32 %v2987_v6, %v2434_v47 }
 0x1ef   : > { %v3377_v25 = vpop.f32.mrf.mxu2 }
 0x1f0   : > { %v3428_v31 = vadd.f32 %v3372_v12, %v3043_v22 }
 0x1f1   : > { %v1995_v51 = vpop.f32.mrf.mxu3 }
 0x1f2   : > { %v3464_v59 = vadd.f32 %v5810_v16, %v3428_v31  ;;  %v2050_v46 = vadd.f32 %v1995_v51, %v5026_v44  ;;  %v2997_v42 = vpop.f32.mrf.mxu1  ;;  %v6019_v31 = vld [vmem:[#allocation17_spill] sm:$0xff] }
 0x1f4   : > { %v3496_v5 = vmax.f32 %v3464_v59, 0.0  ;;  %v2435_v38 = vadd.f32 %v2380_v4, %v2050_v46 }
 0x1f6   : > { %v2385_v43 = vpop.f32.mrf.mxu0  ;;  %3528 = vst [vmem:[%s5414_s12 + $0x80] sm:$0xff] %v3496_v5  ;;  %v3044_v30 = vadd.f32 %v2989_v24, %v2435_v38 }
 0x1f7   : > { %v3379_v13 = vpop.f32.mrf.mxu2 }
 0x1f8   : > { %v3429_v37 = vadd.f32 %v3374_v14, %v3044_v30 }
 0x1f9   : > { %v1998_v54 = vpop.f32.mrf.mxu3 }
 0x1fa   : > { %v3465_v10 = vadd.f32 %v5810_v16, %v3429_v37  ;;  %v2051_v27 = vadd.f32 %v1998_v54, %v5065_v61  ;;  %v2999_v52 = vpop.f32.mrf.mxu1  ;;  %v6020_v37 = vld [vmem:[#allocation31_spill] sm:$0xff] }
 0x1fc   : > { %v3497_v17 = vmax.f32 %v3465_v10, 0.0  ;;  %v2436_v1 = vadd.f32 %v2383_v11, %v2051_v27 }
 0x1fe   : > { %v2388_v20 = vpop.f32.mrf.mxu0  ;;  %3529 = vst [vmem:[%s5414_s12 + $0x88] sm:$0xff] %v3497_v17  ;;  %v3045_v44 = vadd.f32 %v2992_v49, %v2436_v1 }
 0x1ff   : > { %v3382_v56 = vpop.f32.mrf.mxu2 }
 0x200   : > { %v3430_v6 = vadd.f32 %v3377_v25, %v3045_v44 }
 0x201   : > { %v2000_v7 = vpop.f32.mrf.mxu3 }
 0x202   : > { %v3466_v63 = vadd.f32 %v5810_v16, %v3430_v6  ;;  %v2052_v40 = vadd.f32 %v2000_v7, %v5111_v2  ;;  %v3002_v3 = vpop.f32.mrf.mxu1  ;;  %v6021_v7 = vld [vmem:[#allocation11_spill] sm:$0xff] }
 0x204   : > { %v3498_v9 = vmax.f32 %v3466_v63, 0.0  ;;  %v2437_v21 = vadd.f32 %v2385_v43, %v2052_v40 }
 0x206   : > { %v2390_v41 = vpop.f32.mrf.mxu0  ;;  %3530 = vst [vmem:[%s5414_s12 + $0x90] sm:$0xff] %v3498_v9  ;;  %v3046_v61 = vadd.f32 %v2994_v0, %v2437_v21 }
 0x207   : > { %v3384_v60 = vpop.f32.mrf.mxu2 }
 0x208   : > { %v3431_v36 = vadd.f32 %v3379_v13, %v3046_v61 }
 0x209   : > { %v2003_v15 = vpop.f32.mrf.mxu3 }
 0x20a   : > { %v3467_v24 = vadd.f32 %v5810_v16, %v3431_v36  ;;  %v2053_v35 = vadd.f32 %v2003_v15, %v5144_v23  ;;  %v3004_v62 = vpop.f32.mrf.mxu1  ;;  %v6022_v15 = vld [vmem:[#allocation10_spill] sm:$0xff] }
 0x20c   : > { %v3499_v45 = vmax.f32 %v3467_v24, 0.0  ;;  %v2438_v18 = vadd.f32 %v2388_v20, %v2053_v35 }
 0x20e   : > { %v2393_v55 = vpop.f32.mrf.mxu0  ;;  %3531 = vst [vmem:[%s5414_s12 + $0x98] sm:$0xff] %v3499_v45  ;;  %v3047_v2 = vadd.f32 %v2997_v42, %v2438_v18 }
 0x20f   : > { %v3387_v12 = vpop.f32.mrf.mxu2 }
 0x210   : > { %v3432_v19 = vadd.f32 %v3382_v56, %v3047_v2 }
 0x211   : > { %v2005_v48 = vpop.f32.mrf.mxu3 }
 0x212   : > { %v3468_v28 = vadd.f32 %v5810_v16, %v3432_v19  ;;  %v2054_v32 = vadd.f32 %v2005_v48, %v5190_v34 }
 0x214   : > { %v3500_v57 = vmax.f32 %v3468_v28, 0.0  ;;  %v2439_v49 = vadd.f32 %v2390_v41, %v2054_v32  ;;  %v3007_v34 = vpop.f32.mrf.mxu1  ;;  %v6023_v28 = vld [vmem:[#allocation13_spill] sm:$0xff] }
 0x216   : > { %v2395_v33 = vpop.f32.mrf.mxu0  ;;  %3532 = vst [vmem:[%s5414_s12 + $0xa0] sm:$0xff] %v3500_v57  ;;  %v3048_v23 = vadd.f32 %v2999_v52, %v2439_v49 }
 0x217   : > { %v3389_v4 = vpop.f32.mrf.mxu2 }
 0x218   : > { %v3433_v14 = vadd.f32 %v3384_v60, %v3048_v23 }
 0x219   : > { %v2008_v53 = vpop.f32.mrf.mxu3 }
 0x21a   : > { %v3469_v50 = vadd.f32 %v5810_v16, %v3433_v14  ;;  %v2055_v26 = vadd.f32 %v2008_v53, %v6018_v8  ;;  %v6024_v8 = vld [vmem:[#allocation12_spill] sm:$0xff] }
 0x21c   : > { %v3501_v39 = vmax.f32 %v3469_v50, 0.0  ;;  %v2440_v58 = vadd.f32 %v2393_v55, %v2055_v26  ;;  %v3009_v30 = vpop.f32.mrf.mxu1 }
 0x21e   : > { %v2398_v29 = vpop.f32.mrf.mxu0  ;;  %3533 = vst [vmem:[%s5414_s12 + $0xa8] sm:$0xff] %v3501_v39  ;;  %v3049_v47 = vadd.f32 %v3002_v3, %v2440_v58 }
 0x21f   : > { %v3392_v0 = vpop.f32.mrf.mxu2 }
 0x220   : > { %v3434_v11 = vadd.f32 %v3387_v12, %v3049_v47 }
 0x221   : > { %v2010_v25 = vpop.f32.mrf.mxu3 }
 0x222   : > { %v3470_v22 = vadd.f32 %v5810_v16, %v3434_v11  ;;  %v2056_v51 = vadd.f32 %v2010_v25, %v6019_v31 }
 0x224   : > { %v3502_v59 = vmax.f32 %v3470_v22, 0.0  ;;  %v2441_v46 = vadd.f32 %v2395_v33, %v2056_v51  ;;  %v3012_v63 = vpop.f32.mrf.mxu1  ;;  %v6025_v22 = vld [vmem:[#allocation14_spill] sm:$0xff] }
 0x226   : > { %3534 = vst [vmem:[%s5414_s12 + $0xb0] sm:$0xff] %v3502_v59  ;;  %v3050_v5 = vadd.f32 %v3004_v62, %v2441_v46  ;;  %v2400_v38 = vpop.f32.mrf.mxu0 }
 0x227   : > { %v3394_v10 = vpop.f32.mrf.mxu2 }
 0x228   : > { %v3435_v43 = vadd.f32 %v3389_v4, %v3050_v5 }
 0x229   : > { %v2013_v13 = vpop.f32.mrf.mxu3 }
 0x22a   : > { %v3471_v42 = vadd.f32 %v5810_v16, %v3435_v43  ;;  %v2057_v54 = vadd.f32 %v2013_v13, %v6020_v37 }
 0x22c   : > { %v3503_v27 = vmax.f32 %v3471_v42, 0.0  ;;  %v2442_v17 = vadd.f32 %v2398_v29, %v2057_v54  ;;  %v3014_v18 = vpop.f32.mrf.mxu1  ;;  %v6026_v42 = vld [vmem:[#allocation16_spill] sm:$0xff] }
 0x22e   : > { %3535 = vst [vmem:[%s5414_s12 + $0xb8] sm:$0xff] %v3503_v27  ;;  %v3051_v1 = vadd.f32 %v3007_v34, %v2442_v17  ;;  %v2403_v44 = vpop.f32.mrf.mxu0 }
 0x22f   : > { %v3397_v21 = vpop.f32.mrf.mxu2 }
 0x230   : > { %v3436_v20 = vadd.f32 %v3392_v0, %v3051_v1 }
 0x231   : > { %v2015_v56 = vpop.f32.mrf.mxu3 }
 0x232   : > { %v3472_v6 = vadd.f32 %v5810_v16, %v3436_v20  ;;  %v2058_v52 = vadd.f32 %v2015_v56, %v6021_v7 }
 0x234   : > { %v3504_v40 = vmax.f32 %v3472_v6, 0.0  ;;  %v2443_v9 = vadd.f32 %v2400_v38, %v2058_v52  ;;  %v3017_v23 = vpop.f32.mrf.mxu1  ;;  %v6027_v6 = vld [vmem:[#allocation20_spill] sm:$0xff] }
 0x236   : > { %3536 = vst [vmem:[%s5414_s12 + $0xc0] sm:$0xff] %v3504_v40  ;;  %v3052_v41 = vadd.f32 %v3009_v30, %v2443_v9  ;;  %v2405_v35 = vpop.f32.mrf.mxu0 }
 0x237   : > { %v3399_v12 = vpop.f32.mrf.mxu2 }
 0x238   : > { %v3437_v60 = vadd.f32 %v3394_v10, %v3052_v41 }
 0x239   : > { %v2018_v61 = vpop.f32.mrf.mxu3 }
 0x23a   : > { %v3473_v36 = vadd.f32 %v5810_v16, %v3437_v60  ;;  %v2059_v24 = vadd.f32 %v2018_v61, %v6022_v15 }
 0x23c   : > { %v3505_v3 = vmax.f32 %v3473_v36, 0.0  ;;  %v2444_v45 = vadd.f32 %v2403_v44, %v2059_v24  ;;  %v3019_v11 = vpop.f32.mrf.mxu1 }
 0x23e   : > { %3537 = vst [vmem:[%s5414_s12 + $0xc8] sm:$0xff] %v3505_v3  ;;  %v3053_v55 = vadd.f32 %v3012_v63, %v2444_v45  ;;  %v2408_v33 = vpop.f32.mrf.mxu0 }
 0x23f   : > { %v3402_v14 = vpop.f32.mrf.mxu2 }
 0x240   : > { %v3438_v2 = vadd.f32 %v3397_v21, %v3053_v55 }
 0x241   : > { %v2020_v19 = vpop.f32.mrf.mxu3 }
 0x242   : > { %v3474_v48 = vadd.f32 %v5810_v16, %v3438_v2  ;;  %v2060_v32 = vadd.f32 %v2020_v19, %v6023_v28 }
 0x244   : > { %v3506_v57 = vmax.f32 %v3474_v48, 0.0  ;;  %v2445_v49 = vadd.f32 %v2405_v35, %v2060_v32  ;;  %v3022_v54 = vpop.f32.mrf.mxu1 }
 0x246   : > { %3538 = vst [vmem:[%s5414_s12 + $0xd0] sm:$0xff] %v3506_v57  ;;  %v3054_v62 = vadd.f32 %v3014_v18, %v2445_v49  ;;  %v2410_v47 = vpop.f32.mrf.mxu0 }
 0x247   : > { %v3404_v51 = vpop.f32.mrf.mxu2 }
 0x248   : > { %v3439_v4 = vadd.f32 %v3399_v12, %v3054_v62 }
 0x249   : > { %v2023_v53 = vpop.f32.mrf.mxu3 }
 0x24a   : > { %v3475_v50 = vadd.f32 %v5810_v16, %v3439_v4  ;;  %v2061_v26 = vadd.f32 %v2023_v53, %v6024_v8 }
 0x24c   : > { %v3507_v39 = vmax.f32 %v3475_v50, 0.0  ;;  %v2446_v58 = vadd.f32 %v2408_v33, %v2061_v26  ;;  %v3024_v9 = vpop.f32.mrf.mxu1 }
 0x24e   : > { %3539 = vst [vmem:[%s5414_s12 + $0xd8] sm:$0xff] %v3507_v39  ;;  %v3055_v29 = vadd.f32 %v3017_v23, %v2446_v58  ;;  %v2413_v43 = vpop.f32.mrf.mxu0 }
 0x24f   : > { %v3407_v17 = vpop.f32.mrf.mxu2 }
 0x250   : > { %v3440_v34 = vadd.f32 %v3402_v14, %v3055_v29 }
 0x251   : > { %v2025_v25 = vpop.f32.mrf.mxu3 }
 0x252   : > { %v3476_v0 = vadd.f32 %v5810_v16, %v3440_v34  ;;  %v2062_v31 = vadd.f32 %v2025_v25, %v6025_v22 }
 0x254   : > { %v3508_v59 = vmax.f32 %v3476_v0, 0.0  ;;  %v2447_v46 = vadd.f32 %v2410_v47, %v2062_v31 }
 0x256   : > { %3540 = vst [vmem:[%s5414_s12 + $0xe0] sm:$0xff] %v3508_v59  ;;  %v3056_v5 = vadd.f32 %v3019_v11, %v2447_v46  ;;  %v2415_v52 = vpop.f32.mrf.mxu0 }
 0x257   : > { %v3409_v41 = vpop.f32.mrf.mxu2 }
 0x258   : > { %v3441_v38 = vadd.f32 %v3404_v51, %v3056_v5 }
 0x259   : > { %v2028_v13 = vpop.f32.mrf.mxu3 }
 0x25a   : > { %v3477_v30 = vadd.f32 %v5810_v16, %v3441_v38  ;;  %v2063_v37 = vadd.f32 %v2028_v13, %v6026_v42 }
 0x25c   : > { %v3509_v10 = vmax.f32 %v3477_v30, 0.0  ;;  %v2448_v27 = vadd.f32 %v2413_v43, %v2063_v37 }
 0x25e   : > { %3541 = vst [vmem:[%s5414_s12 + $0xe8] sm:$0xff] %v3509_v10  ;;  %v3057_v1 = vadd.f32 %v3022_v54, %v2448_v27 }
 0x260   : > { %v3442_v20 = vadd.f32 %v3407_v17, %v3057_v1 }
 0x261   : > { %v2030_v56 = vpop.f32.mrf.mxu3 }
 0x262   : > { %v3478_v44 = vadd.f32 %v5810_v16, %v3442_v20  ;;  %v2064_v7 = vadd.f32 %v2030_v56, %v6027_v6 }
 0x264   : > { %v3510_v63 = vmax.f32 %v3478_v44, 0.0  ;;  %v2449_v40 = vadd.f32 %v2415_v52, %v2064_v7 }
 0x266   : > { %3542 = vst [vmem:[%s5414_s12 + $0xf0] sm:$0xff] %v3510_v63  ;;  %v3058_v21 = vadd.f32 %v3024_v9, %v2449_v40 }
 0x268   : > { %v3443_v60 = vadd.f32 %v3409_v41, %v3058_v21 }
 0x26a   : > { %v3479_v61 = vadd.f32 %v5810_v16, %v3443_v60 }
 0x26c   : > { %v3511_v36 = vmax.f32 %v3479_v61, 0.0 }
 0x26e   : > { %3543 = vst [vmem:[%s5414_s12 + $0xf8] sm:$0xff] %v3511_v36 }
 0x26f PF: > { %s13_s14 = sadd.s32 1, %s3990_s14   ;;  %s6028_s12 = smov %s3986_s13 }
 0x270   : > { %p10_p5 = scmp.ge.s32.totalorder %s13_s14, 4   ;;  %s6029_s13 = smov %s6031_s15 }
 0x272   :  { %12 = sbr.rel (!%p10_p5) target bundleno = 2 (0x2), region = 74 }

// kernel: module_d_forward.12
= control target key start
LH: loop header
LB: loop body
LE: loop exit
PB: predicated region body
PF: predicated region fallthrough
CT: control target
= control target key end

     0   :  { %s1751_s12 = smov 0   ;;  %s1753_s13 = smov 0   ;;  %s2103_s0 = inlined_call_operand.vmem [shape: bf16[8,9,9,8], index: 0, kind: input, shape index: {}]   ;;  %s2104_s1 = inlined_call_operand.vmem [shape: bf16[9,8,128], index: 1, kind: input, shape index: {}]   ;;  %s2105_s2 = inlined_call_operand.vmem [shape: f32[1,128], index: 2, kind: input, shape index: {}]   ;;  %s2106_s3 = inlined_call_operand.vmem [shape: f32[2,8,8,128], index: 3, kind: output, shape index: {}]  }
   0x1   :  { %s1755_s14 = smov 0  }
   0x2 LB: > { %s25_s15 = sadd.s32 1, %s1725_s13  ;;  %p1434_p0 = scmp.ge.s32.totalorder %s1729_s14, 1  ;;  %s1729_s14 = sphi %s1755_s14, %s13_s14   ;;  %s1725_s13 = sphi %s1753_s13, %s2110_s13   ;;  %s1721_s12 = sphi %s1751_s12, %s2109_s12  }
   0x3   : > { %p27_p1 = scmp.ge.s32.totalorder %s25_s15, 2  ;;  %p170_p2 = scmp.lt.s32.totalorder %s1729_s14, 3 }
   0x5   : > { %s2112_s15 = smov (%p27_p1, %s25_s15), 0  ;;  %p171_p3 = pnand %p1434_p0, %p170_p2 }
   0x6   : > { %s1435_s18 = sshll.u32 (!%p171_p3), %s1721_s12, 2  ;;  %p219_p5 = scmp.lt.s32.totalorder (!%p171_p3), %s1721_s12, 1 }
   0x7   : > { %174 = sbr.rel (%p171_p3) target bundleno = 300 (0x12c), region = 32  ;;  %p206_p4 = scmp.lt.s32.totalorder (!%p171_p3), %s1435_s18, 7 }
   0xc   : > { %v1447_v0 = vld [vmem:[%s2104_s1 + $0x4] sm:$0xf]  ;;  %vm281_vm0 = vcmask 1043456   ;;  %v1488_v2 = vld [vmem:[%s2104_s1 + $0x8] sm:$0xf]  ;;  %s2114_s18 = smov (!%p206_p4, %s1435_s18), 7 }
   0xd   : > { %v283_v1 = vsel %vm281_vm0, %v1447_v0, 0  ;;  %v1501_v3 = vld [vmem:[%s2104_s1 + $0xc] sm:$0xf]  ;;  %v536_v4 = vsel %vm281_vm0, %v1488_v2, 0  ;;  %v236_v6 = vld [vmem:[%s2104_s1] sm:$0xf] }
   0xe   : > { %1678 = vmatpush.bf16.msra.mxu1 %v283_v1  ;;  %1679 = vmatpush.bf16.msra.mxu2 %v283_v1  ;;  %v619_v5 = vsel %vm281_vm0, %v1501_v3, 0  ;;  %v1530_v7 = vld [vmem:[%s2104_s1 + $0x10] sm:$0xf]  ;;  %v347_v8 = vsel %vm281_vm0, %v236_v6, 0  ;;  %s1681_s27 = smul.u32 72, %s2114_s18  ;;  %vm268_vm1 = vcmask 64512  }
   0xf   : > { %1680 = vmatpush.bf16.msra.mxu3 %v283_v1  ;;  %292 = vmatpush.bf16.msra.mxu0 %v283_v1  ;;  %v702_v9 = vsel %vm281_vm0, %v1530_v7, 0  ;;  %v1580_v10 = vld [vmem:[%s2104_s1 + $0x18] sm:$0xf]  ;;  %v1609_v11 = vld [vmem:[%s2104_s1 + $0x1c] sm:$0xf]  ;;  %s2116_s12 = smov (!%p219_p5, %s1721_s12), 1 }
  0x10   : > { %s1798_s5 = scalar_lea.vmem %s2103_s0, %s1681_s27  ;;  %v1567_v12 = vld [vmem:[%s2104_s1 + $0x14] sm:$0xf]  ;;  %v1646_v13 = vld [vmem:[%s2104_s1 + $0x20] sm:$0xf]  ;;  %v979_v25 = vsel %vm281_vm0, %v1580_v10, 0  ;;  %v1062_v26 = vsel %vm281_vm0, %v1609_v11, 0 }
  0x11   : > { %v1454_v14 = vld [vmem:[%s1798_s5 + $0x58] sm:$0xf]  ;;  %v1659_v15 = vld [vmem:[%s1798_s5 + $0x5c] sm:$0xf0]  ;;  %v1458_v16 = vld [vmem:[%s1798_s5 + $0x68] sm:$0xf] }
  0x12   : > { %545 = vmatpush.bf16.msrb.mxu2 %v536_v4  ;;  %356 = vmatpush.bf16.msrb.mxu1 %v347_v8  ;;  %v1455_v17 = vor.u32 %v1659_v15, %v1454_v14  ;;  %v1660_v18 = vld [vmem:[%s1798_s5 + $0x6c] sm:$0xf0]  ;;  %v1462_v19 = vld [vmem:[%s1798_s5 + $0x78] sm:$0xf]  ;;  %v1661_v20 = vld [vmem:[%s1798_s5 + $0x7c] sm:$0xf0] }
  0x13   : > { %628 = vmatpush.bf16.msrb.mxu3 %v619_v5  ;;  %711 = vmatpush.bf16.msrb.mxu0 %v702_v9  ;;  %v1459_v21 = vor.u32 %v1660_v18, %v1458_v16  ;;  %v1463_v22 = vor.u32 %v1661_v20, %v1462_v19  ;;  %v1450_v23 = vld [vmem:[%s1798_s5 + $0x48] sm:$0xf]  ;;  %v1658_v24 = vld [vmem:[%s1798_s5 + $0x4c] sm:$0xf0]  ;;  %v378_v28 = vld [vmem:[%s1798_s5] sm:$0xf] }
  0x14   : > { %1465 = vmatmul.msk.bf16.vlgmr.msra.gmra.mxu1 %vm268_vm1, %v1455_v17  ;;  %v1451_v27 = vor.u32 %v1658_v24, %v1450_v23  ;;  %v379_v29 = vld [vmem:[%s1798_s5 + $0x4] sm:$0x1]  ;;  %v896_v30 = vsel %vm281_vm0, %v1567_v12, 0  ;;  %v1256_v31 = vsel %vm281_vm0, %v1646_v13, 0  ;;  %v380_v32 = vld [vmem:[%s1798_s5 + $0x8] sm:$0xf] }
  0x15   : > { %1466 = vmatmul.msk.bf16.vlgmr.msra.gmra.mxu2 %vm268_vm1, %v1459_v21  ;;  %1467 = vmatmul.msk.bf16.vlgmr.msra.gmra.mxu3 %vm268_vm1, %v1463_v22  ;;  %v381_v33 = vld [vmem:[%s1798_s5 + $0xc] sm:$0x1]  ;;  %v398_v34 = vshrl.u32 %v378_v28, 16  ;;  %v401_v35 = vshll.u32 %v378_v28, 16  ;;  %v407_v36 = vshll.u32 %v379_v29, 16  ;;  %v412_v37 = vshrl.u32 %v380_v32, 16 }
  0x16   : > { %1464 = vmatmul.msk.bf16.vlgmr.msra.gmra.mxu0 %vm268_vm1, %v1451_v27  ;;  %v415_v38 = vshll.u32 %v380_v32, 16  ;;  %v421_v39 = vshll.u32 %v381_v33, 16  ;;  %988 = vmatpush.bf16.msra.mxu2 %v979_v25  ;;  %vm394_vm2 = vsmask.f32 3328  ;;  %vm395_vm3 = vsmask.f32 7440 }
  0x17   : > { %v400_v40 = vrot.slane %v398_v34, 4  ;;  %v403_v41 = vrot.slane %v401_v35, 5  ;;  %1071 = vmatpush.bf16.msra.mxu3 %v1062_v26  ;;  %905 = vmatpush.bf16.msra.mxu1 %v896_v30  ;;  %v414_v42 = vrot.slane %v412_v37, 4  ;;  %v409_v45 = vrot.slane %v407_v36, 5  ;;  %v382_v46 = vld [vmem:[%s1798_s5 + $0x10] sm:$0xf]  ;;  %vm1830_vm4 = vmor %vm394_vm2, %vm395_vm3 }
  0x18   : > { %v417_v43 = vrot.slane %v415_v38, 5  ;;  %1265 = vmatpush.bf16.msra.mxu0 %v1256_v31  ;;  %v423_v49 = vrot.slane %v421_v39, 5  ;;  %v384_v50 = vld [vmem:[%s1798_s5 + $0x18] sm:$0xf]  ;;  %v1470_v51 = vld [vmem:[%s1798_s5] sm:$0xf] }
  0x19   : > { %v404_v44 = vor.u32 %v403_v41, %v400_v40  ;;  %v426_v53 = vshrl.u32 %v382_v46, 16  ;;  %v429_v54 = vshll.u32 %v382_v46, 16  ;;  %v1654_v55 = vld [vmem:[%s1798_s5 + $0x4] sm:$0xf0]  ;;  %v440_v57 = vshrl.u32 %v384_v50, 16  ;;  %s1653_s18 = sshll.u32 %s2116_s12, 6 }
  0x1a   : > { %v418_v48 = vor.u32 %v417_v43, %v414_v42  ;;  %v443_v58 = vshll.u32 %v384_v50, 16  ;;  %v1504_v60 = vld [vmem:[%s1798_s5 + $0x90] sm:$0xf]  ;;  %v1662_v61 = vld [vmem:[%s1798_s5 + $0x94] sm:$0xf0]  ;;  %v1471_v9 = vor.u32 %v1654_v55, %v1470_v51  ;;  %s2055_s21 = scalar_lea.vmem %s2106_s3, %s1653_s18 }
  0x1b   : > { %v405_v52 = vrot.slane %v404_v44, 4  ;;  %v428_v62 = vrot.slane %v426_v53, 4  ;;  %v431_v63 = vrot.slane %v429_v54, 5  ;;  %v1533_v2 = vld [vmem:[%s1798_s5 + $0xd8] sm:$0xf]  ;;  %v442_v4 = vrot.slane %v440_v57, 4 }
  0x1c   : > { %v419_v56 = vrot.slane %v418_v48, 4  ;;  %v1666_v3 = vld [vmem:[%s1798_s5 + $0xdc] sm:$0xf0]  ;;  %v445_v5 = vrot.slane %v443_v58, 5  ;;  %v383_v7 = vld [vmem:[%s1798_s5 + $0x14] sm:$0x1]  ;;  %v1505_v11 = vor.u32 %v1662_v61, %v1504_v60 }
  0x1d   : > { %v410_v59 = vsel %vm1830_vm4, %v405_v52, %v409_v45  ;;  %v385_v8 = vld [vmem:[%s1798_s5 + $0x1c] sm:$0x1]  ;;  %v1534_v12 = vor.u32 %v1666_v3, %v1533_v2  ;;  %v432_v13 = vor.u32 %v431_v63, %v428_v62  ;;  %v435_v14 = vshll.u32 %v383_v7, 16  ;;  %v386_v21 = vld [vmem:[%s1798_s5 + $0x20] sm:$0xf] }
  0x1e   : > { %v424_v0 = vsel %vm1830_vm4, %v419_v56, %v423_v49  ;;  %v511_v1 = vunpack.c.l.b16 %v410_v59  ;;  %v446_v15 = vor.u32 %v445_v5, %v442_v4  ;;  %v449_v16 = vshll.u32 %v385_v8, 16  ;;  %v388_v22 = vld [vmem:[%s1798_s5 + $0x28] sm:$0xf]  ;;  %v1474_v29 = vld [vmem:[%s1798_s5 + $0x10] sm:$0xf] }
  0x1f   : > { %v512_v6 = vunpack.c.l.b16 %v424_v0  ;;  %v433_v17 = vrot.slane %v432_v13, 4  ;;  %v437_v18 = vrot.slane %v435_v14, 5  ;;  %v454_v23 = vshrl.u32 %v386_v21, 16  ;;  %v1655_v30 = vld [vmem:[%s1798_s5 + $0x14] sm:$0xf0] }
  0x20   : > { %v447_v19 = vrot.slane %v446_v15, 4  ;;  %v451_v20 = vrot.slane %v449_v16, 5  ;;  %v457_v24 = vshll.u32 %v386_v21, 16  ;;  %v468_v27 = vshrl.u32 %v388_v22, 16  ;;  %v1508_v33 = vld [vmem:[%s1798_s5 + $0xa0] sm:$0xf] }
  0x21   : > { %v519_v10 = vpack.c.b16 %v512_v6, %v511_v1  ;;  %v438_v25 = vsel %vm1830_vm4, %v433_v17, %v437_v18  ;;  %v471_v28 = vshll.u32 %v388_v22, 16  ;;  %v1663_v34 = vld [vmem:[%s1798_s5 + $0xa4] sm:$0xf0]  ;;  %v1667_v36 = vld [vmem:[%s1798_s5 + $0xec] sm:$0xf0]  ;;  %v456_v37 = vrot.slane %v454_v23, 4 }
  0x22   : > { %v452_v26 = vsel %vm1830_vm4, %v447_v19, %v451_v20  ;;  %v513_v31 = vunpack.c.l.b16 %v438_v25  ;;  %v1537_v35 = vld [vmem:[%s1798_s5 + $0xe8] sm:$0xf]  ;;  %v459_v38 = vrot.slane %v457_v24, 5  ;;  %v470_v39 = vrot.slane %v468_v27, 4  ;;  %v387_v41 = vld [vmem:[%s1798_s5 + $0x24] sm:$0x1] }
  0x23   : > { %v514_v32 = vunpack.c.l.b16 %v452_v26  ;;  %v473_v40 = vrot.slane %v471_v28, 5  ;;  %v389_v42 = vld [vmem:[%s1798_s5 + $0x2c] sm:$0x1]  ;;  %v1475_v43 = vor.u32 %v1655_v30, %v1474_v29  ;;  %v1509_v45 = vor.u32 %v1663_v34, %v1508_v33  ;;  %v390_v52 = vld [vmem:[%s1798_s5 + $0x30] sm:$0xf] }
  0x24   : > { %1484 = vmatmul.msk.bf16.vlgmr.msrb.gmra.mxu1 %vm268_vm1, %v1471_v9  ;;  %v1538_v46 = vor.u32 %v1667_v36, %v1537_v35  ;;  %v460_v48 = vor.u32 %v459_v38, %v456_v37  ;;  %v463_v49 = vshll.u32 %v387_v41, 16  ;;  %v477_v51 = vshll.u32 %v389_v42, 16  ;;  %v392_v53 = vld [vmem:[%s1798_s5 + $0x38] sm:$0xf]  ;;  %v391_v4 = vld [vmem:[%s1798_s5 + $0x34] sm:$0x1] }
  0x25   : > { %1489 = vmatmul.msk.bf16.vlgmr.msrb.gmra.mxu2 %vm268_vm1, %v519_v10  ;;  %1518 = vmatmul.msk.bf16.vlgmr.msrb.gmra.mxu3 %vm268_vm1, %v1505_v11  ;;  %v520_v44 = vpack.c.b16 %v514_v32, %v513_v31  ;;  %v474_v50 = vor.u32 %v473_v40, %v470_v39  ;;  %v482_v58 = vshrl.u32 %v390_v52, 16  ;;  %v485_v59 = vshll.u32 %v390_v52, 16  ;;  %v393_v5 = vld [vmem:[%s1798_s5 + $0x3c] sm:$0x1]  ;;  %v1478_v6 = vld [vmem:[%s1798_s5 + $0x20] sm:$0xf] }
  0x26   : > { %1547 = vmatmul.msk.bf16.vlgmr.msrb.gmra.mxu0 %vm268_vm1, %v1534_v12  ;;  %v461_v54 = vrot.slane %v460_v48, 4  ;;  %v465_v55 = vrot.slane %v463_v49, 5  ;;  %v479_v57 = vrot.slane %v477_v51, 5  ;;  %v496_v60 = vshrl.u32 %v392_v53, 16  ;;  %v1656_v7 = vld [vmem:[%s1798_s5 + $0x24] sm:$0xf0] }
  0x27   : > { %v475_v56 = vrot.slane %v474_v50, 4  ;;  %v499_v61 = vshll.u32 %v392_v53, 16  ;;  %v484_v0 = vrot.slane %v482_v58, 4  ;;  %v487_v1 = vrot.slane %v485_v59, 5  ;;  %v1512_v10 = vld [vmem:[%s1798_s5 + $0xb0] sm:$0xf] }
  0x28   : > { %v466_v62 = vsel %vm1830_vm4, %v461_v54, %v465_v55  ;;  %v498_v2 = vrot.slane %v496_v60, 4  ;;  %v1664_v11 = vld [vmem:[%s1798_s5 + $0xb4] sm:$0xf0]  ;;  %v1668_v13 = vld [vmem:[%s1798_s5 + $0xfc] sm:$0xf0]  ;;  %v491_v15 = vshll.u32 %v391_v4, 16  ;;  %v1479_v18 = vor.u32 %v1656_v7, %v1478_v6 }
  0x29   : > { %v480_v63 = vsel %vm1830_vm4, %v475_v56, %v479_v57  ;;  %v501_v3 = vrot.slane %v499_v61, 5  ;;  %v515_v8 = vunpack.c.l.b16 %v466_v62  ;;  %v1541_v12 = vld [vmem:[%s1798_s5 + $0xf8] sm:$0xf]  ;;  %v488_v14 = vor.u32 %v487_v1, %v484_v0  ;;  %v1551_v26 = vld [vmem:[%s1798_s5 + $0x90] sm:$0xf] }
  0x2a   : > { %v516_v9 = vunpack.c.l.b16 %v480_v63  ;;  %v505_v17 = vshll.u32 %v393_v5, 16  ;;  %v1513_v20 = vor.u32 %v1664_v11, %v1512_v10  ;;  %v1542_v21 = vor.u32 %v1668_v13, %v1541_v12  ;;  %v1553_v27 = vld [vmem:[%s1798_s5 + $0x98] sm:$0xf]  ;;  %v1630_v28 = vld [vmem:[%s1798_s5 + $0x8] sm:$0xf] }
  0x2b   : > { %v502_v16 = vor.u32 %v501_v3, %v498_v2  ;;  %v489_v22 = vrot.slane %v488_v14, 4  ;;  %v493_v23 = vrot.slane %v491_v15, 5  ;;  %v1632_v29 = vld [vmem:[%s1798_s5 + $0x10] sm:$0xf]  ;;  %v758_v32 = vshrl.u32 %v1551_v26, 16 }
  0x2c   : > { %v521_v19 = vpack.c.b16 %v516_v9, %v515_v8  ;;  %v507_v25 = vrot.slane %v505_v17, 5  ;;  %v761_v33 = vshll.u32 %v1551_v26, 16  ;;  %v772_v34 = vshrl.u32 %v1553_v27, 16  ;;  %v1482_v40 = vld [vmem:[%s1798_s5 + $0x30] sm:$0xf] }
  0x2d   : > { %v503_v24 = vrot.slane %v502_v16, 4  ;;  %v494_v30 = vsel %vm1830_vm4, %v489_v22, %v493_v23  ;;  %v775_v35 = vshll.u32 %v1553_v27, 16  ;;  %v1118_v36 = vshrl.u32 %v1630_v28, 16  ;;  %v1657_v41 = vld [vmem:[%s1798_s5 + $0x34] sm:$0xf0] }
  0x2e   : > { %v1121_v37 = vshll.u32 %v1630_v28, 16  ;;  %v1132_v38 = vshrl.u32 %v1632_v29, 16  ;;  %v1135_v39 = vshll.u32 %v1632_v29, 16  ;;  %v517_v42 = vunpack.c.l.b16 %v494_v30  ;;  %v1554_v52 = vld [vmem:[%s1798_s5 + $0x9c] sm:$0x1] }
  0x2f   : > { %v508_v31 = vsel %vm1830_vm4, %v503_v24, %v507_v25  ;;  %v760_v48 = vrot.slane %v758_v32, 4  ;;  %v763_v49 = vrot.slane %v761_v33, 5  ;;  %v774_v50 = vrot.slane %v772_v34, 4  ;;  %v1631_v57 = vld [vmem:[%s1798_s5 + $0xc] sm:$0x1] }
  0x30   : > { %v777_v51 = vrot.slane %v775_v35, 5  ;;  %v1120_v53 = vrot.slane %v1118_v36, 4  ;;  %v1123_v54 = vrot.slane %v1121_v37, 5  ;;  %v1134_v55 = vrot.slane %v1132_v38, 4  ;;  %v1633_v58 = vld [vmem:[%s1798_s5 + $0x14] sm:$0x1] }
  0x31   : > { %v1137_v56 = vrot.slane %v1135_v39, 5  ;;  %v1483_v59 = vor.u32 %v1657_v41, %v1482_v40  ;;  %v1545_v62 = vld [vmem:[%s1798_s5 + $0x108] sm:$0xf]  ;;  %v1669_v63 = vld [vmem:[%s1798_s5 + $0x10c] sm:$0xf0]  ;;  %v764_v0 = vor.u32 %v763_v49, %v760_v48  ;;  %v781_v3 = vshll.u32 %v1554_v52, 16 }
  0x32   : > { %v778_v2 = vor.u32 %v777_v51, %v774_v50  ;;  %v1124_v4 = vor.u32 %v1123_v54, %v1120_v53  ;;  %v1127_v5 = vshll.u32 %v1631_v57, 16  ;;  %v1141_v7 = vshll.u32 %v1633_v58, 16  ;;  %v1555_v9 = vld [vmem:[%s1798_s5 + $0xa0] sm:$0xf]  ;;  %v1557_v10 = vld [vmem:[%s1798_s5 + $0xa8] sm:$0xf] }
  0x33   : > { %v1138_v6 = vor.u32 %v1137_v56, %v1134_v55  ;;  %v1546_v8 = vor.u32 %v1669_v63, %v1545_v62  ;;  %v765_v11 = vrot.slane %v764_v0, 4  ;;  %v783_v14 = vrot.slane %v781_v3, 5  ;;  %v1634_v23 = vld [vmem:[%s1798_s5 + $0x18] sm:$0xf]  ;;  %v1636_v24 = vld [vmem:[%s1798_s5 + $0x20] sm:$0xf] }
  0x34   : > { %1485 = vmatmul.msk.bf16.gmra.mxu1 %vm268_vm1, %v1475_v43  ;;  %v518_v43 = vunpack.c.l.b16 %v508_v31  ;;  %v779_v13 = vrot.slane %v778_v2, 4  ;;  %v1125_v15 = vrot.slane %v1124_v4, 4  ;;  %v1129_v16 = vrot.slane %v1127_v5, 5  ;;  %v1556_v29 = vld [vmem:[%s1798_s5 + $0xa4] sm:$0x1] }
  0x35   : > { %1490 = vmatmul.msk.bf16.gmra.mxu2 %vm268_vm1, %v520_v44  ;;  %1519 = vmatmul.msk.bf16.gmra.mxu3 %vm268_vm1, %v1509_v45  ;;  %v1516_v44 = vld [vmem:[%s1798_s5 + $0xc0] sm:$0xf]  ;;  %v1665_v45 = vld [vmem:[%s1798_s5 + $0xc4] sm:$0xf0]  ;;  %v1139_v17 = vrot.slane %v1138_v6, 4  ;;  %v803_v22 = vshll.u32 %v1557_v10, 16 }
  0x36   : > { %1548 = vmatmul.msk.bf16.gmra.mxu0 %vm268_vm1, %v1538_v46  ;;  %v1552_v46 = vld [vmem:[%s1798_s5 + $0x94] sm:$0x1]  ;;  %v522_v60 = vpack.c.b16 %v518_v43, %v517_v42  ;;  %v1517_v61 = vor.u32 %v1665_v45, %v1516_v44  ;;  %v784_v26 = vsel %vm1830_vm4, %v779_v13, %v783_v14  ;;  %v1130_v27 = vsel %vm1830_vm4, %v1125_v15, %v1129_v16  ;;  %v1558_v34 = vld [vmem:[%s1798_s5 + $0xac] sm:$0x1]  ;;  %v1583_v41 = vld [vmem:[%s1798_s5 + $0x8] sm:$0xf] }
  0x37   : > { %v767_v1 = vshll.u32 %v1552_v46, 16  ;;  %v805_v33 = vrot.slane %v803_v22, 5  ;;  %v1146_v35 = vshrl.u32 %v1634_v23, 16  ;;  %v1149_v36 = vshll.u32 %v1634_v23, 16  ;;  %v1670_v42 = vld [vmem:[%s1798_s5 + $0xc] sm:$0xf0] }
  0x38   : > { %v1160_v37 = vshrl.u32 %v1636_v24, 16  ;;  %v1163_v38 = vshll.u32 %v1636_v24, 16  ;;  %v872_v40 = vunpack.c.l.b16 %v784_v26  ;;  %v1231_v43 = vunpack.c.l.b16 %v1130_v27  ;;  %v1612_v45 = vld [vmem:[%s1798_s5 + $0x50] sm:$0xf]  ;;  %v1674_v46 = vld [vmem:[%s1798_s5 + $0x54] sm:$0xf0] }
  0x39   : > { %v769_v12 = vrot.slane %v767_v1, 5  ;;  %v795_v49 = vshll.u32 %v1556_v29, 16  ;;  %v809_v51 = vshll.u32 %v1558_v34, 16  ;;  %v1148_v52 = vrot.slane %v1146_v35, 4  ;;  %v1635_v57 = vld [vmem:[%s1798_s5 + $0x1c] sm:$0x1] }
  0x3a   : > { %v1151_v53 = vrot.slane %v1149_v36, 5  ;;  %v1162_v54 = vrot.slane %v1160_v37, 4  ;;  %v1165_v55 = vrot.slane %v1163_v38, 5  ;;  %v1637_v58 = vld [vmem:[%s1798_s5 + $0x24] sm:$0x1]  ;;  %v1155_v3 = vshll.u32 %v1635_v57, 16 }
  0x3b   : > { %v770_v25 = vsel %vm1830_vm4, %v765_v11, %v769_v12  ;;  %v797_v63 = vrot.slane %v795_v49, 5  ;;  %v811_v1 = vrot.slane %v809_v51, 5  ;;  %v1169_v5 = vshll.u32 %v1637_v58, 16  ;;  %v1559_v6 = vld [vmem:[%s1798_s5 + $0xb0] sm:$0xf] }
  0x3c   : > { %v871_v39 = vunpack.c.l.b16 %v770_v25  ;;  %v1152_v2 = vor.u32 %v1151_v53, %v1148_v52  ;;  %v1166_v4 = vor.u32 %v1165_v55, %v1162_v54  ;;  %v1157_v12 = vrot.slane %v1155_v3, 5  ;;  %v1640_v15 = vld [vmem:[%s1798_s5 + $0x30] sm:$0xf]  ;;  %v1671_v29 = vld [vmem:[%s1798_s5 + $0x1c] sm:$0xf0] }
  0x3d   : > { %v1171_v14 = vrot.slane %v1169_v5, 5  ;;  %v814_v16 = vshrl.u32 %v1559_v6, 16  ;;  %v1188_v22 = vshrl.u32 %v1640_v15, 16  ;;  %v1191_v23 = vshll.u32 %v1640_v15, 16  ;;  %v1560_v35 = vld [vmem:[%s1798_s5 + $0xb4] sm:$0x1] }
  0x3e   : > { %v879_v56 = vpack.c.b16 %v872_v40, %v871_v39  ;;  %v1153_v11 = vrot.slane %v1152_v2, 4  ;;  %v1167_v13 = vrot.slane %v1166_v4, 4  ;;  %v1562_v36 = vld [vmem:[%s1798_s5 + $0xbc] sm:$0x1]  ;;  %v1675_v39 = vld [vmem:[%s1798_s5 + $0x64] sm:$0xf0] }
  0x3f   : > { %v823_v49 = vshll.u32 %v1560_v35, 16  ;;  %v837_v51 = vshll.u32 %v1562_v36, 16  ;;  %v1563_v3 = vld [vmem:[%s1798_s5 + $0xc0] sm:$0xf]  ;;  %v1565_v4 = vld [vmem:[%s1798_s5 + $0xc8] sm:$0xf] }
  0x40   : > { %v1158_v26 = vsel %vm1830_vm4, %v1153_v11, %v1157_v12  ;;  %v1172_v27 = vsel %vm1830_vm4, %v1167_v13, %v1171_v14  ;;  %v856_v11 = vshrl.u32 %v1565_v4, 16  ;;  %v859_v12 = vshll.u32 %v1565_v4, 16  ;;  %v1624_v4 = vld [vmem:[%s1798_s5 + $0x80] sm:$0xf] }
  0x41   : > { %v1233_v40 = vunpack.c.l.b16 %v1158_v26 }
  0x44   : > { %1486 = vmatmul.msk.bf16.gmra.mxu1 %vm268_vm1, %v1479_v18  ;;  %v1143_v18 = vrot.slane %v1141_v7, 5  ;;  %v1561_v7 = vld [vmem:[%s1798_s5 + $0xb8] sm:$0xf] }
  0x45   : > { %1491 = vmatmul.msk.bf16.gmra.mxu2 %vm268_vm1, %v521_v19  ;;  %1520 = vmatmul.msk.bf16.gmra.mxu3 %vm268_vm1, %v1513_v20  ;;  %v786_v19 = vshrl.u32 %v1555_v9, 16  ;;  %v789_v20 = vshll.u32 %v1555_v9, 16 }
  0x46   : > { %1549 = vmatmul.msk.bf16.gmra.mxu0 %vm268_vm1, %v1542_v21  ;;  %v800_v21 = vshrl.u32 %v1557_v10, 16  ;;  %v1144_v28 = vsel %vm1830_vm4, %v1139_v17, %v1143_v18  ;;  %v1638_v10 = vld [vmem:[%s1798_s5 + $0x28] sm:$0xf]  ;;  %v817_v17 = vshll.u32 %v1559_v6, 16  ;;  %v828_v18 = vshrl.u32 %v1561_v7, 16 }
  0x47   : > { %v788_v30 = vrot.slane %v786_v19, 4  ;;  %v791_v31 = vrot.slane %v789_v20, 5  ;;  %v1232_v44 = vunpack.c.l.b16 %v1144_v28  ;;  %v831_v19 = vshll.u32 %v1561_v7, 16  ;;  %v1587_v28 = vld [vmem:[%s1798_s5 + $0x18] sm:$0xf] }
  0x48   : > { %v802_v32 = vrot.slane %v800_v21, 4  ;;  %v1174_v20 = vshrl.u32 %v1638_v10, 16  ;;  %v1177_v21 = vshll.u32 %v1638_v10, 16  ;;  %v1588_v52 = vor.u32 %v1671_v29, %v1587_v28  ;;  %v1642_v7 = vld [vmem:[%s1798_s5 + $0x38] sm:$0xf] }
  0x49   : > { %v792_v48 = vor.u32 %v791_v31, %v788_v30  ;;  %v1616_v30 = vld [vmem:[%s1798_s5 + $0x60] sm:$0xf]  ;;  %v816_v31 = vrot.slane %v814_v16, 4  ;;  %v833_v34 = vrot.slane %v831_v19, 5  ;;  %v845_v10 = vshll.u32 %v1563_v3, 16 }
  0x4a   : > { %v806_v50 = vor.u32 %v805_v33, %v802_v32  ;;  %v819_v32 = vrot.slane %v817_v17, 5  ;;  %v830_v33 = vrot.slane %v828_v18, 4  ;;  %v1176_v37 = vrot.slane %v1174_v20, 4 }
  0x4b   : > { %v793_v62 = vrot.slane %v792_v48, 4  ;;  %v1179_v38 = vrot.slane %v1177_v21, 5  ;;  %v1617_v53 = vor.u32 %v1675_v39, %v1616_v30  ;;  %v1202_v15 = vshrl.u32 %v1642_v7, 16  ;;  %v1591_v21 = vld [vmem:[%s1798_s5 + $0x28] sm:$0xf] }
  0x4c   : > { %v807_v0 = vrot.slane %v806_v50, 4  ;;  %v820_v48 = vor.u32 %v819_v32, %v816_v31  ;;  %v834_v50 = vor.u32 %v833_v34, %v830_v33  ;;  %v1205_v16 = vshll.u32 %v1642_v7, 16  ;;  %v1564_v31 = vld [vmem:[%s1798_s5 + $0xc4] sm:$0x1]  ;;  %v1566_v32 = vld [vmem:[%s1798_s5 + $0xcc] sm:$0x1] }
  0x4d   : > { %v1180_v54 = vor.u32 %v1179_v38, %v1176_v37  ;;  %v847_v26 = vrot.slane %v845_v10, 5  ;;  %v861_v28 = vrot.slane %v859_v12, 5  ;;  %v1204_v33 = vrot.slane %v1202_v15, 4 }
  0x4e   : > { %v812_v9 = vsel %vm1830_vm4, %v807_v0, %v811_v1  ;;  %v1207_v34 = vrot.slane %v1205_v16, 5 }
  0x4f   : > { %v874_v25 = vunpack.c.l.b16 %v812_v9  ;;  %v842_v9 = vshrl.u32 %v1563_v3, 16  ;;  %v1673_v3 = vld [vmem:[%s1798_s5 + $0x3c] sm:$0xf0] }
  0x54   : > { %1487 = vmatmul.msk.bf16.gmra.mxu1 %vm268_vm1, %v1483_v59  ;;  %v1584_v59 = vor.u32 %v1670_v42, %v1583_v41  ;;  %v1234_v41 = vunpack.c.l.b16 %v1172_v27  ;;  %v1639_v42 = vld [vmem:[%s1798_s5 + $0x2c] sm:$0x1]  ;;  %v858_v27 = vrot.slane %v856_v11, 4 }
  0x55   : > { %1492 = vmatmul.msk.bf16.gmra.mxu2 %vm268_vm1, %v522_v60  ;;  %1521 = vmatmul.msk.bf16.gmra.mxu3 %vm268_vm1, %v1517_v61  ;;  %v1613_v60 = vor.u32 %v1674_v46, %v1612_v45  ;;  %v1239_v61 = vpack.c.b16 %v1232_v44, %v1231_v43  ;;  %v1190_v43 = vrot.slane %v1188_v22, 4  ;;  %v1193_v44 = vrot.slane %v1191_v23, 5  ;;  %v1641_v46 = vld [vmem:[%s1798_s5 + $0x34] sm:$0x1]  ;;  %v1672_v22 = vld [vmem:[%s1798_s5 + $0x2c] sm:$0xf0] }
  0x56   : > { %1550 = vmatmul.msk.bf16.gmra.mxu0 %vm268_vm1, %v1546_v8  ;;  %v798_v8 = vsel %vm1830_vm4, %v793_v62, %v797_v63  ;;  %v1183_v55 = vshll.u32 %v1639_v42, 16  ;;  %v1197_v58 = vshll.u32 %v1641_v46, 16  ;;  %v839_v62 = vrot.slane %v837_v51, 5  ;;  %v1620_v23 = vld [vmem:[%s1798_s5 + $0x70] sm:$0xf] }
  0x57   : > { %v873_v24 = vunpack.c.l.b16 %v798_v8  ;;  %v1194_v57 = vor.u32 %v1193_v44, %v1190_v43  ;;  %v1181_v63 = vrot.slane %v1180_v54, 4  ;;  %v1644_v8 = vld [vmem:[%s1798_s5 + $0x40] sm:$0xf]  ;;  %v1592_v38 = vor.u32 %v1672_v22, %v1591_v21 }
  0x58   : > { %v1185_v0 = vrot.slane %v1183_v55, 5  ;;  %v1199_v2 = vrot.slane %v1197_v58, 5  ;;  %v1216_v17 = vshrl.u32 %v1644_v8, 16  ;;  %v1219_v18 = vshll.u32 %v1644_v8, 16 }
  0x59   : > { %v880_v45 = vpack.c.b16 %v874_v25, %v873_v24  ;;  %v1195_v1 = vrot.slane %v1194_v57, 4  ;;  %v1676_v24 = vld [vmem:[%s1798_s5 + $0x74] sm:$0xf0]  ;;  %v844_v25 = vrot.slane %v842_v9, 4  ;;  %v851_v43 = vshll.u32 %v1564_v31, 16 }
  0x5a   : > { %v1186_v13 = vsel %vm1830_vm4, %v1181_v63, %v1185_v0  ;;  %v1218_v35 = vrot.slane %v1216_v17, 4  ;;  %v1221_v36 = vrot.slane %v1219_v18, 5  ;;  %v1621_v39 = vor.u32 %v1676_v24, %v1620_v23 }
  0x5b   : > { %v1200_v14 = vsel %vm1830_vm4, %v1195_v1, %v1199_v2  ;;  %v1235_v29 = vunpack.c.l.b16 %v1186_v13  ;;  %v848_v42 = vor.u32 %v847_v26, %v844_v25  ;;  %v862_v44 = vor.u32 %v861_v28, %v858_v27  ;;  %v1595_v2 = vld [vmem:[%s1798_s5 + $0x38] sm:$0xf] }
  0x5c   : > { %v1236_v30 = vunpack.c.l.b16 %v1200_v14  ;;  %v1596_v10 = vor.u32 %v1673_v3, %v1595_v2 }
  0x5d   : > { %v863_v54 = vrot.slane %v862_v44, 4 }
  0x5e   : > { %v1241_v46 = vpack.c.b16 %v1236_v30, %v1235_v29 }
  0x64   : > { %1568 = vmatmul.msk.bf16.vlgmr.msra.gmra.mxu1 %vm268_vm1, %v879_v56  ;;  %v1240_v56 = vpack.c.b16 %v1234_v41, %v1233_v40  ;;  %v1643_v40 = vld [vmem:[%s1798_s5 + $0x3c] sm:$0x1]  ;;  %v1645_v41 = vld [vmem:[%s1798_s5 + $0x44] sm:$0x1] }
  0x65   : > { %1597 = vmatmul.msk.bf16.vlgmr.msra.gmra.mxu2 %vm268_vm1, %v1584_v59  ;;  %1626 = vmatmul.msk.bf16.vlgmr.msra.gmra.mxu3 %vm268_vm1, %v1613_v60  ;;  %v821_v59 = vrot.slane %v820_v48, 4  ;;  %v825_v60 = vrot.slane %v823_v49, 5  ;;  %v1208_v48 = vor.u32 %v1207_v34, %v1204_v33  ;;  %v1211_v49 = vshll.u32 %v1643_v40, 16 }
  0x66   : > { %1647 = vmatmul.msk.bf16.vlgmr.msra.gmra.mxu0 %vm268_vm1, %v1239_v61  ;;  %v835_v61 = vrot.slane %v834_v50, 4  ;;  %v1222_v50 = vor.u32 %v1221_v36, %v1218_v35  ;;  %v1225_v51 = vshll.u32 %v1645_v41, 16 }
  0x67   : > { %v826_v5 = vsel %vm1830_vm4, %v821_v59, %v825_v60  ;;  %v1213_v57 = vrot.slane %v1211_v49, 5 }
  0x68   : > { %v840_v6 = vsel %vm1830_vm4, %v835_v61, %v839_v62  ;;  %v875_v19 = vunpack.c.l.b16 %v826_v5  ;;  %v1223_v58 = vrot.slane %v1222_v50, 4  ;;  %v1227_v59 = vrot.slane %v1225_v51, 5  ;;  %v1677_v5 = vld [vmem:[%s1798_s5 + $0x84] sm:$0xf0] }
  0x69   : > { %v876_v20 = vunpack.c.l.b16 %v840_v6  ;;  %v1625_v11 = vor.u32 %v1677_v5, %v1624_v4  ;;  %v2049_v4 = vld [vmem:[%s2105_s2] ss:$0 sm:$0xff] }
  0x6a   : > { %v1228_v63 = vsel %vm1830_vm4, %v1223_v58, %v1227_v59 }
  0x6b   : > { %v881_v37 = vpack.c.b16 %v876_v20, %v875_v19  ;;  %v1238_v7 = vunpack.c.l.b16 %v1228_v63 }
  0x74   : > { %1569 = vmatmul.msk.bf16.gmra.mxu1 %vm268_vm1, %v880_v45  ;;  %v865_v45 = vshll.u32 %v1566_v32, 16 }
  0x75   : > { %1598 = vmatmul.msk.bf16.gmra.mxu2 %vm268_vm1, %v1588_v52  ;;  %1627 = vmatmul.msk.bf16.gmra.mxu3 %vm268_vm1, %v1617_v53  ;;  %v849_v52 = vrot.slane %v848_v42, 4  ;;  %v853_v53 = vrot.slane %v851_v43, 5 }
  0x76   : > { %1648 = vmatmul.msk.bf16.gmra.mxu0 %vm268_vm1, %v1240_v56  ;;  %v867_v55 = vrot.slane %v865_v45, 5  ;;  %v1209_v56 = vrot.slane %v1208_v48, 4 }
  0x77   : > { %v854_v60 = vsel %vm1830_vm4, %v849_v52, %v853_v53 }
  0x78   : > { %v868_v61 = vsel %vm1830_vm4, %v863_v54, %v867_v55  ;;  %v1214_v62 = vsel %vm1830_vm4, %v1209_v56, %v1213_v57  ;;  %v877_v0 = vunpack.c.l.b16 %v854_v60 }
  0x79   : > { %v878_v1 = vunpack.c.l.b16 %v868_v61  ;;  %v1237_v6 = vunpack.c.l.b16 %v1214_v62 }
  0x7b   : > { %v882_v8 = vpack.c.b16 %v878_v1, %v877_v0  ;;  %v1242_v12 = vpack.c.b16 %v1238_v7, %v1237_v6 }
  0x84   : > { %1570 = vmatmul.msk.bf16.gmra.mxu1 %vm268_vm1, %v881_v37 }
  0x85   : > { %1599 = vmatmul.msk.bf16.gmra.mxu2 %vm268_vm1, %v1592_v38  ;;  %1628 = vmatmul.msk.bf16.gmra.mxu3 %vm268_vm1, %v1621_v39 }
  0x86   : > { %1649 = vmatmul.msk.bf16.gmra.mxu0 %vm268_vm1, %v1241_v46 }
  0x91   : > { %v1993_v9 = vpop.f32.mrf.mxu1 }
  0x93   : > { %v294_v13 = vpop.f32.mrf.mxu0 }
  0x94   : > { %1571 = vmatmul.msk.bf16.gmra.mxu1 %vm268_vm1, %v882_v8 }
  0x95   : > { %1600 = vmatmul.msk.bf16.gmra.mxu2 %vm268_vm1, %v1596_v10  ;;  %1629 = vmatmul.msk.bf16.gmra.mxu3 %vm268_vm1, %v1625_v11 }
  0x96   : > { %1650 = vmatmul.msk.bf16.gmra.mxu0 %vm268_vm1, %v1242_v12 }
  0x98   : > { %v1999_v47 = vpop.f32.mrf.mxu2  ;;  %v2001_v14 = vpop.f32.mrf.mxu3 }
  0x99   : > { %v2003_v15 = vpop.f32.mrf.mxu1 }
  0x9b   : > { %v296_v16 = vpop.f32.mrf.mxu0 }
  0xa0   : > { %v2005_v17 = vpop.f32.mrf.mxu2  ;;  %v2007_v18 = vpop.f32.mrf.mxu3 }
  0xa1   : > { %v358_v19 = vpop.f32.mrf.mxu1 }
  0xa2   : > { %v359_v49 = vadd.f32 %v358_v19, %v294_v13 }
  0xa3   : > { %v713_v20 = vpop.f32.mrf.mxu0 }
  0xa8   : > { %v547_v21 = vpop.f32.mrf.mxu2  ;;  %v630_v22 = vpop.f32.mrf.mxu3 }
  0xa9   : > { %v360_v23 = vpop.f32.mrf.mxu1  ;;  %v567_v51 = vadd.f32 %v547_v21, %v359_v49 }
  0xaa   : > { %v361_v56 = vadd.f32 %v360_v23, %v296_v16 }
  0xab   : > { %v715_v24 = vpop.f32.mrf.mxu0  ;;  %v650_v54 = vadd.f32 %v630_v22, %v567_v51 }
  0xad   : > { %v733_v59 = vadd.f32 %v713_v20, %v650_v54 }
  0xb0   : > { %v549_v25 = vpop.f32.mrf.mxu2  ;;  %v632_v26 = vpop.f32.mrf.mxu3 }
  0xb1   : > { %v363_v27 = vpop.f32.mrf.mxu1  ;;  %v568_v58 = vadd.f32 %v549_v25, %v361_v56 }
  0xb2   : > { %v364_v2 = vadd.f32 %v363_v27, %v1993_v9 }
  0xb3   : > { %v718_v28 = vpop.f32.mrf.mxu0  ;;  %v651_v63 = vadd.f32 %v632_v26, %v568_v58 }
  0xb5   : > { %v734_v8 = vadd.f32 %v715_v24, %v651_v63 }
  0xb8   : > { %v552_v29 = vpop.f32.mrf.mxu2  ;;  %v635_v30 = vpop.f32.mrf.mxu3 }
  0xb9   : > { %v365_v31 = vpop.f32.mrf.mxu1  ;;  %v569_v6 = vadd.f32 %v552_v29, %v364_v2 }
  0xba   : > { %v366_v21 = vadd.f32 %v365_v31, %v2003_v15 }
  0xbb   : > { %v2009_v32 = vpop.f32.mrf.mxu0  ;;  %v652_v13 = vadd.f32 %v635_v30, %v569_v6 }
  0xbd   : > { %v735_v26 = vadd.f32 %v718_v28, %v652_v13 }
  0xc0   : > { %v554_v33 = vpop.f32.mrf.mxu2  ;;  %v637_v34 = vpop.f32.mrf.mxu3 }
  0xc1   : > { %v2011_v35 = vpop.f32.mrf.mxu1  ;;  %v570_v24 = vadd.f32 %v554_v33, %v366_v21 }
  0xc3   : > { %v2013_v36 = vpop.f32.mrf.mxu0  ;;  %v653_v54 = vadd.f32 %v637_v34, %v570_v24 }
  0xc5   : > { %v736_v28 = vadd.f32 %v2009_v32, %v653_v54 }
  0xc8   : > { %v2015_v37 = vpop.f32.mrf.mxu2  ;;  %v2017_v38 = vpop.f32.mrf.mxu3 }
  0xc9   : > { %v2019_v39 = vpop.f32.mrf.mxu1 }
  0xcb   : > { %v2021_v40 = vpop.f32.mrf.mxu0 }
  0xd0   : > { %v2023_v41 = vpop.f32.mrf.mxu2  ;;  %v2025_v42 = vpop.f32.mrf.mxu3 }
  0xd1   : > { %v2027_v43 = vpop.f32.mrf.mxu1 }
  0xd3   : > { %v2029_v44 = vpop.f32.mrf.mxu0 }
  0xd8   : > { %v2031_v45 = vpop.f32.mrf.mxu2  ;;  %v2033_v46 = vpop.f32.mrf.mxu3 }
  0xd9   : > { %v2035_v48 = vpop.f32.mrf.mxu1 }
  0xdb   : > { %v2037_v50 = vpop.f32.mrf.mxu0 }
  0xe0   : > { %v2039_v52 = vpop.f32.mrf.mxu2  ;;  %v2041_v53 = vpop.f32.mrf.mxu3 }
  0xe1   : > { %v907_v55 = vpop.f32.mrf.mxu1 }
  0xe2   : > { %v927_v60 = vadd.f32 %v907_v55, %v733_v59 }
  0xe3   : > { %v1267_v57 = vpop.f32.mrf.mxu0 }
  0xe8   : > { %v990_v61 = vpop.f32.mrf.mxu2  ;;  %v1073_v62 = vpop.f32.mrf.mxu3 }
  0xe9   : > { %v1010_v0 = vadd.f32 %v990_v61, %v927_v60  ;;  %v909_v1 = vpop.f32.mrf.mxu1 }
  0xea   : > { %v928_v11 = vadd.f32 %v909_v1, %v734_v8 }
  0xeb   : > { %v1093_v3 = vadd.f32 %v1073_v62, %v1010_v0  ;;  %v1269_v5 = vpop.f32.mrf.mxu0 }
  0xed   : > { %v1287_v7 = vadd.f32 %v1267_v57, %v1093_v3  ;;  %v369_v57 = vadd.f32 %v2011_v35, %v1999_v47  ;;  %v371_v47 = vadd.f32 %v2019_v39, %v2005_v17  ;;  %v374_v17 = vadd.f32 %v2027_v43, %v2001_v14 }
  0xee   : > { %v376_v43 = vadd.f32 %v2035_v48, %v2007_v18 }
  0xef   : > { %v1299_v10 = vadd.f32 %v2049_v4, %v1287_v7  ;;  %v571_v33 = vadd.f32 %v2015_v37, %v369_v57  ;;  %v572_v37 = vadd.f32 %v2023_v41, %v371_v47  ;;  %v573_v41 = vadd.f32 %v2031_v45, %v374_v17 }
  0xf0   : > { %v992_v9 = vpop.f32.mrf.mxu2  ;;  %v1075_v12 = vpop.f32.mrf.mxu3  ;;  %v574_v24 = vadd.f32 %v2039_v52, %v376_v43 }
  0xf1   : > { %v1307_v16 = vmax.f32 %v1299_v10, 0.0  ;;  %v1011_v19 = vadd.f32 %v992_v9, %v928_v11  ;;  %v912_v20 = vpop.f32.mrf.mxu1  ;;  %v654_v62 = vadd.f32 %v2017_v38, %v571_v33  ;;  %v655_v8 = vadd.f32 %v2025_v42, %v572_v37 }
  0xf2   : > { %v929_v29 = vadd.f32 %v912_v20, %v735_v26  ;;  %v656_v21 = vadd.f32 %v2033_v46, %v573_v41  ;;  %v657_v46 = vadd.f32 %v2041_v53, %v574_v24 }
  0xf3   : > { %1315 = vst [vmem:[%s2055_s21] sm:$0xff] %v1307_v16  ;;  %v1094_v22 = vadd.f32 %v1075_v12, %v1011_v19  ;;  %v1272_v23 = vpop.f32.mrf.mxu0  ;;  %v737_v32 = vadd.f32 %v2013_v36, %v654_v62  ;;  %v738_v12 = vadd.f32 %v2021_v40, %v655_v8 }
  0xf4   : > { %v740_v52 = vadd.f32 %v2037_v50, %v657_v46 }
  0xf5   : > { %v1288_v25 = vadd.f32 %v1269_v5, %v1094_v22 }
  0xf7   : > { %v1300_v27 = vadd.f32 %v2049_v4, %v1288_v25  ;;  %v739_v25 = vadd.f32 %v2029_v44, %v656_v21 }
  0xf8   : > { %v995_v49 = vpop.f32.mrf.mxu2  ;;  %v1078_v51 = vpop.f32.mrf.mxu3 }
  0xf9   : > { %v1308_v55 = vmax.f32 %v1300_v27, 0.0  ;;  %v1012_v30 = vadd.f32 %v995_v49, %v929_v29  ;;  %v914_v56 = vpop.f32.mrf.mxu1 }
  0xfa   : > { %v930_v60 = vadd.f32 %v914_v56, %v736_v28 }
  0xfb   : > { %1316 = vst [vmem:[%s2055_s21 + $0x8] sm:$0xff] %v1308_v55  ;;  %v1095_v15 = vadd.f32 %v1078_v51, %v1012_v30  ;;  %v1274_v31 = vpop.f32.mrf.mxu0 }
  0xfd   : > { %v1289_v58 = vadd.f32 %v1272_v23, %v1095_v15 }
  0xff   : > { %v1301_v59 = vadd.f32 %v2049_v4, %v1289_v58 }
 0x100   : > { %v997_v61 = vpop.f32.mrf.mxu2  ;;  %v1080_v34 = vpop.f32.mrf.mxu3 }
 0x101   : > { %v1309_v63 = vmax.f32 %v1301_v59, 0.0  ;;  %v1013_v0 = vadd.f32 %v997_v61, %v930_v60  ;;  %v917_v1 = vpop.f32.mrf.mxu1 }
 0x102   : > { %v931_v6 = vadd.f32 %v917_v1, %v737_v32 }
 0x103   : > { %1317 = vst [vmem:[%s2055_s21 + $0x10] sm:$0xff] %v1309_v63  ;;  %v1096_v35 = vadd.f32 %v1080_v34, %v1013_v0  ;;  %v1277_v3 = vpop.f32.mrf.mxu0 }
 0x105   : > { %v1290_v2 = vadd.f32 %v1274_v31, %v1096_v35 }
 0x107   : > { %v1302_v5 = vadd.f32 %v2049_v4, %v1290_v2 }
 0x108   : > { %v1000_v7 = vpop.f32.mrf.mxu2  ;;  %v1083_v38 = vpop.f32.mrf.mxu3 }
 0x109   : > { %v1310_v10 = vmax.f32 %v1302_v5, 0.0  ;;  %v1014_v11 = vadd.f32 %v1000_v7, %v931_v6  ;;  %v919_v9 = vpop.f32.mrf.mxu1 }
 0x10a   : > { %v932_v16 = vadd.f32 %v919_v9, %v738_v12 }
 0x10b   : > { %1318 = vst [vmem:[%s2055_s21 + $0x18] sm:$0xff] %v1310_v10  ;;  %v1097_v39 = vadd.f32 %v1083_v38, %v1014_v11  ;;  %v1279_v19 = vpop.f32.mrf.mxu0 }
 0x10d   : > { %v1291_v36 = vadd.f32 %v1277_v3, %v1097_v39 }
 0x10f   : > { %v1303_v13 = vadd.f32 %v2049_v4, %v1291_v36 }
 0x110   : > { %v1002_v20 = vpop.f32.mrf.mxu2  ;;  %v1085_v42 = vpop.f32.mrf.mxu3 }
 0x111   : > { %v1311_v22 = vmax.f32 %v1303_v13, 0.0  ;;  %v1015_v23 = vadd.f32 %v1002_v20, %v932_v16  ;;  %v922_v14 = vpop.f32.mrf.mxu1 }
 0x112   : > { %v933_v27 = vadd.f32 %v922_v14, %v739_v25 }
 0x113   : > { %1319 = vst [vmem:[%s2055_s21 + $0x20] sm:$0xff] %v1311_v22  ;;  %v1098_v45 = vadd.f32 %v1085_v42, %v1015_v23  ;;  %v1282_v55 = vpop.f32.mrf.mxu0 }
 0x115   : > { %v1292_v40 = vadd.f32 %v1279_v19, %v1098_v45 }
 0x117   : > { %v1304_v26 = vadd.f32 %v2049_v4, %v1292_v40 }
 0x118   : > { %v1005_v29 = vpop.f32.mrf.mxu2  ;;  %v1088_v49 = vpop.f32.mrf.mxu3 }
 0x119   : > { %v1312_v51 = vmax.f32 %v1304_v26, 0.0  ;;  %v1016_v54 = vadd.f32 %v1005_v29, %v933_v27  ;;  %v924_v48 = vpop.f32.mrf.mxu1 }
 0x11a   : > { %v934_v56 = vadd.f32 %v924_v48, %v740_v52 }
 0x11b   : > { %1320 = vst [vmem:[%s2055_s21 + $0x28] sm:$0xff] %v1312_v51  ;;  %v1099_v18 = vadd.f32 %v1088_v49, %v1016_v54  ;;  %v1284_v53 = vpop.f32.mrf.mxu0 }
 0x11d   : > { %v1293_v30 = vadd.f32 %v1282_v55, %v1099_v18 }
 0x11f   : > { %v1305_v44 = vadd.f32 %v2049_v4, %v1293_v30 }
 0x120   : > { %v1007_v57 = vpop.f32.mrf.mxu2  ;;  %v1090_v33 = vpop.f32.mrf.mxu3 }
 0x121   : > { %v1313_v15 = vmax.f32 %v1305_v44, 0.0  ;;  %v1017_v31 = vadd.f32 %v1007_v57, %v934_v56 }
 0x123   : > { %1321 = vst [vmem:[%s2055_s21 + $0x30] sm:$0xff] %v1313_v15  ;;  %v1100_v58 = vadd.f32 %v1090_v33, %v1017_v31 }
 0x125   : > { %v1294_v28 = vadd.f32 %v1284_v53, %v1100_v58 }
 0x127   : > { %v1306_v59 = vadd.f32 %v2049_v4, %v1294_v28 }
 0x129   : > { %v1314_v60 = vmax.f32 %v1306_v59, 0.0 }
 0x12b   : > { %1322 = vst [vmem:[%s2055_s21 + $0x38] sm:$0xff] %v1314_v60 }
 0x12c PF: > { %s13_s14 = sadd.s32 1, %s1729_s14   ;;  %s2109_s12 = smov %s1725_s13 }
 0x12d   : > { %p10_p6 = scmp.ge.s32.totalorder %s13_s14, 4   ;;  %s2110_s13 = smov %s2112_s15 }
 0x12f   :  { %12 = sbr.rel (!%p10_p6) target bundleno = 2 (0x2), region = 81 }

</bundles_post_ra>
